<compile_context>
chip_gen: v6e
topology: v6e:2x2x1
jax: 0.10.0
libtpu: 0.0.40
codegen_flags: <defaults>
</compile_context>

<pallas_src>
import jax
import jax.numpy as jnp
from jax.experimental import pallas as pl
from jax.experimental.pallas import tpu as pltpu

EPS = 1e-5


def _round_up(x, m):
    return (x + m - 1) // m * m


# ------------------------------ wrapper-side im2col --------------------------------
def _extract_patches(x, b_tile, n_pad):
    """im2col for conv1, arranged so every later regrouping is free inside the kernel.

    Returns (n_tiles, 16, 25*b_tile, 25):
      dim1: (u, v, kh, kw)  u,v   = position inside the 2x2 max-pool window
                            kh,kw = position inside conv2's 2x2 window  (== g % 4)
      dim2: (qh, qw, b)     conv2 output position (5x5) x sample within the batch tile
      dim3: (fh, fw)        conv1 5x5 patch features
    """
    n = x.shape[0]
    x = x.reshape(n, 100, 100)
    if n_pad != n:
        x = jnp.pad(x, ((0, n_pad - n), (0, 0), (0, 0)))
    n_tiles = n_pad // b_tile
    # H = 20*qh + 10*kh + 5*u + fh ; W = 20*qw + 10*kw + 5*v + fw
    xr = x.reshape(n_tiles, b_tile, 5, 2, 2, 5, 5, 2, 2, 5)
    #    dims:      t       b      qh kh u  fh qw kw v  fw
    xp = xr.transpose(0, 4, 8, 3, 7, 2, 6, 1, 5, 9)   # (t, u, v, kh, kw, qh, qw, b, fh, fw)
    return xp.reshape(n_tiles, 16, 25 * b_tile, 25)


# --------------------------------- fused kernel ------------------------------------
def fused_cnn_kernel(xp_ref, w1_ref, b1_ref, w2_ref, b2_ref, s2_ref, t2_ref,
                     wf1_ref, bf1_ref, wf2_ref, bf2_ref, wf3_ref, bf3_ref, o_ref):
    b_tile = o_ref.shape[0]
    w1 = w1_ref[...]
    b1 = b1_ref[...]

    # conv1 (5x5 / stride-5 patch matmul) + bias + ReLU, fused with the 2x2 max-pool.
    # Group g = (u, v, kh, kw): (u, v) is reduced by the pool max; (kh, kw) = g % 4 is the
    # conv2 tap this slab feeds.  Pooling is a max over whole (25*b_tile, 50) slabs.
    pooled = [None] * 4
    for g in range(16):
        c = jnp.dot(xp_ref[0, g], w1, preferred_element_type=jnp.float32)
        c = jnp.maximum(c + b1, 0.0)                              # (25*b_tile, 50)
        j = g % 4
        pooled[j] = c if pooled[j] is None else jnp.maximum(pooled[j], c)

    # conv2 (2x2 / stride-2) with bn1 folded into its weights/bias, + bias + ReLU,
    # then bn2 as a precomputed per-channel affine (bn2 follows the ReLU in torch).
    c2 = b2_ref[...]
    for j in range(4):
        c2 = c2 + jnp.dot(pooled[j], w2_ref[j], preferred_element_type=jnp.float32)
    c2 = jnp.maximum(c2, 0.0)                                     # (25*b_tile, 20)
    c2 = c2 * s2_ref[...] + t2_ref[...]

    # flatten + F.relu + fc: torch's flatten order (cout*25 + qh*5 + qw) is folded into
    # wf1's (25, 20, 200) layout, so fc1 is a sum of 25 per-position matmuls over
    # contiguous, tile-aligned row slabs -- no flatten relayout inside the kernel.
    h2 = jnp.maximum(c2, 0.0)
    h = bf1_ref[...]
    for q in range(25):
        h = h + jnp.dot(h2[q * b_tile:(q + 1) * b_tile, :], wf1_ref[q],
                        preferred_element_type=jnp.float32)
    h = jnp.maximum(h, 0.0)
    h = jnp.dot(h, wf2_ref[...], preferred_element_type=jnp.float32) + bf2_ref[...]
    h = jnp.maximum(h, 0.0)
    o_ref[...] = jnp.dot(h, wf3_ref[...], preferred_element_type=jnp.float32) + bf3_ref[...]


# ----------------------------------- forward ---------------------------------------
def cnn_forward(x, p):
    N = x.shape[0]
    assert x.shape[1:] == (1, 100, 100), "fc in_features=500 implies 1x100x100 inputs"
    b_tile = min(32, _round_up(N, 8))
    n_pad = _round_up(N, b_tile)
    n_tiles = n_pad // b_tile

    xp = _extract_patches(x, b_tile, n_pad)          # (n_tiles, 16, 25*b_tile, 25)

    res_2d = lambda i: (0, 0)
    res_3d = lambda i: (0, 0, 0)
    out = pl.pallas_call(
        fused_cnn_kernel,
        out_shape=jax.ShapeDtypeStruct((n_pad, 3), jnp.float32),
        grid=(n_tiles,),
        in_specs=[
            pl.BlockSpec((1, 16, 25 * b_tile, 25), lambda i: (i, 0, 0, 0)),  # patches (batch-tiled)
            pl.BlockSpec((25, 50), res_2d),        # w1
            pl.BlockSpec((1, 50), res_2d),         # b1
            pl.BlockSpec((4, 50, 20), res_3d),     # w2 (bn1 folded)
            pl.BlockSpec((1, 20), res_2d),         # b2 (bn1 folded)
            pl.BlockSpec((1, 20), res_2d),         # bn2 scale
            pl.BlockSpec((1, 20), res_2d),         # bn2 shift
            pl.BlockSpec((25, 20, 200), res_3d),   # fc1 (flatten folded into layout)
            pl.BlockSpec((1, 200), res_2d),        # fc1 bias
            pl.BlockSpec((200, 100), res_2d),      # fc2
            pl.BlockSpec((1, 100), res_2d),        # fc2 bias
            pl.BlockSpec((100, 3), res_2d),        # fc3
            pl.BlockSpec((1, 3), res_2d),          # fc3 bias
        ],
        out_specs=pl.BlockSpec((b_tile, 3), lambda i: (i, 0)),
        compiler_params=pltpu.CompilerParams(dimension_semantics=("parallel",)),
    )(xp, p["w1"], p["b1"], p["w2"], p["b2"], p["s2"], p["t2"],
      p["wf1"], p["bf1"], p["wf2"], p["bf2"], p["wf3"], p["bf3"])
    return out[:N]


# --------------------------------- parameters ---------------------------------------
def init_torch_params(key):
    """Parameters in the PyTorch module's native layouts (deterministic synthetic values)."""
    ks = jax.random.split(key, 18)

    def rnd(k, shape, fan_in):
        return (jax.random.normal(k, shape, jnp.float32) / jnp.sqrt(float(fan_in))).astype(jnp.float32)

    p = {}
    p["cnn1_w"] = rnd(ks[0], (50, 1, 5, 5), 25)
    p["cnn1_b"] = rnd(ks[1], (50,), 25)
    p["bn1_gamma"] = 1.0 + 0.1 * jax.random.normal(ks[2], (50,), jnp.float32)
    p["bn1_beta"] = 0.1 * jax.random.normal(ks[3], (50,), jnp.float32)
    p["bn1_mean"] = 0.1 * jax.random.normal(ks[4], (50,), jnp.float32)
    p["bn1_var"] = 1.0 + 0.1 * jnp.abs(jax.random.normal(ks[5], (50,), jnp.float32))
    p["cnn2_w"] = rnd(ks[6], (20, 50, 2, 2), 200)
    p["cnn2_b"] = rnd(ks[7], (20,), 200)
    p["bn2_gamma"] = 1.0 + 0.1 * jax.random.normal(ks[8], (20,), jnp.float32)
    p["bn2_beta"] = 0.1 * jax.random.normal(ks[9], (20,), jnp.float32)
    p["bn2_mean"] = 0.1 * jax.random.normal(ks[10], (20,), jnp.float32)
    p["bn2_var"] = 1.0 + 0.1 * jnp.abs(jax.random.normal(ks[11], (20,), jnp.float32))
    p["fc_w"] = rnd(ks[12], (200, 500), 500)
    p["fc_b"] = rnd(ks[13], (200,), 500)
    p["fc2_w"] = rnd(ks[14], (100, 200), 200)
    p["fc2_b"] = rnd(ks[15], (100,), 200)
    p["fc3_w"] = rnd(ks[16], (3, 100), 100)
    p["fc3_b"] = rnd(ks[17], (3,), 100)
    return p


def prepare_params(tp):
    """One-time transform of torch-layout params into the fused kernel's layouts."""
    s1 = tp["bn1_gamma"] * jax.lax.rsqrt(tp["bn1_var"] + EPS)           # (50,)
    t1 = tp["bn1_beta"] - tp["bn1_mean"] * s1                           # (50,)
    s2 = tp["bn2_gamma"] * jax.lax.rsqrt(tp["bn2_var"] + EPS)           # (20,)
    t2 = tp["bn2_beta"] - tp["bn2_mean"] * s2                           # (20,)

    p = {}
    p["w1"] = tp["cnn1_w"].reshape(50, 25).T                            # (25, 50), feat=(fh,fw)
    p["b1"] = tp["cnn1_b"].reshape(1, 50)
    # bn1 folded exactly into conv2 (valid for any gamma sign: fold is downstream of pool)
    w2s = tp["cnn2_w"] * s1[None, :, None, None]                        # (co, ci, kh, kw)
    p["w2"] = jnp.transpose(w2s, (2, 3, 1, 0)).reshape(4, 50, 20)       # (kh*2+kw, ci, co)
    p["b2"] = (tp["cnn2_b"] + jnp.einsum("oikl,i->o", tp["cnn2_w"], t1)).reshape(1, 20)
    p["s2"] = s2.reshape(1, 20)
    p["t2"] = t2.reshape(1, 20)
    # torch flatten index = cout*25 + qh*5 + qw ; kernel row slabs are q = qh*5 + qw
    p["wf1"] = jnp.transpose(tp["fc_w"].T.reshape(20, 25, 200), (1, 0, 2))   # (25, 20, 200)
    p["bf1"] = tp["fc_b"].reshape(1, 200)
    p["wf2"] = tp["fc2_w"].T                                            # (200, 100)
    p["bf2"] = tp["fc2_b"].reshape(1, 100)
    p["wf3"] = tp["fc3_w"].T                                            # (100, 3)
    p["bf3"] = tp["fc3_b"].reshape(1, 3)
    return p


# ------------------------------ pure-JAX reference ----------------------------------
def cnn_forward_ref(x, tp):
    """Plain-JAX replica of the PyTorch forward (inference-mode BatchNorm), torch layouts."""
    n = x.shape[0]
    xs = x.reshape(n, 20, 5, 20, 5)                                     # (n, oh, fh, ow, fw)
    c1 = jnp.einsum("nhpwq,opq->nohw", xs, tp["cnn1_w"][:, 0])
    c1 = jnp.maximum(c1 + tp["cnn1_b"][None, :, None, None], 0.0)       # (n, 50, 20, 20)
    pooled = c1.reshape(n, 50, 10, 2, 10, 2).max(axis=(3, 5))           # (n, 50, 10, 10)
    pooled = ((pooled - tp["bn1_mean"][None, :, None, None])
              * jax.lax.rsqrt(tp["bn1_var"][None, :, None, None] + EPS)
              * tp["bn1_gamma"][None, :, None, None]
              + tp["bn1_beta"][None, :, None, None])
    ps = pooled.reshape(n, 50, 5, 2, 5, 2)                              # (n, ci, qh, kh, qw, kw)
    c2 = jnp.einsum("nihpwq,oipq->nohw", ps, tp["cnn2_w"])
    c2 = jnp.maximum(c2 + tp["cnn2_b"][None, :, None, None], 0.0)       # (n, 20, 5, 5)
    c2 = ((c2 - tp["bn2_mean"][None, :, None, None])
          * jax.lax.rsqrt(tp["bn2_var"][None, :, None, None] + EPS)
          * tp["bn2_gamma"][None, :, None, None]
          + tp["bn2_beta"][None, :, None, None])
    flat = c2.reshape(n, 500)
    h = jnp.maximum(flat, 0.0) @ tp["fc_w"].T + tp["fc_b"]
    h = jnp.maximum(h, 0.0) @ tp["fc2_w"].T + tp["fc2_b"]
    return jnp.maximum(h, 0.0) @ tp["fc3_w"].T + tp["fc3_b"]


if __name__ == "__main__":
    key = jax.random.PRNGKey(0)
    kx, kp = jax.random.split(key)
    # fc in_features=500 pins the input to 1x100x100; batch kept small for the demo.
    x = jax.random.normal(kx, (2, 1, 100, 100), jnp.float32)
    torch_params = init_torch_params(kp)
    params = prepare_params(torch_params)

    out = jax.jit(cnn_forward)(x, params)
    out = jax.block_until_ready(out)

    ref = cnn_forward_ref(x, torch_params)
    assert out.shape == (2, 3)
    assert bool(jnp.all(jnp.isfinite(out)))
    assert bool(jnp.allclose(out, ref, rtol=1e-2, atol=1e-2)), (out, ref)
    print("KERNEL_OK")
</pallas_src>

<mosaic_0001>
module attributes {stable_mosaic.version = 11 : i64} {
  func.func @fused_cnn_kernel(%arg0: i32, %arg1: memref<1x16x200x25xf32, #tpu.memory_space<vmem>>, %arg2: memref<25x50xf32, #tpu.memory_space<vmem>>, %arg3: memref<1x50xf32, #tpu.memory_space<vmem>>, %arg4: memref<4x50x20xf32, #tpu.memory_space<vmem>>, %arg5: memref<1x20xf32, #tpu.memory_space<vmem>>, %arg6: memref<1x20xf32, #tpu.memory_space<vmem>>, %arg7: memref<1x20xf32, #tpu.memory_space<vmem>>, %arg8: memref<25x20x200xf32, #tpu.memory_space<vmem>>, %arg9: memref<1x200xf32, #tpu.memory_space<vmem>>, %arg10: memref<200x100xf32, #tpu.memory_space<vmem>>, %arg11: memref<1x100xf32, #tpu.memory_space<vmem>>, %arg12: memref<100x3xf32, #tpu.memory_space<vmem>>, %arg13: memref<1x3xf32, #tpu.memory_space<vmem>>, %arg14: memref<8x3xf32, #tpu.memory_space<vmem>>) attributes {dimension_semantics = [#tpu.dimension_semantics<parallel>], iteration_bounds = array<i64: 1>, scalar_prefetch = 0 : i64, scratch_operands = 0 : i64, tpu.core_type = #tpu.core_type<tc>, window_params = [{transform_indices = @transform_0, window_bounds = array<i64: 1, 16, 200, 25>}, {pipeline_mode = #tpu.pipeline_mode<synchronous>, transform_indices = @transform_1, window_bounds = array<i64: 25, 50>}, {pipeline_mode = #tpu.pipeline_mode<synchronous>, transform_indices = @transform_2, window_bounds = array<i64: 1, 50>}, {pipeline_mode = #tpu.pipeline_mode<synchronous>, transform_indices = @transform_3, window_bounds = array<i64: 4, 50, 20>}, {pipeline_mode = #tpu.pipeline_mode<synchronous>, transform_indices = @transform_4, window_bounds = array<i64: 1, 20>}, {pipeline_mode = #tpu.pipeline_mode<synchronous>, transform_indices = @transform_5, window_bounds = array<i64: 1, 20>}, {pipeline_mode = #tpu.pipeline_mode<synchronous>, transform_indices = @transform_6, window_bounds = array<i64: 1, 20>}, {pipeline_mode = #tpu.pipeline_mode<synchronous>, transform_indices = @transform_7, window_bounds = array<i64: 25, 20, 200>}, {pipeline_mode = #tpu.pipeline_mode<synchronous>, transform_indices = @transform_8, window_bounds = array<i64: 1, 200>}, {pipeline_mode = #tpu.pipeline_mode<synchronous>, transform_indices = @transform_9, window_bounds = array<i64: 200, 100>}, {pipeline_mode = #tpu.pipeline_mode<synchronous>, transform_indices = @transform_10, window_bounds = array<i64: 1, 100>}, {pipeline_mode = #tpu.pipeline_mode<synchronous>, transform_indices = @transform_11, window_bounds = array<i64: 100, 3>}, {pipeline_mode = #tpu.pipeline_mode<synchronous>, transform_indices = @transform_12, window_bounds = array<i64: 1, 3>}, {transform_indices = @transform_13, window_bounds = array<i64: 8, 3>}]} {
    %c0 = arith.constant 0 : index
    %c0_0 = arith.constant 0 : index
    %0 = vector.load %arg2[%c0, %c0_0] : memref<25x50xf32, #tpu.memory_space<vmem>>, vector<25x50xf32>
    %c0_1 = arith.constant 0 : index
    %c0_2 = arith.constant 0 : index
    %1 = vector.load %arg3[%c0_1, %c0_2] : memref<1x50xf32, #tpu.memory_space<vmem>>, vector<1x50xf32>
    %c0_3 = arith.constant 0 : index
    %c0_4 = arith.constant 0 : index
    %c0_5 = arith.constant 0 : index
    %c0_6 = arith.constant 0 : index
    %2 = vector.load %arg1[%c0_3, %c0_4, %c0_5, %c0_6] : memref<1x16x200x25xf32, #tpu.memory_space<vmem>>, vector<1x1x200x25xf32>
    %3 = vector.shape_cast %2 : vector<1x1x200x25xf32> to vector<200x25xf32>
    %cst = arith.constant dense<0.000000e+00> : vector<200x50xf32>
    %4 = tpu.matmul %3, %0, %cst {dimension_numbers = #tpu.dot_dimension_numbers<[1], [0], [0], [1], [0, 0, 1, 1], [], []>} : vector<200x25xf32>, vector<25x50xf32>, vector<200x50xf32> -> vector<200x50xf32>
    %5 = vector.broadcast %1 : vector<1x50xf32> to vector<200x50xf32>
    %6 = arith.addf %4, %5 : vector<200x50xf32>
    %cst_7 = arith.constant 0.000000e+00 : f32
    %7 = vector.broadcast %cst_7 : f32 to vector<200x50xf32>
    %8 = arith.maximumf %6, %7 : vector<200x50xf32>
    %c0_8 = arith.constant 0 : index
    %c1 = arith.constant 1 : index
    %c0_9 = arith.constant 0 : index
    %c0_10 = arith.constant 0 : index
    %9 = vector.load %arg1[%c0_8, %c1, %c0_9, %c0_10] : memref<1x16x200x25xf32, #tpu.memory_space<vmem>>, vector<1x1x200x25xf32>
    %10 = vector.shape_cast %9 : vector<1x1x200x25xf32> to vector<200x25xf32>
    %cst_11 = arith.constant dense<0.000000e+00> : vector<200x50xf32>
    %11 = tpu.matmul %10, %0, %cst_11 {dimension_numbers = #tpu.dot_dimension_numbers<[1], [0], [0], [1], [0, 0, 1, 1], [], []>} : vector<200x25xf32>, vector<25x50xf32>, vector<200x50xf32> -> vector<200x50xf32>
    %12 = vector.broadcast %1 : vector<1x50xf32> to vector<200x50xf32>
    %13 = arith.addf %11, %12 : vector<200x50xf32>
    %cst_12 = arith.constant 0.000000e+00 : f32
    %14 = vector.broadcast %cst_12 : f32 to vector<200x50xf32>
    %15 = arith.maximumf %13, %14 : vector<200x50xf32>
    %c0_13 = arith.constant 0 : index
    %c2 = arith.constant 2 : index
    %c0_14 = arith.constant 0 : index
    %c0_15 = arith.constant 0 : index
    %16 = vector.load %arg1[%c0_13, %c2, %c0_14, %c0_15] : memref<1x16x200x25xf32, #tpu.memory_space<vmem>>, vector<1x1x200x25xf32>
    %17 = vector.shape_cast %16 : vector<1x1x200x25xf32> to vector<200x25xf32>
    %cst_16 = arith.constant dense<0.000000e+00> : vector<200x50xf32>
    %18 = tpu.matmul %17, %0, %cst_16 {dimension_numbers = #tpu.dot_dimension_numbers<[1], [0], [0], [1], [0, 0, 1, 1], [], []>} : vector<200x25xf32>, vector<25x50xf32>, vector<200x50xf32> -> vector<200x50xf32>
    %19 = vector.broadcast %1 : vector<1x50xf32> to vector<200x50xf32>
    %20 = arith.addf %18, %19 : vector<200x50xf32>
    %cst_17 = arith.constant 0.000000e+00 : f32
    %21 = vector.broadcast %cst_17 : f32 to vector<200x50xf32>
    %22 = arith.maximumf %20, %21 : vector<200x50xf32>
    %c0_18 = arith.constant 0 : index
    %c3 = arith.constant 3 : index
    %c0_19 = arith.constant 0 : index
    %c0_20 = arith.constant 0 : index
    %23 = vector.load %arg1[%c0_18, %c3, %c0_19, %c0_20] : memref<1x16x200x25xf32, #tpu.memory_space<vmem>>, vector<1x1x200x25xf32>
    %24 = vector.shape_cast %23 : vector<1x1x200x25xf32> to vector<200x25xf32>
    %cst_21 = arith.constant dense<0.000000e+00> : vector<200x50xf32>
    %25 = tpu.matmul %24, %0, %cst_21 {dimension_numbers = #tpu.dot_dimension_numbers<[1], [0], [0], [1], [0, 0, 1, 1], [], []>} : vector<200x25xf32>, vector<25x50xf32>, vector<200x50xf32> -> vector<200x50xf32>
    %26 = vector.broadcast %1 : vector<1x50xf32> to vector<200x50xf32>
    %27 = arith.addf %25, %26 : vector<200x50xf32>
    %cst_22 = arith.constant 0.000000e+00 : f32
    %28 = vector.broadcast %cst_22 : f32 to vector<200x50xf32>
    %29 = arith.maximumf %27, %28 : vector<200x50xf32>
    %c0_23 = arith.constant 0 : index
    %c4 = arith.constant 4 : index
    %c0_24 = arith.constant 0 : index
    %c0_25 = arith.constant 0 : index
    %30 = vector.load %arg1[%c0_23, %c4, %c0_24, %c0_25] : memref<1x16x200x25xf32, #tpu.memory_space<vmem>>, vector<1x1x200x25xf32>
    %31 = vector.shape_cast %30 : vector<1x1x200x25xf32> to vector<200x25xf32>
    %cst_26 = arith.constant dense<0.000000e+00> : vector<200x50xf32>
    %32 = tpu.matmul %31, %0, %cst_26 {dimension_numbers = #tpu.dot_dimension_numbers<[1], [0], [0], [1], [0, 0, 1, 1], [], []>} : vector<200x25xf32>, vector<25x50xf32>, vector<200x50xf32> -> vector<200x50xf32>
    %33 = vector.broadcast %1 : vector<1x50xf32> to vector<200x50xf32>
    %34 = arith.addf %32, %33 : vector<200x50xf32>
    %cst_27 = arith.constant 0.000000e+00 : f32
    %35 = vector.broadcast %cst_27 : f32 to vector<200x50xf32>
    %36 = arith.maximumf %34, %35 : vector<200x50xf32>
    %37 = arith.maximumf %8, %36 : vector<200x50xf32>
    %c0_28 = arith.constant 0 : index
    %c5 = arith.constant 5 : index
    %c0_29 = arith.constant 0 : index
    %c0_30 = arith.constant 0 : index
    %38 = vector.load %arg1[%c0_28, %c5, %c0_29, %c0_30] : memref<1x16x200x25xf32, #tpu.memory_space<vmem>>, vector<1x1x200x25xf32>
    %39 = vector.shape_cast %38 : vector<1x1x200x25xf32> to vector<200x25xf32>
    %cst_31 = arith.constant dense<0.000000e+00> : vector<200x50xf32>
    %40 = tpu.matmul %39, %0, %cst_31 {dimension_numbers = #tpu.dot_dimension_numbers<[1], [0], [0], [1], [0, 0, 1, 1], [], []>} : vector<200x25xf32>, vector<25x50xf32>, vector<200x50xf32> -> vector<200x50xf32>
    %41 = vector.broadcast %1 : vector<1x50xf32> to vector<200x50xf32>
    %42 = arith.addf %40, %41 : vector<200x50xf32>
    %cst_32 = arith.constant 0.000000e+00 : f32
    %43 = vector.broadcast %cst_32 : f32 to vector<200x50xf32>
    %44 = arith.maximumf %42, %43 : vector<200x50xf32>
    %45 = arith.maximumf %15, %44 : vector<200x50xf32>
    %c0_33 = arith.constant 0 : index
    %c6 = arith.constant 6 : index
    %c0_34 = arith.constant 0 : index
    %c0_35 = arith.constant 0 : index
    %46 = vector.load %arg1[%c0_33, %c6, %c0_34, %c0_35] : memref<1x16x200x25xf32, #tpu.memory_space<vmem>>, vector<1x1x200x25xf32>
    %47 = vector.shape_cast %46 : vector<1x1x200x25xf32> to vector<200x25xf32>
    %cst_36 = arith.constant dense<0.000000e+00> : vector<200x50xf32>
    %48 = tpu.matmul %47, %0, %cst_36 {dimension_numbers = #tpu.dot_dimension_numbers<[1], [0], [0], [1], [0, 0, 1, 1], [], []>} : vector<200x25xf32>, vector<25x50xf32>, vector<200x50xf32> -> vector<200x50xf32>
    %49 = vector.broadcast %1 : vector<1x50xf32> to vector<200x50xf32>
    %50 = arith.addf %48, %49 : vector<200x50xf32>
    %cst_37 = arith.constant 0.000000e+00 : f32
    %51 = vector.broadcast %cst_37 : f32 to vector<200x50xf32>
    %52 = arith.maximumf %50, %51 : vector<200x50xf32>
    %53 = arith.maximumf %22, %52 : vector<200x50xf32>
    %c0_38 = arith.constant 0 : index
    %c7 = arith.constant 7 : index
    %c0_39 = arith.constant 0 : index
    %c0_40 = arith.constant 0 : index
    %54 = vector.load %arg1[%c0_38, %c7, %c0_39, %c0_40] : memref<1x16x200x25xf32, #tpu.memory_space<vmem>>, vector<1x1x200x25xf32>
    %55 = vector.shape_cast %54 : vector<1x1x200x25xf32> to vector<200x25xf32>
    %cst_41 = arith.constant dense<0.000000e+00> : vector<200x50xf32>
    %56 = tpu.matmul %55, %0, %cst_41 {dimension_numbers = #tpu.dot_dimension_numbers<[1], [0], [0], [1], [0, 0, 1, 1], [], []>} : vector<200x25xf32>, vector<25x50xf32>, vector<200x50xf32> -> vector<200x50xf32>
    %57 = vector.broadcast %1 : vector<1x50xf32> to vector<200x50xf32>
    %58 = arith.addf %56, %57 : vector<200x50xf32>
    %cst_42 = arith.constant 0.000000e+00 : f32
    %59 = vector.broadcast %cst_42 : f32 to vector<200x50xf32>
    %60 = arith.maximumf %58, %59 : vector<200x50xf32>
    %61 = arith.maximumf %29, %60 : vector<200x50xf32>
    %c0_43 = arith.constant 0 : index
    %c8 = arith.constant 8 : index
    %c0_44 = arith.constant 0 : index
    %c0_45 = arith.constant 0 : index
    %62 = vector.load %arg1[%c0_43, %c8, %c0_44, %c0_45] : memref<1x16x200x25xf32, #tpu.memory_space<vmem>>, vector<1x1x200x25xf32>
    %63 = vector.shape_cast %62 : vector<1x1x200x25xf32> to vector<200x25xf32>
    %cst_46 = arith.constant dense<0.000000e+00> : vector<200x50xf32>
    %64 = tpu.matmul %63, %0, %cst_46 {dimension_numbers = #tpu.dot_dimension_numbers<[1], [0], [0], [1], [0, 0, 1, 1], [], []>} : vector<200x25xf32>, vector<25x50xf32>, vector<200x50xf32> -> vector<200x50xf32>
    %65 = vector.broadcast %1 : vector<1x50xf32> to vector<200x50xf32>
    %66 = arith.addf %64, %65 : vector<200x50xf32>
    %cst_47 = arith.constant 0.000000e+00 : f32
    %67 = vector.broadcast %cst_47 : f32 to vector<200x50xf32>
    %68 = arith.maximumf %66, %67 : vector<200x50xf32>
    %69 = arith.maximumf %37, %68 : vector<200x50xf32>
    %c0_48 = arith.constant 0 : index
    %c9 = arith.constant 9 : index
    %c0_49 = arith.constant 0 : index
    %c0_50 = arith.constant 0 : index
    %70 = vector.load %arg1[%c0_48, %c9, %c0_49, %c0_50] : memref<1x16x200x25xf32, #tpu.memory_space<vmem>>, vector<1x1x200x25xf32>
    %71 = vector.shape_cast %70 : vector<1x1x200x25xf32> to vector<200x25xf32>
    %cst_51 = arith.constant dense<0.000000e+00> : vector<200x50xf32>
    %72 = tpu.matmul %71, %0, %cst_51 {dimension_numbers = #tpu.dot_dimension_numbers<[1], [0], [0], [1], [0, 0, 1, 1], [], []>} : vector<200x25xf32>, vector<25x50xf32>, vector<200x50xf32> -> vector<200x50xf32>
    %73 = vector.broadcast %1 : vector<1x50xf32> to vector<200x50xf32>
    %74 = arith.addf %72, %73 : vector<200x50xf32>
    %cst_52 = arith.constant 0.000000e+00 : f32
    %75 = vector.broadcast %cst_52 : f32 to vector<200x50xf32>
    %76 = arith.maximumf %74, %75 : vector<200x50xf32>
    %77 = arith.maximumf %45, %76 : vector<200x50xf32>
    %c0_53 = arith.constant 0 : index
    %c10 = arith.constant 10 : index
    %c0_54 = arith.constant 0 : index
    %c0_55 = arith.constant 0 : index
    %78 = vector.load %arg1[%c0_53, %c10, %c0_54, %c0_55] : memref<1x16x200x25xf32, #tpu.memory_space<vmem>>, vector<1x1x200x25xf32>
    %79 = vector.shape_cast %78 : vector<1x1x200x25xf32> to vector<200x25xf32>
    %cst_56 = arith.constant dense<0.000000e+00> : vector<200x50xf32>
    %80 = tpu.matmul %79, %0, %cst_56 {dimension_numbers = #tpu.dot_dimension_numbers<[1], [0], [0], [1], [0, 0, 1, 1], [], []>} : vector<200x25xf32>, vector<25x50xf32>, vector<200x50xf32> -> vector<200x50xf32>
    %81 = vector.broadcast %1 : vector<1x50xf32> to vector<200x50xf32>
    %82 = arith.addf %80, %81 : vector<200x50xf32>
    %cst_57 = arith.constant 0.000000e+00 : f32
    %83 = vector.broadcast %cst_57 : f32 to vector<200x50xf32>
    %84 = arith.maximumf %82, %83 : vector<200x50xf32>
    %85 = arith.maximumf %53, %84 : vector<200x50xf32>
    %c0_58 = arith.constant 0 : index
    %c11 = arith.constant 11 : index
    %c0_59 = arith.constant 0 : index
    %c0_60 = arith.constant 0 : index
    %86 = vector.load %arg1[%c0_58, %c11, %c0_59, %c0_60] : memref<1x16x200x25xf32, #tpu.memory_space<vmem>>, vector<1x1x200x25xf32>
    %87 = vector.shape_cast %86 : vector<1x1x200x25xf32> to vector<200x25xf32>
    %cst_61 = arith.constant dense<0.000000e+00> : vector<200x50xf32>
    %88 = tpu.matmul %87, %0, %cst_61 {dimension_numbers = #tpu.dot_dimension_numbers<[1], [0], [0], [1], [0, 0, 1, 1], [], []>} : vector<200x25xf32>, vector<25x50xf32>, vector<200x50xf32> -> vector<200x50xf32>
    %89 = vector.broadcast %1 : vector<1x50xf32> to vector<200x50xf32>
    %90 = arith.addf %88, %89 : vector<200x50xf32>
    %cst_62 = arith.constant 0.000000e+00 : f32
    %91 = vector.broadcast %cst_62 : f32 to vector<200x50xf32>
    %92 = arith.maximumf %90, %91 : vector<200x50xf32>
    %93 = arith.maximumf %61, %92 : vector<200x50xf32>
    %c0_63 = arith.constant 0 : index
    %c12 = arith.constant 12 : index
    %c0_64 = arith.constant 0 : index
    %c0_65 = arith.constant 0 : index
    %94 = vector.load %arg1[%c0_63, %c12, %c0_64, %c0_65] : memref<1x16x200x25xf32, #tpu.memory_space<vmem>>, vector<1x1x200x25xf32>
    %95 = vector.shape_cast %94 : vector<1x1x200x25xf32> to vector<200x25xf32>
    %cst_66 = arith.constant dense<0.000000e+00> : vector<200x50xf32>
    %96 = tpu.matmul %95, %0, %cst_66 {dimension_numbers = #tpu.dot_dimension_numbers<[1], [0], [0], [1], [0, 0, 1, 1], [], []>} : vector<200x25xf32>, vector<25x50xf32>, vector<200x50xf32> -> vector<200x50xf32>
    %97 = vector.broadcast %1 : vector<1x50xf32> to vector<200x50xf32>
    %98 = arith.addf %96, %97 : vector<200x50xf32>
    %cst_67 = arith.constant 0.000000e+00 : f32
    %99 = vector.broadcast %cst_67 : f32 to vector<200x50xf32>
    %100 = arith.maximumf %98, %99 : vector<200x50xf32>
    %101 = arith.maximumf %69, %100 : vector<200x50xf32>
    %c0_68 = arith.constant 0 : index
    %c13 = arith.constant 13 : index
    %c0_69 = arith.constant 0 : index
    %c0_70 = arith.constant 0 : index
    %102 = vector.load %arg1[%c0_68, %c13, %c0_69, %c0_70] : memref<1x16x200x25xf32, #tpu.memory_space<vmem>>, vector<1x1x200x25xf32>
    %103 = vector.shape_cast %102 : vector<1x1x200x25xf32> to vector<200x25xf32>
    %cst_71 = arith.constant dense<0.000000e+00> : vector<200x50xf32>
    %104 = tpu.matmul %103, %0, %cst_71 {dimension_numbers = #tpu.dot_dimension_numbers<[1], [0], [0], [1], [0, 0, 1, 1], [], []>} : vector<200x25xf32>, vector<25x50xf32>, vector<200x50xf32> -> vector<200x50xf32>
    %105 = vector.broadcast %1 : vector<1x50xf32> to vector<200x50xf32>
    %106 = arith.addf %104, %105 : vector<200x50xf32>
    %cst_72 = arith.constant 0.000000e+00 : f32
    %107 = vector.broadcast %cst_72 : f32 to vector<200x50xf32>
    %108 = arith.maximumf %106, %107 : vector<200x50xf32>
    %109 = arith.maximumf %77, %108 : vector<200x50xf32>
    %c0_73 = arith.constant 0 : index
    %c14 = arith.constant 14 : index
    %c0_74 = arith.constant 0 : index
    %c0_75 = arith.constant 0 : index
    %110 = vector.load %arg1[%c0_73, %c14, %c0_74, %c0_75] : memref<1x16x200x25xf32, #tpu.memory_space<vmem>>, vector<1x1x200x25xf32>
    %111 = vector.shape_cast %110 : vector<1x1x200x25xf32> to vector<200x25xf32>
    %cst_76 = arith.constant dense<0.000000e+00> : vector<200x50xf32>
    %112 = tpu.matmul %111, %0, %cst_76 {dimension_numbers = #tpu.dot_dimension_numbers<[1], [0], [0], [1], [0, 0, 1, 1], [], []>} : vector<200x25xf32>, vector<25x50xf32>, vector<200x50xf32> -> vector<200x50xf32>
    %113 = vector.broadcast %1 : vector<1x50xf32> to vector<200x50xf32>
    %114 = arith.addf %112, %113 : vector<200x50xf32>
    %cst_77 = arith.constant 0.000000e+00 : f32
    %115 = vector.broadcast %cst_77 : f32 to vector<200x50xf32>
    %116 = arith.maximumf %114, %115 : vector<200x50xf32>
    %117 = arith.maximumf %85, %116 : vector<200x50xf32>
    %c0_78 = arith.constant 0 : index
    %c15 = arith.constant 15 : index
    %c0_79 = arith.constant 0 : index
    %c0_80 = arith.constant 0 : index
    %118 = vector.load %arg1[%c0_78, %c15, %c0_79, %c0_80] : memref<1x16x200x25xf32, #tpu.memory_space<vmem>>, vector<1x1x200x25xf32>
    %119 = vector.shape_cast %118 : vector<1x1x200x25xf32> to vector<200x25xf32>
    %cst_81 = arith.constant dense<0.000000e+00> : vector<200x50xf32>
    %120 = tpu.matmul %119, %0, %cst_81 {dimension_numbers = #tpu.dot_dimension_numbers<[1], [0], [0], [1], [0, 0, 1, 1], [], []>} : vector<200x25xf32>, vector<25x50xf32>, vector<200x50xf32> -> vector<200x50xf32>
    %121 = vector.broadcast %1 : vector<1x50xf32> to vector<200x50xf32>
    %122 = arith.addf %120, %121 : vector<200x50xf32>
    %cst_82 = arith.constant 0.000000e+00 : f32
    %123 = vector.broadcast %cst_82 : f32 to vector<200x50xf32>
    %124 = arith.maximumf %122, %123 : vector<200x50xf32>
    %125 = arith.maximumf %93, %124 : vector<200x50xf32>
    %c0_83 = arith.constant 0 : index
    %c0_84 = arith.constant 0 : index
    %126 = vector.load %arg5[%c0_83, %c0_84] : memref<1x20xf32, #tpu.memory_space<vmem>>, vector<1x20xf32>
    %c0_85 = arith.constant 0 : index
    %c0_86 = arith.constant 0 : index
    %c0_87 = arith.constant 0 : index
    %127 = vector.load %arg4[%c0_85, %c0_86, %c0_87] : memref<4x50x20xf32, #tpu.memory_space<vmem>>, vector<1x50x20xf32>
    %128 = vector.shape_cast %127 : vector<1x50x20xf32> to vector<50x20xf32>
    %cst_88 = arith.constant dense<0.000000e+00> : vector<200x20xf32>
    %129 = tpu.matmul %101, %128, %cst_88 {dimension_numbers = #tpu.dot_dimension_numbers<[1], [0], [0], [1], [0, 0, 1, 1], [], []>} : vector<200x50xf32>, vector<50x20xf32>, vector<200x20xf32> -> vector<200x20xf32>
    %130 = vector.broadcast %126 : vector<1x20xf32> to vector<200x20xf32>
    %131 = arith.addf %130, %129 : vector<200x20xf32>
    %c1_89 = arith.constant 1 : index
    %c0_90 = arith.constant 0 : index
    %c0_91 = arith.constant 0 : index
    %132 = vector.load %arg4[%c1_89, %c0_90, %c0_91] : memref<4x50x20xf32, #tpu.memory_space<vmem>>, vector<1x50x20xf32>
    %133 = vector.shape_cast %132 : vector<1x50x20xf32> to vector<50x20xf32>
    %cst_92 = arith.constant dense<0.000000e+00> : vector<200x20xf32>
    %134 = tpu.matmul %109, %133, %cst_92 {dimension_numbers = #tpu.dot_dimension_numbers<[1], [0], [0], [1], [0, 0, 1, 1], [], []>} : vector<200x50xf32>, vector<50x20xf32>, vector<200x20xf32> -> vector<200x20xf32>
    %135 = arith.addf %131, %134 : vector<200x20xf32>
    %c2_93 = arith.constant 2 : index
    %c0_94 = arith.constant 0 : index
    %c0_95 = arith.constant 0 : index
    %136 = vector.load %arg4[%c2_93, %c0_94, %c0_95] : memref<4x50x20xf32, #tpu.memory_space<vmem>>, vector<1x50x20xf32>
    %137 = vector.shape_cast %136 : vector<1x50x20xf32> to vector<50x20xf32>
    %cst_96 = arith.constant dense<0.000000e+00> : vector<200x20xf32>
    %138 = tpu.matmul %117, %137, %cst_96 {dimension_numbers = #tpu.dot_dimension_numbers<[1], [0], [0], [1], [0, 0, 1, 1], [], []>} : vector<200x50xf32>, vector<50x20xf32>, vector<200x20xf32> -> vector<200x20xf32>
    %139 = arith.addf %135, %138 : vector<200x20xf32>
    %c3_97 = arith.constant 3 : index
    %c0_98 = arith.constant 0 : index
    %c0_99 = arith.constant 0 : index
    %140 = vector.load %arg4[%c3_97, %c0_98, %c0_99] : memref<4x50x20xf32, #tpu.memory_space<vmem>>, vector<1x50x20xf32>
    %141 = vector.shape_cast %140 : vector<1x50x20xf32> to vector<50x20xf32>
    %cst_100 = arith.constant dense<0.000000e+00> : vector<200x20xf32>
    %142 = tpu.matmul %125, %141, %cst_100 {dimension_numbers = #tpu.dot_dimension_numbers<[1], [0], [0], [1], [0, 0, 1, 1], [], []>} : vector<200x50xf32>, vector<50x20xf32>, vector<200x20xf32> -> vector<200x20xf32>
    %143 = arith.addf %139, %142 : vector<200x20xf32>
    %cst_101 = arith.constant 0.000000e+00 : f32
    %144 = vector.broadcast %cst_101 : f32 to vector<200x20xf32>
    %145 = arith.maximumf %143, %144 : vector<200x20xf32>
    %c0_102 = arith.constant 0 : index
    %c0_103 = arith.constant 0 : index
    %146 = vector.load %arg6[%c0_102, %c0_103] : memref<1x20xf32, #tpu.memory_space<vmem>>, vector<1x20xf32>
    %147 = vector.broadcast %146 : vector<1x20xf32> to vector<200x20xf32>
    %148 = arith.mulf %145, %147 : vector<200x20xf32>
    %c0_104 = arith.constant 0 : index
    %c0_105 = arith.constant 0 : index
    %149 = vector.load %arg7[%c0_104, %c0_105] : memref<1x20xf32, #tpu.memory_space<vmem>>, vector<1x20xf32>
    %150 = vector.broadcast %149 : vector<1x20xf32> to vector<200x20xf32>
    %151 = arith.addf %148, %150 : vector<200x20xf32>
    %cst_106 = arith.constant 0.000000e+00 : f32
    %152 = vector.broadcast %cst_106 : f32 to vector<200x20xf32>
    %153 = arith.maximumf %151, %152 : vector<200x20xf32>
    %c0_107 = arith.constant 0 : index
    %c0_108 = arith.constant 0 : index
    %154 = vector.load %arg9[%c0_107, %c0_108] : memref<1x200xf32, #tpu.memory_space<vmem>>, vector<1x200xf32>
    %155 = vector.extract_strided_slice %153 {offsets = [0, 0], sizes = [8, 20], strides = [1, 1]} : vector<200x20xf32> to vector<8x20xf32>
    %c0_109 = arith.constant 0 : index
    %c0_110 = arith.constant 0 : index
    %c0_111 = arith.constant 0 : index
    %156 = vector.load %arg8[%c0_109, %c0_110, %c0_111] : memref<25x20x200xf32, #tpu.memory_space<vmem>>, vector<1x20x200xf32>
    %157 = vector.shape_cast %156 : vector<1x20x200xf32> to vector<20x200xf32>
    %cst_112 = arith.constant dense<0.000000e+00> : vector<8x200xf32>
    %158 = tpu.matmul %155, %157, %cst_112 {dimension_numbers = #tpu.dot_dimension_numbers<[1], [0], [0], [1], [0, 0, 1, 1], [], []>} : vector<8x20xf32>, vector<20x200xf32>, vector<8x200xf32> -> vector<8x200xf32>
    %159 = vector.broadcast %154 : vector<1x200xf32> to vector<8x200xf32>
    %160 = arith.addf %159, %158 : vector<8x200xf32>
    %161 = vector.extract_strided_slice %153 {offsets = [8, 0], sizes = [8, 20], strides = [1, 1]} : vector<200x20xf32> to vector<8x20xf32>
    %c1_113 = arith.constant 1 : index
    %c0_114 = arith.constant 0 : index
    %c0_115 = arith.constant 0 : index
    %162 = vector.load %arg8[%c1_113, %c0_114, %c0_115] : memref<25x20x200xf32, #tpu.memory_space<vmem>>, vector<1x20x200xf32>
    %163 = vector.shape_cast %162 : vector<1x20x200xf32> to vector<20x200xf32>
    %cst_116 = arith.constant dense<0.000000e+00> : vector<8x200xf32>
    %164 = tpu.matmul %161, %163, %cst_116 {dimension_numbers = #tpu.dot_dimension_numbers<[1], [0], [0], [1], [0, 0, 1, 1], [], []>} : vector<8x20xf32>, vector<20x200xf32>, vector<8x200xf32> -> vector<8x200xf32>
    %165 = arith.addf %160, %164 : vector<8x200xf32>
    %166 = vector.extract_strided_slice %153 {offsets = [16, 0], sizes = [8, 20], strides = [1, 1]} : vector<200x20xf32> to vector<8x20xf32>
    %c2_117 = arith.constant 2 : index
    %c0_118 = arith.constant 0 : index
    %c0_119 = arith.constant 0 : index
    %167 = vector.load %arg8[%c2_117, %c0_118, %c0_119] : memref<25x20x200xf32, #tpu.memory_space<vmem>>, vector<1x20x200xf32>
    %168 = vector.shape_cast %167 : vector<1x20x200xf32> to vector<20x200xf32>
    %cst_120 = arith.constant dense<0.000000e+00> : vector<8x200xf32>
    %169 = tpu.matmul %166, %168, %cst_120 {dimension_numbers = #tpu.dot_dimension_numbers<[1], [0], [0], [1], [0, 0, 1, 1], [], []>} : vector<8x20xf32>, vector<20x200xf32>, vector<8x200xf32> -> vector<8x200xf32>
    %170 = arith.addf %165, %169 : vector<8x200xf32>
    %171 = vector.extract_strided_slice %153 {offsets = [24, 0], sizes = [8, 20], strides = [1, 1]} : vector<200x20xf32> to vector<8x20xf32>
    %c3_121 = arith.constant 3 : index
    %c0_122 = arith.constant 0 : index
    %c0_123 = arith.constant 0 : index
    %172 = vector.load %arg8[%c3_121, %c0_122, %c0_123] : memref<25x20x200xf32, #tpu.memory_space<vmem>>, vector<1x20x200xf32>
    %173 = vector.shape_cast %172 : vector<1x20x200xf32> to vector<20x200xf32>
    %cst_124 = arith.constant dense<0.000000e+00> : vector<8x200xf32>
    %174 = tpu.matmul %171, %173, %cst_124 {dimension_numbers = #tpu.dot_dimension_numbers<[1], [0], [0], [1], [0, 0, 1, 1], [], []>} : vector<8x20xf32>, vector<20x200xf32>, vector<8x200xf32> -> vector<8x200xf32>
    %175 = arith.addf %170, %174 : vector<8x200xf32>
    %176 = vector.extract_strided_slice %153 {offsets = [32, 0], sizes = [8, 20], strides = [1, 1]} : vector<200x20xf32> to vector<8x20xf32>
    %c4_125 = arith.constant 4 : index
    %c0_126 = arith.constant 0 : index
    %c0_127 = arith.constant 0 : index
    %177 = vector.load %arg8[%c4_125, %c0_126, %c0_127] : memref<25x20x200xf32, #tpu.memory_space<vmem>>, vector<1x20x200xf32>
    %178 = vector.shape_cast %177 : vector<1x20x200xf32> to vector<20x200xf32>
    %cst_128 = arith.constant dense<0.000000e+00> : vector<8x200xf32>
    %179 = tpu.matmul %176, %178, %cst_128 {dimension_numbers = #tpu.dot_dimension_numbers<[1], [0], [0], [1], [0, 0, 1, 1], [], []>} : vector<8x20xf32>, vector<20x200xf32>, vector<8x200xf32> -> vector<8x200xf32>
    %180 = arith.addf %175, %179 : vector<8x200xf32>
    %181 = vector.extract_strided_slice %153 {offsets = [40, 0], sizes = [8, 20], strides = [1, 1]} : vector<200x20xf32> to vector<8x20xf32>
    %c5_129 = arith.constant 5 : index
    %c0_130 = arith.constant 0 : index
    %c0_131 = arith.constant 0 : index
    %182 = vector.load %arg8[%c5_129, %c0_130, %c0_131] : memref<25x20x200xf32, #tpu.memory_space<vmem>>, vector<1x20x200xf32>
    %183 = vector.shape_cast %182 : vector<1x20x200xf32> to vector<20x200xf32>
    %cst_132 = arith.constant dense<0.000000e+00> : vector<8x200xf32>
    %184 = tpu.matmul %181, %183, %cst_132 {dimension_numbers = #tpu.dot_dimension_numbers<[1], [0], [0], [1], [0, 0, 1, 1], [], []>} : vector<8x20xf32>, vector<20x200xf32>, vector<8x200xf32> -> vector<8x200xf32>
    %185 = arith.addf %180, %184 : vector<8x200xf32>
    %186 = vector.extract_strided_slice %153 {offsets = [48, 0], sizes = [8, 20], strides = [1, 1]} : vector<200x20xf32> to vector<8x20xf32>
    %c6_133 = arith.constant 6 : index
    %c0_134 = arith.constant 0 : index
    %c0_135 = arith.constant 0 : index
    %187 = vector.load %arg8[%c6_133, %c0_134, %c0_135] : memref<25x20x200xf32, #tpu.memory_space<vmem>>, vector<1x20x200xf32>
    %188 = vector.shape_cast %187 : vector<1x20x200xf32> to vector<20x200xf32>
    %cst_136 = arith.constant dense<0.000000e+00> : vector<8x200xf32>
    %189 = tpu.matmul %186, %188, %cst_136 {dimension_numbers = #tpu.dot_dimension_numbers<[1], [0], [0], [1], [0, 0, 1, 1], [], []>} : vector<8x20xf32>, vector<20x200xf32>, vector<8x200xf32> -> vector<8x200xf32>
    %190 = arith.addf %185, %189 : vector<8x200xf32>
    %191 = vector.extract_strided_slice %153 {offsets = [56, 0], sizes = [8, 20], strides = [1, 1]} : vector<200x20xf32> to vector<8x20xf32>
    %c7_137 = arith.constant 7 : index
    %c0_138 = arith.constant 0 : index
    %c0_139 = arith.constant 0 : index
    %192 = vector.load %arg8[%c7_137, %c0_138, %c0_139] : memref<25x20x200xf32, #tpu.memory_space<vmem>>, vector<1x20x200xf32>
    %193 = vector.shape_cast %192 : vector<1x20x200xf32> to vector<20x200xf32>
    %cst_140 = arith.constant dense<0.000000e+00> : vector<8x200xf32>
    %194 = tpu.matmul %191, %193, %cst_140 {dimension_numbers = #tpu.dot_dimension_numbers<[1], [0], [0], [1], [0, 0, 1, 1], [], []>} : vector<8x20xf32>, vector<20x200xf32>, vector<8x200xf32> -> vector<8x200xf32>
    %195 = arith.addf %190, %194 : vector<8x200xf32>
    %196 = vector.extract_strided_slice %153 {offsets = [64, 0], sizes = [8, 20], strides = [1, 1]} : vector<200x20xf32> to vector<8x20xf32>
    %c8_141 = arith.constant 8 : index
    %c0_142 = arith.constant 0 : index
    %c0_143 = arith.constant 0 : index
    %197 = vector.load %arg8[%c8_141, %c0_142, %c0_143] : memref<25x20x200xf32, #tpu.memory_space<vmem>>, vector<1x20x200xf32>
    %198 = vector.shape_cast %197 : vector<1x20x200xf32> to vector<20x200xf32>
    %cst_144 = arith.constant dense<0.000000e+00> : vector<8x200xf32>
    %199 = tpu.matmul %196, %198, %cst_144 {dimension_numbers = #tpu.dot_dimension_numbers<[1], [0], [0], [1], [0, 0, 1, 1], [], []>} : vector<8x20xf32>, vector<20x200xf32>, vector<8x200xf32> -> vector<8x200xf32>
    %200 = arith.addf %195, %199 : vector<8x200xf32>
    %201 = vector.extract_strided_slice %153 {offsets = [72, 0], sizes = [8, 20], strides = [1, 1]} : vector<200x20xf32> to vector<8x20xf32>
    %c9_145 = arith.constant 9 : index
    %c0_146 = arith.constant 0 : index
    %c0_147 = arith.constant 0 : index
    %202 = vector.load %arg8[%c9_145, %c0_146, %c0_147] : memref<25x20x200xf32, #tpu.memory_space<vmem>>, vector<1x20x200xf32>
    %203 = vector.shape_cast %202 : vector<1x20x200xf32> to vector<20x200xf32>
    %cst_148 = arith.constant dense<0.000000e+00> : vector<8x200xf32>
    %204 = tpu.matmul %201, %203, %cst_148 {dimension_numbers = #tpu.dot_dimension_numbers<[1], [0], [0], [1], [0, 0, 1, 1], [], []>} : vector<8x20xf32>, vector<20x200xf32>, vector<8x200xf32> -> vector<8x200xf32>
    %205 = arith.addf %200, %204 : vector<8x200xf32>
    %206 = vector.extract_strided_slice %153 {offsets = [80, 0], sizes = [8, 20], strides = [1, 1]} : vector<200x20xf32> to vector<8x20xf32>
    %c10_149 = arith.constant 10 : index
    %c0_150 = arith.constant 0 : index
    %c0_151 = arith.constant 0 : index
    %207 = vector.load %arg8[%c10_149, %c0_150, %c0_151] : memref<25x20x200xf32, #tpu.memory_space<vmem>>, vector<1x20x200xf32>
    %208 = vector.shape_cast %207 : vector<1x20x200xf32> to vector<20x200xf32>
    %cst_152 = arith.constant dense<0.000000e+00> : vector<8x200xf32>
    %209 = tpu.matmul %206, %208, %cst_152 {dimension_numbers = #tpu.dot_dimension_numbers<[1], [0], [0], [1], [0, 0, 1, 1], [], []>} : vector<8x20xf32>, vector<20x200xf32>, vector<8x200xf32> -> vector<8x200xf32>
    %210 = arith.addf %205, %209 : vector<8x200xf32>
    %211 = vector.extract_strided_slice %153 {offsets = [88, 0], sizes = [8, 20], strides = [1, 1]} : vector<200x20xf32> to vector<8x20xf32>
    %c11_153 = arith.constant 11 : index
    %c0_154 = arith.constant 0 : index
    %c0_155 = arith.constant 0 : index
    %212 = vector.load %arg8[%c11_153, %c0_154, %c0_155] : memref<25x20x200xf32, #tpu.memory_space<vmem>>, vector<1x20x200xf32>
    %213 = vector.shape_cast %212 : vector<1x20x200xf32> to vector<20x200xf32>
    %cst_156 = arith.constant dense<0.000000e+00> : vector<8x200xf32>
    %214 = tpu.matmul %211, %213, %cst_156 {dimension_numbers = #tpu.dot_dimension_numbers<[1], [0], [0], [1], [0, 0, 1, 1], [], []>} : vector<8x20xf32>, vector<20x200xf32>, vector<8x200xf32> -> vector<8x200xf32>
    %215 = arith.addf %210, %214 : vector<8x200xf32>
    %216 = vector.extract_strided_slice %153 {offsets = [96, 0], sizes = [8, 20], strides = [1, 1]} : vector<200x20xf32> to vector<8x20xf32>
    %c12_157 = arith.constant 12 : index
    %c0_158 = arith.constant 0 : index
    %c0_159 = arith.constant 0 : index
    %217 = vector.load %arg8[%c12_157, %c0_158, %c0_159] : memref<25x20x200xf32, #tpu.memory_space<vmem>>, vector<1x20x200xf32>
    %218 = vector.shape_cast %217 : vector<1x20x200xf32> to vector<20x200xf32>
    %cst_160 = arith.constant dense<0.000000e+00> : vector<8x200xf32>
    %219 = tpu.matmul %216, %218, %cst_160 {dimension_numbers = #tpu.dot_dimension_numbers<[1], [0], [0], [1], [0, 0, 1, 1], [], []>} : vector<8x20xf32>, vector<20x200xf32>, vector<8x200xf32> -> vector<8x200xf32>
    %220 = arith.addf %215, %219 : vector<8x200xf32>
    %221 = vector.extract_strided_slice %153 {offsets = [104, 0], sizes = [8, 20], strides = [1, 1]} : vector<200x20xf32> to vector<8x20xf32>
    %c13_161 = arith.constant 13 : index
    %c0_162 = arith.constant 0 : index
    %c0_163 = arith.constant 0 : index
    %222 = vector.load %arg8[%c13_161, %c0_162, %c0_163] : memref<25x20x200xf32, #tpu.memory_space<vmem>>, vector<1x20x200xf32>
    %223 = vector.shape_cast %222 : vector<1x20x200xf32> to vector<20x200xf32>
    %cst_164 = arith.constant dense<0.000000e+00> : vector<8x200xf32>
    %224 = tpu.matmul %221, %223, %cst_164 {dimension_numbers = #tpu.dot_dimension_numbers<[1], [0], [0], [1], [0, 0, 1, 1], [], []>} : vector<8x20xf32>, vector<20x200xf32>, vector<8x200xf32> -> vector<8x200xf32>
    %225 = arith.addf %220, %224 : vector<8x200xf32>
    %226 = vector.extract_strided_slice %153 {offsets = [112, 0], sizes = [8, 20], strides = [1, 1]} : vector<200x20xf32> to vector<8x20xf32>
    %c14_165 = arith.constant 14 : index
    %c0_166 = arith.constant 0 : index
    %c0_167 = arith.constant 0 : index
    %227 = vector.load %arg8[%c14_165, %c0_166, %c0_167] : memref<25x20x200xf32, #tpu.memory_space<vmem>>, vector<1x20x200xf32>
    %228 = vector.shape_cast %227 : vector<1x20x200xf32> to vector<20x200xf32>
    %cst_168 = arith.constant dense<0.000000e+00> : vector<8x200xf32>
    %229 = tpu.matmul %226, %228, %cst_168 {dimension_numbers = #tpu.dot_dimension_numbers<[1], [0], [0], [1], [0, 0, 1, 1], [], []>} : vector<8x20xf32>, vector<20x200xf32>, vector<8x200xf32> -> vector<8x200xf32>
    %230 = arith.addf %225, %229 : vector<8x200xf32>
    %231 = vector.extract_strided_slice %153 {offsets = [120, 0], sizes = [8, 20], strides = [1, 1]} : vector<200x20xf32> to vector<8x20xf32>
    %c15_169 = arith.constant 15 : index
    %c0_170 = arith.constant 0 : index
    %c0_171 = arith.constant 0 : index
    %232 = vector.load %arg8[%c15_169, %c0_170, %c0_171] : memref<25x20x200xf32, #tpu.memory_space<vmem>>, vector<1x20x200xf32>
    %233 = vector.shape_cast %232 : vector<1x20x200xf32> to vector<20x200xf32>
    %cst_172 = arith.constant dense<0.000000e+00> : vector<8x200xf32>
    %234 = tpu.matmul %231, %233, %cst_172 {dimension_numbers = #tpu.dot_dimension_numbers<[1], [0], [0], [1], [0, 0, 1, 1], [], []>} : vector<8x20xf32>, vector<20x200xf32>, vector<8x200xf32> -> vector<8x200xf32>
    %235 = arith.addf %230, %234 : vector<8x200xf32>
    %236 = vector.extract_strided_slice %153 {offsets = [128, 0], sizes = [8, 20], strides = [1, 1]} : vector<200x20xf32> to vector<8x20xf32>
    %c16 = arith.constant 16 : index
    %c0_173 = arith.constant 0 : index
    %c0_174 = arith.constant 0 : index
    %237 = vector.load %arg8[%c16, %c0_173, %c0_174] : memref<25x20x200xf32, #tpu.memory_space<vmem>>, vector<1x20x200xf32>
    %238 = vector.shape_cast %237 : vector<1x20x200xf32> to vector<20x200xf32>
    %cst_175 = arith.constant dense<0.000000e+00> : vector<8x200xf32>
    %239 = tpu.matmul %236, %238, %cst_175 {dimension_numbers = #tpu.dot_dimension_numbers<[1], [0], [0], [1], [0, 0, 1, 1], [], []>} : vector<8x20xf32>, vector<20x200xf32>, vector<8x200xf32> -> vector<8x200xf32>
    %240 = arith.addf %235, %239 : vector<8x200xf32>
    %241 = vector.extract_strided_slice %153 {offsets = [136, 0], sizes = [8, 20], strides = [1, 1]} : vector<200x20xf32> to vector<8x20xf32>
    %c17 = arith.constant 17 : index
    %c0_176 = arith.constant 0 : index
    %c0_177 = arith.constant 0 : index
    %242 = vector.load %arg8[%c17, %c0_176, %c0_177] : memref<25x20x200xf32, #tpu.memory_space<vmem>>, vector<1x20x200xf32>
    %243 = vector.shape_cast %242 : vector<1x20x200xf32> to vector<20x200xf32>
    %cst_178 = arith.constant dense<0.000000e+00> : vector<8x200xf32>
    %244 = tpu.matmul %241, %243, %cst_178 {dimension_numbers = #tpu.dot_dimension_numbers<[1], [0], [0], [1], [0, 0, 1, 1], [], []>} : vector<8x20xf32>, vector<20x200xf32>, vector<8x200xf32> -> vector<8x200xf32>
    %245 = arith.addf %240, %244 : vector<8x200xf32>
    %246 = vector.extract_strided_slice %153 {offsets = [144, 0], sizes = [8, 20], strides = [1, 1]} : vector<200x20xf32> to vector<8x20xf32>
    %c18 = arith.constant 18 : index
    %c0_179 = arith.constant 0 : index
    %c0_180 = arith.constant 0 : index
    %247 = vector.load %arg8[%c18, %c0_179, %c0_180] : memref<25x20x200xf32, #tpu.memory_space<vmem>>, vector<1x20x200xf32>
    %248 = vector.shape_cast %247 : vector<1x20x200xf32> to vector<20x200xf32>
    %cst_181 = arith.constant dense<0.000000e+00> : vector<8x200xf32>
    %249 = tpu.matmul %246, %248, %cst_181 {dimension_numbers = #tpu.dot_dimension_numbers<[1], [0], [0], [1], [0, 0, 1, 1], [], []>} : vector<8x20xf32>, vector<20x200xf32>, vector<8x200xf32> -> vector<8x200xf32>
    %250 = arith.addf %245, %249 : vector<8x200xf32>
    %251 = vector.extract_strided_slice %153 {offsets = [152, 0], sizes = [8, 20], strides = [1, 1]} : vector<200x20xf32> to vector<8x20xf32>
    %c19 = arith.constant 19 : index
    %c0_182 = arith.constant 0 : index
    %c0_183 = arith.constant 0 : index
    %252 = vector.load %arg8[%c19, %c0_182, %c0_183] : memref<25x20x200xf32, #tpu.memory_space<vmem>>, vector<1x20x200xf32>
    %253 = vector.shape_cast %252 : vector<1x20x200xf32> to vector<20x200xf32>
    %cst_184 = arith.constant dense<0.000000e+00> : vector<8x200xf32>
    %254 = tpu.matmul %251, %253, %cst_184 {dimension_numbers = #tpu.dot_dimension_numbers<[1], [0], [0], [1], [0, 0, 1, 1], [], []>} : vector<8x20xf32>, vector<20x200xf32>, vector<8x200xf32> -> vector<8x200xf32>
    %255 = arith.addf %250, %254 : vector<8x200xf32>
    %256 = vector.extract_strided_slice %153 {offsets = [160, 0], sizes = [8, 20], strides = [1, 1]} : vector<200x20xf32> to vector<8x20xf32>
    %c20 = arith.constant 20 : index
    %c0_185 = arith.constant 0 : index
    %c0_186 = arith.constant 0 : index
    %257 = vector.load %arg8[%c20, %c0_185, %c0_186] : memref<25x20x200xf32, #tpu.memory_space<vmem>>, vector<1x20x200xf32>
    %258 = vector.shape_cast %257 : vector<1x20x200xf32> to vector<20x200xf32>
    %cst_187 = arith.constant dense<0.000000e+00> : vector<8x200xf32>
    %259 = tpu.matmul %256, %258, %cst_187 {dimension_numbers = #tpu.dot_dimension_numbers<[1], [0], [0], [1], [0, 0, 1, 1], [], []>} : vector<8x20xf32>, vector<20x200xf32>, vector<8x200xf32> -> vector<8x200xf32>
    %260 = arith.addf %255, %259 : vector<8x200xf32>
    %261 = vector.extract_strided_slice %153 {offsets = [168, 0], sizes = [8, 20], strides = [1, 1]} : vector<200x20xf32> to vector<8x20xf32>
    %c21 = arith.constant 21 : index
    %c0_188 = arith.constant 0 : index
    %c0_189 = arith.constant 0 : index
    %262 = vector.load %arg8[%c21, %c0_188, %c0_189] : memref<25x20x200xf32, #tpu.memory_space<vmem>>, vector<1x20x200xf32>
    %263 = vector.shape_cast %262 : vector<1x20x200xf32> to vector<20x200xf32>
    %cst_190 = arith.constant dense<0.000000e+00> : vector<8x200xf32>
    %264 = tpu.matmul %261, %263, %cst_190 {dimension_numbers = #tpu.dot_dimension_numbers<[1], [0], [0], [1], [0, 0, 1, 1], [], []>} : vector<8x20xf32>, vector<20x200xf32>, vector<8x200xf32> -> vector<8x200xf32>
    %265 = arith.addf %260, %264 : vector<8x200xf32>
    %266 = vector.extract_strided_slice %153 {offsets = [176, 0], sizes = [8, 20], strides = [1, 1]} : vector<200x20xf32> to vector<8x20xf32>
    %c22 = arith.constant 22 : index
    %c0_191 = arith.constant 0 : index
    %c0_192 = arith.constant 0 : index
    %267 = vector.load %arg8[%c22, %c0_191, %c0_192] : memref<25x20x200xf32, #tpu.memory_space<vmem>>, vector<1x20x200xf32>
    %268 = vector.shape_cast %267 : vector<1x20x200xf32> to vector<20x200xf32>
    %cst_193 = arith.constant dense<0.000000e+00> : vector<8x200xf32>
    %269 = tpu.matmul %266, %268, %cst_193 {dimension_numbers = #tpu.dot_dimension_numbers<[1], [0], [0], [1], [0, 0, 1, 1], [], []>} : vector<8x20xf32>, vector<20x200xf32>, vector<8x200xf32> -> vector<8x200xf32>
    %270 = arith.addf %265, %269 : vector<8x200xf32>
    %271 = vector.extract_strided_slice %153 {offsets = [184, 0], sizes = [8, 20], strides = [1, 1]} : vector<200x20xf32> to vector<8x20xf32>
    %c23 = arith.constant 23 : index
    %c0_194 = arith.constant 0 : index
    %c0_195 = arith.constant 0 : index
    %272 = vector.load %arg8[%c23, %c0_194, %c0_195] : memref<25x20x200xf32, #tpu.memory_space<vmem>>, vector<1x20x200xf32>
    %273 = vector.shape_cast %272 : vector<1x20x200xf32> to vector<20x200xf32>
    %cst_196 = arith.constant dense<0.000000e+00> : vector<8x200xf32>
    %274 = tpu.matmul %271, %273, %cst_196 {dimension_numbers = #tpu.dot_dimension_numbers<[1], [0], [0], [1], [0, 0, 1, 1], [], []>} : vector<8x20xf32>, vector<20x200xf32>, vector<8x200xf32> -> vector<8x200xf32>
    %275 = arith.addf %270, %274 : vector<8x200xf32>
    %276 = vector.extract_strided_slice %153 {offsets = [192, 0], sizes = [8, 20], strides = [1, 1]} : vector<200x20xf32> to vector<8x20xf32>
    %c24 = arith.constant 24 : index
    %c0_197 = arith.constant 0 : index
    %c0_198 = arith.constant 0 : index
    %277 = vector.load %arg8[%c24, %c0_197, %c0_198] : memref<25x20x200xf32, #tpu.memory_space<vmem>>, vector<1x20x200xf32>
    %278 = vector.shape_cast %277 : vector<1x20x200xf32> to vector<20x200xf32>
    %cst_199 = arith.constant dense<0.000000e+00> : vector<8x200xf32>
    %279 = tpu.matmul %276, %278, %cst_199 {dimension_numbers = #tpu.dot_dimension_numbers<[1], [0], [0], [1], [0, 0, 1, 1], [], []>} : vector<8x20xf32>, vector<20x200xf32>, vector<8x200xf32> -> vector<8x200xf32>
    %280 = arith.addf %275, %279 : vector<8x200xf32>
    %cst_200 = arith.constant 0.000000e+00 : f32
    %281 = vector.broadcast %cst_200 : f32 to vector<8x200xf32>
    %282 = arith.maximumf %280, %281 : vector<8x200xf32>
    %c0_201 = arith.constant 0 : index
    %c0_202 = arith.constant 0 : index
    %283 = vector.load %arg10[%c0_201, %c0_202] : memref<200x100xf32, #tpu.memory_space<vmem>>, vector<200x100xf32>
    %cst_203 = arith.constant dense<0.000000e+00> : vector<8x100xf32>
    %284 = tpu.matmul %282, %283, %cst_203 {dimension_numbers = #tpu.dot_dimension_numbers<[1], [0], [0], [1], [0, 0, 1, 1], [], []>} : vector<8x200xf32>, vector<200x100xf32>, vector<8x100xf32> -> vector<8x100xf32>
    %c0_204 = arith.constant 0 : index
    %c0_205 = arith.constant 0 : index
    %285 = vector.load %arg11[%c0_204, %c0_205] : memref<1x100xf32, #tpu.memory_space<vmem>>, vector<1x100xf32>
    %286 = vector.broadcast %285 : vector<1x100xf32> to vector<8x100xf32>
    %287 = arith.addf %284, %286 : vector<8x100xf32>
    %cst_206 = arith.constant 0.000000e+00 : f32
    %288 = vector.broadcast %cst_206 : f32 to vector<8x100xf32>
    %289 = arith.maximumf %287, %288 : vector<8x100xf32>
    %c0_207 = arith.constant 0 : index
    %c0_208 = arith.constant 0 : index
    %290 = vector.load %arg12[%c0_207, %c0_208] : memref<100x3xf32, #tpu.memory_space<vmem>>, vector<100x3xf32>
    %cst_209 = arith.constant dense<0.000000e+00> : vector<8x3xf32>
    %291 = tpu.matmul %289, %290, %cst_209 {dimension_numbers = #tpu.dot_dimension_numbers<[1], [0], [0], [1], [0, 0, 1, 1], [], []>} : vector<8x100xf32>, vector<100x3xf32>, vector<8x3xf32> -> vector<8x3xf32>
    %c0_210 = arith.constant 0 : index
    %c0_211 = arith.constant 0 : index
    %292 = vector.load %arg13[%c0_210, %c0_211] : memref<1x3xf32, #tpu.memory_space<vmem>>, vector<1x3xf32>
    %293 = vector.broadcast %292 : vector<1x3xf32> to vector<8x3xf32>
    %294 = arith.addf %291, %293 : vector<8x3xf32>
    %c0_212 = arith.constant 0 : index
    %c0_213 = arith.constant 0 : index
    %295 = vector.load %arg14[%c0_212, %c0_213] : memref<8x3xf32, #tpu.memory_space<vmem>>, vector<8x3xf32>
    tpu.vector_store %arg14[%c0_212, %c0_213], %294 {strides = array<i32>} : memref<8x3xf32, #tpu.memory_space<vmem>>, vector<8x3xf32>,
    return
  }
  func.func @transform_0(%arg0: i32) -> (i32, i32, i32, i32) {
    %c0_i32 = arith.constant 0 : i32
    %c0_i32_0 = arith.constant 0 : i32
    %c0_i32_1 = arith.constant 0 : i32
    %c0_i32_2 = arith.constant 0 : i32
    return %arg0, %c0_i32, %c0_i32_0, %c0_i32_1 : i32, i32, i32, i32
  }
  func.func @transform_1(%arg0: i32) -> (i32, i32) {
    %c0_i32 = arith.constant 0 : i32
    %c0_i32_0 = arith.constant 0 : i32
    %c0_i32_1 = arith.constant 0 : i32
    return %c0_i32, %c0_i32_0 : i32, i32
  }
  func.func @transform_2(%arg0: i32) -> (i32, i32) {
    %c0_i32 = arith.constant 0 : i32
    %c0_i32_0 = arith.constant 0 : i32
    %c0_i32_1 = arith.constant 0 : i32
    return %c0_i32, %c0_i32_0 : i32, i32
  }
  func.func @transform_3(%arg0: i32) -> (i32, i32, i32) {
    %c0_i32 = arith.constant 0 : i32
    %c0_i32_0 = arith.constant 0 : i32
    %c0_i32_1 = arith.constant 0 : i32
    %c0_i32_2 = arith.constant 0 : i32
    return %c0_i32, %c0_i32_0, %c0_i32_1 : i32, i32, i32
  }
  func.func @transform_4(%arg0: i32) -> (i32, i32) {
    %c0_i32 = arith.constant 0 : i32
    %c0_i32_0 = arith.constant 0 : i32
    %c0_i32_1 = arith.constant 0 : i32
    return %c0_i32, %c0_i32_0 : i32, i32
  }
  func.func @transform_5(%arg0: i32) -> (i32, i32) {
    %c0_i32 = arith.constant 0 : i32
    %c0_i32_0 = arith.constant 0 : i32
    %c0_i32_1 = arith.constant 0 : i32
    return %c0_i32, %c0_i32_0 : i32, i32
  }
  func.func @transform_6(%arg0: i32) -> (i32, i32) {
    %c0_i32 = arith.constant 0 : i32
    %c0_i32_0 = arith.constant 0 : i32
    %c0_i32_1 = arith.constant 0 : i32
    return %c0_i32, %c0_i32_0 : i32, i32
  }
  func.func @transform_7(%arg0: i32) -> (i32, i32, i32) {
    %c0_i32 = arith.constant 0 : i32
    %c0_i32_0 = arith.constant 0 : i32
    %c0_i32_1 = arith.constant 0 : i32
    %c0_i32_2 = arith.constant 0 : i32
    return %c0_i32, %c0_i32_0, %c0_i32_1 : i32, i32, i32
  }
  func.func @transform_8(%arg0: i32) -> (i32, i32) {
    %c0_i32 = arith.constant 0 : i32
    %c0_i32_0 = arith.constant 0 : i32
    %c0_i32_1 = arith.constant 0 : i32
    return %c0_i32, %c0_i32_0 : i32, i32
  }
  func.func @transform_9(%arg0: i32) -> (i32, i32) {
    %c0_i32 = arith.constant 0 : i32
    %c0_i32_0 = arith.constant 0 : i32
    %c0_i32_1 = arith.constant 0 : i32
    return %c0_i32, %c0_i32_0 : i32, i32
  }
  func.func @transform_10(%arg0: i32) -> (i32, i32) {
    %c0_i32 = arith.constant 0 : i32
    %c0_i32_0 = arith.constant 0 : i32
    %c0_i32_1 = arith.constant 0 : i32
    return %c0_i32, %c0_i32_0 : i32, i32
  }
  func.func @transform_11(%arg0: i32) -> (i32, i32) {
    %c0_i32 = arith.constant 0 : i32
    %c0_i32_0 = arith.constant 0 : i32
    %c0_i32_1 = arith.constant 0 : i32
    return %c0_i32, %c0_i32_0 : i32, i32
  }
  func.func @transform_12(%arg0: i32) -> (i32, i32) {
    %c0_i32 = arith.constant 0 : i32
    %c0_i32_0 = arith.constant 0 : i32
    %c0_i32_1 = arith.constant 0 : i32
    return %c0_i32, %c0_i32_0 : i32, i32
  }
  func.func @transform_13(%arg0: i32) -> (i32, i32) {
    %c0_i32 = arith.constant 0 : i32
    %c0_i32_0 = arith.constant 0 : i32
    return %arg0, %c0_i32 : i32, i32
  }
}

</mosaic_0001>

<bundles_post_ra>
// kernel: cnn_forward.1
= control target key start
LH: loop header
LB: loop body
LE: loop exit
PB: predicated region body
PF: predicated region fallthrough
CT: control target
= control target key end

     0   :  { %vm156_vm0 = vcmask 1040384   ;;  %v18082_v0 = vmov 0.0   ;;  %vm80_vm1 = vcmask 203776   ;;  %vm12684_vm2 = vmmov 0   ;;  %s18068_s1 = inlined_call_operand.vmem [shape: f32[25,50], index: 1, kind: input, shape index: {}]   ;;  %s18069_s0 = inlined_call_operand.vmem [shape: f32[1,16,200,25], index: 0, kind: input, shape index: {}]   ;;  %s18070_s2 = inlined_call_operand.vmem [shape: f32[1,50], index: 2, kind: input, shape index: {}]   ;;  %s18071_s3 = inlined_call_operand.vmem [shape: f32[4,50,20], index: 3, kind: input, shape index: {}]   ;;  %s18072_s7 = inlined_call_operand.vmem [shape: f32[25,20,200], index: 7, kind: input, shape index: {}]   ;;  %s18073_s4 = inlined_call_operand.vmem [shape: f32[1,20], index: 4, kind: input, shape index: {}]   ;;  %s18074_s5 = inlined_call_operand.vmem [shape: f32[1,20], index: 5, kind: input, shape index: {}]   ;;  %s18075_s6 = inlined_call_operand.vmem [shape: f32[1,20], index: 6, kind: input, shape index: {}]   ;;  %s18076_s9 = inlined_call_operand.vmem [shape: f32[200,100], index: 9, kind: input, shape index: {}]   ;;  %s18077_s11 = inlined_call_operand.vmem [shape: f32[100,3], index: 11, kind: input, shape index: {}]   ;;  %s18078_s8 = inlined_call_operand.vmem [shape: f32[1,200], index: 8, kind: input, shape index: {}]   ;;  %s18079_s10 = inlined_call_operand.vmem [shape: f32[1,100], index: 10, kind: input, shape index: {}]   ;;  %s18080_s12 = inlined_call_operand.vmem [shape: f32[1,3], index: 12, kind: input, shape index: {}]   ;;  %s18081_s13 = inlined_call_operand.vmem [shape: f32[8,3], index: 13, kind: output, shape index: {}]  }
   0x1   :  { %10941 = vmatprep.subr.mxu0 %v18082_v0  ;;  %12654 = vmatprep.subr.mxu1 %v18082_v0  ;;  %v12760_v1 = vld [vmem:[%s18068_s1 + $0x18] sm:$0x1]  ;;  %v12765_v2 = vld [vmem:[%s18068_s1 + $0x10] sm:$0xff]  ;;  %v12776_v3 = vld [vmem:[%s18068_s1 + $0x8] sm:$0xff]  ;;  %vm5499_vm3 = vcmask 1041408   ;;  %vm5423_vm4 = vcmask 408576  }
   0x2   :  { %10942 = vmatpush3.msk.msra.mxu0 %vm156_vm0, %v12760_v1  ;;  %12658 = vmatpush3.msk.msra.mxu1 %vm156_vm0, %v12760_v1  ;;  %v12785_v4 = vld [vmem:[%s18068_s1] sm:$0xff]  ;;  %v9220_v6 = vld [vmem:[%s18069_s0 + $0xd8] sm:$0xff]  ;;  %v50_v7 = vld [vmem:[%s18069_s0 + $0x8] sm:$0xff]  ;;  %vm6752_vm5 = vcmask 1043456   ;;  %vm6748_vm6 = vcmask 162816   ;;  %vm9013_vm7 = vcmask 588800  }
   0x3   :  { %10943 = vmatprep.subr.mxu0 %v18082_v0  ;;  %12655 = vmatprep.subr.mxu1 %v18082_v0  ;;  %v49_v5 = vld [vmem:[%s18069_s0] sm:$0xff]  ;;  %v51_v9 = vld [vmem:[%s18069_s0 + $0x10] sm:$0xff]  ;;  %v9222_v10 = vld [vmem:[%s18069_s0 + $0xe8] sm:$0xff]  ;;  %vm9108_vm8 = vcmask 818176   ;;  %vm9185_vm9 = vcmask 23552  }
   0x4   :  { %10944 = vmatpush3.msra.mxu0 %v12765_v2  ;;  %12659 = vmatpush3.msra.mxu1 %v12765_v2  ;;  %v9221_v8 = vld [vmem:[%s18069_s0 + $0xe0] sm:$0xff]  ;;  %v52_v11 = vld [vmem:[%s18069_s0 + $0x18] sm:$0xff]  ;;  %v9223_v12 = vld [vmem:[%s18069_s0 + $0xf0] sm:$0xff] }
   0x5   :  { %10945 = vmatprep.subr.mxu0 %v18082_v0  ;;  %12656 = vmatprep.subr.mxu1 %v18082_v0  ;;  %v53_v13 = vld [vmem:[%s18069_s0 + $0x20] sm:$0xff]  ;;  %v9224_v14 = vld [vmem:[%s18069_s0 + $0xf8] sm:$0xff]  ;;  %v54_v15 = vld [vmem:[%s18069_s0 + $0x28] sm:$0xff] }
   0x6   :  { %10946 = vmatpush3.msra.mxu0 %v12776_v3  ;;  %12660 = vmatpush3.msra.mxu1 %v12776_v3  ;;  %v9225_v16 = vld [vmem:[%s18069_s0 + $0x100] sm:$0xff]  ;;  %v55_v17 = vld [vmem:[%s18069_s0 + $0x30] sm:$0xff]  ;;  %v9226_v18 = vld [vmem:[%s18069_s0 + $0x108] sm:$0xff] }
   0x7   :  { %10947 = vmatprep.subr.mxu0 %v18082_v0  ;;  %12657 = vmatprep.subr.mxu1 %v18082_v0  ;;  %v56_v19 = vld [vmem:[%s18069_s0 + $0x38] sm:$0xff]  ;;  %v9227_v20 = vld [vmem:[%s18069_s0 + $0x110] sm:$0xff]  ;;  %v57_v21 = vld [vmem:[%s18069_s0 + $0x40] sm:$0xff] }
   0x8   :  { %10948 = vmatpush3.msra.mxu0 %v12785_v4  ;;  %10949 = vmatprep.mubr.msk.f32.mxu0 %vm12684_vm2, %v18082_v0  ;;  %v9228_v22 = vld [vmem:[%s18069_s0 + $0x118] sm:$0xff]  ;;  %v58_v23 = vld [vmem:[%s18069_s0 + $0x48] sm:$0xff]  ;;  %v9229_v24 = vld [vmem:[%s18069_s0 + $0x120] sm:$0xff] }
   0x9   :  { %12661 = vmatpush3.msra.mxu1 %v12785_v4  ;;  %11038 = vmatprep.mubr.msk.f32.mxu1 %vm12684_vm2, %v18082_v0  ;;  %v59_v25 = vld [vmem:[%s18069_s0 + $0x50] sm:$0xff]  ;;  %v9230_v26 = vld [vmem:[%s18069_s0 + $0x128] sm:$0xff]  ;;  %v60_v27 = vld [vmem:[%s18069_s0 + $0x58] sm:$0xff] }
   0xa   :  { %10950 = vmatmul.mubr.msk.f32.vlgmr.msra.gmra.mxu0 %vm80_vm1, %v49_v5  ;;  %11024 = vmatprep.subr.mxu0 %v18082_v0  ;;  %v9231_v28 = vld [vmem:[%s18069_s0 + $0x130] sm:$0xff]  ;;  %v61_v29 = vld [vmem:[%s18069_s0 + $0x60] sm:$0xff]  ;;  %v9232_v30 = vld [vmem:[%s18069_s0 + $0x138] sm:$0xff] }
   0xb   :  { %11039 = vmatmul.mubr.msk.f32.vlgmr.msra.gmra.mxu1 %vm80_vm1, %v9220_v6  ;;  %11025 = vmatpush3.msk.msra.mxu0 %vm156_vm0, %v12760_v1  ;;  %v62_v31 = vld [vmem:[%s18069_s0 + $0x68] sm:$0xff]  ;;  %v9233_v32 = vld [vmem:[%s18069_s0 + $0x140] sm:$0xff]  ;;  %v63_v33 = vld [vmem:[%s18069_s0 + $0x70] sm:$0xff] }
   0xc   :  { %10952 = vmatprep.mubr.msk.f32.mxu0 %vm12684_vm2, %v18082_v0  ;;  %11041 = vmatprep.mubr.msk.f32.mxu1 %vm12684_vm2, %v18082_v0  ;;  %v9234_v34 = vld [vmem:[%s18069_s0 + $0x148] sm:$0xff]  ;;  %v64_v35 = vld [vmem:[%s18069_s0 + $0x78] sm:$0xff]  ;;  %v9235_v36 = vld [vmem:[%s18069_s0 + $0x150] sm:$0xff] }
   0xd   :  { %11190 = vmatprep.subr.mxu1 %v18082_v0  ;;  %11026 = vmatprep.subr.mxu0 %v18082_v0  ;;  %v65_v37 = vld [vmem:[%s18069_s0 + $0x80] sm:$0xff]  ;;  %v9236_v38 = vld [vmem:[%s18069_s0 + $0x158] sm:$0xff]  ;;  %v66_v39 = vld [vmem:[%s18069_s0 + $0x88] sm:$0xff] }
   0xe   :  { %10953 = vmatmul.mubr.msk.f32.gmra.mxu0 %vm80_vm1, %v50_v7  ;;  %11191 = vmatpush3.msk.msra.mxu1 %vm156_vm0, %v12760_v1  ;;  %v9237_v40 = vld [vmem:[%s18069_s0 + $0x160] sm:$0xff]  ;;  %v67_v41 = vld [vmem:[%s18069_s0 + $0x90] sm:$0xff]  ;;  %v9238_v42 = vld [vmem:[%s18069_s0 + $0x168] sm:$0xff] }
   0xf   :  { %11042 = vmatmul.mubr.msk.f32.gmra.mxu1 %vm80_vm1, %v9221_v8  ;;  %10955 = vmatprep.mubr.msk.f32.mxu0 %vm12684_vm2, %v18082_v0  ;;  %v68_v43 = vld [vmem:[%s18069_s0 + $0x98] sm:$0xff]  ;;  %v9239_v44 = vld [vmem:[%s18069_s0 + $0x170] sm:$0xff]  ;;  %v69_v45 = vld [vmem:[%s18069_s0 + $0xa0] sm:$0xff] }
  0x10   :  { %11044 = vmatprep.mubr.msk.f32.mxu1 %vm12684_vm2, %v18082_v0  ;;  %11027 = vmatpush3.msra.mxu0 %v12765_v2  ;;  %v9240_v46 = vld [vmem:[%s18069_s0 + $0x178] sm:$0xff]  ;;  %v70_v47 = vld [vmem:[%s18069_s0 + $0xa8] sm:$0xff]  ;;  %v9241_v48 = vld [vmem:[%s18069_s0 + $0x180] sm:$0xff] }
  0x11   :  { %11192 = vmatprep.subr.mxu1 %v18082_v0  ;;  %11028 = vmatprep.subr.mxu0 %v18082_v0  ;;  %v71_v49 = vld [vmem:[%s18069_s0 + $0xb0] sm:$0xff]  ;;  %v9242_v50 = vld [vmem:[%s18069_s0 + $0x188] sm:$0xff]  ;;  %v72_v51 = vld [vmem:[%s18069_s0 + $0xb8] sm:$0xff] }
  0x12   :  { %10956 = vmatmul.mubr.msk.f32.gmra.mxu0 %vm80_vm1, %v51_v9  ;;  %11193 = vmatpush3.msra.mxu1 %v12765_v2  ;;  %v9320_v52 = vld [vmem:[%s18069_s0 + $0x258] sm:$0xff]  ;;  %v73_v53 = vld [vmem:[%s18069_s0 + $0xc0] sm:$0xff]  ;;  %v9218_v55 = vld [vmem:[%s18069_s0 + $0xc8] sm:$0xff] }
  0x13   :  { %11045 = vmatmul.mubr.msk.f32.gmra.mxu1 %vm80_vm1, %v9222_v10  ;;  %10958 = vmatprep.mubr.msk.f32.mxu0 %vm12684_vm2, %v18082_v0  ;;  %v9321_v54 = vld [vmem:[%s18069_s0 + $0x260] sm:$0xff]  ;;  %v9322_v56 = vld [vmem:[%s18069_s0 + $0x268] sm:$0xff]  ;;  %v9219_v57 = vld [vmem:[%s18069_s0 + $0xd0] sm:$0xff] }
  0x14   :  { %11047 = vmatprep.mubr.msk.f32.mxu1 %vm12684_vm2, %v18082_v0  ;;  %11029 = vmatpush3.msra.mxu0 %v12776_v3  ;;  %v9323_v58 = vld [vmem:[%s18069_s0 + $0x270] sm:$0xff]  ;;  %v9324_v60 = vld [vmem:[%s18069_s0 + $0x278] sm:$0xff]  ;;  %v9325_v62 = vld [vmem:[%s18069_s0 + $0x280] sm:$0xff] }
  0x15   :  { %11194 = vmatprep.subr.mxu1 %v18082_v0  ;;  %11030 = vmatprep.subr.mxu0 %v18082_v0  ;;  %v9269_v59 = vld [vmem:[%s18069_s0 + $0x190] sm:$0xff]  ;;  %v9270_v61 = vld [vmem:[%s18069_s0 + $0x198] sm:$0xff]  ;;  %v9271_v63 = vld [vmem:[%s18069_s0 + $0x1a0] sm:$0xff] }
  0x16   :  { %10959 = vmatmul.mubr.msk.f32.gmra.mxu0 %vm80_vm1, %v52_v11  ;;  %11195 = vmatpush3.msra.mxu1 %v12776_v3  ;;  %v9326_v5 = vld [vmem:[%s18069_s0 + $0x288] sm:$0xff]  ;;  %v9327_v7 = vld [vmem:[%s18069_s0 + $0x290] sm:$0xff]  ;;  %v9328_v9 = vld [vmem:[%s18069_s0 + $0x298] sm:$0xff] }
  0x17   :  { %11048 = vmatmul.mubr.msk.f32.gmra.mxu1 %vm80_vm1, %v9223_v12  ;;  %10961 = vmatprep.mubr.msk.f32.mxu0 %vm12684_vm2, %v18082_v0  ;;  %v9272_v6 = vld [vmem:[%s18069_s0 + $0x1a8] sm:$0xff]  ;;  %v9273_v8 = vld [vmem:[%s18069_s0 + $0x1b0] sm:$0xff]  ;;  %v9274_v10 = vld [vmem:[%s18069_s0 + $0x1b8] sm:$0xff] }
  0x18   :  { %11050 = vmatprep.mubr.msk.f32.mxu1 %vm12684_vm2, %v18082_v0  ;;  %11031 = vmatpush3.msra.mxu0 %v12785_v4  ;;  %v9329_v11 = vld [vmem:[%s18069_s0 + $0x2a0] sm:$0xff] }
  0x19   :  { %11196 = vmatprep.subr.mxu1 %v18082_v0  ;;  %11107 = vmatprep.subr.mxu0 %v18082_v0  ;;  %v9275_v12 = vld [vmem:[%s18069_s0 + $0x1c0] sm:$0xff] }
  0x1a   :  { %10962 = vmatmul.mubr.msk.f32.gmra.mxu0 %vm80_vm1, %v53_v13  ;;  %11197 = vmatpush3.msra.mxu1 %v12785_v4  ;;  %v9330_v13 = vld [vmem:[%s18069_s0 + $0x2a8] sm:$0xff] }
  0x1b   :  { %11051 = vmatmul.mubr.msk.f32.gmra.mxu1 %vm80_vm1, %v9224_v14  ;;  %10964 = vmatprep.mubr.msk.f32.mxu0 %vm12684_vm2, %v18082_v0  ;;  %v9276_v14 = vld [vmem:[%s18069_s0 + $0x1c8] sm:$0xff] }
  0x1c   :  { %11053 = vmatprep.mubr.msk.f32.mxu1 %vm12684_vm2, %v18082_v0  ;;  %11356 = vmatprep.subr.mxu1 %v18082_v0 }
  0x1e   :  { %10965 = vmatmul.mubr.msk.f32.gmra.mxu0 %vm80_vm1, %v54_v15  ;;  %v9331_v15 = vld [vmem:[%s18069_s0 + $0x2b0] sm:$0xff] }
  0x1f   :  { %11054 = vmatmul.mubr.msk.f32.gmra.mxu1 %vm80_vm1, %v9225_v16  ;;  %10967 = vmatprep.mubr.msk.f32.mxu0 %vm12684_vm2, %v18082_v0  ;;  %v9277_v16 = vld [vmem:[%s18069_s0 + $0x1d0] sm:$0xff] }
  0x20   :  { %11056 = vmatprep.mubr.msk.f32.mxu1 %vm12684_vm2, %v18082_v0 }
  0x22   :  { %10968 = vmatmul.mubr.msk.f32.gmra.mxu0 %vm80_vm1, %v55_v17  ;;  %v9332_v17 = vld [vmem:[%s18069_s0 + $0x2b8] sm:$0xff] }
  0x23   :  { %11057 = vmatmul.mubr.msk.f32.gmra.mxu1 %vm80_vm1, %v9226_v18  ;;  %10970 = vmatprep.mubr.msk.f32.mxu0 %vm12684_vm2, %v18082_v0  ;;  %v9278_v18 = vld [vmem:[%s18069_s0 + $0x1d8] sm:$0xff] }
  0x24   :  { %11059 = vmatprep.mubr.msk.f32.mxu1 %vm12684_vm2, %v18082_v0 }
  0x26   :  { %10971 = vmatmul.mubr.msk.f32.gmra.mxu0 %vm80_vm1, %v56_v19  ;;  %v9333_v19 = vld [vmem:[%s18069_s0 + $0x2c0] sm:$0xff] }
  0x27   :  { %11060 = vmatmul.mubr.msk.f32.gmra.mxu1 %vm80_vm1, %v9227_v20  ;;  %10973 = vmatprep.mubr.msk.f32.mxu0 %vm12684_vm2, %v18082_v0  ;;  %v9279_v20 = vld [vmem:[%s18069_s0 + $0x1e0] sm:$0xff] }
  0x28   :  { %11062 = vmatprep.mubr.msk.f32.mxu1 %vm12684_vm2, %v18082_v0 }
  0x2a   :  { %10974 = vmatmul.mubr.msk.f32.gmra.mxu0 %vm80_vm1, %v57_v21  ;;  %v9334_v21 = vld [vmem:[%s18069_s0 + $0x2c8] sm:$0xff] }
  0x2b   :  { %11063 = vmatmul.mubr.msk.f32.gmra.mxu1 %vm80_vm1, %v9228_v22  ;;  %10976 = vmatprep.mubr.msk.f32.mxu0 %vm12684_vm2, %v18082_v0  ;;  %v9280_v22 = vld [vmem:[%s18069_s0 + $0x1e8] sm:$0xff] }
  0x2c   :  { %11065 = vmatprep.mubr.msk.f32.mxu1 %vm12684_vm2, %v18082_v0 }
  0x2e   :  { %10977 = vmatmul.mubr.msk.f32.gmra.mxu0 %vm80_vm1, %v58_v23  ;;  %v9335_v23 = vld [vmem:[%s18069_s0 + $0x2d0] sm:$0xff] }
  0x2f   :  { %11066 = vmatmul.mubr.msk.f32.gmra.mxu1 %vm80_vm1, %v9229_v24  ;;  %10979 = vmatprep.mubr.msk.f32.mxu0 %vm12684_vm2, %v18082_v0  ;;  %v9281_v24 = vld [vmem:[%s18069_s0 + $0x1f0] sm:$0xff] }
  0x30   :  { %11068 = vmatprep.mubr.msk.f32.mxu1 %vm12684_vm2, %v18082_v0 }
  0x32   :  { %10980 = vmatmul.mubr.msk.f32.gmra.mxu0 %vm80_vm1, %v59_v25  ;;  %v9336_v25 = vld [vmem:[%s18069_s0 + $0x2d8] sm:$0xff] }
  0x33   :  { %11069 = vmatmul.mubr.msk.f32.gmra.mxu1 %vm80_vm1, %v9230_v26  ;;  %10982 = vmatprep.mubr.msk.f32.mxu0 %vm12684_vm2, %v18082_v0  ;;  %v9282_v26 = vld [vmem:[%s18069_s0 + $0x1f8] sm:$0xff] }
  0x34   :  { %11071 = vmatprep.mubr.msk.f32.mxu1 %vm12684_vm2, %v18082_v0 }
  0x36   :  { %10983 = vmatmul.mubr.msk.f32.gmra.mxu0 %vm80_vm1, %v60_v27  ;;  %v9337_v27 = vld [vmem:[%s18069_s0 + $0x2e0] sm:$0xff] }
  0x37   :  { %11072 = vmatmul.mubr.msk.f32.gmra.mxu1 %vm80_vm1, %v9231_v28  ;;  %10985 = vmatprep.mubr.msk.f32.mxu0 %vm12684_vm2, %v18082_v0  ;;  %v9283_v28 = vld [vmem:[%s18069_s0 + $0x200] sm:$0xff] }
  0x38   :  { %11074 = vmatprep.mubr.msk.f32.mxu1 %vm12684_vm2, %v18082_v0 }
  0x3a   :  { %10986 = vmatmul.mubr.msk.f32.gmra.mxu0 %vm80_vm1, %v61_v29  ;;  %v9338_v29 = vld [vmem:[%s18069_s0 + $0x2e8] sm:$0xff] }
  0x3b   :  { %11075 = vmatmul.mubr.msk.f32.gmra.mxu1 %vm80_vm1, %v9232_v30  ;;  %10988 = vmatprep.mubr.msk.f32.mxu0 %vm12684_vm2, %v18082_v0  ;;  %v9284_v30 = vld [vmem:[%s18069_s0 + $0x208] sm:$0xff] }
  0x3c   :  { %11077 = vmatprep.mubr.msk.f32.mxu1 %vm12684_vm2, %v18082_v0 }
  0x3e   :  { %10989 = vmatmul.mubr.msk.f32.gmra.mxu0 %vm80_vm1, %v62_v31  ;;  %v9339_v31 = vld [vmem:[%s18069_s0 + $0x2f0] sm:$0xff] }
  0x3f   :  { %11078 = vmatmul.mubr.msk.f32.gmra.mxu1 %vm80_vm1, %v9233_v32  ;;  %10991 = vmatprep.mubr.msk.f32.mxu0 %vm12684_vm2, %v18082_v0  ;;  %v9285_v32 = vld [vmem:[%s18069_s0 + $0x210] sm:$0xff] }
  0x40   :  { %11080 = vmatprep.mubr.msk.f32.mxu1 %vm12684_vm2, %v18082_v0 }
  0x42   :  { %10992 = vmatmul.mubr.msk.f32.gmra.mxu0 %vm80_vm1, %v63_v33  ;;  %v9340_v33 = vld [vmem:[%s18069_s0 + $0x2f8] sm:$0xff] }
  0x43   :  { %11081 = vmatmul.mubr.msk.f32.gmra.mxu1 %vm80_vm1, %v9234_v34  ;;  %10994 = vmatprep.mubr.msk.f32.mxu0 %vm12684_vm2, %v18082_v0  ;;  %v9286_v34 = vld [vmem:[%s18069_s0 + $0x218] sm:$0xff] }
  0x44   :  { %11083 = vmatprep.mubr.msk.f32.mxu1 %vm12684_vm2, %v18082_v0 }
  0x46   :  { %10995 = vmatmul.mubr.msk.f32.gmra.mxu0 %vm80_vm1, %v64_v35  ;;  %v9341_v35 = vld [vmem:[%s18069_s0 + $0x300] sm:$0xff] }
  0x47   :  { %11084 = vmatmul.mubr.msk.f32.gmra.mxu1 %vm80_vm1, %v9235_v36  ;;  %10997 = vmatprep.mubr.msk.f32.mxu0 %vm12684_vm2, %v18082_v0  ;;  %v9287_v36 = vld [vmem:[%s18069_s0 + $0x220] sm:$0xff] }
  0x48   :  { %11086 = vmatprep.mubr.msk.f32.mxu1 %vm12684_vm2, %v18082_v0 }
  0x4a   :  { %10998 = vmatmul.mubr.msk.f32.gmra.mxu0 %vm80_vm1, %v65_v37  ;;  %v9342_v37 = vld [vmem:[%s18069_s0 + $0x308] sm:$0xff] }
  0x4b   :  { %11087 = vmatmul.mubr.msk.f32.gmra.mxu1 %vm80_vm1, %v9236_v38  ;;  %11000 = vmatprep.mubr.msk.f32.mxu0 %vm12684_vm2, %v18082_v0  ;;  %v9288_v38 = vld [vmem:[%s18069_s0 + $0x228] sm:$0xff] }
  0x4c   :  { %11089 = vmatprep.mubr.msk.f32.mxu1 %vm12684_vm2, %v18082_v0 }
  0x4e   :  { %11001 = vmatmul.mubr.msk.f32.gmra.mxu0 %vm80_vm1, %v66_v39  ;;  %v9343_v39 = vld [vmem:[%s18069_s0 + $0x310] sm:$0xff] }
  0x4f   :  { %11090 = vmatmul.mubr.msk.f32.gmra.mxu1 %vm80_vm1, %v9237_v40  ;;  %11003 = vmatprep.mubr.msk.f32.mxu0 %vm12684_vm2, %v18082_v0  ;;  %v9289_v40 = vld [vmem:[%s18069_s0 + $0x230] sm:$0xff] }
  0x50   :  { %11092 = vmatprep.mubr.msk.f32.mxu1 %vm12684_vm2, %v18082_v0 }
  0x52   :  { %11004 = vmatmul.mubr.msk.f32.gmra.mxu0 %vm80_vm1, %v67_v41  ;;  %v9344_v41 = vld [vmem:[%s18069_s0 + $0x318] sm:$0xff] }
  0x53   :  { %11093 = vmatmul.mubr.msk.f32.gmra.mxu1 %vm80_vm1, %v9238_v42  ;;  %11006 = vmatprep.mubr.msk.f32.mxu0 %vm12684_vm2, %v18082_v0  ;;  %v9290_v42 = vld [vmem:[%s18069_s0 + $0x238] sm:$0xff] }
  0x54   :  { %11095 = vmatprep.mubr.msk.f32.mxu1 %vm12684_vm2, %v18082_v0 }
  0x56   :  { %11007 = vmatmul.mubr.msk.f32.gmra.mxu0 %vm80_vm1, %v68_v43  ;;  %v9422_v43 = vld [vmem:[%s18069_s0 + $0x3e8] sm:$0xff] }
  0x57   :  { %11096 = vmatmul.mubr.msk.f32.gmra.mxu1 %vm80_vm1, %v9239_v44  ;;  %11009 = vmatprep.mubr.msk.f32.mxu0 %vm12684_vm2, %v18082_v0 }
  0x58   :  { %11098 = vmatprep.mubr.msk.f32.mxu1 %vm12684_vm2, %v18082_v0 }
  0x5a   :  { %11010 = vmatmul.mubr.msk.f32.gmra.mxu0 %vm80_vm1, %v69_v45 }
  0x5b   :  { %11099 = vmatmul.mubr.msk.f32.gmra.mxu1 %vm80_vm1, %v9240_v46  ;;  %11012 = vmatprep.mubr.msk.f32.mxu0 %vm12684_vm2, %v18082_v0  ;;  %v9291_v46 = vld [vmem:[%s18069_s0 + $0x240] sm:$0xff] }
  0x5c   :  { %11101 = vmatprep.mubr.msk.f32.mxu1 %vm12684_vm2, %v18082_v0 }
  0x5e   :  { %11013 = vmatmul.mubr.msk.f32.gmra.mxu0 %vm80_vm1, %v70_v47 }
  0x5f   :  { %11102 = vmatmul.mubr.msk.f32.gmra.mxu1 %vm80_vm1, %v9241_v48  ;;  %11015 = vmatprep.mubr.msk.f32.mxu0 %vm12684_vm2, %v18082_v0  ;;  %v9423_v48 = vld [vmem:[%s18069_s0 + $0x3f0] sm:$0xff] }
  0x60   :  { %11104 = vmatprep.mubr.msk.f32.mxu1 %vm12684_vm2, %v18082_v0 }
  0x62   :  { %11016 = vmatmul.mubr.msk.f32.gmra.mxu0 %vm80_vm1, %v71_v49 }
  0x63   :  { %11105 = vmatmul.mubr.msk.f32.gmra.mxu1 %vm80_vm1, %v9242_v50  ;;  %11018 = vmatprep.mubr.msk.f32.mxu0 %vm12684_vm2, %v18082_v0 }
  0x64   :  { %11198 = vmatprep.mubr.msk.f32.mxu1 %vm12684_vm2, %v18082_v0 }
  0x66   :  { %11019 = vmatmul.mubr.msk.f32.gmra.mxu0 %vm80_vm1, %v72_v51 }
  0x67   :  { %11199 = vmatmul.mubr.msk.f32.vlgmr.msra.gmra.mxu1 %vm80_vm1, %v9320_v52  ;;  %11021 = vmatprep.mubr.msk.f32.mxu0 %vm12684_vm2, %v18082_v0  ;;  %v9292_v52 = vld [vmem:[%s18069_s0 + $0x248] sm:$0xff] }
  0x68   :  { %11201 = vmatprep.mubr.msk.f32.mxu1 %vm12684_vm2, %v18082_v0  ;;  %11357 = vmatpush3.msk.msra.mxu1 %vm156_vm0, %v12760_v1 }
  0x69   :  { %11358 = vmatprep.subr.mxu1 %v18082_v0 }
  0x6a   :  { %11022 = vmatmul.mubr.msk.f32.gmra.mxu0 %vm80_vm1, %v73_v53  ;;  %11359 = vmatpush3.msra.mxu1 %v12765_v2 }
  0x6b   :  { %11202 = vmatmul.mubr.msk.f32.gmra.mxu1 %vm80_vm1, %v9321_v54  ;;  %11032 = vmatprep.mubr.msk.f32.mxu0 %vm12684_vm2, %v18082_v0  ;;  %v9424_v54 = vld [vmem:[%s18069_s0 + $0x3f8] sm:$0xff] }
  0x6c   :  { %11204 = vmatprep.mubr.msk.f32.mxu1 %vm12684_vm2, %v18082_v0  ;;  %11360 = vmatprep.subr.mxu1 %v18082_v0 }
  0x6d   :  { %11361 = vmatpush3.msra.mxu1 %v12776_v3 }
  0x6e   :  { %11033 = vmatmul.mubr.msk.f32.vlgmr.msra.gmra.mxu0 %vm80_vm1, %v9218_v55  ;;  %11362 = vmatprep.subr.mxu1 %v18082_v0 }
  0x6f   :  { %11205 = vmatmul.mubr.msk.f32.gmra.mxu1 %vm80_vm1, %v9322_v56  ;;  %11108 = vmatpush3.msk.msra.mxu0 %vm156_vm0, %v12760_v1 }
  0x70   :  { %11109 = vmatprep.subr.mxu0 %v18082_v0  ;;  %11035 = vmatprep.mubr.msk.f32.mxu0 %vm12684_vm2, %v18082_v0 }
  0x71   :  { %11110 = vmatpush3.msra.mxu0 %v12765_v2  ;;  %11207 = vmatprep.mubr.msk.f32.mxu1 %vm12684_vm2, %v18082_v0 }
  0x72   :  { %11036 = vmatmul.mubr.msk.f32.gmra.mxu0 %vm80_vm1, %v9219_v57  ;;  %11111 = vmatprep.subr.mxu0 %v18082_v0 }
  0x73   :  { %11208 = vmatmul.mubr.msk.f32.gmra.mxu1 %vm80_vm1, %v9323_v58  ;;  %11112 = vmatpush3.msra.mxu0 %v12776_v3  ;;  %v9293_v58 = vld [vmem:[%s18069_s0 + $0x250] sm:$0xff] }
  0x74   :  { %11113 = vmatprep.subr.mxu0 %v18082_v0  ;;  %11115 = vmatprep.mubr.msk.f32.mxu0 %vm12684_vm2, %v18082_v0 }
  0x75   :  { %11114 = vmatpush3.msra.mxu0 %v12785_v4  ;;  %11210 = vmatprep.mubr.msk.f32.mxu1 %vm12684_vm2, %v18082_v0 }
  0x76   :  { %11116 = vmatmul.mubr.msk.f32.vlgmr.msra.gmra.mxu0 %vm80_vm1, %v9269_v59  ;;  %11273 = vmatprep.subr.mxu0 %v18082_v0 }
  0x77   :  { %11211 = vmatmul.mubr.msk.f32.gmra.mxu1 %vm80_vm1, %v9324_v60  ;;  %11274 = vmatpush3.msk.msra.mxu0 %vm156_vm0, %v12760_v1  ;;  %v9425_v60 = vld [vmem:[%s18069_s0 + $0x400] sm:$0xff] }
  0x78   :  { %11118 = vmatprep.mubr.msk.f32.mxu0 %vm12684_vm2, %v18082_v0  ;;  %11213 = vmatprep.mubr.msk.f32.mxu1 %vm12684_vm2, %v18082_v0 }
  0x79   :  { %11275 = vmatprep.subr.mxu0 %v18082_v0  ;;  %11363 = vmatpush3.msra.mxu1 %v12785_v4 }
  0x7a   :  { %11119 = vmatmul.mubr.msk.f32.gmra.mxu0 %vm80_vm1, %v9270_v61  ;;  %11522 = vmatprep.subr.mxu1 %v18082_v0 }
  0x7b   :  { %11214 = vmatmul.mubr.msk.f32.gmra.mxu1 %vm80_vm1, %v9325_v62  ;;  %11121 = vmatprep.mubr.msk.f32.mxu0 %vm12684_vm2, %v18082_v0 }
  0x7c   :  { %11216 = vmatprep.mubr.msk.f32.mxu1 %vm12684_vm2, %v18082_v0  ;;  %11276 = vmatpush3.msra.mxu0 %v12765_v2 }
  0x7d   :  { %11277 = vmatprep.subr.mxu0 %v18082_v0 }
  0x7e   :  { %11122 = vmatmul.mubr.msk.f32.gmra.mxu0 %vm80_vm1, %v9271_v63 }
  0x7f   :  { %11217 = vmatmul.mubr.msk.f32.gmra.mxu1 %vm80_vm1, %v9326_v5  ;;  %11124 = vmatprep.mubr.msk.f32.mxu0 %vm12684_vm2, %v18082_v0  ;;  %v9371_v5 = vld [vmem:[%s18069_s0 + $0x320] sm:$0xff] }
  0x80   :  { %11219 = vmatprep.mubr.msk.f32.mxu1 %vm12684_vm2, %v18082_v0  ;;  %11278 = vmatpush3.msra.mxu0 %v12776_v3 }
  0x81   :  { %11279 = vmatprep.subr.mxu0 %v18082_v0 }
  0x82   :  { %11125 = vmatmul.mubr.msk.f32.gmra.mxu0 %vm80_vm1, %v9272_v6 }
  0x83   :  { %11220 = vmatmul.mubr.msk.f32.gmra.mxu1 %vm80_vm1, %v9327_v7  ;;  %11127 = vmatprep.mubr.msk.f32.mxu0 %vm12684_vm2, %v18082_v0  ;;  %v9426_v7 = vld [vmem:[%s18069_s0 + $0x408] sm:$0xff] }
  0x84   :  { %11222 = vmatprep.mubr.msk.f32.mxu1 %vm12684_vm2, %v18082_v0  ;;  %11280 = vmatpush3.msra.mxu0 %v12785_v4 }
  0x85   :  { %11439 = vmatprep.subr.mxu0 %v18082_v0 }
  0x86   :  { %11128 = vmatmul.mubr.msk.f32.gmra.mxu0 %vm80_vm1, %v9273_v8 }
  0x87   :  { %11223 = vmatmul.mubr.msk.f32.gmra.mxu1 %vm80_vm1, %v9328_v9  ;;  %11130 = vmatprep.mubr.msk.f32.mxu0 %vm12684_vm2, %v18082_v0 }
  0x88   :  { %11225 = vmatprep.mubr.msk.f32.mxu1 %vm12684_vm2, %v18082_v0 }
  0x8a   :  { %11131 = vmatmul.mubr.msk.f32.gmra.mxu0 %vm80_vm1, %v9274_v10 }
  0x8b   :  { %11226 = vmatmul.mubr.msk.f32.gmra.mxu1 %vm80_vm1, %v9329_v11  ;;  %11133 = vmatprep.mubr.msk.f32.mxu0 %vm12684_vm2, %v18082_v0  ;;  %v9372_v11 = vld [vmem:[%s18069_s0 + $0x328] sm:$0xff] }
  0x8c   :  { %11228 = vmatprep.mubr.msk.f32.mxu1 %vm12684_vm2, %v18082_v0 }
  0x8e   :  { %11134 = vmatmul.mubr.msk.f32.gmra.mxu0 %vm80_vm1, %v9275_v12 }
  0x8f   :  { %11229 = vmatmul.mubr.msk.f32.gmra.mxu1 %vm80_vm1, %v9330_v13  ;;  %11136 = vmatprep.mubr.msk.f32.mxu0 %vm12684_vm2, %v18082_v0  ;;  %v9427_v13 = vld [vmem:[%s18069_s0 + $0x410] sm:$0xff] }
  0x90   :  { %11231 = vmatprep.mubr.msk.f32.mxu1 %vm12684_vm2, %v18082_v0 }
  0x92   :  { %11137 = vmatmul.mubr.msk.f32.gmra.mxu0 %vm80_vm1, %v9276_v14 }
  0x93   :  { %11232 = vmatmul.mubr.msk.f32.gmra.mxu1 %vm80_vm1, %v9331_v15  ;;  %11139 = vmatprep.mubr.msk.f32.mxu0 %vm12684_vm2, %v18082_v0 }
  0x94   :  { %11234 = vmatprep.mubr.msk.f32.mxu1 %vm12684_vm2, %v18082_v0 }
  0x96   :  { %11140 = vmatmul.mubr.msk.f32.gmra.mxu0 %vm80_vm1, %v9277_v16  ;;  %v9373_v16 = vld [vmem:[%s18069_s0 + $0x330] sm:$0xff] }
  0x97   :  { %11235 = vmatmul.mubr.msk.f32.gmra.mxu1 %vm80_vm1, %v9332_v17  ;;  %11142 = vmatprep.mubr.msk.f32.mxu0 %vm12684_vm2, %v18082_v0 }
  0x98   :  { %11237 = vmatprep.mubr.msk.f32.mxu1 %vm12684_vm2, %v18082_v0 }
  0x9a   :  { %11143 = vmatmul.mubr.msk.f32.gmra.mxu0 %vm80_vm1, %v9278_v18  ;;  %v9428_v18 = vld [vmem:[%s18069_s0 + $0x418] sm:$0xff] }
  0x9b   :  { %11238 = vmatmul.mubr.msk.f32.gmra.mxu1 %vm80_vm1, %v9333_v19  ;;  %11145 = vmatprep.mubr.msk.f32.mxu0 %vm12684_vm2, %v18082_v0 }
  0x9c   :  { %11240 = vmatprep.mubr.msk.f32.mxu1 %vm12684_vm2, %v18082_v0 }
  0x9e   :  { %11146 = vmatmul.mubr.msk.f32.gmra.mxu0 %vm80_vm1, %v9279_v20 }
  0x9f   :  { %11241 = vmatmul.mubr.msk.f32.gmra.mxu1 %vm80_vm1, %v9334_v21  ;;  %11148 = vmatprep.mubr.msk.f32.mxu0 %vm12684_vm2, %v18082_v0 }
  0xa0   :  { %11243 = vmatprep.mubr.msk.f32.mxu1 %vm12684_vm2, %v18082_v0 }
  0xa2   :  { %11149 = vmatmul.mubr.msk.f32.gmra.mxu0 %vm80_vm1, %v9280_v22  ;;  %v9374_v22 = vld [vmem:[%s18069_s0 + $0x338] sm:$0xff] }
  0xa3   :  { %11244 = vmatmul.mubr.msk.f32.gmra.mxu1 %vm80_vm1, %v9335_v23  ;;  %11151 = vmatprep.mubr.msk.f32.mxu0 %vm12684_vm2, %v18082_v0 }
  0xa4   :  { %11246 = vmatprep.mubr.msk.f32.mxu1 %vm12684_vm2, %v18082_v0 }
  0xa6   :  { %11152 = vmatmul.mubr.msk.f32.gmra.mxu0 %vm80_vm1, %v9281_v24 }
  0xa7   :  { %11247 = vmatmul.mubr.msk.f32.gmra.mxu1 %vm80_vm1, %v9336_v25  ;;  %11154 = vmatprep.mubr.msk.f32.mxu0 %vm12684_vm2, %v18082_v0 }
  0xa8   :  { %11249 = vmatprep.mubr.msk.f32.mxu1 %vm12684_vm2, %v18082_v0 }
  0xaa   :  { %11155 = vmatmul.mubr.msk.f32.gmra.mxu0 %vm80_vm1, %v9282_v26 }
  0xab   :  { %11250 = vmatmul.mubr.msk.f32.gmra.mxu1 %vm80_vm1, %v9337_v27  ;;  %11157 = vmatprep.mubr.msk.f32.mxu0 %vm12684_vm2, %v18082_v0  ;;  %v9375_v27 = vld [vmem:[%s18069_s0 + $0x340] sm:$0xff] }
  0xac   :  { %11252 = vmatprep.mubr.msk.f32.mxu1 %vm12684_vm2, %v18082_v0 }
  0xae   :  { %11158 = vmatmul.mubr.msk.f32.gmra.mxu0 %vm80_vm1, %v9283_v28 }
  0xaf   :  { %11253 = vmatmul.mubr.msk.f32.gmra.mxu1 %vm80_vm1, %v9338_v29  ;;  %11160 = vmatprep.mubr.msk.f32.mxu0 %vm12684_vm2, %v18082_v0 }
  0xb0   :  { %11255 = vmatprep.mubr.msk.f32.mxu1 %vm12684_vm2, %v18082_v0 }
  0xb2   :  { %11161 = vmatmul.mubr.msk.f32.gmra.mxu0 %vm80_vm1, %v9284_v30 }
  0xb3   :  { %11256 = vmatmul.mubr.msk.f32.gmra.mxu1 %vm80_vm1, %v9339_v31  ;;  %11163 = vmatprep.mubr.msk.f32.mxu0 %vm12684_vm2, %v18082_v0 }
  0xb4   :  { %11258 = vmatprep.mubr.msk.f32.mxu1 %vm12684_vm2, %v18082_v0 }
  0xb6   :  { %11164 = vmatmul.mubr.msk.f32.gmra.mxu0 %vm80_vm1, %v9285_v32  ;;  %v9376_v32 = vld [vmem:[%s18069_s0 + $0x348] sm:$0xff] }
  0xb7   :  { %11259 = vmatmul.mubr.msk.f32.gmra.mxu1 %vm80_vm1, %v9340_v33  ;;  %11166 = vmatprep.mubr.msk.f32.mxu0 %vm12684_vm2, %v18082_v0 }
  0xb8   :  { %11261 = vmatprep.mubr.msk.f32.mxu1 %vm12684_vm2, %v18082_v0 }
  0xba   :  { %11167 = vmatmul.mubr.msk.f32.gmra.mxu0 %vm80_vm1, %v9286_v34 }
  0xbb   :  { %11262 = vmatmul.mubr.msk.f32.gmra.mxu1 %vm80_vm1, %v9341_v35  ;;  %11169 = vmatprep.mubr.msk.f32.mxu0 %vm12684_vm2, %v18082_v0 }
  0xbc   :  { %11264 = vmatprep.mubr.msk.f32.mxu1 %vm12684_vm2, %v18082_v0 }
  0xbe   :  { %11170 = vmatmul.mubr.msk.f32.gmra.mxu0 %vm80_vm1, %v9287_v36 }
  0xbf   :  { %11265 = vmatmul.mubr.msk.f32.gmra.mxu1 %vm80_vm1, %v9342_v37  ;;  %11172 = vmatprep.mubr.msk.f32.mxu0 %vm12684_vm2, %v18082_v0  ;;  %v9377_v37 = vld [vmem:[%s18069_s0 + $0x350] sm:$0xff] }
  0xc0   :  { %11267 = vmatprep.mubr.msk.f32.mxu1 %vm12684_vm2, %v18082_v0 }
  0xc2   :  { %11173 = vmatmul.mubr.msk.f32.gmra.mxu0 %vm80_vm1, %v9288_v38 }
  0xc3   :  { %11268 = vmatmul.mubr.msk.f32.gmra.mxu1 %vm80_vm1, %v9343_v39  ;;  %11175 = vmatprep.mubr.msk.f32.mxu0 %vm12684_vm2, %v18082_v0  ;;  %v9432_v39 = vld [vmem:[%s18069_s0 + $0x438] sm:$0xff] }
  0xc4   :  { %11270 = vmatprep.mubr.msk.f32.mxu1 %vm12684_vm2, %v18082_v0 }
  0xc6   :  { %11176 = vmatmul.mubr.msk.f32.gmra.mxu0 %vm80_vm1, %v9289_v40 }
  0xc7   :  { %11271 = vmatmul.mubr.msk.f32.gmra.mxu1 %vm80_vm1, %v9344_v41  ;;  %11178 = vmatprep.mubr.msk.f32.mxu0 %vm12684_vm2, %v18082_v0 }
  0xc8   :  { %11364 = vmatprep.mubr.msk.f32.mxu1 %vm12684_vm2, %v18082_v0 }
  0xca   :  { %v13426_v44 = vpop.f32.mrf.mxu0  ;;  %11179 = vmatmul.mubr.msk.f32.gmra.mxu0 %vm80_vm1, %v9290_v42 }
  0xcb   :  { %v13429_v45 = vpop.f32.mrf.mxu1  ;;  %11365 = vmatmul.mubr.msk.f32.vlgmr.msra.gmra.mxu1 %vm80_vm1, %v9422_v43  ;;  %11181 = vmatprep.mubr.msk.f32.mxu0 %vm12684_vm2, %v18082_v0  ;;  %v9378_v43 = vld [vmem:[%s18069_s0 + $0x358] sm:$0xff] }
  0xcc   :  { %v10951_v47 = vpop.f32.mrf.mxu0  ;;  %11367 = vmatprep.mubr.msk.f32.mxu1 %vm12684_vm2, %v18082_v0  ;;  %11523 = vmatpush3.msk.msra.mxu1 %vm156_vm0, %v12760_v1 }
  0xcd   :  { %v11040_v49 = vpop.f32.mrf.mxu1  ;;  %11524 = vmatprep.subr.mxu1 %v18082_v0  ;;  %v9433_v47 = vld [vmem:[%s18069_s0 + $0x440] sm:$0xff] }
  0xce   :  { %v13445_v50 = vpop.f32.mrf.mxu0  ;;  %11182 = vmatmul.mubr.msk.f32.gmra.mxu0 %vm80_vm1, %v9291_v46  ;;  %11525 = vmatpush3.msra.mxu1 %v12765_v2 }
  0xcf   :  { %v13449_v51 = vpop.f32.mrf.mxu1  ;;  %11368 = vmatmul.mubr.msk.f32.gmra.mxu1 %vm80_vm1, %v9423_v48  ;;  %11184 = vmatprep.mubr.msk.f32.mxu0 %vm12684_vm2, %v18082_v0 }
  0xd0   :  { %v10954_v53 = vpop.f32.mrf.mxu0  ;;  %11370 = vmatprep.mubr.msk.f32.mxu1 %vm12684_vm2, %v18082_v0  ;;  %11526 = vmatprep.subr.mxu1 %v18082_v0 }
  0xd1   :  { %v11043_v55 = vpop.f32.mrf.mxu1  ;;  %11527 = vmatpush3.msra.mxu1 %v12776_v3  ;;  %v9379_v53 = vld [vmem:[%s18069_s0 + $0x360] sm:$0xff] }
  0xd2   :  { %v13464_v56 = vpop.f32.mrf.mxu0  ;;  %11185 = vmatmul.mubr.msk.f32.gmra.mxu0 %vm80_vm1, %v9292_v52  ;;  %11528 = vmatprep.subr.mxu1 %v18082_v0  ;;  %v9434_v55 = vld [vmem:[%s18069_s0 + $0x448] sm:$0xff] }
  0xd3   :  { %v13468_v57 = vpop.f32.mrf.mxu1  ;;  %11371 = vmatmul.mubr.msk.f32.gmra.mxu1 %vm80_vm1, %v9424_v54  ;;  %11187 = vmatprep.mubr.msk.f32.mxu0 %vm12684_vm2, %v18082_v0 }
  0xd4   :  { %v10957_v59 = vpop.f32.mrf.mxu0  ;;  %11373 = vmatprep.mubr.msk.f32.mxu1 %vm12684_vm2, %v18082_v0  ;;  %11529 = vmatpush3.msra.mxu1 %v12785_v4 }
  0xd5   :  { %v11046_v61 = vpop.f32.mrf.mxu1  ;;  %11688 = vmatprep.subr.mxu1 %v18082_v0 }
  0xd6   :  { %v13483_v62 = vpop.f32.mrf.mxu0  ;;  %11188 = vmatmul.mubr.msk.f32.gmra.mxu0 %vm80_vm1, %v9293_v58  ;;  %v9380_v61 = vld [vmem:[%s18069_s0 + $0x368] sm:$0xff] }
  0xd7   :  { %v13486_v63 = vpop.f32.mrf.mxu1  ;;  %11374 = vmatmul.mubr.msk.f32.gmra.mxu1 %vm80_vm1, %v9425_v60  ;;  %11281 = vmatprep.mubr.msk.f32.mxu0 %vm12684_vm2, %v18082_v0 }
  0xd8   :  { %v10960_v6 = vpop.f32.mrf.mxu0  ;;  %11376 = vmatprep.mubr.msk.f32.mxu1 %vm12684_vm2, %v18082_v0 }
  0xd9   :  { %v11049_v8 = vpop.f32.mrf.mxu1  ;;  %v9435_v6 = vld [vmem:[%s18069_s0 + $0x450] sm:$0xff] }
  0xda   :  { %v13499_v9 = vpop.f32.mrf.mxu0  ;;  %11282 = vmatmul.mubr.msk.f32.vlgmr.msra.gmra.mxu0 %vm80_vm1, %v9371_v5 }
  0xdb   :  { %v13502_v10 = vpop.f32.mrf.mxu1  ;;  %11377 = vmatmul.mubr.msk.f32.gmra.mxu1 %vm80_vm1, %v9426_v7  ;;  %11440 = vmatpush3.msk.msra.mxu0 %vm156_vm0, %v12760_v1 }
  0xdc   :  { %v10963_v12 = vpop.f32.mrf.mxu0  ;;  %11284 = vmatprep.mubr.msk.f32.mxu0 %vm12684_vm2, %v18082_v0  ;;  %11379 = vmatprep.mubr.msk.f32.mxu1 %vm12684_vm2, %v18082_v0 }
  0xdd   :  { %v11052_v14 = vpop.f32.mrf.mxu1  ;;  %11441 = vmatprep.subr.mxu0 %v18082_v0  ;;  %v9381_v12 = vld [vmem:[%s18069_s0 + $0x370] sm:$0xff] }
  0xde   :  { %v13518_v15 = vpop.f32.mrf.mxu0  ;;  %11285 = vmatmul.mubr.msk.f32.gmra.mxu0 %vm80_vm1, %v9372_v11  ;;  %v9436_v14 = vld [vmem:[%s18069_s0 + $0x458] sm:$0xff] }
  0xdf   :  { %v13521_v1 = vpop.f32.mrf.mxu1  ;;  %11380 = vmatmul.mubr.msk.f32.gmra.mxu1 %vm80_vm1, %v9427_v13  ;;  %11287 = vmatprep.mubr.msk.f32.mxu0 %vm12684_vm2, %v18082_v0 }
  0xe0   :  { %v10966_v17 = vpop.f32.mrf.mxu0  ;;  %11382 = vmatprep.mubr.msk.f32.mxu1 %vm12684_vm2, %v18082_v0  ;;  %11442 = vmatpush3.msra.mxu0 %v12765_v2  ;;  %v9429_v2 = vld [vmem:[%s18069_s0 + $0x420] sm:$0xff] }
  0xe1   :  { %v11055_v19 = vpop.f32.mrf.mxu1  ;;  %11443 = vmatprep.subr.mxu0 %v18082_v0 }
  0xe2   :  { %v13536_v20 = vpop.f32.mrf.mxu0  ;;  %11288 = vmatmul.mubr.msk.f32.gmra.mxu0 %vm80_vm1, %v9373_v16  ;;  %v9382_v19 = vld [vmem:[%s18069_s0 + $0x378] sm:$0xff] }
  0xe3   :  { %v13539_v21 = vpop.f32.mrf.mxu1  ;;  %11383 = vmatmul.mubr.msk.f32.gmra.mxu1 %vm80_vm1, %v9428_v18  ;;  %11290 = vmatprep.mubr.msk.f32.mxu0 %vm12684_vm2, %v18082_v0 }
  0xe4   :  { %v10969_v23 = vpop.f32.mrf.mxu0  ;;  %11385 = vmatprep.mubr.msk.f32.mxu1 %vm12684_vm2, %v18082_v0  ;;  %11444 = vmatpush3.msra.mxu0 %v12776_v3  ;;  %v9430_v3 = vld [vmem:[%s18069_s0 + $0x428] sm:$0xff] }
  0xe5   :  { %v11058_v24 = vpop.f32.mrf.mxu1  ;;  %11445 = vmatprep.subr.mxu0 %v18082_v0  ;;  %v9437_v23 = vld [vmem:[%s18069_s0 + $0x460] sm:$0xff] }
  0xe6   :  { %v13554_v25 = vpop.f32.mrf.mxu0  ;;  %11291 = vmatmul.mubr.msk.f32.gmra.mxu0 %vm80_vm1, %v9374_v22 }
  0xe7   :  { %v13557_v26 = vpop.f32.mrf.mxu1  ;;  %11386 = vmatmul.mubr.msk.f32.gmra.mxu1 %vm80_vm1, %v9429_v2  ;;  %11293 = vmatprep.mubr.msk.f32.mxu0 %vm12684_vm2, %v18082_v0 }
  0xe8   :  { %v10972_v28 = vpop.f32.mrf.mxu0  ;;  %11388 = vmatprep.mubr.msk.f32.mxu1 %vm12684_vm2, %v18082_v0  ;;  %11446 = vmatpush3.msra.mxu0 %v12785_v4  ;;  %v9431_v4 = vld [vmem:[%s18069_s0 + $0x430] sm:$0xff] }
  0xe9   :  { %v11061_v29 = vpop.f32.mrf.mxu1  ;;  %11605 = vmatprep.subr.mxu0 %v18082_v0  ;;  %v9383_v28 = vld [vmem:[%s18069_s0 + $0x380] sm:$0xff] }
  0xea   :  { %v13572_v30 = vpop.f32.mrf.mxu0  ;;  %11294 = vmatmul.mubr.msk.f32.gmra.mxu0 %vm80_vm1, %v9375_v27  ;;  %v9438_v29 = vld [vmem:[%s18069_s0 + $0x468] sm:$0xff] }
  0xeb   :  { %v13575_v31 = vpop.f32.mrf.mxu1  ;;  %11389 = vmatmul.mubr.msk.f32.gmra.mxu1 %vm80_vm1, %v9430_v3  ;;  %11296 = vmatprep.mubr.msk.f32.mxu0 %vm12684_vm2, %v18082_v0 }
  0xec   :  { %v10975_v33 = vpop.f32.mrf.mxu0  ;;  %11391 = vmatprep.mubr.msk.f32.mxu1 %vm12684_vm2, %v18082_v0 }
  0xed   :  { %v11064_v34 = vpop.f32.mrf.mxu1 }
  0xee   :  { %v13588_v35 = vpop.f32.mrf.mxu0  ;;  %11297 = vmatmul.mubr.msk.f32.gmra.mxu0 %vm80_vm1, %v9376_v32  ;;  %v9384_v34 = vld [vmem:[%s18069_s0 + $0x388] sm:$0xff] }
  0xef   :  { %v13591_v36 = vpop.f32.mrf.mxu1  ;;  %11392 = vmatmul.mubr.msk.f32.gmra.mxu1 %vm80_vm1, %v9431_v4  ;;  %11299 = vmatprep.mubr.msk.f32.mxu0 %vm12684_vm2, %v18082_v0 }
  0xf0   :  { %v10978_v38 = vpop.f32.mrf.mxu0  ;;  %11394 = vmatprep.mubr.msk.f32.mxu1 %vm12684_vm2, %v18082_v0 }
  0xf1   :  { %v11067_v40 = vpop.f32.mrf.mxu1  ;;  %v9439_v38 = vld [vmem:[%s18069_s0 + $0x470] sm:$0xff] }
  0xf2   :  { %v13604_v41 = vpop.f32.mrf.mxu0  ;;  %11300 = vmatmul.mubr.msk.f32.gmra.mxu0 %vm80_vm1, %v9377_v37 }
  0xf3   :  { %v13607_v42 = vpop.f32.mrf.mxu1  ;;  %11395 = vmatmul.mubr.msk.f32.gmra.mxu1 %vm80_vm1, %v9432_v39  ;;  %11302 = vmatprep.mubr.msk.f32.mxu0 %vm12684_vm2, %v18082_v0 }
  0xf4   :  { %v10981_v46 = vpop.f32.mrf.mxu0  ;;  %11397 = vmatprep.mubr.msk.f32.mxu1 %vm12684_vm2, %v18082_v0 }
  0xf5   :  { %v11070_v48 = vpop.f32.mrf.mxu1  ;;  %v9385_v46 = vld [vmem:[%s18069_s0 + $0x390] sm:$0xff] }
  0xf6   :  { %v13620_v49 = vpop.f32.mrf.mxu0  ;;  %11303 = vmatmul.mubr.msk.f32.gmra.mxu0 %vm80_vm1, %v9378_v43  ;;  %v9440_v48 = vld [vmem:[%s18069_s0 + $0x478] sm:$0xff] }
  0xf7   :  { %v13623_v52 = vpop.f32.mrf.mxu1  ;;  %11398 = vmatmul.mubr.msk.f32.gmra.mxu1 %vm80_vm1, %v9433_v47  ;;  %11305 = vmatprep.mubr.msk.f32.mxu0 %vm12684_vm2, %v18082_v0 }
  0xf8   :  { %v10984_v54 = vpop.f32.mrf.mxu0  ;;  %11400 = vmatprep.mubr.msk.f32.mxu1 %vm12684_vm2, %v18082_v0 }
  0xf9   :  { %v11073_v58 = vpop.f32.mrf.mxu1 }
  0xfa   :  { %v13636_v59 = vpop.f32.mrf.mxu0  ;;  %11306 = vmatmul.mubr.msk.f32.gmra.mxu0 %vm80_vm1, %v9379_v53  ;;  %v9386_v58 = vld [vmem:[%s18069_s0 + $0x398] sm:$0xff] }
  0xfb   :  { %v13639_v60 = vpop.f32.mrf.mxu1  ;;  %11401 = vmatmul.mubr.msk.f32.gmra.mxu1 %vm80_vm1, %v9434_v55  ;;  %11308 = vmatprep.mubr.msk.f32.mxu0 %vm12684_vm2, %v18082_v0 }
  0xfc   :  { %v10987_v5 = vpop.f32.mrf.mxu0  ;;  %11403 = vmatprep.mubr.msk.f32.mxu1 %vm12684_vm2, %v18082_v0 }
  0xfd   :  { %v11076_v7 = vpop.f32.mrf.mxu1  ;;  %v9441_v5 = vld [vmem:[%s18069_s0 + $0x480] sm:$0xff] }
  0xfe   :  { %v13652_v8 = vpop.f32.mrf.mxu0  ;;  %11309 = vmatmul.mubr.msk.f32.gmra.mxu0 %vm80_vm1, %v9380_v61 }
  0xff   :  { %v13655_v11 = vpop.f32.mrf.mxu1  ;;  %11404 = vmatmul.mubr.msk.f32.gmra.mxu1 %vm80_vm1, %v9435_v6  ;;  %11311 = vmatprep.mubr.msk.f32.mxu0 %vm12684_vm2, %v18082_v0 }
 0x100   :  { %v10990_v13 = vpop.f32.mrf.mxu0  ;;  %11406 = vmatprep.mubr.msk.f32.mxu1 %vm12684_vm2, %v18082_v0 }
 0x101   :  { %v11079_v16 = vpop.f32.mrf.mxu1  ;;  %v9387_v13 = vld [vmem:[%s18069_s0 + $0x3a0] sm:$0xff] }
 0x102   :  { %v13668_v17 = vpop.f32.mrf.mxu0  ;;  %11312 = vmatmul.mubr.msk.f32.gmra.mxu0 %vm80_vm1, %v9381_v12  ;;  %v9442_v16 = vld [vmem:[%s18069_s0 + $0x488] sm:$0xff] }
 0x103   :  { %v13671_v18 = vpop.f32.mrf.mxu1  ;;  %11407 = vmatmul.mubr.msk.f32.gmra.mxu1 %vm80_vm1, %v9436_v14  ;;  %11314 = vmatprep.mubr.msk.f32.mxu0 %vm12684_vm2, %v18082_v0 }
 0x104   :  { %v10993_v22 = vpop.f32.mrf.mxu0  ;;  %11409 = vmatprep.mubr.msk.f32.mxu1 %vm12684_vm2, %v18082_v0 }
 0x105   :  { %v11082_v2 = vpop.f32.mrf.mxu1 }
 0x106   :  { %v13684_v24 = vpop.f32.mrf.mxu0  ;;  %11315 = vmatmul.mubr.msk.f32.gmra.mxu0 %vm80_vm1, %v9382_v19  ;;  %v9388_v2 = vld [vmem:[%s18069_s0 + $0x3a8] sm:$0xff] }
 0x107   :  { %v13687_v27 = vpop.f32.mrf.mxu1  ;;  %11410 = vmatmul.mubr.msk.f32.gmra.mxu1 %vm80_vm1, %v9437_v23  ;;  %11317 = vmatprep.mubr.msk.f32.mxu0 %vm12684_vm2, %v18082_v0 }
 0x108   :  { %v10996_v3 = vpop.f32.mrf.mxu0  ;;  %11412 = vmatprep.mubr.msk.f32.mxu1 %vm12684_vm2, %v18082_v0 }
 0x109   :  { %v11085_v32 = vpop.f32.mrf.mxu1  ;;  %v9443_v3 = vld [vmem:[%s18069_s0 + $0x490] sm:$0xff] }
 0x10a   :  { %v13700_v33 = vpop.f32.mrf.mxu0  ;;  %11318 = vmatmul.mubr.msk.f32.gmra.mxu0 %vm80_vm1, %v9383_v28 }
 0x10b   :  { %v13703_v4 = vpop.f32.mrf.mxu1  ;;  %11413 = vmatmul.mubr.msk.f32.gmra.mxu1 %vm80_vm1, %v9438_v29  ;;  %11320 = vmatprep.mubr.msk.f32.mxu0 %vm12684_vm2, %v18082_v0 }
 0x10c   :  { %v10999_v37 = vpop.f32.mrf.mxu0  ;;  %11415 = vmatprep.mubr.msk.f32.mxu1 %vm12684_vm2, %v18082_v0 }
 0x10d   :  { %v11088_v39 = vpop.f32.mrf.mxu1  ;;  %v9389_v37 = vld [vmem:[%s18069_s0 + $0x3b0] sm:$0xff] }
 0x10e   :  { %v13716_v40 = vpop.f32.mrf.mxu0  ;;  %11321 = vmatmul.mubr.msk.f32.gmra.mxu0 %vm80_vm1, %v9384_v34  ;;  %v9444_v39 = vld [vmem:[%s18069_s0 + $0x498] sm:$0xff] }
 0x10f   :  { %v13719_v43 = vpop.f32.mrf.mxu1  ;;  %11416 = vmatmul.mubr.msk.f32.gmra.mxu1 %vm80_vm1, %v9439_v38  ;;  %11323 = vmatprep.mubr.msk.f32.mxu0 %vm12684_vm2, %v18082_v0 }
 0x110   :  { %v11002_v47 = vpop.f32.mrf.mxu0  ;;  %11418 = vmatprep.mubr.msk.f32.mxu1 %vm12684_vm2, %v18082_v0 }
 0x111   :  { %v11091_v53 = vpop.f32.mrf.mxu1 }
 0x112   :  { %v13732_v54 = vpop.f32.mrf.mxu0  ;;  %11324 = vmatmul.mubr.msk.f32.gmra.mxu0 %vm80_vm1, %v9385_v46  ;;  %v9390_v53 = vld [vmem:[%s18069_s0 + $0x3b8] sm:$0xff] }
 0x113   :  { %v13735_v55 = vpop.f32.mrf.mxu1  ;;  %11419 = vmatmul.mubr.msk.f32.gmra.mxu1 %vm80_vm1, %v9440_v48  ;;  %11326 = vmatprep.mubr.msk.f32.mxu0 %vm12684_vm2, %v18082_v0 }
 0x114   :  { %v11005_v61 = vpop.f32.mrf.mxu0  ;;  %11421 = vmatprep.mubr.msk.f32.mxu1 %vm12684_vm2, %v18082_v0 }
 0x115   :  { %v11094_v6 = vpop.f32.mrf.mxu1  ;;  %v9445_v61 = vld [vmem:[%s18069_s0 + $0x4a0] sm:$0xff] }
 0x116   :  { %v13748_v7 = vpop.f32.mrf.mxu0  ;;  %11327 = vmatmul.mubr.msk.f32.gmra.mxu0 %vm80_vm1, %v9386_v58 }
 0x117   :  { %v13751_v12 = vpop.f32.mrf.mxu1  ;;  %11422 = vmatmul.mubr.msk.f32.gmra.mxu1 %vm80_vm1, %v9441_v5  ;;  %11329 = vmatprep.mubr.msk.f32.mxu0 %vm12684_vm2, %v18082_v0 }
 0x118   :  { %v11008_v14 = vpop.f32.mrf.mxu0  ;;  %11424 = vmatprep.mubr.msk.f32.mxu1 %vm12684_vm2, %v18082_v0 }
 0x119   :  { %v11097_v19 = vpop.f32.mrf.mxu1  ;;  %v9391_v14 = vld [vmem:[%s18069_s0 + $0x3c0] sm:$0xff] }
 0x11a   :  { %v13764_v22 = vpop.f32.mrf.mxu0  ;;  %11330 = vmatmul.mubr.msk.f32.gmra.mxu0 %vm80_vm1, %v9387_v13  ;;  %v9446_v19 = vld [vmem:[%s18069_s0 + $0x4a8] sm:$0xff] }
 0x11b   :  { %v13767_v23 = vpop.f32.mrf.mxu1  ;;  %11425 = vmatmul.mubr.msk.f32.gmra.mxu1 %vm80_vm1, %v9442_v16  ;;  %11332 = vmatprep.mubr.msk.f32.mxu0 %vm12684_vm2, %v18082_v0 }
 0x11c   :  { %v11011_v28 = vpop.f32.mrf.mxu0  ;;  %11427 = vmatprep.mubr.msk.f32.mxu1 %vm12684_vm2, %v18082_v0 }
 0x11d   :  { %v11100_v29 = vpop.f32.mrf.mxu1 }
 0x11e   :  { %v13780_v32 = vpop.f32.mrf.mxu0  ;;  %11333 = vmatmul.mubr.msk.f32.gmra.mxu0 %vm80_vm1, %v9388_v2  ;;  %v9392_v29 = vld [vmem:[%s18069_s0 + $0x3c8] sm:$0xff] }
 0x11f   :  { %18084 = vst [vmem:[#allocation2_spill] sm:$0xff] %v13780_v32  ;;  %v13783_v34 = vpop.f32.mrf.mxu1  ;;  %11428 = vmatmul.mubr.msk.f32.gmra.mxu1 %vm80_vm1, %v9443_v3  ;;  %11335 = vmatprep.mubr.msk.f32.mxu0 %vm12684_vm2, %v18082_v0 }
 0x120   :  { %v11014_v38 = vpop.f32.mrf.mxu0  ;;  %11430 = vmatprep.mubr.msk.f32.mxu1 %vm12684_vm2, %v18082_v0 }
 0x121   :  { %v11103_v46 = vpop.f32.mrf.mxu1  ;;  %v9524_v38 = vld [vmem:[%s18069_s0 + $0x578] sm:$0xff] }
 0x122   :  { %v13796_v47 = vpop.f32.mrf.mxu0  ;;  %11336 = vmatmul.mubr.msk.f32.gmra.mxu0 %vm80_vm1, %v9389_v37 }
 0x123   :  { %18085 = vst [vmem:[#allocation3_spill] sm:$0xff] %v13796_v47  ;;  %v13799_v48 = vpop.f32.mrf.mxu1  ;;  %11431 = vmatmul.mubr.msk.f32.gmra.mxu1 %vm80_vm1, %v9444_v39  ;;  %11338 = vmatprep.mubr.msk.f32.mxu0 %vm12684_vm2, %v18082_v0 }
 0x124   :  { %v11017_v58 = vpop.f32.mrf.mxu0  ;;  %11433 = vmatprep.mubr.msk.f32.mxu1 %vm12684_vm2, %v18082_v0 }
 0x125   :  { %v11106_v5 = vpop.f32.mrf.mxu1  ;;  %v9393_v58 = vld [vmem:[%s18069_s0 + $0x3d0] sm:$0xff] }
 0x126   :  { %v13812_v6 = vpop.f32.mrf.mxu0  ;;  %11339 = vmatmul.mubr.msk.f32.gmra.mxu0 %vm80_vm1, %v9390_v53  ;;  %v9525_v5 = vld [vmem:[%s18069_s0 + $0x580] sm:$0xff] }
 0x127   :  { %18086 = vst [vmem:[#allocation4_spill] sm:$0xff] %v13812_v6  ;;  %v13815_v13 = vpop.f32.mrf.mxu1  ;;  %11434 = vmatmul.mubr.msk.f32.gmra.mxu1 %vm80_vm1, %v9445_v61  ;;  %11341 = vmatprep.mubr.msk.f32.mxu0 %vm12684_vm2, %v18082_v0 }
 0x128   :  { %18087 = vst [vmem:[#allocation5_spill] sm:$0xff] %v13815_v13  ;;  %v11020_v16 = vpop.f32.mrf.mxu0  ;;  %11436 = vmatprep.mubr.msk.f32.mxu1 %vm12684_vm2, %v18082_v0 }
 0x129   :  { %v11200_v2 = vpop.f32.mrf.mxu1 }
 0x12a   :  { %v13828_v28 = vpop.f32.mrf.mxu0  ;;  %11342 = vmatmul.mubr.msk.f32.gmra.mxu0 %vm80_vm1, %v9391_v14  ;;  %v13863_v14 = vld [vmem:[%s18068_s1 + $0x18] sm:$0x1]  ;;  %v13874_v2 = vld [vmem:[%s18068_s1 + $0x10] sm:$0xff] }
 0x12b   :  { %18088 = vst [vmem:[#allocation6_spill] sm:$0xff] %v13828_v28  ;;  %v13831_v3 = vpop.f32.mrf.mxu1  ;;  %11437 = vmatmul.mubr.msk.f32.gmra.mxu1 %vm80_vm1, %v9446_v19  ;;  %11344 = vmatprep.mubr.msk.f32.mxu0 %vm12684_vm2, %v18082_v0 }
 0x12c   :  { %18089 = vst [vmem:[#allocation7_spill] sm:$0xff] %v13831_v3  ;;  %v11023_v37 = vpop.f32.mrf.mxu0  ;;  %11530 = vmatprep.mubr.msk.f32.mxu1 %vm12684_vm2, %v18082_v0 }
 0x12d   :  { %v11203_v39 = vpop.f32.mrf.mxu1  ;;  %v9394_v37 = vld [vmem:[%s18069_s0 + $0x3d8] sm:$0xff] }
 0x12e   :  { %v13844_v46 = vpop.f32.mrf.mxu0  ;;  %11345 = vmatmul.mubr.msk.f32.gmra.mxu0 %vm80_vm1, %v9392_v29  ;;  %v9526_v39 = vld [vmem:[%s18069_s0 + $0x588] sm:$0xff] }
 0x12f   :  { %v13847_v53 = vpop.f32.mrf.mxu1  ;;  %11531 = vmatmul.mubr.msk.f32.vlgmr.msra.gmra.mxu1 %vm80_vm1, %v9524_v38  ;;  %11347 = vmatprep.mubr.msk.f32.mxu0 %vm12684_vm2, %v18082_v0 }
 0x130   :  { %18090 = vst [vmem:[#allocation8_spill] sm:$0xff] %v13847_v53  ;;  %v11034_v61 = vpop.f32.mrf.mxu0  ;;  %11533 = vmatprep.mubr.msk.f32.mxu1 %vm12684_vm2, %v18082_v0  ;;  %11689 = vmatpush3.msk.msra.mxu1 %vm156_vm0, %v13863_v14  ;;  %v9493_v53 = vld [vmem:[%s18069_s0 + $0x550] sm:$0xff] }
 0x131   :  { %v11206_v16 = vpop.f32.mrf.mxu1  ;;  %11690 = vmatprep.subr.mxu1 %v18082_v0  ;;  %v13894_v61 = vld [vmem:[%s18068_s1 + $0x8] sm:$0xff] }
 0x132   :  { %v13868_v19 = vpop.f32.mrf.mxu0  ;;  %11348 = vmatmul.mubr.msk.f32.gmra.mxu0 %vm80_vm1, %v9393_v58  ;;  %11691 = vmatpush3.msra.mxu1 %v13874_v2 }
 0x133   :  { %v13877_v29 = vpop.f32.mrf.mxu1  ;;  %11534 = vmatmul.mubr.msk.f32.gmra.mxu1 %vm80_vm1, %v9525_v5  ;;  %11350 = vmatprep.mubr.msk.f32.mxu0 %vm12684_vm2, %v18082_v0 }
 0x134   :  { %18091 = vst [vmem:[#allocation9_spill] sm:$0xff] %v13877_v29  ;;  %v11037_v38 = vpop.f32.mrf.mxu0  ;;  %11536 = vmatprep.mubr.msk.f32.mxu1 %vm12684_vm2, %v18082_v0  ;;  %11692 = vmatprep.subr.mxu1 %v18082_v0  ;;  %v9473_v29 = vld [vmem:[%s18069_s0 + $0x4b0] sm:$0xff] }
 0x135   :  { %v11209_v58 = vpop.f32.mrf.mxu1  ;;  %11693 = vmatpush3.msra.mxu1 %v13894_v61  ;;  %v9395_v38 = vld [vmem:[%s18069_s0 + $0x3e0] sm:$0xff] }
 0x136   :  { %v13897_v5 = vpop.f32.mrf.mxu0  ;;  %11351 = vmatmul.mubr.msk.f32.gmra.mxu0 %vm80_vm1, %v9394_v37  ;;  %11694 = vmatprep.subr.mxu1 %v18082_v0  ;;  %v9527_v37 = vld [vmem:[%s18069_s0 + $0x590] sm:$0xff] }
 0x137   :  { %18092 = vst [vmem:[#allocation10_spill] sm:$0xff] %v13897_v5  ;;  %v13901_v16 = vpop.f32.mrf.mxu1  ;;  %11537 = vmatmul.mubr.msk.f32.gmra.mxu1 %vm80_vm1, %v9526_v39  ;;  %11353 = vmatprep.mubr.msk.f32.mxu0 %vm12684_vm2, %v18082_v0 }
 0x138   :  { %18093 = vst [vmem:[#allocation11_spill] sm:$0xff] %v13901_v16  ;;  %v11117_v58 = vpop.f32.mrf.mxu0  ;;  %11539 = vmatprep.mubr.msk.f32.mxu1 %vm12684_vm2, %v18082_v0  ;;  %v13917_v16 = vld [vmem:[%s18068_s1] sm:$0xff] }
 0x139   :  { %11695 = vmatpush3.msra.mxu1 %v13917_v16  ;;  %v11212_v39 = vpop.f32.mrf.mxu1 }
 0x13a   :  { %11854 = vmatprep.subr.mxu1 %v18082_v0  ;;  %v13921_v5 = vpop.f32.mrf.mxu0  ;;  %11354 = vmatmul.mubr.msk.f32.gmra.mxu0 %vm80_vm1, %v9395_v38  ;;  %v9528_v39 = vld [vmem:[%s18069_s0 + $0x598] sm:$0xff] }
 0x13b   :  { %18094 = vst [vmem:[#allocation12_spill] sm:$0xff] %v13921_v5  ;;  %v13924_v58 = vpop.f32.mrf.mxu1  ;;  %11540 = vmatmul.mubr.msk.f32.gmra.mxu1 %vm80_vm1, %v9527_v37  ;;  %11447 = vmatprep.mubr.msk.f32.mxu0 %vm12684_vm2, %v18082_v0 }
 0x13c   :  { %18095 = vst [vmem:[#allocation13_spill] sm:$0xff] %v13924_v58  ;;  %v11120_v28 = vpop.f32.mrf.mxu0  ;;  %11542 = vmatprep.mubr.msk.f32.mxu1 %vm12684_vm2, %v18082_v0  ;;  %v18098_v58 = vmov 0.0  }
 0x13d   :  { %v11215_v38 = vpop.f32.mrf.mxu1  ;;  %v9474_v28 = vld [vmem:[%s18069_s0 + $0x4b8] sm:$0xff] }
 0x13e   :  { %v13937_v5 = vpop.f32.mrf.mxu0  ;;  %11448 = vmatmul.mubr.msk.f32.vlgmr.msra.gmra.mxu0 %vm80_vm1, %v9473_v29  ;;  %v9529_v29 = vld [vmem:[%s18069_s0 + $0x5a0] sm:$0xff] }
 0x13f   :  { %18096 = vst [vmem:[#allocation14_spill] sm:$0xff] %v13937_v5  ;;  %v13940_v37 = vpop.f32.mrf.mxu1  ;;  %11543 = vmatmul.mubr.msk.f32.gmra.mxu1 %vm80_vm1, %v9528_v39  ;;  %11606 = vmatpush3.msk.msra.mxu0 %vm156_vm0, %v13863_v14 }
 0x140   :  { %18097 = vst [vmem:[#allocation15_spill] sm:$0xff] %v13940_v37  ;;  %v11123_v0 = vpop.f32.mrf.mxu0  ;;  %11450 = vmatprep.mubr.msk.f32.mxu0 %vm12684_vm2, %v18098_v58  ;;  %11545 = vmatprep.mubr.msk.f32.mxu1 %vm12684_vm2, %v18098_v58 }
 0x141   :  { %v11218_v38 = vpop.f32.mrf.mxu1  ;;  %11607 = vmatprep.subr.mxu0 %v18098_v58  ;;  %v9475_v0 = vld [vmem:[%s18069_s0 + $0x4c0] sm:$0xff] }
 0x142   :  { %v13956_v39 = vpop.f32.mrf.mxu0  ;;  %11451 = vmatmul.mubr.msk.f32.gmra.mxu0 %vm80_vm1, %v9474_v28  ;;  %v9530_v38 = vld [vmem:[%s18069_s0 + $0x5a8] sm:$0xff] }
 0x143   :  { %18099 = vst [vmem:[#allocation16_spill] sm:$0xff] %v13956_v39  ;;  %v13959_v37 = vpop.f32.mrf.mxu1  ;;  %11546 = vmatmul.mubr.msk.f32.gmra.mxu1 %vm80_vm1, %v9529_v29  ;;  %11453 = vmatprep.mubr.msk.f32.mxu0 %vm12684_vm2, %v18098_v58 }
 0x144   :  { %18100 = vst [vmem:[#allocation17_spill] sm:$0xff] %v13959_v37  ;;  %v11126_v5 = vpop.f32.mrf.mxu0  ;;  %11548 = vmatprep.mubr.msk.f32.mxu1 %vm12684_vm2, %v18098_v58  ;;  %11608 = vmatpush3.msra.mxu0 %v13874_v2 }
 0x145   :  { %v11221_v28 = vpop.f32.mrf.mxu1  ;;  %11609 = vmatprep.subr.mxu0 %v18098_v58  ;;  %v9476_v5 = vld [vmem:[%s18069_s0 + $0x4c8] sm:$0xff] }
 0x146   :  { %v13974_v29 = vpop.f32.mrf.mxu0  ;;  %11454 = vmatmul.mubr.msk.f32.gmra.mxu0 %vm80_vm1, %v9475_v0  ;;  %v9531_v28 = vld [vmem:[%s18069_s0 + $0x5b0] sm:$0xff] }
 0x147   :  { %18101 = vst [vmem:[#allocation18_spill] sm:$0xff] %v13974_v29  ;;  %v13977_v37 = vpop.f32.mrf.mxu1  ;;  %11549 = vmatmul.mubr.msk.f32.gmra.mxu1 %vm80_vm1, %v9530_v38  ;;  %11456 = vmatprep.mubr.msk.f32.mxu0 %vm12684_vm2, %v18098_v58 }
 0x148   :  { %18102 = vst [vmem:[#allocation19_spill] sm:$0xff] %v13977_v37  ;;  %v11129_v39 = vpop.f32.mrf.mxu0  ;;  %11551 = vmatprep.mubr.msk.f32.mxu1 %vm12684_vm2, %v18098_v58  ;;  %11610 = vmatpush3.msra.mxu0 %v13894_v61 }
 0x149   :  { %v11224_v0 = vpop.f32.mrf.mxu1  ;;  %11611 = vmatprep.subr.mxu0 %v18098_v58  ;;  %v9477_v39 = vld [vmem:[%s18069_s0 + $0x4d0] sm:$0xff] }
 0x14a   :  { %v13992_v38 = vpop.f32.mrf.mxu0  ;;  %11457 = vmatmul.mubr.msk.f32.gmra.mxu0 %vm80_vm1, %v9476_v5  ;;  %v9532_v0 = vld [vmem:[%s18069_s0 + $0x5b8] sm:$0xff] }
 0x14b   :  { %18103 = vst [vmem:[#allocation20_spill] sm:$0xff] %v13992_v38  ;;  %v13995_v37 = vpop.f32.mrf.mxu1  ;;  %11552 = vmatmul.mubr.msk.f32.gmra.mxu1 %vm80_vm1, %v9531_v28  ;;  %11459 = vmatprep.mubr.msk.f32.mxu0 %vm12684_vm2, %v18098_v58 }
 0x14c   :  { %18104 = vst [vmem:[#allocation21_spill] sm:$0xff] %v13995_v37  ;;  %v11132_v29 = vpop.f32.mrf.mxu0  ;;  %11554 = vmatprep.mubr.msk.f32.mxu1 %vm12684_vm2, %v18098_v58  ;;  %11612 = vmatpush3.msra.mxu0 %v13917_v16 }
 0x14d   :  { %v11227_v5 = vpop.f32.mrf.mxu1  ;;  %11771 = vmatprep.subr.mxu0 %v18098_v58  ;;  %v9478_v29 = vld [vmem:[%s18069_s0 + $0x4d8] sm:$0xff] }
 0x14e   :  { %v14010_v28 = vpop.f32.mrf.mxu0  ;;  %11460 = vmatmul.mubr.msk.f32.gmra.mxu0 %vm80_vm1, %v9477_v39  ;;  %v9533_v5 = vld [vmem:[%s18069_s0 + $0x5c0] sm:$0xff] }
 0x14f   :  { %18105 = vst [vmem:[#allocation22_spill] sm:$0xff] %v14010_v28  ;;  %v14013_v37 = vpop.f32.mrf.mxu1  ;;  %11555 = vmatmul.mubr.msk.f32.gmra.mxu1 %vm80_vm1, %v9532_v0  ;;  %11462 = vmatprep.mubr.msk.f32.mxu0 %vm12684_vm2, %v18098_v58 }
 0x150   :  { %18106 = vst [vmem:[#allocation23_spill] sm:$0xff] %v14013_v37  ;;  %v11135_v38 = vpop.f32.mrf.mxu0  ;;  %11557 = vmatprep.mubr.msk.f32.mxu1 %vm12684_vm2, %v18098_v58 }
 0x151   :  { %v11230_v39 = vpop.f32.mrf.mxu1  ;;  %v9479_v38 = vld [vmem:[%s18069_s0 + $0x4e0] sm:$0xff] }
 0x152   :  { %v14026_v28 = vpop.f32.mrf.mxu0  ;;  %11463 = vmatmul.mubr.msk.f32.gmra.mxu0 %vm80_vm1, %v9478_v29  ;;  %v9534_v39 = vld [vmem:[%s18069_s0 + $0x5c8] sm:$0xff] }
 0x153   :  { %18107 = vst [vmem:[#allocation24_spill] sm:$0xff] %v14026_v28  ;;  %v14029_v0 = vpop.f32.mrf.mxu1  ;;  %11558 = vmatmul.mubr.msk.f32.gmra.mxu1 %vm80_vm1, %v9533_v5  ;;  %11465 = vmatprep.mubr.msk.f32.mxu0 %vm12684_vm2, %v18098_v58 }
 0x154   :  { %18108 = vst [vmem:[#allocation25_spill] sm:$0xff] %v14029_v0  ;;  %v11138_v37 = vpop.f32.mrf.mxu0  ;;  %11560 = vmatprep.mubr.msk.f32.mxu1 %vm12684_vm2, %v18098_v58 }
 0x155   :  { %v11233_v29 = vpop.f32.mrf.mxu1  ;;  %v9480_v37 = vld [vmem:[%s18069_s0 + $0x4e8] sm:$0xff] }
 0x156   :  { %v14042_v28 = vpop.f32.mrf.mxu0  ;;  %11466 = vmatmul.mubr.msk.f32.gmra.mxu0 %vm80_vm1, %v9479_v38  ;;  %v9535_v29 = vld [vmem:[%s18069_s0 + $0x5d0] sm:$0xff] }
 0x157   :  { %18109 = vst [vmem:[#allocation26_spill] sm:$0xff] %v14042_v28  ;;  %v14045_v5 = vpop.f32.mrf.mxu1  ;;  %11561 = vmatmul.mubr.msk.f32.gmra.mxu1 %vm80_vm1, %v9534_v39  ;;  %11468 = vmatprep.mubr.msk.f32.mxu0 %vm12684_vm2, %v18098_v58 }
 0x158   :  { %18110 = vst [vmem:[#allocation27_spill] sm:$0xff] %v14045_v5  ;;  %v11141_v0 = vpop.f32.mrf.mxu0  ;;  %11563 = vmatprep.mubr.msk.f32.mxu1 %vm12684_vm2, %v18098_v58 }
 0x159   :  { %v11236_v38 = vpop.f32.mrf.mxu1  ;;  %v9481_v0 = vld [vmem:[%s18069_s0 + $0x4f0] sm:$0xff] }
 0x15a   :  { %v14058_v28 = vpop.f32.mrf.mxu0  ;;  %11469 = vmatmul.mubr.msk.f32.gmra.mxu0 %vm80_vm1, %v9480_v37  ;;  %v9536_v38 = vld [vmem:[%s18069_s0 + $0x5d8] sm:$0xff] }
 0x15b   :  { %18111 = vst [vmem:[#allocation28_spill] sm:$0xff] %v14058_v28  ;;  %v14061_v39 = vpop.f32.mrf.mxu1  ;;  %11564 = vmatmul.mubr.msk.f32.gmra.mxu1 %vm80_vm1, %v9535_v29  ;;  %11471 = vmatprep.mubr.msk.f32.mxu0 %vm12684_vm2, %v18098_v58 }
 0x15c   :  { %18112 = vst [vmem:[#allocation29_spill] sm:$0xff] %v14061_v39  ;;  %v11144_v5 = vpop.f32.mrf.mxu0  ;;  %11566 = vmatprep.mubr.msk.f32.mxu1 %vm12684_vm2, %v18098_v58 }
 0x15d   :  { %v11239_v37 = vpop.f32.mrf.mxu1  ;;  %v9482_v5 = vld [vmem:[%s18069_s0 + $0x4f8] sm:$0xff] }
 0x15e   :  { %v14074_v28 = vpop.f32.mrf.mxu0  ;;  %11472 = vmatmul.mubr.msk.f32.gmra.mxu0 %vm80_vm1, %v9481_v0  ;;  %v9537_v37 = vld [vmem:[%s18069_s0 + $0x5e0] sm:$0xff] }
 0x15f   :  { %18113 = vst [vmem:[#allocation30_spill] sm:$0xff] %v14074_v28  ;;  %v14077_v29 = vpop.f32.mrf.mxu1  ;;  %11567 = vmatmul.mubr.msk.f32.gmra.mxu1 %vm80_vm1, %v9536_v38  ;;  %11474 = vmatprep.mubr.msk.f32.mxu0 %vm12684_vm2, %v18098_v58 }
 0x160   :  { %18114 = vst [vmem:[#allocation31_spill] sm:$0xff] %v14077_v29  ;;  %v11147_v39 = vpop.f32.mrf.mxu0  ;;  %11569 = vmatprep.mubr.msk.f32.mxu1 %vm12684_vm2, %v18098_v58 }
 0x161   :  { %v11242_v0 = vpop.f32.mrf.mxu1  ;;  %v9483_v39 = vld [vmem:[%s18069_s0 + $0x500] sm:$0xff] }
 0x162   :  { %v14090_v28 = vpop.f32.mrf.mxu0  ;;  %11475 = vmatmul.mubr.msk.f32.gmra.mxu0 %vm80_vm1, %v9482_v5  ;;  %v9538_v0 = vld [vmem:[%s18069_s0 + $0x5e8] sm:$0xff] }
 0x163   :  { %18115 = vst [vmem:[#allocation32_spill] sm:$0xff] %v14090_v28  ;;  %v14093_v38 = vpop.f32.mrf.mxu1  ;;  %11570 = vmatmul.mubr.msk.f32.gmra.mxu1 %vm80_vm1, %v9537_v37  ;;  %11477 = vmatprep.mubr.msk.f32.mxu0 %vm12684_vm2, %v18098_v58 }
 0x164   :  { %18116 = vst [vmem:[#allocation33_spill] sm:$0xff] %v14093_v38  ;;  %v11150_v29 = vpop.f32.mrf.mxu0  ;;  %11572 = vmatprep.mubr.msk.f32.mxu1 %vm12684_vm2, %v18098_v58 }
 0x165   :  { %v11245_v5 = vpop.f32.mrf.mxu1  ;;  %v9484_v29 = vld [vmem:[%s18069_s0 + $0x508] sm:$0xff] }
 0x166   :  { %v14106_v28 = vpop.f32.mrf.mxu0  ;;  %11478 = vmatmul.mubr.msk.f32.gmra.mxu0 %vm80_vm1, %v9483_v39  ;;  %v9539_v5 = vld [vmem:[%s18069_s0 + $0x5f0] sm:$0xff] }
 0x167   :  { %18117 = vst [vmem:[#allocation34_spill] sm:$0xff] %v14106_v28  ;;  %v14109_v37 = vpop.f32.mrf.mxu1  ;;  %11573 = vmatmul.mubr.msk.f32.gmra.mxu1 %vm80_vm1, %v9538_v0  ;;  %11480 = vmatprep.mubr.msk.f32.mxu0 %vm12684_vm2, %v18098_v58 }
 0x168   :  { %18118 = vst [vmem:[#allocation35_spill] sm:$0xff] %v14109_v37  ;;  %v11153_v38 = vpop.f32.mrf.mxu0  ;;  %11575 = vmatprep.mubr.msk.f32.mxu1 %vm12684_vm2, %v18098_v58 }
 0x169   :  { %v11248_v39 = vpop.f32.mrf.mxu1  ;;  %v9485_v38 = vld [vmem:[%s18069_s0 + $0x510] sm:$0xff] }
 0x16a   :  { %v14122_v28 = vpop.f32.mrf.mxu0  ;;  %11481 = vmatmul.mubr.msk.f32.gmra.mxu0 %vm80_vm1, %v9484_v29  ;;  %v9540_v39 = vld [vmem:[%s18069_s0 + $0x5f8] sm:$0xff] }
 0x16b   :  { %18119 = vst [vmem:[#allocation36_spill] sm:$0xff] %v14122_v28  ;;  %v14125_v0 = vpop.f32.mrf.mxu1  ;;  %11576 = vmatmul.mubr.msk.f32.gmra.mxu1 %vm80_vm1, %v9539_v5  ;;  %11483 = vmatprep.mubr.msk.f32.mxu0 %vm12684_vm2, %v18098_v58 }
 0x16c   :  { %18120 = vst [vmem:[#allocation37_spill] sm:$0xff] %v14125_v0  ;;  %v11156_v37 = vpop.f32.mrf.mxu0  ;;  %11578 = vmatprep.mubr.msk.f32.mxu1 %vm12684_vm2, %v18098_v58 }
 0x16d   :  { %v11251_v29 = vpop.f32.mrf.mxu1  ;;  %v9486_v37 = vld [vmem:[%s18069_s0 + $0x518] sm:$0xff] }
 0x16e   :  { %v14138_v28 = vpop.f32.mrf.mxu0  ;;  %11484 = vmatmul.mubr.msk.f32.gmra.mxu0 %vm80_vm1, %v9485_v38  ;;  %v9541_v29 = vld [vmem:[%s18069_s0 + $0x600] sm:$0xff] }
 0x16f   :  { %18121 = vst [vmem:[#allocation38_spill] sm:$0xff] %v14138_v28  ;;  %v14141_v5 = vpop.f32.mrf.mxu1  ;;  %11579 = vmatmul.mubr.msk.f32.gmra.mxu1 %vm80_vm1, %v9540_v39  ;;  %11486 = vmatprep.mubr.msk.f32.mxu0 %vm12684_vm2, %v18098_v58 }
 0x170   :  { %18122 = vst [vmem:[#allocation39_spill] sm:$0xff] %v14141_v5  ;;  %v11159_v0 = vpop.f32.mrf.mxu0  ;;  %11581 = vmatprep.mubr.msk.f32.mxu1 %vm12684_vm2, %v18098_v58 }
 0x171   :  { %v11254_v38 = vpop.f32.mrf.mxu1  ;;  %v9487_v0 = vld [vmem:[%s18069_s0 + $0x520] sm:$0xff] }
 0x172   :  { %v14154_v28 = vpop.f32.mrf.mxu0  ;;  %11487 = vmatmul.mubr.msk.f32.gmra.mxu0 %vm80_vm1, %v9486_v37  ;;  %v9542_v38 = vld [vmem:[%s18069_s0 + $0x608] sm:$0xff] }
 0x173   :  { %18123 = vst [vmem:[#allocation40_spill] sm:$0xff] %v14154_v28  ;;  %v14157_v39 = vpop.f32.mrf.mxu1  ;;  %11582 = vmatmul.mubr.msk.f32.gmra.mxu1 %vm80_vm1, %v9541_v29  ;;  %11489 = vmatprep.mubr.msk.f32.mxu0 %vm12684_vm2, %v18098_v58 }
 0x174   :  { %18124 = vst [vmem:[#allocation41_spill] sm:$0xff] %v14157_v39  ;;  %v11162_v5 = vpop.f32.mrf.mxu0  ;;  %11584 = vmatprep.mubr.msk.f32.mxu1 %vm12684_vm2, %v18098_v58 }
 0x175   :  { %v11257_v37 = vpop.f32.mrf.mxu1  ;;  %v9488_v5 = vld [vmem:[%s18069_s0 + $0x528] sm:$0xff] }
 0x176   :  { %v14170_v28 = vpop.f32.mrf.mxu0  ;;  %11490 = vmatmul.mubr.msk.f32.gmra.mxu0 %vm80_vm1, %v9487_v0  ;;  %v9543_v37 = vld [vmem:[%s18069_s0 + $0x610] sm:$0xff] }
 0x177   :  { %18125 = vst [vmem:[#allocation42_spill] sm:$0xff] %v14170_v28  ;;  %v14173_v29 = vpop.f32.mrf.mxu1  ;;  %11585 = vmatmul.mubr.msk.f32.gmra.mxu1 %vm80_vm1, %v9542_v38  ;;  %11492 = vmatprep.mubr.msk.f32.mxu0 %vm12684_vm2, %v18098_v58 }
 0x178   :  { %18126 = vst [vmem:[#allocation43_spill] sm:$0xff] %v14173_v29  ;;  %v11165_v39 = vpop.f32.mrf.mxu0  ;;  %11587 = vmatprep.mubr.msk.f32.mxu1 %vm12684_vm2, %v18098_v58 }
 0x179   :  { %v11260_v0 = vpop.f32.mrf.mxu1  ;;  %v9489_v39 = vld [vmem:[%s18069_s0 + $0x530] sm:$0xff] }
 0x17a   :  { %v14186_v28 = vpop.f32.mrf.mxu0  ;;  %11493 = vmatmul.mubr.msk.f32.gmra.mxu0 %vm80_vm1, %v9488_v5  ;;  %v9544_v0 = vld [vmem:[%s18069_s0 + $0x618] sm:$0xff] }
 0x17b   :  { %18127 = vst [vmem:[#allocation44_spill] sm:$0xff] %v14186_v28  ;;  %v14189_v38 = vpop.f32.mrf.mxu1  ;;  %11588 = vmatmul.mubr.msk.f32.gmra.mxu1 %vm80_vm1, %v9543_v37  ;;  %11495 = vmatprep.mubr.msk.f32.mxu0 %vm12684_vm2, %v18098_v58 }
 0x17c   :  { %18128 = vst [vmem:[#allocation45_spill] sm:$0xff] %v14189_v38  ;;  %v11168_v29 = vpop.f32.mrf.mxu0  ;;  %11590 = vmatprep.mubr.msk.f32.mxu1 %vm12684_vm2, %v18098_v58 }
 0x17d   :  { %v11263_v5 = vpop.f32.mrf.mxu1  ;;  %v9490_v29 = vld [vmem:[%s18069_s0 + $0x538] sm:$0xff] }
 0x17e   :  { %v14202_v28 = vpop.f32.mrf.mxu0  ;;  %11496 = vmatmul.mubr.msk.f32.gmra.mxu0 %vm80_vm1, %v9489_v39  ;;  %v9545_v5 = vld [vmem:[%s18069_s0 + $0x620] sm:$0xff] }
 0x17f   :  { %18129 = vst [vmem:[#allocation46_spill] sm:$0xff] %v14202_v28  ;;  %v14205_v37 = vpop.f32.mrf.mxu1  ;;  %11591 = vmatmul.mubr.msk.f32.gmra.mxu1 %vm80_vm1, %v9544_v0  ;;  %11498 = vmatprep.mubr.msk.f32.mxu0 %vm12684_vm2, %v18098_v58 }
 0x180   :  { %18130 = vst [vmem:[#allocation47_spill] sm:$0xff] %v14205_v37  ;;  %v11171_v38 = vpop.f32.mrf.mxu0  ;;  %11593 = vmatprep.mubr.msk.f32.mxu1 %vm12684_vm2, %v18098_v58 }
 0x181   :  { %v11266_v39 = vpop.f32.mrf.mxu1  ;;  %v9491_v38 = vld [vmem:[%s18069_s0 + $0x540] sm:$0xff] }
 0x182   :  { %v14218_v28 = vpop.f32.mrf.mxu0  ;;  %11499 = vmatmul.mubr.msk.f32.gmra.mxu0 %vm80_vm1, %v9490_v29  ;;  %v9546_v39 = vld [vmem:[%s18069_s0 + $0x628] sm:$0xff] }
 0x183   :  { %18131 = vst [vmem:[#allocation48_spill] sm:$0xff] %v14218_v28  ;;  %v14221_v0 = vpop.f32.mrf.mxu1  ;;  %11594 = vmatmul.mubr.msk.f32.gmra.mxu1 %vm80_vm1, %v9545_v5  ;;  %11501 = vmatprep.mubr.msk.f32.mxu0 %vm12684_vm2, %v18098_v58 }
 0x184   :  { %18132 = vst [vmem:[#allocation49_spill] sm:$0xff] %v14221_v0  ;;  %v11174_v37 = vpop.f32.mrf.mxu0  ;;  %11596 = vmatprep.mubr.msk.f32.mxu1 %vm12684_vm2, %v18098_v58 }
 0x185   :  { %v11269_v29 = vpop.f32.mrf.mxu1  ;;  %v9492_v37 = vld [vmem:[%s18069_s0 + $0x548] sm:$0xff] }
 0x186   :  { %v14234_v28 = vpop.f32.mrf.mxu0  ;;  %11502 = vmatmul.mubr.msk.f32.gmra.mxu0 %vm80_vm1, %v9491_v38  ;;  %v9547_v29 = vld [vmem:[%s18069_s0 + $0x630] sm:$0xff]  ;;  %v14253_v38 = vld [vmem:[%s18070_s2] ss:$0 sm:$0xff] }
 0x187   :  { %18133 = vst [vmem:[#allocation50_spill] sm:$0xff] %v14234_v28  ;;  %v14237_v5 = vpop.f32.mrf.mxu1  ;;  %11597 = vmatmul.mubr.msk.f32.gmra.mxu1 %vm80_vm1, %v9546_v39  ;;  %11504 = vmatprep.mubr.msk.f32.mxu0 %vm12684_vm2, %v18098_v58 }
 0x188   :  { %18134 = vst [vmem:[#allocation51_spill] sm:$0xff] %v14237_v5  ;;  %v11177_v0 = vpop.f32.mrf.mxu0  ;;  %11599 = vmatprep.mubr.msk.f32.mxu1 %vm12684_vm2, %v18098_v58  ;;  %v543_v5 = vadd.f32 %v14253_v38, %v13844_v46  ;;  %v9548_v46 = vld [vmem:[%s18069_s0 + $0x638] sm:$0xff] }
 0x189   :  { %v11272_v39 = vpop.f32.mrf.mxu1 }
 0x18a   :  { %v14257_v28 = vpop.f32.mrf.mxu0  ;;  %11505 = vmatmul.mubr.msk.f32.gmra.mxu0 %vm80_vm1, %v9492_v37 }
 0x18b   :  { %18135 = vst [vmem:[#allocation52_spill] sm:$0xff] %v14257_v28  ;;  %v1831_v0 = vpop.f32.mrf.mxu1  ;;  %11600 = vmatmul.mubr.msk.f32.gmra.mxu1 %vm80_vm1, %v9547_v29  ;;  %11507 = vmatprep.mubr.msk.f32.mxu0 %vm12684_vm2, %v18098_v58  ;;  %v666_v28 = vmax.f32 %v543_v5, 0.0  ;;  %v548_v29 = vadd.f32 %v14253_v38, %v13868_v19 }
 0x18c   :  { %v1832_v6 = vadd.f32 %v14253_v38, %v1831_v0  ;;  %v11180_v39 = vpop.f32.mrf.mxu0  ;;  %11602 = vmatprep.mubr.msk.f32.mxu1 %vm12684_vm2, %v18098_v58  ;;  %v9494_v0 = vld [vmem:[%s18069_s0 + $0x558] sm:$0xff] }
 0x18d   :  { %v11366_v37 = vpop.f32.mrf.mxu1 }
 0x18e   :  { %v1955_v3 = vmax.f32 %v1832_v6, 0.0  ;;  %v14274_v47 = vpop.f32.mrf.mxu0  ;;  %11508 = vmatmul.mubr.msk.f32.gmra.mxu0 %vm80_vm1, %v9493_v53  ;;  %v9626_v6 = vld [vmem:[%s18069_s0 + $0x708] sm:$0xff]  ;;  %v667_v37 = vmax.f32 %v548_v29, 0.0 }
 0x18f   :  { %18136 = vst [vmem:[#allocation53_spill] sm:$0xff] %v14274_v47  ;;  %v1836_v13 = vpop.f32.mrf.mxu1  ;;  %11603 = vmatmul.mubr.msk.f32.gmra.mxu1 %vm80_vm1, %v9548_v46  ;;  %11510 = vmatprep.mubr.msk.f32.mxu0 %vm12684_vm2, %v18098_v58  ;;  %v553_v46 = vadd.f32 %v14253_v38, %v13429_v45 }
 0x190   :  { %v14283_v39 = vmax.f32 %v666_v28, %v1955_v3  ;;  %v1837_v5 = vadd.f32 %v14253_v38, %v1836_v13  ;;  %v11183_v19 = vpop.f32.mrf.mxu0  ;;  %11696 = vmatprep.mubr.msk.f32.mxu1 %vm12684_vm2, %v18098_v58  ;;  %v9495_v13 = vld [vmem:[%s18069_s0 + $0x560] sm:$0xff] }
 0x191   :  { %v11369_v53 = vpop.f32.mrf.mxu1  ;;  %v668_v19 = vmax.f32 %v553_v46, 0.0  ;;  %v9496_v46 = vld [vmem:[%s18069_s0 + $0x568] sm:$0xff] }
 0x192   :  { %v1956_v47 = vmax.f32 %v1837_v5, 0.0  ;;  %v14293_v32 = vpop.f32.mrf.mxu0  ;;  %11511 = vmatmul.mubr.msk.f32.gmra.mxu0 %vm80_vm1, %v9494_v0  ;;  %v9627_v0 = vld [vmem:[%s18069_s0 + $0x710] sm:$0xff] }
 0x193   :  { %v1841_v3 = vpop.f32.mrf.mxu1  ;;  %11697 = vmatmul.mubr.msk.f32.vlgmr.msra.gmra.mxu1 %vm80_vm1, %v9626_v6  ;;  %11513 = vmatprep.mubr.msk.f32.mxu0 %vm12684_vm2, %v18098_v58 }
 0x194   :  { %v14302_v28 = vmax.f32 %v667_v37, %v1956_v47  ;;  %v1842_v45 = vadd.f32 %v14253_v38, %v1841_v3  ;;  %v11186_v29 = vpop.f32.mrf.mxu0  ;;  %11699 = vmatprep.mubr.msk.f32.mxu1 %vm12684_vm2, %v18098_v58  ;;  %11855 = vmatpush3.msk.msra.mxu1 %vm156_vm0, %v13863_v14  ;;  %v558_v47 = vadd.f32 %v14253_v38, %v13449_v51 }
 0x195   :  { %v11372_v5 = vpop.f32.mrf.mxu1  ;;  %11856 = vmatprep.subr.mxu1 %v18098_v58  ;;  %v227_v29 = vadd.f32 %v14253_v38, %v13426_v44  ;;  %v9497_v44 = vld [vmem:[%s18069_s0 + $0x570] sm:$0xff] }
 0x196   :  { %18137 = vst [vmem:[#allocation54_spill] sm:$0xff] %v14302_v28  ;;  %v1957_v6 = vmax.f32 %v1842_v45, 0.0  ;;  %v14315_v53 = vpop.f32.mrf.mxu0  ;;  %11514 = vmatmul.mubr.msk.f32.gmra.mxu0 %vm80_vm1, %v9495_v13  ;;  %11857 = vmatpush3.msra.mxu1 %v13874_v2  ;;  %v9628_v13 = vld [vmem:[%s18069_s0 + $0x718] sm:$0xff]  ;;  %v669_v5 = vmax.f32 %v558_v47, 0.0 }
 0x197   :  { %18138 = vst [vmem:[#allocation55_spill] sm:$0xff] %v14315_v53  ;;  %v1846_v37 = vpop.f32.mrf.mxu1  ;;  %11700 = vmatmul.mubr.msk.f32.gmra.mxu1 %vm80_vm1, %v9627_v0  ;;  %11516 = vmatprep.mubr.msk.f32.mxu0 %vm12684_vm2, %v18098_v58 }
 0x198   :  { %v14325_v3 = vmax.f32 %v668_v19, %v1957_v6  ;;  %v1847_v51 = vadd.f32 %v14253_v38, %v1846_v37  ;;  %v11189_v45 = vpop.f32.mrf.mxu0  ;;  %11702 = vmatprep.mubr.msk.f32.mxu1 %vm12684_vm2, %v18098_v58  ;;  %11858 = vmatprep.subr.mxu1 %v18098_v58  ;;  %v563_v19 = vadd.f32 %v14253_v38, %v13468_v57 }
 0x199   :  { %v11375_v0 = vpop.f32.mrf.mxu1  ;;  %11859 = vmatpush3.msra.mxu1 %v13894_v61 }
 0x19a   :  { %18139 = vst [vmem:[#allocation56_spill] sm:$0xff] %v14325_v3  ;;  %v1958_v6 = vmax.f32 %v1847_v51, 0.0  ;;  %v1490_v37 = vpop.f32.mrf.mxu0  ;;  %11517 = vmatmul.mubr.msk.f32.gmra.mxu0 %vm80_vm1, %v9496_v46  ;;  %11860 = vmatprep.subr.mxu1 %v18098_v58  ;;  %v9629_v46 = vld [vmem:[%s18069_s0 + $0x720] sm:$0xff]  ;;  %v232_v0 = vadd.f32 %v14253_v38, %v13445_v50 }
 0x19b   :  { %v1491_v45 = vadd.f32 %v14253_v38, %v1490_v37  ;;  %v1851_v3 = vpop.f32.mrf.mxu1  ;;  %11703 = vmatmul.mubr.msk.f32.gmra.mxu1 %vm80_vm1, %v9628_v13  ;;  %11519 = vmatprep.mubr.msk.f32.mxu0 %vm12684_vm2, %v18098_v58  ;;  %v350_v13 = vmax.f32 %v227_v29, 0.0  ;;  %v9575_v50 = vld [vmem:[%s18069_s0 + $0x640] sm:$0xff] }
 0x19c   :  { %v14348_v47 = vmax.f32 %v669_v5, %v1958_v6  ;;  %v1852_v57 = vadd.f32 %v14253_v38, %v1851_v3  ;;  %v11283_v51 = vpop.f32.mrf.mxu0  ;;  %11705 = vmatprep.mubr.msk.f32.mxu1 %vm12684_vm2, %v18098_v58  ;;  %11861 = vmatpush3.msra.mxu1 %v13917_v16  ;;  %v670_v5 = vmax.f32 %v563_v19, 0.0  ;;  %v568_v3 = vadd.f32 %v14253_v38, %v13486_v63 }
 0x19d   :  { %v1614_v37 = vmax.f32 %v1491_v45, 0.0  ;;  %v11378_v53 = vpop.f32.mrf.mxu1  ;;  %12020 = vmatprep.subr.mxu1 %v18098_v58  ;;  %v9630_v45 = vld [vmem:[%s18069_s0 + $0x728] sm:$0xff] }
 0x19e   :  { %18140 = vst [vmem:[#allocation57_spill] sm:$0xff] %v14348_v47  ;;  %v1959_v6 = vmax.f32 %v1852_v57, 0.0  ;;  %v1495_v51 = vpop.f32.mrf.mxu0  ;;  %11520 = vmatmul.mubr.msk.f32.gmra.mxu0 %vm80_vm1, %v9497_v44  ;;  %v351_v44 = vmax.f32 %v232_v0, 0.0  ;;  %v237_v57 = vadd.f32 %v14253_v38, %v13464_v56  ;;  %v9576_v56 = vld [vmem:[%s18069_s0 + $0x648] sm:$0xff] }
 0x19f   :  { %v14363_v47 = vmax.f32 %v350_v13, %v1614_v37  ;;  %v1496_v28 = vadd.f32 %v14253_v38, %v1495_v51  ;;  %v1856_v29 = vpop.f32.mrf.mxu1  ;;  %11706 = vmatmul.mubr.msk.f32.gmra.mxu1 %vm80_vm1, %v9629_v46  ;;  %11613 = vmatprep.mubr.msk.f32.mxu0 %vm12684_vm2, %v18098_v58  ;;  %v671_v37 = vmax.f32 %v568_v3, 0.0  ;;  %v9631_v3 = vld [vmem:[%s18069_s0 + $0x730] sm:$0xff] }
 0x1a0   :  { %v14372_v53 = vmax.f32 %v670_v5, %v1959_v6  ;;  %v1857_v63 = vadd.f32 %v14253_v38, %v1856_v29  ;;  %v11286_v19 = vpop.f32.mrf.mxu0  ;;  %11708 = vmatprep.mubr.msk.f32.mxu1 %vm12684_vm2, %v18098_v58  ;;  %v573_v5 = vadd.f32 %v14253_v38, %v13502_v10 }
 0x1a1   :  { %v1615_v46 = vmax.f32 %v1496_v28, 0.0  ;;  %v11381_v13 = vpop.f32.mrf.mxu1 }
 0x1a2   :  { %18141 = vst [vmem:[#allocation58_spill] sm:$0xff] %v14372_v53  ;;  %v1960_v6 = vmax.f32 %v1857_v63, 0.0  ;;  %v1500_v51 = vpop.f32.mrf.mxu0  ;;  %11614 = vmatmul.mubr.msk.f32.vlgmr.msra.gmra.mxu0 %vm80_vm1, %v9575_v50  ;;  %v242_v50 = vadd.f32 %v14253_v38, %v13483_v62  ;;  %v9577_v62 = vld [vmem:[%s18069_s0 + $0x650] sm:$0xff] }
 0x1a3   :  { %v14385_v29 = vmax.f32 %v351_v44, %v1615_v46  ;;  %v1501_v19 = vadd.f32 %v14253_v38, %v1500_v51  ;;  %v1861_v53 = vpop.f32.mrf.mxu1  ;;  %11709 = vmatmul.mubr.msk.f32.gmra.mxu1 %vm80_vm1, %v9630_v45  ;;  %11772 = vmatpush3.msk.msra.mxu0 %vm156_vm0, %v13863_v14  ;;  %v352_v14 = vmax.f32 %v237_v57, 0.0  ;;  %v578_v44 = vadd.f32 %v14253_v38, %v13521_v1 }
 0x1a4   :  { %v14394_v28 = vmax.f32 %v671_v37, %v1960_v6  ;;  %v1862_v10 = vadd.f32 %v14253_v38, %v1861_v53  ;;  %v11289_v0 = vpop.f32.mrf.mxu0  ;;  %11616 = vmatprep.mubr.msk.f32.mxu0 %vm12684_vm2, %v18098_v58  ;;  %11711 = vmatprep.mubr.msk.f32.mxu1 %vm12684_vm2, %v18098_v58  ;;  %v672_v53 = vmax.f32 %v573_v5, 0.0 }
 0x1a5   :  { %v1616_v63 = vmax.f32 %v1501_v19, 0.0  ;;  %v11384_v45 = vpop.f32.mrf.mxu1  ;;  %11773 = vmatprep.subr.mxu0 %v18098_v58  ;;  %v9632_v19 = vld [vmem:[%s18069_s0 + $0x738] sm:$0xff] }
 0x1a6   :  { %v1961_v46 = vmax.f32 %v1862_v10, 0.0  ;;  %v1505_v13 = vpop.f32.mrf.mxu0  ;;  %11617 = vmatmul.mubr.msk.f32.gmra.mxu0 %vm80_vm1, %v9576_v56  ;;  %v353_v56 = vmax.f32 %v242_v50, 0.0  ;;  %v247_v10 = vadd.f32 %v14253_v38, %v13499_v9  ;;  %v9578_v9 = vld [vmem:[%s18069_s0 + $0x658] sm:$0xff] }
 0x1a7   :  { %v14410_v37 = vmax.f32 %v352_v14, %v1616_v63  ;;  %v1506_v6 = vadd.f32 %v14253_v38, %v1505_v13  ;;  %v1866_v57 = vpop.f32.mrf.mxu1  ;;  %11712 = vmatmul.mubr.msk.f32.gmra.mxu1 %vm80_vm1, %v9631_v3  ;;  %11619 = vmatprep.mubr.msk.f32.mxu0 %vm12684_vm2, %v18098_v58  ;;  %v673_v14 = vmax.f32 %v578_v44, 0.0  ;;  %v583_v63 = vadd.f32 %v14253_v38, %v13539_v21 }
 0x1a8   :  { %v14419_v5 = vmax.f32 %v672_v53, %v1961_v46  ;;  %v1867_v1 = vadd.f32 %v14253_v38, %v1866_v57  ;;  %v11292_v51 = vpop.f32.mrf.mxu0  ;;  %11714 = vmatprep.mubr.msk.f32.mxu1 %vm12684_vm2, %v18098_v58  ;;  %11774 = vmatpush3.msra.mxu0 %v13874_v2  ;;  %v354_v57 = vmax.f32 %v247_v10, 0.0 }
 0x1a9   :  { %v1617_v0 = vmax.f32 %v1506_v6, 0.0  ;;  %v11387_v3 = vpop.f32.mrf.mxu1  ;;  %11775 = vmatprep.subr.mxu0 %v18098_v58  ;;  %v9633_v6 = vld [vmem:[%s18069_s0 + $0x740] sm:$0xff] }
 0x1aa   :  { %v1962_v45 = vmax.f32 %v1867_v1, 0.0  ;;  %v1510_v53 = vpop.f32.mrf.mxu0  ;;  %11620 = vmatmul.mubr.msk.f32.gmra.mxu0 %vm80_vm1, %v9577_v62  ;;  %v252_v62 = vadd.f32 %v14253_v38, %v13518_v15  ;;  %v9579_v15 = vld [vmem:[%s18069_s0 + $0x660] sm:$0xff] }
 0x1ab   :  { %v14434_v46 = vmax.f32 %v353_v56, %v1617_v0  ;;  %v1511_v2 = vadd.f32 %v14253_v38, %v1510_v53  ;;  %v1871_v50 = vpop.f32.mrf.mxu1  ;;  %11715 = vmatmul.mubr.msk.f32.gmra.mxu1 %vm80_vm1, %v9632_v19  ;;  %11622 = vmatprep.mubr.msk.f32.mxu0 %vm12684_vm2, %v18098_v58  ;;  %v674_v19 = vmax.f32 %v583_v63, 0.0  ;;  %v588_v56 = vadd.f32 %v14253_v38, %v13557_v26  ;;  %v9634_v53 = vld [vmem:[%s18069_s0 + $0x748] sm:$0xff] }
 0x1ac   :  { %v14443_v44 = vmax.f32 %v673_v14, %v1962_v45  ;;  %v1872_v21 = vadd.f32 %v14253_v38, %v1871_v50  ;;  %v11295_v13 = vpop.f32.mrf.mxu0  ;;  %11717 = vmatprep.mubr.msk.f32.mxu1 %vm12684_vm2, %v18098_v58  ;;  %11776 = vmatpush3.msra.mxu0 %v13894_v61  ;;  %v257_v50 = vadd.f32 %v14253_v38, %v13536_v20  ;;  %v9580_v20 = vld [vmem:[%s18069_s0 + $0x668] sm:$0xff] }
 0x1ad   :  { %v1618_v1 = vmax.f32 %v1511_v2, 0.0  ;;  %v11390_v51 = vpop.f32.mrf.mxu1  ;;  %11777 = vmatprep.subr.mxu0 %v18098_v58  ;;  %v355_v2 = vmax.f32 %v252_v62, 0.0  ;;  %v675_v13 = vmax.f32 %v588_v56, 0.0 }
 0x1ae   :  { %v1963_v0 = vmax.f32 %v1872_v21, 0.0  ;;  %v1515_v3 = vpop.f32.mrf.mxu0  ;;  %11623 = vmatmul.mubr.msk.f32.gmra.mxu0 %vm80_vm1, %v9578_v9 }
 0x1af   :  { %v14458_v14 = vmax.f32 %v354_v57, %v1618_v1  ;;  %v1516_v61 = vadd.f32 %v14253_v38, %v1515_v3  ;;  %v1876_v10 = vpop.f32.mrf.mxu1  ;;  %11718 = vmatmul.mubr.msk.f32.gmra.mxu1 %vm80_vm1, %v9633_v6  ;;  %11625 = vmatprep.mubr.msk.f32.mxu0 %vm12684_vm2, %v18098_v58  ;;  %v593_v6 = vadd.f32 %v14253_v38, %v13575_v31  ;;  %v356_v3 = vmax.f32 %v257_v50, 0.0 }
 0x1b0   :  { %v14467_v63 = vmax.f32 %v674_v19, %v1963_v0  ;;  %v1877_v26 = vadd.f32 %v14253_v38, %v1876_v10  ;;  %v11298_v45 = vpop.f32.mrf.mxu0  ;;  %11720 = vmatprep.mubr.msk.f32.mxu1 %vm12684_vm2, %v18098_v58  ;;  %11778 = vmatpush3.msra.mxu0 %v13917_v16  ;;  %v9635_v0 = vld [vmem:[%s18069_s0 + $0x750] sm:$0xff] }
 0x1b1   :  { %v1619_v9 = vmax.f32 %v1516_v61, 0.0  ;;  %v11393_v21 = vpop.f32.mrf.mxu1  ;;  %11937 = vmatprep.subr.mxu0 %v18098_v58  ;;  %v262_v61 = vadd.f32 %v14253_v38, %v13554_v25  ;;  %v598_v45 = vadd.f32 %v14253_v38, %v13591_v36  ;;  %v9581_v25 = vld [vmem:[%s18069_s0 + $0x670] sm:$0xff] }
 0x1b2   :  { %v1964_v57 = vmax.f32 %v1877_v26, 0.0  ;;  %v1520_v1 = vpop.f32.mrf.mxu0  ;;  %11626 = vmatmul.mubr.msk.f32.gmra.mxu0 %vm80_vm1, %v9579_v15  ;;  %v676_v26 = vmax.f32 %v593_v6, 0.0 }
 0x1b3   :  { %v14482_v51 = vmax.f32 %v355_v2, %v1619_v9  ;;  %v1521_v16 = vadd.f32 %v14253_v38, %v1520_v1  ;;  %v1881_v62 = vpop.f32.mrf.mxu1  ;;  %11721 = vmatmul.mubr.msk.f32.gmra.mxu1 %vm80_vm1, %v9634_v53  ;;  %11628 = vmatprep.mubr.msk.f32.mxu0 %vm12684_vm2, %v18098_v58  ;;  %v357_v1 = vmax.f32 %v262_v61, 0.0 }
 0x1b4   :  { %v14491_v19 = vmax.f32 %v675_v13, %v1964_v57  ;;  %v1882_v31 = vadd.f32 %v14253_v38, %v1881_v62  ;;  %v11301_v56 = vpop.f32.mrf.mxu0  ;;  %11723 = vmatprep.mubr.msk.f32.mxu1 %vm12684_vm2, %v18098_v58  ;;  %v9636_v57 = vld [vmem:[%s18069_s0 + $0x758] sm:$0xff] }
 0x1b5   :  { %v1620_v10 = vmax.f32 %v1521_v16, 0.0  ;;  %v11396_v15 = vpop.f32.mrf.mxu1  ;;  %v267_v16 = vadd.f32 %v14253_v38, %v13572_v30  ;;  %v603_v56 = vadd.f32 %v14253_v38, %v13607_v42  ;;  %v9582_v30 = vld [vmem:[%s18069_s0 + $0x678] sm:$0xff] }
 0x1b6   :  { %v1965_v53 = vmax.f32 %v1882_v31, 0.0  ;;  %v1525_v2 = vpop.f32.mrf.mxu0  ;;  %11629 = vmatmul.mubr.msk.f32.gmra.mxu0 %vm80_vm1, %v9580_v20  ;;  %v677_v31 = vmax.f32 %v598_v45, 0.0 }
 0x1b7   :  { %v14504_v9 = vmax.f32 %v356_v3, %v1620_v10  ;;  %v1526_v21 = vadd.f32 %v14253_v38, %v1525_v2  ;;  %v1886_v13 = vpop.f32.mrf.mxu1  ;;  %11724 = vmatmul.mubr.msk.f32.gmra.mxu1 %vm80_vm1, %v9635_v0  ;;  %11631 = vmatprep.mubr.msk.f32.mxu0 %vm12684_vm2, %v18098_v58  ;;  %v358_v2 = vmax.f32 %v267_v16, 0.0 }
 0x1b8   :  { %v14513_v50 = vmax.f32 %v676_v26, %v1965_v53  ;;  %v1887_v36 = vadd.f32 %v14253_v38, %v1886_v13  ;;  %v11304_v6 = vpop.f32.mrf.mxu0  ;;  %11726 = vmatprep.mubr.msk.f32.mxu1 %vm12684_vm2, %v18098_v58  ;;  %v9637_v53 = vld [vmem:[%s18069_s0 + $0x760] sm:$0xff] }
 0x1b9   :  { %v1621_v62 = vmax.f32 %v1526_v21, 0.0  ;;  %v11399_v20 = vpop.f32.mrf.mxu1  ;;  %v272_v21 = vadd.f32 %v14253_v38, %v13588_v35  ;;  %v608_v6 = vadd.f32 %v14253_v38, %v13623_v52  ;;  %v9583_v35 = vld [vmem:[%s18069_s0 + $0x680] sm:$0xff] }
 0x1ba   :  { %v1966_v0 = vmax.f32 %v1887_v36, 0.0  ;;  %v1530_v3 = vpop.f32.mrf.mxu0  ;;  %11632 = vmatmul.mubr.msk.f32.gmra.mxu0 %vm80_vm1, %v9581_v25  ;;  %v678_v36 = vmax.f32 %v603_v56, 0.0 }
 0x1bb   :  { %v14526_v10 = vmax.f32 %v357_v1, %v1621_v62  ;;  %v1531_v15 = vadd.f32 %v14253_v38, %v1530_v3  ;;  %v1891_v26 = vpop.f32.mrf.mxu1  ;;  %11727 = vmatmul.mubr.msk.f32.gmra.mxu1 %vm80_vm1, %v9636_v57  ;;  %11634 = vmatprep.mubr.msk.f32.mxu0 %vm12684_vm2, %v18098_v58  ;;  %v359_v3 = vmax.f32 %v272_v21, 0.0 }
 0x1bc   :  { %v14535_v61 = vmax.f32 %v677_v31, %v1966_v0  ;;  %v1892_v42 = vadd.f32 %v14253_v38, %v1891_v26  ;;  %v11307_v45 = vpop.f32.mrf.mxu0  ;;  %11729 = vmatprep.mubr.msk.f32.mxu1 %vm12684_vm2, %v18098_v58  ;;  %v9638_v0 = vld [vmem:[%s18069_s0 + $0x768] sm:$0xff] }
 0x1bd   :  { %v1622_v13 = vmax.f32 %v1531_v15, 0.0  ;;  %v11402_v25 = vpop.f32.mrf.mxu1  ;;  %v277_v15 = vadd.f32 %v14253_v38, %v13604_v41  ;;  %v613_v45 = vadd.f32 %v14253_v38, %v13639_v60  ;;  %v9584_v41 = vld [vmem:[%s18069_s0 + $0x688] sm:$0xff] }
 0x1be   :  { %v1967_v57 = vmax.f32 %v1892_v42, 0.0  ;;  %v1535_v1 = vpop.f32.mrf.mxu0  ;;  %11635 = vmatmul.mubr.msk.f32.gmra.mxu0 %vm80_vm1, %v9582_v30  ;;  %v679_v42 = vmax.f32 %v608_v6, 0.0 }
 0x1bf   :  { %v14548_v62 = vmax.f32 %v358_v2, %v1622_v13  ;;  %v1536_v20 = vadd.f32 %v14253_v38, %v1535_v1  ;;  %v1896_v31 = vpop.f32.mrf.mxu1  ;;  %11730 = vmatmul.mubr.msk.f32.gmra.mxu1 %vm80_vm1, %v9637_v53  ;;  %11637 = vmatprep.mubr.msk.f32.mxu0 %vm12684_vm2, %v18098_v58  ;;  %v360_v1 = vmax.f32 %v277_v15, 0.0 }
 0x1c0   :  { %v14557_v16 = vmax.f32 %v678_v36, %v1967_v57  ;;  %v1897_v52 = vadd.f32 %v14253_v38, %v1896_v31  ;;  %v11310_v56 = vpop.f32.mrf.mxu0  ;;  %11732 = vmatprep.mubr.msk.f32.mxu1 %vm12684_vm2, %v18098_v58  ;;  %v9639_v57 = vld [vmem:[%s18069_s0 + $0x770] sm:$0xff] }
 0x1c1   :  { %v1623_v26 = vmax.f32 %v1536_v20, 0.0  ;;  %v11405_v30 = vpop.f32.mrf.mxu1  ;;  %v282_v20 = vadd.f32 %v14253_v38, %v13620_v49  ;;  %v618_v56 = vadd.f32 %v14253_v38, %v13655_v11  ;;  %v9585_v49 = vld [vmem:[%s18069_s0 + $0x690] sm:$0xff] }
 0x1c2   :  { %v1968_v53 = vmax.f32 %v1897_v52, 0.0  ;;  %v1540_v2 = vpop.f32.mrf.mxu0  ;;  %11638 = vmatmul.mubr.msk.f32.gmra.mxu0 %vm80_vm1, %v9583_v35  ;;  %v680_v52 = vmax.f32 %v613_v45, 0.0 }
 0x1c3   :  { %v14570_v13 = vmax.f32 %v359_v3, %v1623_v26  ;;  %v1541_v25 = vadd.f32 %v14253_v38, %v1540_v2  ;;  %v1901_v36 = vpop.f32.mrf.mxu1  ;;  %11733 = vmatmul.mubr.msk.f32.gmra.mxu1 %vm80_vm1, %v9638_v0  ;;  %11640 = vmatprep.mubr.msk.f32.mxu0 %vm12684_vm2, %v18098_v58  ;;  %v361_v2 = vmax.f32 %v282_v20, 0.0 }
 0x1c4   :  { %v14579_v21 = vmax.f32 %v679_v42, %v1968_v53  ;;  %v1902_v60 = vadd.f32 %v14253_v38, %v1901_v36  ;;  %v11313_v6 = vpop.f32.mrf.mxu0  ;;  %11735 = vmatprep.mubr.msk.f32.mxu1 %vm12684_vm2, %v18098_v58  ;;  %v9640_v53 = vld [vmem:[%s18069_s0 + $0x778] sm:$0xff] }
 0x1c5   :  { %v1624_v31 = vmax.f32 %v1541_v25, 0.0  ;;  %v11408_v35 = vpop.f32.mrf.mxu1  ;;  %v287_v25 = vadd.f32 %v14253_v38, %v13636_v59  ;;  %v623_v6 = vadd.f32 %v14253_v38, %v13671_v18  ;;  %v9586_v59 = vld [vmem:[%s18069_s0 + $0x698] sm:$0xff] }
 0x1c6   :  { %v1969_v0 = vmax.f32 %v1902_v60, 0.0  ;;  %v1545_v3 = vpop.f32.mrf.mxu0  ;;  %11641 = vmatmul.mubr.msk.f32.gmra.mxu0 %vm80_vm1, %v9584_v41  ;;  %v681_v60 = vmax.f32 %v618_v56, 0.0 }
 0x1c7   :  { %v14592_v26 = vmax.f32 %v360_v1, %v1624_v31  ;;  %v1546_v30 = vadd.f32 %v14253_v38, %v1545_v3  ;;  %v1906_v42 = vpop.f32.mrf.mxu1  ;;  %11736 = vmatmul.mubr.msk.f32.gmra.mxu1 %vm80_vm1, %v9639_v57  ;;  %11643 = vmatprep.mubr.msk.f32.mxu0 %vm12684_vm2, %v18098_v58  ;;  %v362_v3 = vmax.f32 %v287_v25, 0.0 }
 0x1c8   :  { %v14601_v15 = vmax.f32 %v680_v52, %v1969_v0  ;;  %v1907_v11 = vadd.f32 %v14253_v38, %v1906_v42  ;;  %v11316_v45 = vpop.f32.mrf.mxu0  ;;  %11738 = vmatprep.mubr.msk.f32.mxu1 %vm12684_vm2, %v18098_v58  ;;  %v9641_v0 = vld [vmem:[%s18069_s0 + $0x780] sm:$0xff] }
 0x1c9   :  { %v1625_v36 = vmax.f32 %v1546_v30, 0.0  ;;  %v11411_v41 = vpop.f32.mrf.mxu1  ;;  %v292_v30 = vadd.f32 %v14253_v38, %v13652_v8  ;;  %v628_v45 = vadd.f32 %v14253_v38, %v13687_v27  ;;  %v9587_v8 = vld [vmem:[%s18069_s0 + $0x6a0] sm:$0xff] }
 0x1ca   :  { %v1970_v57 = vmax.f32 %v1907_v11, 0.0  ;;  %v1550_v1 = vpop.f32.mrf.mxu0  ;;  %11644 = vmatmul.mubr.msk.f32.gmra.mxu0 %vm80_vm1, %v9585_v49  ;;  %v682_v11 = vmax.f32 %v623_v6, 0.0 }
 0x1cb   :  { %v14614_v31 = vmax.f32 %v361_v2, %v1625_v36  ;;  %v1551_v35 = vadd.f32 %v14253_v38, %v1550_v1  ;;  %v1911_v52 = vpop.f32.mrf.mxu1  ;;  %11739 = vmatmul.mubr.msk.f32.gmra.mxu1 %vm80_vm1, %v9640_v53  ;;  %11646 = vmatprep.mubr.msk.f32.mxu0 %vm12684_vm2, %v18098_v58  ;;  %v363_v1 = vmax.f32 %v292_v30, 0.0 }
 0x1cc   :  { %v14623_v20 = vmax.f32 %v681_v60, %v1970_v57  ;;  %v1912_v18 = vadd.f32 %v14253_v38, %v1911_v52  ;;  %v11319_v56 = vpop.f32.mrf.mxu0  ;;  %11741 = vmatprep.mubr.msk.f32.mxu1 %vm12684_vm2, %v18098_v58  ;;  %v9642_v57 = vld [vmem:[%s18069_s0 + $0x788] sm:$0xff] }
 0x1cd   :  { %v1626_v42 = vmax.f32 %v1551_v35, 0.0  ;;  %v11414_v49 = vpop.f32.mrf.mxu1  ;;  %v297_v35 = vadd.f32 %v14253_v38, %v13668_v17  ;;  %v633_v56 = vadd.f32 %v14253_v38, %v13703_v4  ;;  %v9588_v17 = vld [vmem:[%s18069_s0 + $0x6a8] sm:$0xff] }
 0x1ce   :  { %v1971_v53 = vmax.f32 %v1912_v18, 0.0  ;;  %v1555_v2 = vpop.f32.mrf.mxu0  ;;  %11647 = vmatmul.mubr.msk.f32.gmra.mxu0 %vm80_vm1, %v9586_v59  ;;  %v683_v18 = vmax.f32 %v628_v45, 0.0 }
 0x1cf   :  { %v14636_v36 = vmax.f32 %v362_v3, %v1626_v42  ;;  %v1556_v41 = vadd.f32 %v14253_v38, %v1555_v2  ;;  %v1916_v60 = vpop.f32.mrf.mxu1  ;;  %11742 = vmatmul.mubr.msk.f32.gmra.mxu1 %vm80_vm1, %v9641_v0  ;;  %11649 = vmatprep.mubr.msk.f32.mxu0 %vm12684_vm2, %v18098_v58  ;;  %v364_v2 = vmax.f32 %v297_v35, 0.0 }
 0x1d0   :  { %v14645_v25 = vmax.f32 %v682_v11, %v1971_v53  ;;  %v1917_v27 = vadd.f32 %v14253_v38, %v1916_v60  ;;  %v11322_v6 = vpop.f32.mrf.mxu0  ;;  %11744 = vmatprep.mubr.msk.f32.mxu1 %vm12684_vm2, %v18098_v58  ;;  %v9643_v53 = vld [vmem:[%s18069_s0 + $0x790] sm:$0xff] }
 0x1d1   :  { %v1627_v52 = vmax.f32 %v1556_v41, 0.0  ;;  %v11417_v59 = vpop.f32.mrf.mxu1  ;;  %v302_v41 = vadd.f32 %v14253_v38, %v13684_v24  ;;  %v638_v6 = vadd.f32 %v14253_v38, %v13719_v43  ;;  %v9589_v24 = vld [vmem:[%s18069_s0 + $0x6b0] sm:$0xff] }
 0x1d2   :  { %v1972_v0 = vmax.f32 %v1917_v27, 0.0  ;;  %v1560_v3 = vpop.f32.mrf.mxu0  ;;  %11650 = vmatmul.mubr.msk.f32.gmra.mxu0 %vm80_vm1, %v9587_v8  ;;  %v684_v27 = vmax.f32 %v633_v56, 0.0 }
 0x1d3   :  { %v14658_v42 = vmax.f32 %v363_v1, %v1627_v52  ;;  %v1561_v49 = vadd.f32 %v14253_v38, %v1560_v3  ;;  %v1921_v11 = vpop.f32.mrf.mxu1  ;;  %11745 = vmatmul.mubr.msk.f32.gmra.mxu1 %vm80_vm1, %v9642_v57  ;;  %11652 = vmatprep.mubr.msk.f32.mxu0 %vm12684_vm2, %v18098_v58  ;;  %v365_v3 = vmax.f32 %v302_v41, 0.0 }
 0x1d4   :  { %v14667_v30 = vmax.f32 %v683_v18, %v1972_v0  ;;  %v1922_v4 = vadd.f32 %v14253_v38, %v1921_v11  ;;  %v11325_v45 = vpop.f32.mrf.mxu0  ;;  %11747 = vmatprep.mubr.msk.f32.mxu1 %vm12684_vm2, %v18098_v58  ;;  %v9644_v0 = vld [vmem:[%s18069_s0 + $0x798] sm:$0xff] }
 0x1d5   :  { %v1628_v60 = vmax.f32 %v1561_v49, 0.0  ;;  %v11420_v8 = vpop.f32.mrf.mxu1  ;;  %v307_v49 = vadd.f32 %v14253_v38, %v13700_v33  ;;  %v643_v45 = vadd.f32 %v14253_v38, %v13735_v55  ;;  %v9590_v33 = vld [vmem:[%s18069_s0 + $0x6b8] sm:$0xff] }
 0x1d6   :  { %v1973_v57 = vmax.f32 %v1922_v4, 0.0  ;;  %v1565_v1 = vpop.f32.mrf.mxu0  ;;  %11653 = vmatmul.mubr.msk.f32.gmra.mxu0 %vm80_vm1, %v9588_v17  ;;  %v685_v4 = vmax.f32 %v638_v6, 0.0 }
 0x1d7   :  { %v14680_v52 = vmax.f32 %v364_v2, %v1628_v60  ;;  %v1566_v59 = vadd.f32 %v14253_v38, %v1565_v1  ;;  %v1926_v18 = vpop.f32.mrf.mxu1  ;;  %11748 = vmatmul.mubr.msk.f32.gmra.mxu1 %vm80_vm1, %v9643_v53  ;;  %11655 = vmatprep.mubr.msk.f32.mxu0 %vm12684_vm2, %v18098_v58  ;;  %v366_v1 = vmax.f32 %v307_v49, 0.0 }
 0x1d8   :  { %v14689_v35 = vmax.f32 %v684_v27, %v1973_v57  ;;  %v1927_v43 = vadd.f32 %v14253_v38, %v1926_v18  ;;  %v11328_v56 = vpop.f32.mrf.mxu0  ;;  %11750 = vmatprep.mubr.msk.f32.mxu1 %vm12684_vm2, %v18098_v58  ;;  %v9645_v57 = vld [vmem:[%s18069_s0 + $0x7a0] sm:$0xff] }
 0x1d9   :  { %v1629_v11 = vmax.f32 %v1566_v59, 0.0  ;;  %v11423_v17 = vpop.f32.mrf.mxu1  ;;  %v312_v59 = vadd.f32 %v14253_v38, %v13716_v40  ;;  %v648_v56 = vadd.f32 %v14253_v38, %v13751_v12  ;;  %v9591_v40 = vld [vmem:[%s18069_s0 + $0x6c0] sm:$0xff] }
 0x1da   :  { %v1974_v53 = vmax.f32 %v1927_v43, 0.0  ;;  %v1570_v2 = vpop.f32.mrf.mxu0  ;;  %11656 = vmatmul.mubr.msk.f32.gmra.mxu0 %vm80_vm1, %v9589_v24  ;;  %v686_v43 = vmax.f32 %v643_v45, 0.0 }
 0x1db   :  { %v14702_v60 = vmax.f32 %v365_v3, %v1629_v11  ;;  %v1571_v8 = vadd.f32 %v14253_v38, %v1570_v2  ;;  %v1931_v27 = vpop.f32.mrf.mxu1  ;;  %11751 = vmatmul.mubr.msk.f32.gmra.mxu1 %vm80_vm1, %v9644_v0  ;;  %11658 = vmatprep.mubr.msk.f32.mxu0 %vm12684_vm2, %v18098_v58  ;;  %v367_v2 = vmax.f32 %v312_v59, 0.0 }
 0x1dc   :  { %v14711_v41 = vmax.f32 %v685_v4, %v1974_v53  ;;  %v1932_v55 = vadd.f32 %v14253_v38, %v1931_v27  ;;  %v11331_v6 = vpop.f32.mrf.mxu0  ;;  %11753 = vmatprep.mubr.msk.f32.mxu1 %vm12684_vm2, %v18098_v58  ;;  %v9646_v53 = vld [vmem:[%s18069_s0 + $0x7a8] sm:$0xff] }
 0x1dd   :  { %v1630_v18 = vmax.f32 %v1571_v8, 0.0  ;;  %v11426_v24 = vpop.f32.mrf.mxu1  ;;  %v317_v8 = vadd.f32 %v14253_v38, %v13732_v54  ;;  %v653_v6 = vadd.f32 %v14253_v38, %v13767_v23  ;;  %v9592_v54 = vld [vmem:[%s18069_s0 + $0x6c8] sm:$0xff] }
 0x1de   :  { %v1975_v0 = vmax.f32 %v1932_v55, 0.0  ;;  %v1575_v3 = vpop.f32.mrf.mxu0  ;;  %11659 = vmatmul.mubr.msk.f32.gmra.mxu0 %vm80_vm1, %v9590_v33  ;;  %v687_v55 = vmax.f32 %v648_v56, 0.0 }
 0x1df   :  { %v14724_v11 = vmax.f32 %v366_v1, %v1630_v18  ;;  %v1576_v17 = vadd.f32 %v14253_v38, %v1575_v3  ;;  %v1936_v4 = vpop.f32.mrf.mxu1  ;;  %11754 = vmatmul.mubr.msk.f32.gmra.mxu1 %vm80_vm1, %v9645_v57  ;;  %11661 = vmatprep.mubr.msk.f32.mxu0 %vm12684_vm2, %v18098_v58  ;;  %v368_v3 = vmax.f32 %v317_v8, 0.0 }
 0x1e0   :  { %v14733_v49 = vmax.f32 %v686_v43, %v1975_v0  ;;  %v1937_v12 = vadd.f32 %v14253_v38, %v1936_v4  ;;  %v11334_v45 = vpop.f32.mrf.mxu0  ;;  %11756 = vmatprep.mubr.msk.f32.mxu1 %vm12684_vm2, %v18098_v58  ;;  %v9647_v0 = vld [vmem:[%s18069_s0 + $0x7b0] sm:$0xff] }
 0x1e1   :  { %v1631_v27 = vmax.f32 %v1576_v17, 0.0  ;;  %v11429_v33 = vpop.f32.mrf.mxu1  ;;  %v322_v17 = vadd.f32 %v14253_v38, %v13748_v7  ;;  %v658_v45 = vadd.f32 %v14253_v38, %v13783_v34  ;;  %v9593_v7 = vld [vmem:[%s18069_s0 + $0x6d0] sm:$0xff] }
 0x1e2   :  { %v1976_v57 = vmax.f32 %v1937_v12, 0.0  ;;  %v1580_v1 = vpop.f32.mrf.mxu0  ;;  %11662 = vmatmul.mubr.msk.f32.gmra.mxu0 %vm80_vm1, %v9591_v40  ;;  %v688_v12 = vmax.f32 %v653_v6, 0.0 }
 0x1e3   :  { %v14746_v18 = vmax.f32 %v367_v2, %v1631_v27  ;;  %v1581_v24 = vadd.f32 %v14253_v38, %v1580_v1  ;;  %v1941_v43 = vpop.f32.mrf.mxu1  ;;  %11757 = vmatmul.mubr.msk.f32.gmra.mxu1 %vm80_vm1, %v9646_v53  ;;  %11664 = vmatprep.mubr.msk.f32.mxu0 %vm12684_vm2, %v18098_v58  ;;  %v369_v1 = vmax.f32 %v322_v17, 0.0 }
 0x1e4   :  { %v14755_v59 = vmax.f32 %v687_v55, %v1976_v57  ;;  %v1942_v23 = vadd.f32 %v14253_v38, %v1941_v43  ;;  %v11337_v56 = vpop.f32.mrf.mxu0  ;;  %11759 = vmatprep.mubr.msk.f32.mxu1 %vm12684_vm2, %v18098_v58  ;;  %v9648_v57 = vld [vmem:[%s18069_s0 + $0x7b8] sm:$0xff] }
 0x1e5   :  { %v1632_v4 = vmax.f32 %v1581_v24, 0.0  ;;  %v11432_v40 = vpop.f32.mrf.mxu1  ;;  %v327_v24 = vadd.f32 %v14253_v38, %v13764_v22  ;;  %v663_v56 = vadd.f32 %v14253_v38, %v13799_v48  ;;  %v9594_v22 = vld [vmem:[%s18069_s0 + $0x6d8] sm:$0xff] }
 0x1e6   :  { %v1977_v53 = vmax.f32 %v1942_v23, 0.0  ;;  %v1585_v2 = vpop.f32.mrf.mxu0  ;;  %11665 = vmatmul.mubr.msk.f32.gmra.mxu0 %vm80_vm1, %v9592_v54  ;;  %v689_v23 = vmax.f32 %v658_v45, 0.0 }
 0x1e7   :  { %v14768_v27 = vmax.f32 %v368_v3, %v1632_v4  ;;  %v1586_v33 = vadd.f32 %v14253_v38, %v1585_v2  ;;  %v1946_v55 = vpop.f32.mrf.mxu1  ;;  %11760 = vmatmul.mubr.msk.f32.gmra.mxu1 %vm80_vm1, %v9647_v0  ;;  %11667 = vmatprep.mubr.msk.f32.mxu0 %vm12684_vm2, %v18098_v58  ;;  %v370_v2 = vmax.f32 %v327_v24, 0.0  ;;  %v9595_v24 = vld [vmem:[%s18069_s0 + $0x6e0] sm:$0xff] }
 0x1e8   :  { %v14777_v8 = vmax.f32 %v688_v12, %v1977_v53  ;;  %v1947_v34 = vadd.f32 %v14253_v38, %v1946_v55  ;;  %v11340_v6 = vpop.f32.mrf.mxu0  ;;  %11762 = vmatprep.mubr.msk.f32.mxu1 %vm12684_vm2, %v18098_v58  ;;  %v9649_v53 = vld [vmem:[%s18069_s0 + $0x7c0] sm:$0xff] }
 0x1e9   :  { %v1633_v43 = vmax.f32 %v1586_v33, 0.0  ;;  %v11435_v54 = vpop.f32.mrf.mxu1  ;;  %v18144_v33 = vld [vmem:[#allocation2_spill] sm:$0xff]  ;;  %v690_v6 = vmax.f32 %v663_v56, 0.0 }
 0x1ea   :  { %v1978_v0 = vmax.f32 %v1947_v34, 0.0  ;;  %v1590_v3 = vpop.f32.mrf.mxu0  ;;  %11668 = vmatmul.mubr.msk.f32.gmra.mxu0 %vm80_vm1, %v9593_v7  ;;  %v332_v55 = vadd.f32 %v14253_v38, %v18144_v33 }
 0x1eb   :  { %v14790_v4 = vmax.f32 %v369_v1, %v1633_v43  ;;  %v1591_v40 = vadd.f32 %v14253_v38, %v1590_v3  ;;  %v1951_v12 = vpop.f32.mrf.mxu1  ;;  %11763 = vmatmul.mubr.msk.f32.gmra.mxu1 %vm80_vm1, %v9648_v57  ;;  %11670 = vmatprep.mubr.msk.f32.mxu0 %vm12684_vm2, %v18098_v58  ;;  %v18145_v57 = vld [vmem:[#allocation5_spill] sm:$0xff] }
 0x1ec   :  { %v14799_v17 = vmax.f32 %v689_v23, %v1978_v0  ;;  %v1952_v48 = vadd.f32 %v14253_v38, %v1951_v12  ;;  %v11343_v45 = vpop.f32.mrf.mxu0  ;;  %11765 = vmatprep.mubr.msk.f32.mxu1 %vm12684_vm2, %v18098_v58  ;;  %v1175_v1 = vadd.f32 %v14253_v38, %v18145_v57 }
 0x1ed   :  { %18142 = vst [vmem:[#allocation59_spill] sm:$0xff] %v14790_v4  ;;  %v1634_v7 = vmax.f32 %v1591_v40, 0.0  ;;  %v11438_v34 = vpop.f32.mrf.mxu1  ;;  %v14832_v45 = vld [vmem:[%s18070_s2] ss:$0 sm:$0xff] }
 0x1ee   :  { %18143 = vst [vmem:[#allocation60_spill] sm:$0xff] %v14799_v17  ;;  %v1979_v43 = vmax.f32 %v1952_v48, 0.0  ;;  %v1595_v54 = vpop.f32.mrf.mxu0  ;;  %11671 = vmatmul.mubr.msk.f32.gmra.mxu0 %vm80_vm1, %v9594_v22  ;;  %v9650_v22 = vld [vmem:[%s18069_s0 + $0x7c8] sm:$0xff]  ;;  %v371_v48 = vmax.f32 %v332_v55, 0.0 }
 0x1ef   :  { %v14812_v23 = vmax.f32 %v370_v2, %v1634_v7  ;;  %v1596_v0 = vadd.f32 %v14253_v38, %v1595_v54  ;;  %v2513_v3 = vpop.f32.mrf.mxu1  ;;  %11766 = vmatmul.mubr.msk.f32.gmra.mxu1 %vm80_vm1, %v9649_v53  ;;  %11673 = vmatprep.mubr.msk.f32.mxu0 %vm12684_vm2, %v18098_v58  ;;  %v18148_v53 = vld [vmem:[#allocation3_spill] sm:$0xff] }
 0x1f0   :  { %v14821_v56 = vmax.f32 %v690_v6, %v1979_v43  ;;  %v2514_v40 = vadd.f32 %v14253_v38, %v2513_v3  ;;  %v11346_v12 = vpop.f32.mrf.mxu0  ;;  %11768 = vmatprep.mubr.msk.f32.mxu1 %vm12684_vm2, %v18098_v58  ;;  %v337_v2 = vadd.f32 %v14832_v45, %v18148_v53  ;;  %v1298_v38 = vmax.f32 %v1175_v1, 0.0  ;;  %v18149_v34 = vld [vmem:[#allocation7_spill] sm:$0xff] }
 0x1f1   :  { %18146 = vst [vmem:[#allocation2_spill] sm:$0xff] %v14812_v23  ;;  %v1635_v33 = vmax.f32 %v1596_v0, 0.0  ;;  %v11532_v7 = vpop.f32.mrf.mxu1  ;;  %v1180_v6 = vadd.f32 %v14832_v45, %v18149_v34  ;;  %v9596_v1 = vld [vmem:[%s18069_s0 + $0x6e8] sm:$0xff] }
 0x1f2   :  { %18147 = vst [vmem:[#allocation5_spill] sm:$0xff] %v14821_v56  ;;  %v2637_v57 = vmax.f32 %v2514_v40, 0.0  ;;  %v1600_v43 = vpop.f32.mrf.mxu0  ;;  %11674 = vmatmul.mubr.msk.f32.gmra.mxu0 %vm80_vm1, %v9595_v24  ;;  %v9728_v24 = vld [vmem:[%s18069_s0 + $0x898] sm:$0xff] }
 0x1f3   :  { %v14839_v54 = vmax.f32 %v371_v48, %v1635_v33  ;;  %v1601_v55 = vadd.f32 %v14832_v45, %v1600_v43  ;;  %v2518_v3 = vpop.f32.mrf.mxu1  ;;  %11769 = vmatmul.mubr.msk.f32.gmra.mxu1 %vm80_vm1, %v9650_v22  ;;  %11676 = vmatprep.mubr.msk.f32.mxu0 %vm12684_vm2, %v18098_v58  ;;  %v372_v22 = vmax.f32 %v337_v2, 0.0  ;;  %v18152_v48 = vld [vmem:[#allocation4_spill] sm:$0xff]  ;;  %v1299_v34 = vmax.f32 %v1180_v6, 0.0 }
 0x1f4   :  { %v14848_v0 = vmax.f32 %v1298_v38, %v2637_v57  ;;  %v2519_v40 = vadd.f32 %v14832_v45, %v2518_v3  ;;  %v11349_v12 = vpop.f32.mrf.mxu0  ;;  %11862 = vmatprep.mubr.msk.f32.mxu1 %vm12684_vm2, %v18098_v58  ;;  %v342_v53 = vadd.f32 %v14832_v45, %v18152_v48  ;;  %v18153_v43 = vld [vmem:[#allocation8_spill] sm:$0xff]  ;;  %v18156_v48 = vld [vmem:[#allocation6_spill] sm:$0xff] }
 0x1f5   :  { %18150 = vst [vmem:[#allocation3_spill] sm:$0xff] %v14839_v54  ;;  %v1636_v33 = vmax.f32 %v1601_v55, 0.0  ;;  %v11535_v7 = vpop.f32.mrf.mxu1  ;;  %v1185_v38 = vadd.f32 %v14832_v45, %v18153_v43  ;;  %v9597_v2 = vld [vmem:[%s18069_s0 + $0x6f0] sm:$0xff]  ;;  %v18157_v43 = vld [vmem:[#allocation9_spill] sm:$0xff] }
 0x1f6   :  { %18151 = vst [vmem:[#allocation7_spill] sm:$0xff] %v14848_v0  ;;  %v2638_v57 = vmax.f32 %v2519_v40, 0.0  ;;  %v1605_v3 = vpop.f32.mrf.mxu0  ;;  %11677 = vmatmul.mubr.msk.f32.gmra.mxu0 %vm80_vm1, %v9596_v1  ;;  %v9729_v1 = vld [vmem:[%s18069_s0 + $0x8a0] sm:$0xff] }
 0x1f7   :  { %v14861_v12 = vmax.f32 %v372_v22, %v1636_v33  ;;  %v1606_v0 = vadd.f32 %v14832_v45, %v1605_v3  ;;  %v2523_v54 = vpop.f32.mrf.mxu1  ;;  %11863 = vmatmul.mubr.msk.f32.vlgmr.msra.gmra.mxu1 %vm80_vm1, %v9728_v24  ;;  %11679 = vmatprep.mubr.msk.f32.mxu0 %vm12684_vm2, %v18098_v58  ;;  %v14881_v24 = vld [vmem:[%s18068_s1 + $0x18] sm:$0x1]  ;;  %v373_v22 = vmax.f32 %v342_v53, 0.0 }
 0x1f8   :  { %v14870_v6 = vmax.f32 %v1299_v34, %v2638_v57  ;;  %v2524_v55 = vadd.f32 %v14832_v45, %v2523_v54  ;;  %v11352_v40 = vpop.f32.mrf.mxu0  ;;  %11865 = vmatprep.mubr.msk.f32.mxu1 %vm12684_vm2, %v18098_v58  ;;  %12021 = vmatpush3.msk.msra.mxu1 %vm156_vm0, %v14881_v24  ;;  %v347_v54 = vadd.f32 %v14832_v45, %v18156_v48  ;;  %v1300_v34 = vmax.f32 %v1185_v38, 0.0  ;;  %v9598_v38 = vld [vmem:[%s18069_s0 + $0x6f8] sm:$0xff] }
 0x1f9   :  { %18154 = vst [vmem:[#allocation4_spill] sm:$0xff] %v14861_v12  ;;  %v1637_v33 = vmax.f32 %v1606_v0, 0.0  ;;  %v11538_v7 = vpop.f32.mrf.mxu1  ;;  %12022 = vmatprep.subr.mxu1 %v18098_v58  ;;  %v1190_v57 = vadd.f32 %v14832_v45, %v18157_v43 }
 0x1fa   :  { %18155 = vst [vmem:[#allocation8_spill] sm:$0xff] %v14870_v6  ;;  %v2639_v3 = vmax.f32 %v2524_v55, 0.0  ;;  %v1610_v40 = vpop.f32.mrf.mxu0  ;;  %11680 = vmatmul.mubr.msk.f32.gmra.mxu0 %vm80_vm1, %v9597_v2  ;;  %v14894_v6 = vld [vmem:[%s18068_s1 + $0x10] sm:$0xff] }
 0x1fb   :  { %12023 = vmatpush3.msra.mxu1 %v14894_v6  ;;  %v14897_v53 = vmax.f32 %v373_v22, %v1637_v33  ;;  %v1611_v0 = vadd.f32 %v14832_v45, %v1610_v40  ;;  %v2528_v48 = vpop.f32.mrf.mxu1  ;;  %11682 = vmatprep.mubr.msk.f32.mxu0 %vm12684_vm2, %v18098_v58  ;;  %v9730_v22 = vld [vmem:[%s18069_s0 + $0x8a8] sm:$0xff]  ;;  %v18160_v33 = vld [vmem:[#allocation10_spill] sm:$0xff] }
 0x1fc   :  { %11866 = vmatmul.mubr.msk.f32.gmra.mxu1 %vm80_vm1, %v9729_v1  ;;  %v14906_v2 = vmax.f32 %v1300_v34, %v2639_v3  ;;  %v2529_v55 = vadd.f32 %v14832_v45, %v2528_v48  ;;  %v11355_v7 = vpop.f32.mrf.mxu0  ;;  %12024 = vmatprep.subr.mxu1 %v18098_v58  ;;  %v374_v1 = vmax.f32 %v347_v54, 0.0  ;;  %v859_v43 = vadd.f32 %v14832_v45, %v18160_v33  ;;  %v14920_v34 = vld [vmem:[%s18068_s1 + $0x8] sm:$0xff] }
 0x1fd   :  { %18158 = vst [vmem:[#allocation6_spill] sm:$0xff] %v14897_v53  ;;  %11868 = vmatprep.mubr.msk.f32.mxu1 %vm12684_vm2, %v18098_v58  ;;  %v1638_v40 = vmax.f32 %v1611_v0, 0.0  ;;  %v11541_v53 = vpop.f32.mrf.mxu1  ;;  %12025 = vmatpush3.msra.mxu1 %v14920_v34  ;;  %v1301_v3 = vmax.f32 %v1190_v57, 0.0  ;;  %v18161_v48 = vld [vmem:[#allocation11_spill] sm:$0xff]  ;;  %v9599_v57 = vld [vmem:[%s18069_s0 + $0x700] sm:$0xff] }
 0x1fe   :  { %18159 = vst [vmem:[#allocation9_spill] sm:$0xff] %v14906_v2  ;;  %v1195_v7 = vadd.f32 %v14832_v45, %v18161_v48  ;;  %v2640_v2 = vmax.f32 %v2529_v55, 0.0  ;;  %v2172_v12 = vpop.f32.mrf.mxu0  ;;  %11683 = vmatmul.mubr.msk.f32.gmra.mxu0 %vm80_vm1, %v9598_v38  ;;  %12026 = vmatprep.subr.mxu1 %v18098_v58 }
 0x1ff   :  { %v14927_v54 = vmax.f32 %v374_v1, %v1638_v40  ;;  %v2173_v53 = vadd.f32 %v14832_v45, %v2172_v12  ;;  %v2533_v0 = vpop.f32.mrf.mxu1  ;;  %11685 = vmatprep.mubr.msk.f32.mxu0 %vm12684_vm2, %v18098_v58  ;;  %v9731_v12 = vld [vmem:[%s18069_s0 + $0x8b0] sm:$0xff]  ;;  %v982_v1 = vmax.f32 %v859_v43, 0.0 }
 0x200   :  { %11869 = vmatmul.mubr.msk.f32.gmra.mxu1 %vm80_vm1, %v9730_v22  ;;  %v14936_v55 = vmax.f32 %v1301_v3, %v2640_v2  ;;  %v2534_v38 = vadd.f32 %v14832_v45, %v2533_v0  ;;  %v11449_v33 = vpop.f32.mrf.mxu0  ;;  %v14947_v22 = vld [vmem:[%s18068_s1] sm:$0xff]  ;;  %v18164_v2 = vld [vmem:[#allocation12_spill] sm:$0xff]  ;;  %v1302_v0 = vmax.f32 %v1195_v7, 0.0 }
 0x201   :  { %18162 = vst [vmem:[#allocation10_spill] sm:$0xff] %v14927_v54  ;;  %11871 = vmatprep.mubr.msk.f32.mxu1 %vm12684_vm2, %v18098_v58  ;;  %12027 = vmatpush3.msra.mxu1 %v14947_v22  ;;  %v864_v40 = vadd.f32 %v14832_v45, %v18164_v2  ;;  %v2296_v3 = vmax.f32 %v2173_v53, 0.0  ;;  %v11544_v48 = vpop.f32.mrf.mxu1  ;;  %v18165_v33 = vld [vmem:[#allocation13_spill] sm:$0xff]  ;;  %v9677_v7 = vld [vmem:[%s18069_s0 + $0x7d0] sm:$0xff] }
 0x202   :  { %18163 = vst [vmem:[#allocation11_spill] sm:$0xff] %v14936_v55  ;;  %12186 = vmatprep.subr.mxu1 %v18098_v58  ;;  %v1200_v55 = vadd.f32 %v14832_v45, %v18165_v33  ;;  %v2641_v54 = vmax.f32 %v2534_v38, 0.0  ;;  %v2177_v56 = vpop.f32.mrf.mxu0  ;;  %11686 = vmatmul.mubr.msk.f32.gmra.mxu0 %vm80_vm1, %v9599_v57 }
 0x203   :  { %v14956_v23 = vmax.f32 %v982_v1, %v2296_v3  ;;  %v2178_v17 = vadd.f32 %v14832_v45, %v2177_v56  ;;  %v2538_v43 = vpop.f32.mrf.mxu1  ;;  %11779 = vmatprep.mubr.msk.f32.mxu0 %vm12684_vm2, %v18098_v58  ;;  %v9732_v56 = vld [vmem:[%s18069_s0 + $0x8b8] sm:$0xff]  ;;  %v983_v57 = vmax.f32 %v864_v40, 0.0 }
 0x204   :  { %11872 = vmatmul.mubr.msk.f32.gmra.mxu1 %vm80_vm1, %v9731_v12  ;;  %v14965_v53 = vmax.f32 %v1302_v0, %v2641_v54  ;;  %v2539_v38 = vadd.f32 %v14832_v45, %v2538_v43  ;;  %v11452_v2 = vpop.f32.mrf.mxu0  ;;  %v18168_v12 = vld [vmem:[#allocation14_spill] sm:$0xff]  ;;  %v1303_v33 = vmax.f32 %v1200_v55, 0.0 }
 0x205   :  { %18166 = vst [vmem:[#allocation12_spill] sm:$0xff] %v14956_v23  ;;  %11874 = vmatprep.mubr.msk.f32.mxu1 %vm12684_vm2, %v18098_v58  ;;  %v869_v1 = vadd.f32 %v14832_v45, %v18168_v12  ;;  %v2297_v3 = vmax.f32 %v2178_v17, 0.0  ;;  %v11547_v48 = vpop.f32.mrf.mxu1  ;;  %v18169_v23 = vld [vmem:[#allocation15_spill] sm:$0xff]  ;;  %v9678_v17 = vld [vmem:[%s18069_s0 + $0x7d8] sm:$0xff] }
 0x206   :  { %18167 = vst [vmem:[#allocation13_spill] sm:$0xff] %v14965_v53  ;;  %v1205_v54 = vadd.f32 %v14832_v45, %v18169_v23  ;;  %v2642_v0 = vmax.f32 %v2539_v38, 0.0  ;;  %v2182_v43 = vpop.f32.mrf.mxu0  ;;  %11780 = vmatmul.mubr.msk.f32.vlgmr.msra.gmra.mxu0 %vm80_vm1, %v9677_v7  ;;  %v9733_v7 = vld [vmem:[%s18069_s0 + $0x8c0] sm:$0xff]  ;;  %v18173_v48 = vld [vmem:[#allocation17_spill] sm:$0xff] }
 0x207   :  { %v14978_v2 = vmax.f32 %v983_v57, %v2297_v3  ;;  %v2183_v53 = vadd.f32 %v14832_v45, %v2182_v43  ;;  %v2543_v4 = vpop.f32.mrf.mxu1  ;;  %11938 = vmatpush3.msk.msra.mxu0 %vm156_vm0, %v14881_v24  ;;  %11782 = vmatprep.mubr.msk.f32.mxu0 %vm12684_vm2, %v18098_v58  ;;  %v984_v38 = vmax.f32 %v869_v1, 0.0 }
 0x208   :  { %11875 = vmatmul.mubr.msk.f32.gmra.mxu1 %vm80_vm1, %v9732_v56  ;;  %v14987_v55 = vmax.f32 %v1303_v33, %v2642_v0  ;;  %v2544_v23 = vadd.f32 %v14832_v45, %v2543_v4  ;;  %v11455_v40 = vpop.f32.mrf.mxu0  ;;  %v18172_v56 = vld [vmem:[#allocation16_spill] sm:$0xff]  ;;  %11939 = vmatprep.subr.mxu0 %v18098_v58  ;;  %v1304_v4 = vmax.f32 %v1205_v54, 0.0  ;;  %v1210_v33 = vadd.f32 %v14832_v45, %v18173_v48 }
 0x209   :  { %18170 = vst [vmem:[#allocation14_spill] sm:$0xff] %v14978_v2  ;;  %11877 = vmatprep.mubr.msk.f32.mxu1 %vm12684_vm2, %v18098_v58  ;;  %v874_v57 = vadd.f32 %v14832_v45, %v18172_v56  ;;  %v2298_v12 = vmax.f32 %v2183_v53, 0.0  ;;  %v11550_v3 = vpop.f32.mrf.mxu1  ;;  %v9679_v53 = vld [vmem:[%s18069_s0 + $0x7e0] sm:$0xff]  ;;  %11940 = vmatpush3.msra.mxu0 %v14894_v6 }
 0x20a   :  { %18171 = vst [vmem:[#allocation15_spill] sm:$0xff] %v14987_v55  ;;  %v2643_v0 = vmax.f32 %v2544_v23, 0.0  ;;  %v2187_v43 = vpop.f32.mrf.mxu0  ;;  %11783 = vmatmul.mubr.msk.f32.gmra.mxu0 %vm80_vm1, %v9678_v17  ;;  %v9734_v17 = vld [vmem:[%s18069_s0 + $0x8c8] sm:$0xff]  ;;  %11941 = vmatprep.subr.mxu0 %v18098_v58 }
 0x20b   :  { %v15003_v40 = vmax.f32 %v984_v38, %v2298_v12  ;;  %v2188_v55 = vadd.f32 %v14832_v45, %v2187_v43  ;;  %v2548_v1 = vpop.f32.mrf.mxu1  ;;  %11785 = vmatprep.mubr.msk.f32.mxu0 %vm12684_vm2, %v18098_v58  ;;  %v18176_v38 = vld [vmem:[#allocation18_spill] sm:$0xff]  ;;  %11942 = vmatpush3.msra.mxu0 %v14920_v34 }
 0x20c   :  { %11878 = vmatmul.mubr.msk.f32.gmra.mxu1 %vm80_vm1, %v9733_v7  ;;  %v15012_v54 = vmax.f32 %v1304_v4, %v2643_v0  ;;  %v2549_v23 = vadd.f32 %v14832_v45, %v2548_v1  ;;  %v11458_v56 = vpop.f32.mrf.mxu0  ;;  %v985_v7 = vmax.f32 %v874_v57, 0.0  ;;  %v879_v12 = vadd.f32 %v14832_v45, %v18176_v38  ;;  %v18177_v0 = vld [vmem:[#allocation19_spill] sm:$0xff]  ;;  %11943 = vmatprep.subr.mxu0 %v18098_v58 }
 0x20d   :  { %18174 = vst [vmem:[#allocation16_spill] sm:$0xff] %v15003_v40  ;;  %11880 = vmatprep.mubr.msk.f32.mxu1 %vm12684_vm2, %v18098_v58  ;;  %v2299_v3 = vmax.f32 %v2188_v55, 0.0  ;;  %v11553_v48 = vpop.f32.mrf.mxu1  ;;  %v1305_v4 = vmax.f32 %v1210_v33, 0.0  ;;  %v1215_v43 = vadd.f32 %v14832_v45, %v18177_v0  ;;  %v9680_v55 = vld [vmem:[%s18069_s0 + $0x7e8] sm:$0xff]  ;;  %11944 = vmatpush3.msra.mxu0 %v14947_v22 }
 0x20e   :  { %18175 = vst [vmem:[#allocation17_spill] sm:$0xff] %v15012_v54  ;;  %v2644_v1 = vmax.f32 %v2549_v23, 0.0  ;;  %v2192_v56 = vpop.f32.mrf.mxu0  ;;  %11786 = vmatmul.mubr.msk.f32.gmra.mxu0 %vm80_vm1, %v9679_v53  ;;  %v9735_v53 = vld [vmem:[%s18069_s0 + $0x8d0] sm:$0xff]  ;;  %12103 = vmatprep.subr.mxu0 %v18098_v58 }
 0x20f   :  { %v15027_v54 = vmax.f32 %v985_v7, %v2299_v3  ;;  %v2193_v40 = vadd.f32 %v14832_v45, %v2192_v56  ;;  %v2553_v57 = vpop.f32.mrf.mxu1  ;;  %11788 = vmatprep.mubr.msk.f32.mxu0 %vm12684_vm2, %v18098_v58  ;;  %v18180_v7 = vld [vmem:[#allocation20_spill] sm:$0xff] }
 0x210   :  { %11881 = vmatmul.mubr.msk.f32.gmra.mxu1 %vm80_vm1, %v9734_v17  ;;  %v15036_v33 = vmax.f32 %v1305_v4, %v2644_v1  ;;  %v2554_v23 = vadd.f32 %v14832_v45, %v2553_v57  ;;  %v11461_v38 = vpop.f32.mrf.mxu0  ;;  %v986_v17 = vmax.f32 %v879_v12, 0.0  ;;  %v884_v3 = vadd.f32 %v14832_v45, %v18180_v7  ;;  %v18181_v1 = vld [vmem:[#allocation21_spill] sm:$0xff] }
 0x211   :  { %18178 = vst [vmem:[#allocation18_spill] sm:$0xff] %v15027_v54  ;;  %11883 = vmatprep.mubr.msk.f32.mxu1 %vm12684_vm2, %v18098_v58  ;;  %v2300_v48 = vmax.f32 %v2193_v40, 0.0  ;;  %v11556_v0 = vpop.f32.mrf.mxu1  ;;  %v1306_v4 = vmax.f32 %v1215_v43, 0.0  ;;  %v1220_v56 = vadd.f32 %v14832_v45, %v18181_v1  ;;  %v9681_v40 = vld [vmem:[%s18069_s0 + $0x7f0] sm:$0xff] }
 0x212   :  { %18179 = vst [vmem:[#allocation19_spill] sm:$0xff] %v15036_v33  ;;  %v2645_v57 = vmax.f32 %v2554_v23, 0.0  ;;  %v2197_v38 = vpop.f32.mrf.mxu0  ;;  %11789 = vmatmul.mubr.msk.f32.gmra.mxu0 %vm80_vm1, %v9680_v55  ;;  %v9736_v55 = vld [vmem:[%s18069_s0 + $0x8d8] sm:$0xff] }
 0x213   :  { %v15051_v33 = vmax.f32 %v986_v17, %v2300_v48  ;;  %v2198_v54 = vadd.f32 %v14832_v45, %v2197_v38  ;;  %v2558_v12 = vpop.f32.mrf.mxu1  ;;  %11791 = vmatprep.mubr.msk.f32.mxu0 %vm12684_vm2, %v18098_v58  ;;  %v18184_v17 = vld [vmem:[#allocation22_spill] sm:$0xff] }
 0x214   :  { %11884 = vmatmul.mubr.msk.f32.gmra.mxu1 %vm80_vm1, %v9735_v53  ;;  %v15060_v43 = vmax.f32 %v1306_v4, %v2645_v57  ;;  %v2559_v23 = vadd.f32 %v14832_v45, %v2558_v12  ;;  %v11464_v7 = vpop.f32.mrf.mxu0  ;;  %v987_v53 = vmax.f32 %v884_v3, 0.0  ;;  %v889_v48 = vadd.f32 %v14832_v45, %v18184_v17  ;;  %v18185_v57 = vld [vmem:[#allocation23_spill] sm:$0xff] }
 0x215   :  { %18182 = vst [vmem:[#allocation20_spill] sm:$0xff] %v15051_v33  ;;  %11886 = vmatprep.mubr.msk.f32.mxu1 %vm12684_vm2, %v18098_v58  ;;  %v2301_v0 = vmax.f32 %v2198_v54, 0.0  ;;  %v11559_v1 = vpop.f32.mrf.mxu1  ;;  %v1307_v4 = vmax.f32 %v1220_v56, 0.0  ;;  %v1225_v38 = vadd.f32 %v14832_v45, %v18185_v57  ;;  %v9682_v54 = vld [vmem:[%s18069_s0 + $0x7f8] sm:$0xff] }
 0x216   :  { %18183 = vst [vmem:[#allocation21_spill] sm:$0xff] %v15060_v43  ;;  %v2646_v12 = vmax.f32 %v2559_v23, 0.0  ;;  %v2202_v7 = vpop.f32.mrf.mxu0  ;;  %11792 = vmatmul.mubr.msk.f32.gmra.mxu0 %vm80_vm1, %v9681_v40  ;;  %v9737_v40 = vld [vmem:[%s18069_s0 + $0x8e0] sm:$0xff] }
 0x217   :  { %v15075_v43 = vmax.f32 %v987_v53, %v2301_v0  ;;  %v2203_v33 = vadd.f32 %v14832_v45, %v2202_v7  ;;  %v2563_v3 = vpop.f32.mrf.mxu1  ;;  %11794 = vmatprep.mubr.msk.f32.mxu0 %vm12684_vm2, %v18098_v58  ;;  %v18188_v53 = vld [vmem:[#allocation24_spill] sm:$0xff]  ;;  %v1308_v7 = vmax.f32 %v1225_v38, 0.0 }
 0x218   :  { %11887 = vmatmul.mubr.msk.f32.gmra.mxu1 %vm80_vm1, %v9736_v55  ;;  %v15084_v56 = vmax.f32 %v1307_v4, %v2646_v12  ;;  %v2564_v23 = vadd.f32 %v14832_v45, %v2563_v3  ;;  %v11467_v17 = vpop.f32.mrf.mxu0  ;;  %v988_v55 = vmax.f32 %v889_v48, 0.0  ;;  %v894_v0 = vadd.f32 %v14832_v45, %v18188_v53 }
 0x219   :  { %18186 = vst [vmem:[#allocation22_spill] sm:$0xff] %v15075_v43  ;;  %11889 = vmatprep.mubr.msk.f32.mxu1 %vm12684_vm2, %v18098_v58  ;;  %v2302_v1 = vmax.f32 %v2203_v33, 0.0  ;;  %v11562_v57 = vpop.f32.mrf.mxu1  ;;  %v18189_v43 = vld [vmem:[#allocation25_spill] sm:$0xff]  ;;  %v9683_v33 = vld [vmem:[%s18069_s0 + $0x800] sm:$0xff] }
 0x21a   :  { %18187 = vst [vmem:[#allocation23_spill] sm:$0xff] %v15084_v56  ;;  %v1230_v4 = vadd.f32 %v14832_v45, %v18189_v43  ;;  %v2647_v12 = vmax.f32 %v2564_v23, 0.0  ;;  %v2207_v3 = vpop.f32.mrf.mxu0  ;;  %11795 = vmatmul.mubr.msk.f32.gmra.mxu0 %vm80_vm1, %v9682_v54  ;;  %v9738_v54 = vld [vmem:[%s18069_s0 + $0x8e8] sm:$0xff]  ;;  %v989_v23 = vmax.f32 %v894_v0, 0.0 }
 0x21b   :  { %v15097_v17 = vmax.f32 %v988_v55, %v2302_v1  ;;  %v2208_v56 = vadd.f32 %v14832_v45, %v2207_v3  ;;  %v2568_v2 = vpop.f32.mrf.mxu1  ;;  %11797 = vmatprep.mubr.msk.f32.mxu0 %vm12684_vm2, %v18098_v58  ;;  %v18193_v3 = vld [vmem:[#allocation27_spill] sm:$0xff] }
 0x21c   :  { %11890 = vmatmul.mubr.msk.f32.gmra.mxu1 %vm80_vm1, %v9737_v40  ;;  %v15106_v48 = vmax.f32 %v1308_v7, %v2647_v12  ;;  %v2569_v43 = vadd.f32 %v14832_v45, %v2568_v2  ;;  %v11470_v38 = vpop.f32.mrf.mxu0  ;;  %v18192_v40 = vld [vmem:[#allocation26_spill] sm:$0xff]  ;;  %v1309_v57 = vmax.f32 %v1230_v4, 0.0  ;;  %v1235_v7 = vadd.f32 %v14832_v45, %v18193_v3 }
 0x21d   :  { %18190 = vst [vmem:[#allocation24_spill] sm:$0xff] %v15097_v17  ;;  %11892 = vmatprep.mubr.msk.f32.mxu1 %vm12684_vm2, %v18098_v58  ;;  %v899_v55 = vadd.f32 %v14832_v45, %v18192_v40  ;;  %v2303_v53 = vmax.f32 %v2208_v56, 0.0  ;;  %v11565_v1 = vpop.f32.mrf.mxu1  ;;  %v9684_v56 = vld [vmem:[%s18069_s0 + $0x808] sm:$0xff] }
 0x21e   :  { %18191 = vst [vmem:[#allocation25_spill] sm:$0xff] %v15106_v48  ;;  %v2648_v12 = vmax.f32 %v2569_v43, 0.0  ;;  %v2212_v2 = vpop.f32.mrf.mxu0  ;;  %11798 = vmatmul.mubr.msk.f32.gmra.mxu0 %vm80_vm1, %v9683_v33  ;;  %v9739_v33 = vld [vmem:[%s18069_s0 + $0x8f0] sm:$0xff]  ;;  %v1310_v3 = vmax.f32 %v1235_v7, 0.0 }
 0x21f   :  { %v15119_v38 = vmax.f32 %v989_v23, %v2303_v53  ;;  %v2213_v48 = vadd.f32 %v14832_v45, %v2212_v2  ;;  %v2573_v17 = vpop.f32.mrf.mxu1  ;;  %11800 = vmatprep.mubr.msk.f32.mxu0 %vm12684_vm2, %v18098_v58  ;;  %v18196_v23 = vld [vmem:[#allocation28_spill] sm:$0xff]  ;;  %v18197_v2 = vld [vmem:[#allocation29_spill] sm:$0xff] }
 0x220   :  { %11893 = vmatmul.mubr.msk.f32.gmra.mxu1 %vm80_vm1, %v9738_v54  ;;  %v15128_v0 = vmax.f32 %v1309_v57, %v2648_v12  ;;  %v2574_v4 = vadd.f32 %v14832_v45, %v2573_v17  ;;  %v11473_v43 = vpop.f32.mrf.mxu0  ;;  %v990_v54 = vmax.f32 %v899_v55, 0.0  ;;  %v904_v40 = vadd.f32 %v14832_v45, %v18196_v23 }
 0x221   :  { %18194 = vst [vmem:[#allocation26_spill] sm:$0xff] %v15119_v38  ;;  %11895 = vmatprep.mubr.msk.f32.mxu1 %vm12684_vm2, %v18098_v58  ;;  %v2304_v53 = vmax.f32 %v2213_v48, 0.0  ;;  %v11568_v1 = vpop.f32.mrf.mxu1  ;;  %v1240_v57 = vadd.f32 %v14832_v45, %v18197_v2  ;;  %v9685_v48 = vld [vmem:[%s18069_s0 + $0x810] sm:$0xff] }
 0x222   :  { %18195 = vst [vmem:[#allocation27_spill] sm:$0xff] %v15128_v0  ;;  %v2649_v12 = vmax.f32 %v2574_v4, 0.0  ;;  %v2217_v17 = vpop.f32.mrf.mxu0  ;;  %11801 = vmatmul.mubr.msk.f32.gmra.mxu0 %vm80_vm1, %v9684_v56  ;;  %v9740_v56 = vld [vmem:[%s18069_s0 + $0x8f8] sm:$0xff] }
 0x223   :  { %v15141_v43 = vmax.f32 %v990_v54, %v2304_v53  ;;  %v2218_v0 = vadd.f32 %v14832_v45, %v2217_v17  ;;  %v2578_v38 = vpop.f32.mrf.mxu1  ;;  %11803 = vmatprep.mubr.msk.f32.mxu0 %vm12684_vm2, %v18098_v58  ;;  %v18200_v54 = vld [vmem:[#allocation30_spill] sm:$0xff]  ;;  %v1311_v2 = vmax.f32 %v1240_v57, 0.0  ;;  %v18201_v17 = vld [vmem:[#allocation31_spill] sm:$0xff] }
 0x224   :  { %11896 = vmatmul.mubr.msk.f32.gmra.mxu1 %vm80_vm1, %v9739_v33  ;;  %v15150_v55 = vmax.f32 %v1310_v3, %v2649_v12  ;;  %v2579_v7 = vadd.f32 %v14832_v45, %v2578_v38  ;;  %v11476_v4 = vpop.f32.mrf.mxu0  ;;  %v991_v33 = vmax.f32 %v904_v40, 0.0  ;;  %v909_v23 = vadd.f32 %v14832_v45, %v18200_v54 }
 0x225   :  { %18198 = vst [vmem:[#allocation28_spill] sm:$0xff] %v15141_v43  ;;  %11898 = vmatprep.mubr.msk.f32.mxu1 %vm12684_vm2, %v18098_v58  ;;  %v2305_v53 = vmax.f32 %v2218_v0, 0.0  ;;  %v11571_v1 = vpop.f32.mrf.mxu1  ;;  %v1245_v3 = vadd.f32 %v14832_v45, %v18201_v17  ;;  %v9686_v0 = vld [vmem:[%s18069_s0 + $0x818] sm:$0xff] }
 0x226   :  { %18199 = vst [vmem:[#allocation29_spill] sm:$0xff] %v15150_v55  ;;  %v2650_v12 = vmax.f32 %v2579_v7, 0.0  ;;  %v2222_v38 = vpop.f32.mrf.mxu0  ;;  %11804 = vmatmul.mubr.msk.f32.gmra.mxu0 %vm80_vm1, %v9685_v48  ;;  %v9741_v48 = vld [vmem:[%s18069_s0 + $0x900] sm:$0xff] }
 0x227   :  { %v15163_v4 = vmax.f32 %v991_v33, %v2305_v53  ;;  %v2223_v55 = vadd.f32 %v14832_v45, %v2222_v38  ;;  %v2583_v43 = vpop.f32.mrf.mxu1  ;;  %11806 = vmatprep.mubr.msk.f32.mxu0 %vm12684_vm2, %v18098_v58  ;;  %v18204_v33 = vld [vmem:[#allocation32_spill] sm:$0xff]  ;;  %v1312_v17 = vmax.f32 %v1245_v3, 0.0  ;;  %v18205_v38 = vld [vmem:[#allocation33_spill] sm:$0xff] }
 0x228   :  { %11899 = vmatmul.mubr.msk.f32.gmra.mxu1 %vm80_vm1, %v9740_v56  ;;  %v15172_v40 = vmax.f32 %v1311_v2, %v2650_v12  ;;  %v2584_v57 = vadd.f32 %v14832_v45, %v2583_v43  ;;  %v11479_v7 = vpop.f32.mrf.mxu0  ;;  %v992_v56 = vmax.f32 %v909_v23, 0.0  ;;  %v914_v54 = vadd.f32 %v14832_v45, %v18204_v33 }
 0x229   :  { %18202 = vst [vmem:[#allocation30_spill] sm:$0xff] %v15163_v4  ;;  %11901 = vmatprep.mubr.msk.f32.mxu1 %vm12684_vm2, %v18098_v58  ;;  %v2306_v53 = vmax.f32 %v2223_v55, 0.0  ;;  %v11574_v1 = vpop.f32.mrf.mxu1  ;;  %v1250_v2 = vadd.f32 %v14832_v45, %v18205_v38  ;;  %v9687_v55 = vld [vmem:[%s18069_s0 + $0x820] sm:$0xff] }
 0x22a   :  { %18203 = vst [vmem:[#allocation31_spill] sm:$0xff] %v15172_v40  ;;  %v2651_v12 = vmax.f32 %v2584_v57, 0.0  ;;  %v2227_v43 = vpop.f32.mrf.mxu0  ;;  %11807 = vmatmul.mubr.msk.f32.gmra.mxu0 %vm80_vm1, %v9686_v0  ;;  %v9742_v0 = vld [vmem:[%s18069_s0 + $0x908] sm:$0xff] }
 0x22b   :  { %v15185_v7 = vmax.f32 %v992_v56, %v2306_v53  ;;  %v2228_v40 = vadd.f32 %v14832_v45, %v2227_v43  ;;  %v2588_v4 = vpop.f32.mrf.mxu1  ;;  %11809 = vmatprep.mubr.msk.f32.mxu0 %vm12684_vm2, %v18098_v58  ;;  %v18208_v56 = vld [vmem:[#allocation34_spill] sm:$0xff]  ;;  %v1313_v38 = vmax.f32 %v1250_v2, 0.0  ;;  %v18209_v43 = vld [vmem:[#allocation35_spill] sm:$0xff] }
 0x22c   :  { %11902 = vmatmul.mubr.msk.f32.gmra.mxu1 %vm80_vm1, %v9741_v48  ;;  %v15194_v23 = vmax.f32 %v1312_v17, %v2651_v12  ;;  %v2589_v3 = vadd.f32 %v14832_v45, %v2588_v4  ;;  %v11482_v57 = vpop.f32.mrf.mxu0  ;;  %v993_v48 = vmax.f32 %v914_v54, 0.0  ;;  %v919_v33 = vadd.f32 %v14832_v45, %v18208_v56 }
 0x22d   :  { %18206 = vst [vmem:[#allocation32_spill] sm:$0xff] %v15185_v7  ;;  %11904 = vmatprep.mubr.msk.f32.mxu1 %vm12684_vm2, %v18098_v58  ;;  %v2307_v53 = vmax.f32 %v2228_v40, 0.0  ;;  %v11577_v1 = vpop.f32.mrf.mxu1  ;;  %v1255_v17 = vadd.f32 %v14832_v45, %v18209_v43  ;;  %v9688_v40 = vld [vmem:[%s18069_s0 + $0x828] sm:$0xff] }
 0x22e   :  { %18207 = vst [vmem:[#allocation33_spill] sm:$0xff] %v15194_v23  ;;  %v2652_v12 = vmax.f32 %v2589_v3, 0.0  ;;  %v2232_v4 = vpop.f32.mrf.mxu0  ;;  %11810 = vmatmul.mubr.msk.f32.gmra.mxu0 %vm80_vm1, %v9687_v55  ;;  %v9743_v55 = vld [vmem:[%s18069_s0 + $0x910] sm:$0xff] }
 0x22f   :  { %v15207_v57 = vmax.f32 %v993_v48, %v2307_v53  ;;  %v2233_v23 = vadd.f32 %v14832_v45, %v2232_v4  ;;  %v2593_v7 = vpop.f32.mrf.mxu1  ;;  %11812 = vmatprep.mubr.msk.f32.mxu0 %vm12684_vm2, %v18098_v58  ;;  %v18212_v48 = vld [vmem:[#allocation36_spill] sm:$0xff]  ;;  %v1314_v43 = vmax.f32 %v1255_v17, 0.0  ;;  %v18213_v4 = vld [vmem:[#allocation37_spill] sm:$0xff] }
 0x230   :  { %11905 = vmatmul.mubr.msk.f32.gmra.mxu1 %vm80_vm1, %v9742_v0  ;;  %v15216_v54 = vmax.f32 %v1313_v38, %v2652_v12  ;;  %v2594_v2 = vadd.f32 %v14832_v45, %v2593_v7  ;;  %v11485_v3 = vpop.f32.mrf.mxu0  ;;  %v994_v0 = vmax.f32 %v919_v33, 0.0  ;;  %v924_v56 = vadd.f32 %v14832_v45, %v18212_v48 }
 0x231   :  { %18210 = vst [vmem:[#allocation34_spill] sm:$0xff] %v15207_v57  ;;  %11907 = vmatprep.mubr.msk.f32.mxu1 %vm12684_vm2, %v18098_v58  ;;  %v2308_v53 = vmax.f32 %v2233_v23, 0.0  ;;  %v11580_v1 = vpop.f32.mrf.mxu1  ;;  %v1260_v38 = vadd.f32 %v14832_v45, %v18213_v4  ;;  %v9689_v23 = vld [vmem:[%s18069_s0 + $0x830] sm:$0xff] }
 0x232   :  { %18211 = vst [vmem:[#allocation35_spill] sm:$0xff] %v15216_v54  ;;  %v2653_v12 = vmax.f32 %v2594_v2, 0.0  ;;  %v2237_v7 = vpop.f32.mrf.mxu0  ;;  %11813 = vmatmul.mubr.msk.f32.gmra.mxu0 %vm80_vm1, %v9688_v40  ;;  %v9744_v40 = vld [vmem:[%s18069_s0 + $0x918] sm:$0xff] }
 0x233   :  { %v15229_v3 = vmax.f32 %v994_v0, %v2308_v53  ;;  %v2238_v54 = vadd.f32 %v14832_v45, %v2237_v7  ;;  %v2598_v57 = vpop.f32.mrf.mxu1  ;;  %11815 = vmatprep.mubr.msk.f32.mxu0 %vm12684_vm2, %v18098_v58  ;;  %v18216_v0 = vld [vmem:[#allocation38_spill] sm:$0xff]  ;;  %v1315_v4 = vmax.f32 %v1260_v38, 0.0  ;;  %v18217_v7 = vld [vmem:[#allocation39_spill] sm:$0xff] }
 0x234   :  { %11908 = vmatmul.mubr.msk.f32.gmra.mxu1 %vm80_vm1, %v9743_v55  ;;  %v15238_v33 = vmax.f32 %v1314_v43, %v2653_v12  ;;  %v2599_v17 = vadd.f32 %v14832_v45, %v2598_v57  ;;  %v11488_v2 = vpop.f32.mrf.mxu0  ;;  %v995_v55 = vmax.f32 %v924_v56, 0.0  ;;  %v929_v48 = vadd.f32 %v14832_v45, %v18216_v0 }
 0x235   :  { %18214 = vst [vmem:[#allocation36_spill] sm:$0xff] %v15229_v3  ;;  %11910 = vmatprep.mubr.msk.f32.mxu1 %vm12684_vm2, %v18098_v58  ;;  %v2309_v53 = vmax.f32 %v2238_v54, 0.0  ;;  %v11583_v1 = vpop.f32.mrf.mxu1  ;;  %v1265_v43 = vadd.f32 %v14832_v45, %v18217_v7  ;;  %v9690_v54 = vld [vmem:[%s18069_s0 + $0x838] sm:$0xff] }
 0x236   :  { %18215 = vst [vmem:[#allocation37_spill] sm:$0xff] %v15238_v33  ;;  %v2654_v12 = vmax.f32 %v2599_v17, 0.0  ;;  %v2242_v57 = vpop.f32.mrf.mxu0  ;;  %11816 = vmatmul.mubr.msk.f32.gmra.mxu0 %vm80_vm1, %v9689_v23  ;;  %v9745_v23 = vld [vmem:[%s18069_s0 + $0x920] sm:$0xff] }
 0x237   :  { %v15251_v2 = vmax.f32 %v995_v55, %v2309_v53  ;;  %v2243_v33 = vadd.f32 %v14832_v45, %v2242_v57  ;;  %v2603_v3 = vpop.f32.mrf.mxu1  ;;  %11818 = vmatprep.mubr.msk.f32.mxu0 %vm12684_vm2, %v18098_v58  ;;  %v18220_v55 = vld [vmem:[#allocation40_spill] sm:$0xff]  ;;  %v1316_v7 = vmax.f32 %v1265_v43, 0.0  ;;  %v18221_v57 = vld [vmem:[#allocation41_spill] sm:$0xff] }
 0x238   :  { %11911 = vmatmul.mubr.msk.f32.gmra.mxu1 %vm80_vm1, %v9744_v40  ;;  %v15260_v56 = vmax.f32 %v1315_v4, %v2654_v12  ;;  %v2604_v38 = vadd.f32 %v14832_v45, %v2603_v3  ;;  %v11491_v17 = vpop.f32.mrf.mxu0  ;;  %v996_v40 = vmax.f32 %v929_v48, 0.0  ;;  %v934_v0 = vadd.f32 %v14832_v45, %v18220_v55 }
 0x239   :  { %18218 = vst [vmem:[#allocation38_spill] sm:$0xff] %v15251_v2  ;;  %11913 = vmatprep.mubr.msk.f32.mxu1 %vm12684_vm2, %v18098_v58  ;;  %v2310_v53 = vmax.f32 %v2243_v33, 0.0  ;;  %v11586_v1 = vpop.f32.mrf.mxu1  ;;  %v1270_v4 = vadd.f32 %v14832_v45, %v18221_v57  ;;  %v9691_v33 = vld [vmem:[%s18069_s0 + $0x840] sm:$0xff] }
 0x23a   :  { %18219 = vst [vmem:[#allocation39_spill] sm:$0xff] %v15260_v56  ;;  %v2655_v12 = vmax.f32 %v2604_v38, 0.0  ;;  %v2247_v3 = vpop.f32.mrf.mxu0  ;;  %11819 = vmatmul.mubr.msk.f32.gmra.mxu0 %vm80_vm1, %v9690_v54  ;;  %v9746_v54 = vld [vmem:[%s18069_s0 + $0x928] sm:$0xff] }
 0x23b   :  { %v15273_v17 = vmax.f32 %v996_v40, %v2310_v53  ;;  %v2248_v56 = vadd.f32 %v14832_v45, %v2247_v3  ;;  %v2608_v2 = vpop.f32.mrf.mxu1  ;;  %11821 = vmatprep.mubr.msk.f32.mxu0 %vm12684_vm2, %v18098_v58  ;;  %v18224_v40 = vld [vmem:[#allocation42_spill] sm:$0xff]  ;;  %v1317_v57 = vmax.f32 %v1270_v4, 0.0  ;;  %v18225_v3 = vld [vmem:[#allocation43_spill] sm:$0xff] }
 0x23c   :  { %11914 = vmatmul.mubr.msk.f32.gmra.mxu1 %vm80_vm1, %v9745_v23  ;;  %v15282_v48 = vmax.f32 %v1316_v7, %v2655_v12  ;;  %v2609_v43 = vadd.f32 %v14832_v45, %v2608_v2  ;;  %v11494_v38 = vpop.f32.mrf.mxu0  ;;  %v997_v23 = vmax.f32 %v934_v0, 0.0  ;;  %v939_v55 = vadd.f32 %v14832_v45, %v18224_v40 }
 0x23d   :  { %18222 = vst [vmem:[#allocation40_spill] sm:$0xff] %v15273_v17  ;;  %11916 = vmatprep.mubr.msk.f32.mxu1 %vm12684_vm2, %v18098_v58  ;;  %v2311_v53 = vmax.f32 %v2248_v56, 0.0  ;;  %v11589_v1 = vpop.f32.mrf.mxu1  ;;  %v1275_v7 = vadd.f32 %v14832_v45, %v18225_v3  ;;  %v9692_v56 = vld [vmem:[%s18069_s0 + $0x848] sm:$0xff] }
 0x23e   :  { %18223 = vst [vmem:[#allocation41_spill] sm:$0xff] %v15282_v48  ;;  %v2656_v12 = vmax.f32 %v2609_v43, 0.0  ;;  %v2252_v2 = vpop.f32.mrf.mxu0  ;;  %11822 = vmatmul.mubr.msk.f32.gmra.mxu0 %vm80_vm1, %v9691_v33  ;;  %v9747_v33 = vld [vmem:[%s18069_s0 + $0x930] sm:$0xff] }
 0x23f   :  { %v15295_v38 = vmax.f32 %v997_v23, %v2311_v53  ;;  %v2253_v48 = vadd.f32 %v14832_v45, %v2252_v2  ;;  %v2613_v17 = vpop.f32.mrf.mxu1  ;;  %11824 = vmatprep.mubr.msk.f32.mxu0 %vm12684_vm2, %v18098_v58  ;;  %v18228_v23 = vld [vmem:[#allocation44_spill] sm:$0xff]  ;;  %v1318_v3 = vmax.f32 %v1275_v7, 0.0  ;;  %v18229_v2 = vld [vmem:[#allocation45_spill] sm:$0xff] }
 0x240   :  { %11917 = vmatmul.mubr.msk.f32.gmra.mxu1 %vm80_vm1, %v9746_v54  ;;  %v15304_v0 = vmax.f32 %v1317_v57, %v2656_v12  ;;  %v2614_v4 = vadd.f32 %v14832_v45, %v2613_v17  ;;  %v11497_v43 = vpop.f32.mrf.mxu0  ;;  %v998_v54 = vmax.f32 %v939_v55, 0.0  ;;  %v944_v40 = vadd.f32 %v14832_v45, %v18228_v23 }
 0x241   :  { %18226 = vst [vmem:[#allocation42_spill] sm:$0xff] %v15295_v38  ;;  %11919 = vmatprep.mubr.msk.f32.mxu1 %vm12684_vm2, %v18098_v58  ;;  %v2312_v53 = vmax.f32 %v2253_v48, 0.0  ;;  %v11592_v1 = vpop.f32.mrf.mxu1  ;;  %v1280_v57 = vadd.f32 %v14832_v45, %v18229_v2  ;;  %v9693_v48 = vld [vmem:[%s18069_s0 + $0x850] sm:$0xff] }
 0x242   :  { %18227 = vst [vmem:[#allocation43_spill] sm:$0xff] %v15304_v0  ;;  %v2657_v12 = vmax.f32 %v2614_v4, 0.0  ;;  %v2257_v17 = vpop.f32.mrf.mxu0  ;;  %11825 = vmatmul.mubr.msk.f32.gmra.mxu0 %vm80_vm1, %v9692_v56  ;;  %v9748_v56 = vld [vmem:[%s18069_s0 + $0x938] sm:$0xff] }
 0x243   :  { %v15317_v43 = vmax.f32 %v998_v54, %v2312_v53  ;;  %v2258_v0 = vadd.f32 %v14832_v45, %v2257_v17  ;;  %v2618_v38 = vpop.f32.mrf.mxu1  ;;  %11827 = vmatprep.mubr.msk.f32.mxu0 %vm12684_vm2, %v18098_v58  ;;  %v18232_v54 = vld [vmem:[#allocation46_spill] sm:$0xff]  ;;  %v1319_v2 = vmax.f32 %v1280_v57, 0.0  ;;  %v18233_v17 = vld [vmem:[#allocation47_spill] sm:$0xff] }
 0x244   :  { %11920 = vmatmul.mubr.msk.f32.gmra.mxu1 %vm80_vm1, %v9747_v33  ;;  %v15326_v55 = vmax.f32 %v1318_v3, %v2657_v12  ;;  %v2619_v7 = vadd.f32 %v14832_v45, %v2618_v38  ;;  %v11500_v4 = vpop.f32.mrf.mxu0  ;;  %v999_v33 = vmax.f32 %v944_v40, 0.0  ;;  %v949_v23 = vadd.f32 %v14832_v45, %v18232_v54 }
 0x245   :  { %18230 = vst [vmem:[#allocation44_spill] sm:$0xff] %v15317_v43  ;;  %11922 = vmatprep.mubr.msk.f32.mxu1 %vm12684_vm2, %v18098_v58  ;;  %v2313_v53 = vmax.f32 %v2258_v0, 0.0  ;;  %v11595_v1 = vpop.f32.mrf.mxu1  ;;  %v1285_v3 = vadd.f32 %v14832_v45, %v18233_v17  ;;  %v9694_v0 = vld [vmem:[%s18069_s0 + $0x858] sm:$0xff] }
 0x246   :  { %18231 = vst [vmem:[#allocation45_spill] sm:$0xff] %v15326_v55  ;;  %v2658_v12 = vmax.f32 %v2619_v7, 0.0  ;;  %v2262_v38 = vpop.f32.mrf.mxu0  ;;  %11828 = vmatmul.mubr.msk.f32.gmra.mxu0 %vm80_vm1, %v9693_v48  ;;  %v9749_v48 = vld [vmem:[%s18069_s0 + $0x940] sm:$0xff] }
 0x247   :  { %v15339_v4 = vmax.f32 %v999_v33, %v2313_v53  ;;  %v2263_v55 = vadd.f32 %v14832_v45, %v2262_v38  ;;  %v2623_v43 = vpop.f32.mrf.mxu1  ;;  %11830 = vmatprep.mubr.msk.f32.mxu0 %vm12684_vm2, %v18098_v58  ;;  %v18236_v33 = vld [vmem:[#allocation48_spill] sm:$0xff]  ;;  %v1320_v17 = vmax.f32 %v1285_v3, 0.0  ;;  %v18237_v38 = vld [vmem:[#allocation49_spill] sm:$0xff] }
 0x248   :  { %11923 = vmatmul.mubr.msk.f32.gmra.mxu1 %vm80_vm1, %v9748_v56  ;;  %v15348_v40 = vmax.f32 %v1319_v2, %v2658_v12  ;;  %v2624_v57 = vadd.f32 %v14832_v45, %v2623_v43  ;;  %v11503_v7 = vpop.f32.mrf.mxu0  ;;  %v1000_v56 = vmax.f32 %v949_v23, 0.0  ;;  %v954_v54 = vadd.f32 %v14832_v45, %v18236_v33 }
 0x249   :  { %18234 = vst [vmem:[#allocation46_spill] sm:$0xff] %v15339_v4  ;;  %11925 = vmatprep.mubr.msk.f32.mxu1 %vm12684_vm2, %v18098_v58  ;;  %v2314_v53 = vmax.f32 %v2263_v55, 0.0  ;;  %v11598_v1 = vpop.f32.mrf.mxu1  ;;  %v1290_v2 = vadd.f32 %v14832_v45, %v18237_v38  ;;  %v9695_v55 = vld [vmem:[%s18069_s0 + $0x860] sm:$0xff] }
 0x24a   :  { %18235 = vst [vmem:[#allocation47_spill] sm:$0xff] %v15348_v40  ;;  %v2659_v12 = vmax.f32 %v2624_v57, 0.0  ;;  %v2267_v43 = vpop.f32.mrf.mxu0  ;;  %11831 = vmatmul.mubr.msk.f32.gmra.mxu0 %vm80_vm1, %v9694_v0  ;;  %v9750_v0 = vld [vmem:[%s18069_s0 + $0x948] sm:$0xff] }
 0x24b   :  { %v15361_v7 = vmax.f32 %v1000_v56, %v2314_v53  ;;  %v2268_v40 = vadd.f32 %v14832_v45, %v2267_v43  ;;  %v2628_v4 = vpop.f32.mrf.mxu1  ;;  %11833 = vmatprep.mubr.msk.f32.mxu0 %vm12684_vm2, %v18098_v58  ;;  %v18240_v56 = vld [vmem:[#allocation50_spill] sm:$0xff]  ;;  %v1321_v38 = vmax.f32 %v1290_v2, 0.0  ;;  %v18241_v43 = vld [vmem:[#allocation51_spill] sm:$0xff] }
 0x24c   :  { %11926 = vmatmul.mubr.msk.f32.gmra.mxu1 %vm80_vm1, %v9749_v48  ;;  %v15370_v23 = vmax.f32 %v1320_v17, %v2659_v12  ;;  %v2629_v3 = vadd.f32 %v14832_v45, %v2628_v4  ;;  %v11506_v57 = vpop.f32.mrf.mxu0  ;;  %v1001_v48 = vmax.f32 %v954_v54, 0.0  ;;  %v959_v33 = vadd.f32 %v14832_v45, %v18240_v56 }
 0x24d   :  { %18238 = vst [vmem:[#allocation48_spill] sm:$0xff] %v15361_v7  ;;  %11928 = vmatprep.mubr.msk.f32.mxu1 %vm12684_vm2, %v18098_v58  ;;  %v2315_v53 = vmax.f32 %v2268_v40, 0.0  ;;  %v11601_v1 = vpop.f32.mrf.mxu1  ;;  %v1295_v17 = vadd.f32 %v14832_v45, %v18241_v43  ;;  %v9696_v40 = vld [vmem:[%s18069_s0 + $0x868] sm:$0xff] }
 0x24e   :  { %18239 = vst [vmem:[#allocation49_spill] sm:$0xff] %v15370_v23  ;;  %v2660_v12 = vmax.f32 %v2629_v3, 0.0  ;;  %v2272_v4 = vpop.f32.mrf.mxu0  ;;  %11834 = vmatmul.mubr.msk.f32.gmra.mxu0 %vm80_vm1, %v9695_v55  ;;  %v9751_v55 = vld [vmem:[%s18069_s0 + $0x950] sm:$0xff] }
 0x24f   :  { %v15383_v57 = vmax.f32 %v1001_v48, %v2315_v53  ;;  %v2273_v23 = vadd.f32 %v14832_v45, %v2272_v4  ;;  %v2633_v7 = vpop.f32.mrf.mxu1  ;;  %11836 = vmatprep.mubr.msk.f32.mxu0 %vm12684_vm2, %v18098_v58  ;;  %v18242_v48 = vld [vmem:[#allocation52_spill] sm:$0xff]  ;;  %v1322_v43 = vmax.f32 %v1295_v17, 0.0 }
 0x250   :  { %11929 = vmatmul.mubr.msk.f32.gmra.mxu1 %vm80_vm1, %v9750_v0  ;;  %v15392_v54 = vmax.f32 %v1321_v38, %v2660_v12  ;;  %v2634_v2 = vadd.f32 %v14832_v45, %v2633_v7  ;;  %v11509_v3 = vpop.f32.mrf.mxu0  ;;  %v1002_v0 = vmax.f32 %v959_v33, 0.0  ;;  %v964_v56 = vadd.f32 %v14832_v45, %v18242_v48  ;;  %v18243_v48 = vld [vmem:[#allocation53_spill] sm:$0xff] }
 0x251   :  { %11931 = vmatprep.mubr.msk.f32.mxu1 %vm12684_vm2, %v18098_v58  ;;  %v2316_v53 = vmax.f32 %v2273_v23, 0.0  ;;  %v11604_v1 = vpop.f32.mrf.mxu1  ;;  %v9697_v23 = vld [vmem:[%s18069_s0 + $0x870] sm:$0xff] }
 0x252   :  { %v2661_v4 = vmax.f32 %v2634_v2, 0.0  ;;  %v2277_v38 = vpop.f32.mrf.mxu0  ;;  %11837 = vmatmul.mubr.msk.f32.gmra.mxu0 %vm80_vm1, %v9696_v40  ;;  %v9752_v40 = vld [vmem:[%s18069_s0 + $0x958] sm:$0xff] }
 0x253   :  { %v15403_v7 = vmax.f32 %v1002_v0, %v2316_v53  ;;  %v2278_v12 = vadd.f32 %v14832_v45, %v2277_v38  ;;  %v3195_v3 = vpop.f32.mrf.mxu1  ;;  %11839 = vmatprep.mubr.msk.f32.mxu0 %vm12684_vm2, %v18098_v58  ;;  %v15423_v0 = vld [vmem:[%s18070_s2] ss:$0 sm:$0xff] }
 0x254   :  { %11932 = vmatmul.mubr.msk.f32.gmra.mxu1 %vm80_vm1, %v9751_v55  ;;  %v15412_v33 = vmax.f32 %v1322_v43, %v2661_v4  ;;  %v3196_v17 = vadd.f32 %v14832_v45, %v3195_v3  ;;  %v11512_v2 = vpop.f32.mrf.mxu0  ;;  %v1003_v55 = vmax.f32 %v964_v56, 0.0  ;;  %v969_v53 = vadd.f32 %v15423_v0, %v18243_v48  ;;  %v9698_v56 = vld [vmem:[%s18069_s0 + $0x878] sm:$0xff] }
 0x255   :  { %11934 = vmatprep.mubr.msk.f32.mxu1 %vm12684_vm2, %v18098_v58  ;;  %v2317_v1 = vmax.f32 %v2278_v12, 0.0  ;;  %v11698_v43 = vpop.f32.mrf.mxu1  ;;  %v974_v48 = vadd.f32 %v15423_v0, %v14293_v32  ;;  %v9699_v32 = vld [vmem:[%s18069_s0 + $0x880] sm:$0xff] }
 0x256   :  { %v3319_v45 = vmax.f32 %v3196_v17, 0.0  ;;  %v2282_v4 = vpop.f32.mrf.mxu0  ;;  %11840 = vmatmul.mubr.msk.f32.gmra.mxu0 %vm80_vm1, %v9697_v23 }
 0x257   :  { %v15428_v38 = vmax.f32 %v1003_v55, %v2317_v1  ;;  %v2283_v3 = vadd.f32 %v15423_v0, %v2282_v4  ;;  %v3200_v2 = vpop.f32.mrf.mxu1  ;;  %11842 = vmatprep.mubr.msk.f32.mxu0 %vm12684_vm2, %v18098_v58  ;;  %v1004_v55 = vmax.f32 %v969_v53, 0.0  ;;  %v18245_v53 = vld [vmem:[#allocation54_spill] sm:$0xff] }
 0x258   :  { %11935 = vmatmul.mubr.msk.f32.gmra.mxu1 %vm80_vm1, %v9752_v40  ;;  %v15438_v12 = vmax.f32 %v14283_v39, %v3319_v45  ;;  %v3201_v17 = vadd.f32 %v15423_v0, %v3200_v2  ;;  %v11515_v23 = vpop.f32.mrf.mxu0  ;;  %v9830_v40 = vld [vmem:[%s18069_s0 + $0xa28] sm:$0xff] }
 0x259   :  { %18244 = vst [vmem:[#allocation50_spill] sm:$0xff] %v15428_v38  ;;  %12028 = vmatprep.mubr.msk.f32.mxu1 %vm12684_vm2, %v18098_v58  ;;  %v2318_v1 = vmax.f32 %v2283_v3, 0.0  ;;  %v11701_v43 = vpop.f32.mrf.mxu1  ;;  %v1005_v23 = vmax.f32 %v974_v48, 0.0  ;;  %v18248_v48 = vld [vmem:[#allocation56_spill] sm:$0xff] }
 0x25a   :  { %v3320_v4 = vmax.f32 %v3201_v17, 0.0  ;;  %v2287_v38 = vpop.f32.mrf.mxu0  ;;  %11843 = vmatmul.mubr.msk.f32.gmra.mxu0 %vm80_vm1, %v9698_v56 }
 0x25b   :  { %v15449_v39 = vmax.f32 %v1004_v55, %v2318_v1  ;;  %v2288_v45 = vadd.f32 %v15423_v0, %v2287_v38  ;;  %v3205_v2 = vpop.f32.mrf.mxu1  ;;  %11845 = vmatprep.mubr.msk.f32.mxu0 %vm12684_vm2, %v18098_v58  ;;  %v9831_v38 = vld [vmem:[%s18069_s0 + $0xa30] sm:$0xff] }
 0x25c   :  { %12029 = vmatmul.mubr.msk.f32.vlgmr.msra.gmra.mxu1 %vm80_vm1, %v9830_v40  ;;  %v15459_v3 = vmax.f32 %v18245_v53, %v3320_v4  ;;  %v3206_v17 = vadd.f32 %v15423_v0, %v3205_v2  ;;  %v11518_v56 = vpop.f32.mrf.mxu0  ;;  %v18247_v40 = vld [vmem:[#allocation55_spill] sm:$0xff] }
 0x25d   :  { %12031 = vmatprep.mubr.msk.f32.mxu1 %vm12684_vm2, %v18098_v58  ;;  %12187 = vmatpush3.msk.msra.mxu1 %vm156_vm0, %v14881_v24  ;;  %v979_v55 = vadd.f32 %v15423_v0, %v18247_v40  ;;  %v2319_v1 = vmax.f32 %v2288_v45, 0.0  ;;  %v11704_v43 = vpop.f32.mrf.mxu1  ;;  %v9700_v24 = vld [vmem:[%s18069_s0 + $0x888] sm:$0xff] }
 0x25e   :  { %18246 = vst [vmem:[#allocation51_spill] sm:$0xff] %v15459_v3  ;;  %12188 = vmatprep.subr.mxu1 %v18098_v58  ;;  %v3321_v4 = vmax.f32 %v3206_v17, 0.0  ;;  %v2292_v2 = vpop.f32.mrf.mxu0  ;;  %11846 = vmatmul.mubr.msk.f32.gmra.mxu0 %vm80_vm1, %v9699_v32  ;;  %v9832_v17 = vld [vmem:[%s18069_s0 + $0xa38] sm:$0xff] }
 0x25f   :  { %12189 = vmatpush3.msra.mxu1 %v14894_v6  ;;  %v15474_v53 = vmax.f32 %v1005_v23, %v2319_v1  ;;  %v2293_v56 = vadd.f32 %v15423_v0, %v2292_v2  ;;  %v3210_v3 = vpop.f32.mrf.mxu1  ;;  %11848 = vmatprep.mubr.msk.f32.mxu0 %vm12684_vm2, %v18098_v58 }
 0x260   :  { %12032 = vmatmul.mubr.msk.f32.gmra.mxu1 %vm80_vm1, %v9831_v38  ;;  %v15484_v45 = vmax.f32 %v18248_v48, %v3321_v4  ;;  %v3211_v32 = vadd.f32 %v15423_v0, %v3210_v3  ;;  %v11521_v6 = vpop.f32.mrf.mxu0  ;;  %12190 = vmatprep.subr.mxu1 %v18098_v58  ;;  %v1006_v38 = vmax.f32 %v979_v55, 0.0  ;;  %v18249_v55 = vld [vmem:[#allocation57_spill] sm:$0xff] }
 0x261   :  { %12034 = vmatprep.mubr.msk.f32.mxu1 %vm12684_vm2, %v18098_v58  ;;  %v2320_v23 = vmax.f32 %v2293_v56, 0.0  ;;  %v11707_v40 = vpop.f32.mrf.mxu1  ;;  %12191 = vmatpush3.msra.mxu1 %v14920_v34  ;;  %v9701_v34 = vld [vmem:[%s18069_s0 + $0x890] sm:$0xff] }
 0x262   :  { %v3322_v1 = vmax.f32 %v3211_v32, 0.0  ;;  %v2854_v43 = vpop.f32.mrf.mxu0  ;;  %11849 = vmatmul.mubr.msk.f32.gmra.mxu0 %vm80_vm1, %v9700_v24  ;;  %12192 = vmatprep.subr.mxu1 %v18098_v58  ;;  %v9833_v32 = vld [vmem:[%s18069_s0 + $0xa40] sm:$0xff] }
 0x263   :  { %v15496_v3 = vmax.f32 %v1006_v38, %v2320_v23  ;;  %v2855_v4 = vadd.f32 %v15423_v0, %v2854_v43  ;;  %v3215_v2 = vpop.f32.mrf.mxu1  ;;  %11851 = vmatprep.mubr.msk.f32.mxu0 %vm12684_vm2, %v18098_v58  ;;  %12193 = vmatpush3.msra.mxu1 %v14947_v22  ;;  %v9779_v22 = vld [vmem:[%s18069_s0 + $0x960] sm:$0xff] }
 0x264   :  { %12035 = vmatmul.mubr.msk.f32.gmra.mxu1 %vm80_vm1, %v9832_v17  ;;  %v15506_v56 = vmax.f32 %v18249_v55, %v3322_v1  ;;  %v3216_v24 = vadd.f32 %v15423_v0, %v3215_v2  ;;  %v11615_v48 = vpop.f32.mrf.mxu0  ;;  %12358 = vmatprep.subr.mxu1 %v18098_v58 }
 0x265   :  { %12037 = vmatprep.mubr.msk.f32.mxu1 %vm12684_vm2, %v18098_v58  ;;  %v2978_v6 = vmax.f32 %v2855_v4, 0.0  ;;  %v11710_v17 = vpop.f32.mrf.mxu1  ;;  %v18250_v4 = vld [vmem:[#allocation58_spill] sm:$0xff] }
 0x266   :  { %v3323_v38 = vmax.f32 %v3216_v24, 0.0  ;;  %v2859_v23 = vpop.f32.mrf.mxu0  ;;  %11852 = vmatmul.mubr.msk.f32.gmra.mxu0 %vm80_vm1, %v9701_v34 }
 0x267   :  { %v15518_v40 = vmax.f32 %v14363_v47, %v2978_v6  ;;  %v2860_v1 = vadd.f32 %v15423_v0, %v2859_v23  ;;  %v3220_v43 = vpop.f32.mrf.mxu1  ;;  %11945 = vmatprep.mubr.msk.f32.mxu0 %vm12684_vm2, %v18098_v58  ;;  %v9834_v47 = vld [vmem:[%s18069_s0 + $0xa48] sm:$0xff] }
 0x268   :  { %12038 = vmatmul.mubr.msk.f32.gmra.mxu1 %vm80_vm1, %v9833_v32  ;;  %v15528_v2 = vmax.f32 %v18250_v4, %v3323_v38  ;;  %v3221_v34 = vadd.f32 %v15423_v0, %v3220_v43  ;;  %v11618_v55 = vpop.f32.mrf.mxu0  ;;  %v12674_v43 = vld [vmem:[%s18068_s1 + $0x18] sm:$0x1] }
 0x269   :  { %12040 = vmatprep.mubr.msk.f32.mxu1 %vm12684_vm2, %v18098_v58  ;;  %v2979_v24 = vmax.f32 %v2860_v1, 0.0  ;;  %v11713_v48 = vpop.f32.mrf.mxu1  ;;  %v9780_v1 = vld [vmem:[%s18069_s0 + $0x968] sm:$0xff] }
 0x26a   :  { %v3324_v32 = vmax.f32 %v3221_v34, 0.0  ;;  %v2864_v6 = vpop.f32.mrf.mxu0  ;;  %11946 = vmatmul.mubr.msk.f32.vlgmr.msra.gmra.mxu0 %vm80_vm1, %v9779_v22  ;;  %v9835_v34 = vld [vmem:[%s18069_s0 + $0xa50] sm:$0xff] }
 0x26b   :  { %v15538_v17 = vmax.f32 %v14385_v29, %v2979_v24  ;;  %v2865_v38 = vadd.f32 %v15423_v0, %v2864_v6  ;;  %v3225_v23 = vpop.f32.mrf.mxu1  ;;  %12104 = vmatpush3.msk.msra.mxu0 %vm156_vm0, %v12674_v43  ;;  %11948 = vmatprep.mubr.msk.f32.mxu0 %vm12684_vm2, %v18098_v58 }
 0x26c   :  { %12041 = vmatmul.mubr.msk.f32.gmra.mxu1 %vm80_vm1, %v9834_v47  ;;  %v15550_v22 = vmax.f32 %v14394_v28, %v3324_v32  ;;  %v3226_v29 = vadd.f32 %v15423_v0, %v3225_v23  ;;  %v11621_v4 = vpop.f32.mrf.mxu0  ;;  %12105 = vmatprep.subr.mxu0 %v18098_v58 }
 0x26d   :  { %12043 = vmatprep.mubr.msk.f32.mxu1 %vm12684_vm2, %v18098_v58  ;;  %v2980_v55 = vmax.f32 %v2865_v38, 0.0  ;;  %v11716_v47 = vpop.f32.mrf.mxu1  ;;  %v9781_v38 = vld [vmem:[%s18069_s0 + $0x970] sm:$0xff] }
 0x26e   :  { %v3325_v24 = vmax.f32 %v3226_v29, 0.0  ;;  %v2869_v28 = vpop.f32.mrf.mxu0  ;;  %11949 = vmatmul.mubr.msk.f32.gmra.mxu0 %vm80_vm1, %v9780_v1  ;;  %v12675_v29 = vld [vmem:[%s18068_s1 + $0x10] sm:$0xff] }
 0x26f   :  { %v15563_v48 = vmax.f32 %v14410_v37, %v2980_v55  ;;  %v2870_v32 = vadd.f32 %v15423_v0, %v2869_v28  ;;  %v3230_v6 = vpop.f32.mrf.mxu1  ;;  %11951 = vmatprep.mubr.msk.f32.mxu0 %vm12684_vm2, %v18098_v58  ;;  %v9836_v37 = vld [vmem:[%s18069_s0 + $0xa58] sm:$0xff]  ;;  %12106 = vmatpush3.msra.mxu0 %v12675_v29 }
 0x270   :  { %12044 = vmatmul.mubr.msk.f32.gmra.mxu1 %vm80_vm1, %v9835_v34  ;;  %v15573_v23 = vmax.f32 %v14419_v5, %v3325_v24  ;;  %v3231_v43 = vadd.f32 %v15423_v0, %v3230_v6  ;;  %v11624_v1 = vpop.f32.mrf.mxu0  ;;  %12107 = vmatprep.subr.mxu0 %v18098_v58 }
 0x271   :  { %12046 = vmatprep.mubr.msk.f32.mxu1 %vm12684_vm2, %v18098_v58  ;;  %v2981_v4 = vmax.f32 %v2870_v32, 0.0  ;;  %v11719_v34 = vpop.f32.mrf.mxu1  ;;  %v9782_v32 = vld [vmem:[%s18069_s0 + $0x978] sm:$0xff]  ;;  %v12676_v1 = vld [vmem:[%s18068_s1 + $0x8] sm:$0xff] }
 0x272   :  { %v3326_v5 = vmax.f32 %v3231_v43, 0.0  ;;  %v2874_v55 = vpop.f32.mrf.mxu0  ;;  %11952 = vmatmul.mubr.msk.f32.gmra.mxu0 %vm80_vm1, %v9781_v38 }
 0x273   :  { %v15587_v47 = vmax.f32 %v14434_v46, %v2981_v4  ;;  %v2875_v24 = vadd.f32 %v15423_v0, %v2874_v55  ;;  %v3235_v28 = vpop.f32.mrf.mxu1  ;;  %11954 = vmatprep.mubr.msk.f32.mxu0 %vm12684_vm2, %v18098_v58  ;;  %v9837_v46 = vld [vmem:[%s18069_s0 + $0xa60] sm:$0xff]  ;;  %12108 = vmatpush3.msra.mxu0 %v12676_v1 }
 0x274   :  { %12047 = vmatmul.mubr.msk.f32.gmra.mxu1 %vm80_vm1, %v9836_v37  ;;  %v15597_v6 = vmax.f32 %v14443_v44, %v3326_v5  ;;  %v3236_v38 = vadd.f32 %v15423_v0, %v3235_v28  ;;  %v11627_v43 = vpop.f32.mrf.mxu0  ;;  %12109 = vmatprep.subr.mxu0 %v18098_v58 }
 0x275   :  { %12049 = vmatprep.mubr.msk.f32.mxu1 %vm12684_vm2, %v18098_v58  ;;  %v2982_v37 = vmax.f32 %v2875_v24, 0.0  ;;  %v11722_v29 = vpop.f32.mrf.mxu1  ;;  %v9783_v24 = vld [vmem:[%s18069_s0 + $0x980] sm:$0xff] }
 0x276   :  { %v3327_v44 = vmax.f32 %v3236_v38, 0.0  ;;  %v2879_v4 = vpop.f32.mrf.mxu0  ;;  %11955 = vmatmul.mubr.msk.f32.gmra.mxu0 %vm80_vm1, %v9782_v32  ;;  %v12677_v43 = vld [vmem:[%s18068_s1] sm:$0xff] }
 0x277   :  { %v15611_v34 = vmax.f32 %v14458_v14, %v2982_v37  ;;  %v2880_v5 = vadd.f32 %v15423_v0, %v2879_v4  ;;  %v3240_v55 = vpop.f32.mrf.mxu1  ;;  %11957 = vmatprep.mubr.msk.f32.mxu0 %vm12684_vm2, %v18098_v58  ;;  %v9838_v14 = vld [vmem:[%s18069_s0 + $0xa68] sm:$0xff]  ;;  %12110 = vmatpush3.msra.mxu0 %v12677_v43 }
 0x278   :  { %12050 = vmatmul.mubr.msk.f32.gmra.mxu1 %vm80_vm1, %v9837_v46  ;;  %v15621_v28 = vmax.f32 %v14467_v63, %v3327_v44  ;;  %v3241_v32 = vadd.f32 %v15423_v0, %v3240_v55  ;;  %v11630_v38 = vpop.f32.mrf.mxu0  ;;  %12269 = vmatprep.subr.mxu0 %v18098_v58 }
 0x279   :  { %12052 = vmatprep.mubr.msk.f32.mxu1 %vm12684_vm2, %v18098_v58  ;;  %v2983_v46 = vmax.f32 %v2880_v5, 0.0  ;;  %v11725_v1 = vpop.f32.mrf.mxu1  ;;  %v9784_v5 = vld [vmem:[%s18069_s0 + $0x988] sm:$0xff] }
 0x27a   :  { %v3328_v63 = vmax.f32 %v3241_v32, 0.0  ;;  %v2884_v37 = vpop.f32.mrf.mxu0  ;;  %11958 = vmatmul.mubr.msk.f32.gmra.mxu0 %vm80_vm1, %v9783_v24 }
 0x27b   :  { %v15635_v29 = vmax.f32 %v14482_v51, %v2983_v46  ;;  %v2885_v44 = vadd.f32 %v15423_v0, %v2884_v37  ;;  %v3245_v4 = vpop.f32.mrf.mxu1  ;;  %11960 = vmatprep.mubr.msk.f32.mxu0 %vm12684_vm2, %v18098_v58  ;;  %v9839_v51 = vld [vmem:[%s18069_s0 + $0xa70] sm:$0xff] }
 0x27c   :  { %12053 = vmatmul.mubr.msk.f32.gmra.mxu1 %vm80_vm1, %v9838_v14  ;;  %v15645_v55 = vmax.f32 %v14491_v19, %v3328_v63  ;;  %v3246_v24 = vadd.f32 %v15423_v0, %v3245_v4  ;;  %v11633_v32 = vpop.f32.mrf.mxu0  ;;  %v9785_v37 = vld [vmem:[%s18069_s0 + $0x990] sm:$0xff] }
 0x27d   :  { %12055 = vmatprep.mubr.msk.f32.mxu1 %vm12684_vm2, %v18098_v58  ;;  %v2984_v38 = vmax.f32 %v2885_v44, 0.0  ;;  %v11728_v14 = vpop.f32.mrf.mxu1 }
 0x27e   :  { %v3329_v43 = vmax.f32 %v3246_v24, 0.0  ;;  %v2889_v46 = vpop.f32.mrf.mxu0  ;;  %11961 = vmatmul.mubr.msk.f32.gmra.mxu0 %vm80_vm1, %v9784_v5 }
 0x27f   :  { %v15655_v1 = vmax.f32 %v14504_v9, %v2984_v38  ;;  %v2890_v19 = vadd.f32 %v15423_v0, %v2889_v46  ;;  %v3250_v63 = vpop.f32.mrf.mxu1  ;;  %11963 = vmatprep.mubr.msk.f32.mxu0 %vm12684_vm2, %v18098_v58  ;;  %v9840_v9 = vld [vmem:[%s18069_s0 + $0xa78] sm:$0xff] }
 0x280   :  { %12056 = vmatmul.mubr.msk.f32.gmra.mxu1 %vm80_vm1, %v9839_v51  ;;  %v15665_v44 = vmax.f32 %v14513_v50, %v3329_v43  ;;  %v3251_v4 = vadd.f32 %v15423_v0, %v3250_v63  ;;  %v11636_v5 = vpop.f32.mrf.mxu0  ;;  %v9786_v46 = vld [vmem:[%s18069_s0 + $0x998] sm:$0xff] }
 0x281   :  { %12058 = vmatprep.mubr.msk.f32.mxu1 %vm12684_vm2, %v18098_v58  ;;  %v2985_v24 = vmax.f32 %v2890_v19, 0.0  ;;  %v11731_v32 = vpop.f32.mrf.mxu1 }
 0x282   :  { %v3330_v51 = vmax.f32 %v3251_v4, 0.0  ;;  %v2894_v38 = vpop.f32.mrf.mxu0  ;;  %11964 = vmatmul.mubr.msk.f32.gmra.mxu0 %vm80_vm1, %v9785_v37 }
 0x283   :  { %v15675_v14 = vmax.f32 %v14526_v10, %v2985_v24  ;;  %v2895_v50 = vadd.f32 %v15423_v0, %v2894_v38  ;;  %v3255_v43 = vpop.f32.mrf.mxu1  ;;  %11966 = vmatprep.mubr.msk.f32.mxu0 %vm12684_vm2, %v18098_v58  ;;  %v9841_v10 = vld [vmem:[%s18069_s0 + $0xa80] sm:$0xff] }
 0x284   :  { %12059 = vmatmul.mubr.msk.f32.gmra.mxu1 %vm80_vm1, %v9840_v9  ;;  %v15685_v19 = vmax.f32 %v14535_v61, %v3330_v51  ;;  %v3256_v63 = vadd.f32 %v15423_v0, %v3255_v43  ;;  %v11639_v37 = vpop.f32.mrf.mxu0  ;;  %v9787_v38 = vld [vmem:[%s18069_s0 + $0x9a0] sm:$0xff] }
 0x285   :  { %12061 = vmatprep.mubr.msk.f32.mxu1 %vm12684_vm2, %v18098_v58  ;;  %v2986_v4 = vmax.f32 %v2895_v50, 0.0  ;;  %v11734_v5 = vpop.f32.mrf.mxu1 }
 0x286   :  { %v3331_v9 = vmax.f32 %v3256_v63, 0.0  ;;  %v2899_v24 = vpop.f32.mrf.mxu0  ;;  %11967 = vmatmul.mubr.msk.f32.gmra.mxu0 %vm80_vm1, %v9786_v46 }
 0x287   :  { %v15695_v32 = vmax.f32 %v14548_v62, %v2986_v4  ;;  %v2900_v61 = vadd.f32 %v15423_v0, %v2899_v24  ;;  %v3260_v51 = vpop.f32.mrf.mxu1  ;;  %11969 = vmatprep.mubr.msk.f32.mxu0 %vm12684_vm2, %v18098_v58  ;;  %v9842_v62 = vld [vmem:[%s18069_s0 + $0xa88] sm:$0xff] }
 0x288   :  { %12062 = vmatmul.mubr.msk.f32.gmra.mxu1 %vm80_vm1, %v9841_v10  ;;  %v15705_v50 = vmax.f32 %v14557_v16, %v3331_v9  ;;  %v3261_v43 = vadd.f32 %v15423_v0, %v3260_v51  ;;  %v11642_v46 = vpop.f32.mrf.mxu0  ;;  %v9788_v24 = vld [vmem:[%s18069_s0 + $0x9a8] sm:$0xff] }
 0x289   :  { %12064 = vmatprep.mubr.msk.f32.mxu1 %vm12684_vm2, %v18098_v58  ;;  %v2987_v63 = vmax.f32 %v2900_v61, 0.0  ;;  %v11737_v37 = vpop.f32.mrf.mxu1 }
 0x28a   :  { %v3332_v10 = vmax.f32 %v3261_v43, 0.0  ;;  %v2904_v4 = vpop.f32.mrf.mxu0  ;;  %11970 = vmatmul.mubr.msk.f32.gmra.mxu0 %vm80_vm1, %v9787_v38 }
 0x28b   :  { %v15715_v5 = vmax.f32 %v14570_v13, %v2987_v63  ;;  %v2905_v16 = vadd.f32 %v15423_v0, %v2904_v4  ;;  %v3265_v9 = vpop.f32.mrf.mxu1  ;;  %11972 = vmatprep.mubr.msk.f32.mxu0 %vm12684_vm2, %v18098_v58  ;;  %v9843_v13 = vld [vmem:[%s18069_s0 + $0xa90] sm:$0xff] }
 0x28c   :  { %12065 = vmatmul.mubr.msk.f32.gmra.mxu1 %vm80_vm1, %v9842_v62  ;;  %v15725_v61 = vmax.f32 %v14579_v21, %v3332_v10  ;;  %v3266_v51 = vadd.f32 %v15423_v0, %v3265_v9  ;;  %v11645_v38 = vpop.f32.mrf.mxu0  ;;  %v9789_v4 = vld [vmem:[%s18069_s0 + $0x9b0] sm:$0xff] }
 0x28d   :  { %12067 = vmatprep.mubr.msk.f32.mxu1 %vm12684_vm2, %v18098_v58  ;;  %v2988_v43 = vmax.f32 %v2905_v16, 0.0  ;;  %v11740_v46 = vpop.f32.mrf.mxu1 }
 0x28e   :  { %v3333_v62 = vmax.f32 %v3266_v51, 0.0  ;;  %v2909_v63 = vpop.f32.mrf.mxu0  ;;  %11973 = vmatmul.mubr.msk.f32.gmra.mxu0 %vm80_vm1, %v9788_v24 }
 0x28f   :  { %v15735_v37 = vmax.f32 %v14592_v26, %v2988_v43  ;;  %v2910_v21 = vadd.f32 %v15423_v0, %v2909_v63  ;;  %v3270_v10 = vpop.f32.mrf.mxu1  ;;  %11975 = vmatprep.mubr.msk.f32.mxu0 %vm12684_vm2, %v18098_v58  ;;  %v9844_v26 = vld [vmem:[%s18069_s0 + $0xa98] sm:$0xff] }
 0x290   :  { %12068 = vmatmul.mubr.msk.f32.gmra.mxu1 %vm80_vm1, %v9843_v13  ;;  %v15745_v16 = vmax.f32 %v14601_v15, %v3333_v62  ;;  %v3271_v9 = vadd.f32 %v15423_v0, %v3270_v10  ;;  %v11648_v24 = vpop.f32.mrf.mxu0  ;;  %v9790_v63 = vld [vmem:[%s18069_s0 + $0x9b8] sm:$0xff] }
 0x291   :  { %12070 = vmatprep.mubr.msk.f32.mxu1 %vm12684_vm2, %v18098_v58  ;;  %v2989_v51 = vmax.f32 %v2910_v21, 0.0  ;;  %v11743_v38 = vpop.f32.mrf.mxu1 }
 0x292   :  { %v3334_v13 = vmax.f32 %v3271_v9, 0.0  ;;  %v2914_v43 = vpop.f32.mrf.mxu0  ;;  %11976 = vmatmul.mubr.msk.f32.gmra.mxu0 %vm80_vm1, %v9789_v4 }
 0x293   :  { %v15755_v46 = vmax.f32 %v14614_v31, %v2989_v51  ;;  %v2915_v15 = vadd.f32 %v15423_v0, %v2914_v43  ;;  %v3275_v62 = vpop.f32.mrf.mxu1  ;;  %11978 = vmatprep.mubr.msk.f32.mxu0 %vm12684_vm2, %v18098_v58  ;;  %v9845_v31 = vld [vmem:[%s18069_s0 + $0xaa0] sm:$0xff] }
 0x294   :  { %12071 = vmatmul.mubr.msk.f32.gmra.mxu1 %vm80_vm1, %v9844_v26  ;;  %v15765_v21 = vmax.f32 %v14623_v20, %v3334_v13  ;;  %v3276_v10 = vadd.f32 %v15423_v0, %v3275_v62  ;;  %v11651_v4 = vpop.f32.mrf.mxu0  ;;  %v9791_v43 = vld [vmem:[%s18069_s0 + $0x9c0] sm:$0xff] }
 0x295   :  { %12073 = vmatprep.mubr.msk.f32.mxu1 %vm12684_vm2, %v18098_v58  ;;  %v2990_v9 = vmax.f32 %v2915_v15, 0.0  ;;  %v11746_v24 = vpop.f32.mrf.mxu1 }
 0x296   :  { %v3335_v26 = vmax.f32 %v3276_v10, 0.0  ;;  %v2919_v51 = vpop.f32.mrf.mxu0  ;;  %11979 = vmatmul.mubr.msk.f32.gmra.mxu0 %vm80_vm1, %v9790_v63 }
 0x297   :  { %v15775_v38 = vmax.f32 %v14636_v36, %v2990_v9  ;;  %v2920_v20 = vadd.f32 %v15423_v0, %v2919_v51  ;;  %v3280_v13 = vpop.f32.mrf.mxu1  ;;  %11981 = vmatprep.mubr.msk.f32.mxu0 %vm12684_vm2, %v18098_v58  ;;  %v9846_v36 = vld [vmem:[%s18069_s0 + $0xaa8] sm:$0xff] }
 0x298   :  { %12074 = vmatmul.mubr.msk.f32.gmra.mxu1 %vm80_vm1, %v9845_v31  ;;  %v15785_v15 = vmax.f32 %v14645_v25, %v3335_v26  ;;  %v3281_v62 = vadd.f32 %v15423_v0, %v3280_v13  ;;  %v11654_v63 = vpop.f32.mrf.mxu0  ;;  %v9792_v51 = vld [vmem:[%s18069_s0 + $0x9c8] sm:$0xff] }
 0x299   :  { %12076 = vmatprep.mubr.msk.f32.mxu1 %vm12684_vm2, %v18098_v58  ;;  %v2991_v10 = vmax.f32 %v2920_v20, 0.0  ;;  %v11749_v4 = vpop.f32.mrf.mxu1 }
 0x29a   :  { %v3336_v31 = vmax.f32 %v3281_v62, 0.0  ;;  %v2924_v9 = vpop.f32.mrf.mxu0  ;;  %11982 = vmatmul.mubr.msk.f32.gmra.mxu0 %vm80_vm1, %v9791_v43 }
 0x29b   :  { %v15795_v24 = vmax.f32 %v14658_v42, %v2991_v10  ;;  %v2925_v25 = vadd.f32 %v15423_v0, %v2924_v9  ;;  %v3285_v26 = vpop.f32.mrf.mxu1  ;;  %11984 = vmatprep.mubr.msk.f32.mxu0 %vm12684_vm2, %v18098_v58  ;;  %v9847_v42 = vld [vmem:[%s18069_s0 + $0xab0] sm:$0xff] }
 0x29c   :  { %12077 = vmatmul.mubr.msk.f32.gmra.mxu1 %vm80_vm1, %v9846_v36  ;;  %v15805_v20 = vmax.f32 %v14667_v30, %v3336_v31  ;;  %v3286_v13 = vadd.f32 %v15423_v0, %v3285_v26  ;;  %v11657_v43 = vpop.f32.mrf.mxu0  ;;  %v9793_v9 = vld [vmem:[%s18069_s0 + $0x9d0] sm:$0xff] }
 0x29d   :  { %12079 = vmatprep.mubr.msk.f32.mxu1 %vm12684_vm2, %v18098_v58  ;;  %v2992_v62 = vmax.f32 %v2925_v25, 0.0  ;;  %v11752_v63 = vpop.f32.mrf.mxu1 }
 0x29e   :  { %v3337_v36 = vmax.f32 %v3286_v13, 0.0  ;;  %v2929_v10 = vpop.f32.mrf.mxu0  ;;  %11985 = vmatmul.mubr.msk.f32.gmra.mxu0 %vm80_vm1, %v9792_v51 }
 0x29f   :  { %v15815_v4 = vmax.f32 %v14680_v52, %v2992_v62  ;;  %v2930_v30 = vadd.f32 %v15423_v0, %v2929_v10  ;;  %v3290_v31 = vpop.f32.mrf.mxu1  ;;  %11987 = vmatprep.mubr.msk.f32.mxu0 %vm12684_vm2, %v18098_v58  ;;  %v9848_v52 = vld [vmem:[%s18069_s0 + $0xab8] sm:$0xff] }
 0x2a0   :  { %12080 = vmatmul.mubr.msk.f32.gmra.mxu1 %vm80_vm1, %v9847_v42  ;;  %v15825_v25 = vmax.f32 %v14689_v35, %v3337_v36  ;;  %v3291_v26 = vadd.f32 %v15423_v0, %v3290_v31  ;;  %v11660_v51 = vpop.f32.mrf.mxu0  ;;  %v9794_v10 = vld [vmem:[%s18069_s0 + $0x9d8] sm:$0xff] }
 0x2a1   :  { %12082 = vmatprep.mubr.msk.f32.mxu1 %vm12684_vm2, %v18098_v58  ;;  %v2993_v13 = vmax.f32 %v2930_v30, 0.0  ;;  %v11755_v43 = vpop.f32.mrf.mxu1 }
 0x2a2   :  { %v3338_v42 = vmax.f32 %v3291_v26, 0.0  ;;  %v2934_v62 = vpop.f32.mrf.mxu0  ;;  %11988 = vmatmul.mubr.msk.f32.gmra.mxu0 %vm80_vm1, %v9793_v9 }
 0x2a3   :  { %v15835_v63 = vmax.f32 %v14702_v60, %v2993_v13  ;;  %v2935_v35 = vadd.f32 %v15423_v0, %v2934_v62  ;;  %v3295_v36 = vpop.f32.mrf.mxu1  ;;  %11990 = vmatprep.mubr.msk.f32.mxu0 %vm12684_vm2, %v18098_v58  ;;  %v9849_v60 = vld [vmem:[%s18069_s0 + $0xac0] sm:$0xff] }
 0x2a4   :  { %12083 = vmatmul.mubr.msk.f32.gmra.mxu1 %vm80_vm1, %v9848_v52  ;;  %v15845_v30 = vmax.f32 %v14711_v41, %v3338_v42  ;;  %v3296_v31 = vadd.f32 %v15423_v0, %v3295_v36  ;;  %v11663_v9 = vpop.f32.mrf.mxu0  ;;  %v9795_v62 = vld [vmem:[%s18069_s0 + $0x9e0] sm:$0xff] }
 0x2a5   :  { %12085 = vmatprep.mubr.msk.f32.mxu1 %vm12684_vm2, %v18098_v58  ;;  %v2994_v26 = vmax.f32 %v2935_v35, 0.0  ;;  %v11758_v51 = vpop.f32.mrf.mxu1 }
 0x2a6   :  { %v3339_v52 = vmax.f32 %v3296_v31, 0.0  ;;  %v2939_v13 = vpop.f32.mrf.mxu0  ;;  %11991 = vmatmul.mubr.msk.f32.gmra.mxu0 %vm80_vm1, %v9794_v10 }
 0x2a7   :  { %v15855_v43 = vmax.f32 %v14724_v11, %v2994_v26  ;;  %v2940_v41 = vadd.f32 %v15423_v0, %v2939_v13  ;;  %v3300_v42 = vpop.f32.mrf.mxu1  ;;  %11993 = vmatprep.mubr.msk.f32.mxu0 %vm12684_vm2, %v18098_v58  ;;  %v9850_v11 = vld [vmem:[%s18069_s0 + $0xac8] sm:$0xff] }
 0x2a8   :  { %12086 = vmatmul.mubr.msk.f32.gmra.mxu1 %vm80_vm1, %v9849_v60  ;;  %v15865_v35 = vmax.f32 %v14733_v49, %v3339_v52  ;;  %v3301_v36 = vadd.f32 %v15423_v0, %v3300_v42  ;;  %v11666_v10 = vpop.f32.mrf.mxu0  ;;  %v9796_v13 = vld [vmem:[%s18069_s0 + $0x9e8] sm:$0xff] }
 0x2a9   :  { %12088 = vmatprep.mubr.msk.f32.mxu1 %vm12684_vm2, %v18098_v58  ;;  %v2995_v31 = vmax.f32 %v2940_v41, 0.0  ;;  %v11761_v9 = vpop.f32.mrf.mxu1 }
 0x2aa   :  { %v3340_v60 = vmax.f32 %v3301_v36, 0.0  ;;  %v2944_v26 = vpop.f32.mrf.mxu0  ;;  %11994 = vmatmul.mubr.msk.f32.gmra.mxu0 %vm80_vm1, %v9795_v62 }
 0x2ab   :  { %v15875_v51 = vmax.f32 %v14746_v18, %v2995_v31  ;;  %v2945_v49 = vadd.f32 %v15423_v0, %v2944_v26  ;;  %v3305_v52 = vpop.f32.mrf.mxu1  ;;  %11996 = vmatprep.mubr.msk.f32.mxu0 %vm12684_vm2, %v18098_v58  ;;  %v9851_v18 = vld [vmem:[%s18069_s0 + $0xad0] sm:$0xff] }
 0x2ac   :  { %12089 = vmatmul.mubr.msk.f32.gmra.mxu1 %vm80_vm1, %v9850_v11  ;;  %v15885_v41 = vmax.f32 %v14755_v59, %v3340_v60  ;;  %v3306_v42 = vadd.f32 %v15423_v0, %v3305_v52  ;;  %v11669_v62 = vpop.f32.mrf.mxu0  ;;  %v9797_v26 = vld [vmem:[%s18069_s0 + $0x9f0] sm:$0xff] }
 0x2ad   :  { %12091 = vmatprep.mubr.msk.f32.mxu1 %vm12684_vm2, %v18098_v58  ;;  %v2996_v36 = vmax.f32 %v2945_v49, 0.0  ;;  %v11764_v10 = vpop.f32.mrf.mxu1 }
 0x2ae   :  { %v3341_v11 = vmax.f32 %v3306_v42, 0.0  ;;  %v2949_v31 = vpop.f32.mrf.mxu0  ;;  %11997 = vmatmul.mubr.msk.f32.gmra.mxu0 %vm80_vm1, %v9796_v13  ;;  %v18252_v10 = vld [vmem:[#allocation59_spill] sm:$0xff] }
 0x2af   :  { %v15895_v9 = vmax.f32 %v14768_v27, %v2996_v36  ;;  %v2950_v59 = vadd.f32 %v15423_v0, %v2949_v31  ;;  %v3310_v60 = vpop.f32.mrf.mxu1  ;;  %11999 = vmatprep.mubr.msk.f32.mxu0 %vm12684_vm2, %v18098_v58  ;;  %v9852_v27 = vld [vmem:[%s18069_s0 + $0xad8] sm:$0xff] }
 0x2b0   :  { %12092 = vmatmul.mubr.msk.f32.gmra.mxu1 %vm80_vm1, %v9851_v18  ;;  %v15905_v49 = vmax.f32 %v14777_v8, %v3341_v11  ;;  %v3311_v52 = vadd.f32 %v15423_v0, %v3310_v60  ;;  %v11672_v13 = vpop.f32.mrf.mxu0  ;;  %v18254_v60 = vld [vmem:[#allocation60_spill] sm:$0xff] }
 0x2b1   :  { %12094 = vmatprep.mubr.msk.f32.mxu1 %vm12684_vm2, %v18098_v58  ;;  %v2997_v42 = vmax.f32 %v2950_v59, 0.0  ;;  %v11767_v62 = vpop.f32.mrf.mxu1  ;;  %v9798_v59 = vld [vmem:[%s18069_s0 + $0x9f8] sm:$0xff] }
 0x2b2   :  { %18251 = vst [vmem:[#allocation52_spill] sm:$0xff] %v15905_v49  ;;  %v3342_v18 = vmax.f32 %v3311_v52, 0.0  ;;  %v2954_v36 = vpop.f32.mrf.mxu0  ;;  %12000 = vmatmul.mubr.msk.f32.gmra.mxu0 %vm80_vm1, %v9797_v26 }
 0x2b3   :  { %v15915_v31 = vmax.f32 %v18252_v10, %v2997_v42  ;;  %v2955_v8 = vadd.f32 %v15423_v0, %v2954_v36  ;;  %v3315_v11 = vpop.f32.mrf.mxu1  ;;  %12002 = vmatprep.mubr.msk.f32.mxu0 %vm12684_vm2, %v18098_v58 }
 0x2b4   :  { %12095 = vmatmul.mubr.msk.f32.gmra.mxu1 %vm80_vm1, %v9852_v27  ;;  %v15925_v52 = vmax.f32 %v18254_v60, %v3342_v18  ;;  %v3316_v26 = vadd.f32 %v15423_v0, %v3315_v11  ;;  %v11675_v13 = vpop.f32.mrf.mxu0  ;;  %v9853_v27 = vld [vmem:[%s18069_s0 + $0xae0] sm:$0xff]  ;;  %v18258_v60 = vld [vmem:[#allocation5_spill] sm:$0xff] }
 0x2b5   :  { %18253 = vst [vmem:[#allocation53_spill] sm:$0xff] %v15915_v31  ;;  %12097 = vmatprep.mubr.msk.f32.mxu1 %vm12684_vm2, %v18098_v58  ;;  %v2998_v42 = vmax.f32 %v2955_v8, 0.0  ;;  %v11770_v62 = vpop.f32.mrf.mxu1  ;;  %v18256_v31 = vld [vmem:[#allocation2_spill] sm:$0xff] }
 0x2b6   :  { %18255 = vst [vmem:[#allocation54_spill] sm:$0xff] %v15925_v52  ;;  %v3343_v36 = vmax.f32 %v3316_v26, 0.0  ;;  %v2959_v10 = vpop.f32.mrf.mxu0  ;;  %12003 = vmatmul.mubr.msk.f32.gmra.mxu0 %vm80_vm1, %v9798_v59  ;;  %v9799_v8 = vld [vmem:[%s18069_s0 + $0xa00] sm:$0xff] }
 0x2b7   :  { %v15935_v49 = vmax.f32 %v18256_v31, %v2998_v42  ;;  %v2960_v18 = vadd.f32 %v15423_v0, %v2959_v10  ;;  %v3877_v11 = vpop.f32.mrf.mxu1  ;;  %12005 = vmatprep.mubr.msk.f32.mxu0 %vm12684_vm2, %v18098_v58  ;;  %v9854_v31 = vld [vmem:[%s18069_s0 + $0xae8] sm:$0xff] }
 0x2b8   :  { %12098 = vmatmul.mubr.msk.f32.gmra.mxu1 %vm80_vm1, %v9853_v27  ;;  %v15945_v26 = vmax.f32 %v18258_v60, %v3343_v36  ;;  %v3878_v59 = vadd.f32 %v15423_v0, %v3877_v11  ;;  %v11678_v13 = vpop.f32.mrf.mxu0  ;;  %v18262_v60 = vld [vmem:[#allocation7_spill] sm:$0xff] }
 0x2b9   :  { %18257 = vst [vmem:[#allocation55_spill] sm:$0xff] %v15935_v49  ;;  %12100 = vmatprep.mubr.msk.f32.mxu1 %vm12684_vm2, %v18098_v58  ;;  %v2999_v27 = vmax.f32 %v2960_v18, 0.0  ;;  %v11864_v42 = vpop.f32.mrf.mxu1  ;;  %v18260_v49 = vld [vmem:[#allocation3_spill] sm:$0xff] }
 0x2ba   :  { %18259 = vst [vmem:[#allocation56_spill] sm:$0xff] %v15945_v26  ;;  %v4001_v62 = vmax.f32 %v3878_v59, 0.0  ;;  %v2964_v10 = vpop.f32.mrf.mxu0  ;;  %12006 = vmatmul.mubr.msk.f32.gmra.mxu0 %vm80_vm1, %v9799_v8  ;;  %v9800_v18 = vld [vmem:[%s18069_s0 + $0xa08] sm:$0xff] }
 0x2bb   :  { %v15955_v52 = vmax.f32 %v18260_v49, %v2999_v27  ;;  %v2965_v36 = vadd.f32 %v15423_v0, %v2964_v10  ;;  %12008 = vmatprep.mubr.msk.f32.mxu0 %vm12684_vm2, %v18098_v58  ;;  %v9932_v49 = vld [vmem:[%s18069_s0 + $0xbb8] sm:$0xff]  ;;  %v10016_v42 = vld [vmem:[%s18071_s3 + $0x68] sm:$0x3] }
 0x2bc   :  { %v3882_v11 = vpop.f32.mrf.mxu1  ;;  %12101 = vmatmul.mubr.msk.f32.gmra.mxu1 %vm80_vm1, %v9854_v31  ;;  %v15965_v59 = vmax.f32 %v18262_v60, %v4001_v62  ;;  %v11681_v13 = vpop.f32.mrf.mxu0 }
 0x2bd   :  { %18261 = vst [vmem:[#allocation57_spill] sm:$0xff] %v15955_v52  ;;  %v3883_v8 = vadd.f32 %v15423_v0, %v3882_v11  ;;  %12194 = vmatprep.mubr.msk.f32.mxu1 %vm12684_vm2, %v18098_v58  ;;  %v3000_v31 = vmax.f32 %v2965_v36, 0.0  ;;  %v18264_v11 = vld [vmem:[#allocation4_spill] sm:$0xff] }
 0x2be   :  { %18263 = vst [vmem:[#allocation58_spill] sm:$0xff] %v15965_v59  ;;  %v11867_v27 = vpop.f32.mrf.mxu1  ;;  %v2969_v62 = vpop.f32.mrf.mxu0  ;;  %12009 = vmatmul.mubr.msk.f32.gmra.mxu0 %vm80_vm1, %v9800_v18  ;;  %v9801_v36 = vld [vmem:[%s18069_s0 + $0xa10] sm:$0xff] }
 0x2bf   :  { %v4002_v10 = vmax.f32 %v3883_v8, 0.0  ;;  %v15978_v60 = vmax.f32 %v18264_v11, %v3000_v31  ;;  %v2970_v13 = vadd.f32 %v15423_v0, %v2969_v62  ;;  %12011 = vmatprep.mubr.msk.f32.mxu0 %vm12684_vm2, %v18098_v58  ;;  %v10015_v8 = vld [vmem:[%s18071_s3 + $0x60] sm:$0xff]  ;;  %v18266_v18 = vld [vmem:[#allocation8_spill] sm:$0xff] }
 0x2c0   :  { %v3887_v59 = vpop.f32.mrf.mxu1  ;;  %12195 = vmatmul.mubr.msk.f32.vlgmr.msra.gmra.mxu1 %vm80_vm1, %v9932_v49  ;;  %v11684_v62 = vpop.f32.mrf.mxu0  ;;  %v9933_v49 = vld [vmem:[%s18069_s0 + $0xbc0] sm:$0xff] }
 0x2c1   :  { %18265 = vst [vmem:[#allocation59_spill] sm:$0xff] %v15978_v60  ;;  %v15991_v27 = vmax.f32 %v18266_v18, %v4002_v10  ;;  %v3888_v31 = vadd.f32 %v15423_v0, %v3887_v59  ;;  %12197 = vmatprep.mubr.msk.f32.mxu1 %vm12684_vm2, %v18098_v58  ;;  %12359 = vmatpush3.msk.msra.mxu1 %vm5499_vm3, %v10016_v42  ;;  %v3001_v11 = vmax.f32 %v2970_v13, 0.0  ;;  %v10014_v59 = vld [vmem:[%s18071_s3 + $0x58] sm:$0xff]  ;;  %v18268_v10 = vld [vmem:[#allocation6_spill] sm:$0xff] }
 0x2c2   :  { %v11870_v60 = vpop.f32.mrf.mxu1  ;;  %12360 = vmatprep.subr.mxu1 %v18098_v58  ;;  %v2974_v26 = vpop.f32.mrf.mxu0  ;;  %12012 = vmatmul.mubr.msk.f32.gmra.mxu0 %vm80_vm1, %v9801_v36  ;;  %v9802_v42 = vld [vmem:[%s18069_s0 + $0xa18] sm:$0xff] }
 0x2c3   :  { %18267 = vst [vmem:[#allocation60_spill] sm:$0xff] %v15991_v27  ;;  %v4003_v52 = vmax.f32 %v3888_v31, 0.0  ;;  %12361 = vmatpush3.msra.mxu1 %v10015_v8  ;;  %v16006_v18 = vmax.f32 %v18268_v10, %v3001_v11  ;;  %v2975_v62 = vadd.f32 %v15423_v0, %v2974_v26  ;;  %12014 = vmatprep.mubr.msk.f32.mxu0 %vm12684_vm2, %v18098_v58  ;;  %v18270_v60 = vld [vmem:[#allocation9_spill] sm:$0xff]  ;;  %v9934_v26 = vld [vmem:[%s18069_s0 + $0xbc8] sm:$0xff] }
 0x2c4   :  { %v3892_v27 = vpop.f32.mrf.mxu1  ;;  %12198 = vmatmul.mubr.msk.f32.gmra.mxu1 %vm80_vm1, %v9933_v49  ;;  %v11687_v8 = vpop.f32.mrf.mxu0  ;;  %12362 = vmatprep.subr.mxu1 %v18098_v58 }
 0x2c5   :  { %18269 = vst [vmem:[#allocation2_spill] sm:$0xff] %v16006_v18  ;;  %v16016_v13 = vmax.f32 %v18270_v60, %v4003_v52  ;;  %v3893_v36 = vadd.f32 %v15423_v0, %v3892_v27  ;;  %12200 = vmatprep.mubr.msk.f32.mxu1 %vm12684_vm2, %v18098_v58  ;;  %v3002_v31 = vmax.f32 %v2975_v62, 0.0  ;;  %12363 = vmatpush3.msra.mxu1 %v10014_v59  ;;  %v10013_v52 = vld [vmem:[%s18071_s3 + $0x50] sm:$0xff]  ;;  %v18272_v27 = vld [vmem:[#allocation10_spill] sm:$0xff]  ;;  %v10012_v62 = vld [vmem:[%s18071_s3 + $0x48] sm:$0xff] }
 0x2c6   :  { %v11873_v49 = vpop.f32.mrf.mxu1  ;;  %v3536_v10 = vpop.f32.mrf.mxu0  ;;  %12015 = vmatmul.mubr.msk.f32.gmra.mxu0 %vm80_vm1, %v9802_v42  ;;  %12364 = vmatprep.subr.mxu1 %v18098_v58  ;;  %v9803_v59 = vld [vmem:[%s18069_s0 + $0xa20] sm:$0xff]  ;;  %v18274_v42 = vld [vmem:[#allocation11_spill] sm:$0xff] }
 0x2c7   :  { %18271 = vst [vmem:[#allocation5_spill] sm:$0xff] %v16016_v13  ;;  %v4004_v11 = vmax.f32 %v3893_v36, 0.0  ;;  %v16031_v60 = vmax.f32 %v18272_v27, %v3002_v31  ;;  %v3537_v8 = vadd.f32 %v15423_v0, %v3536_v10  ;;  %12017 = vmatprep.mubr.msk.f32.mxu0 %vm12684_vm2, %v18098_v58  ;;  %12365 = vmatpush3.msra.mxu1 %v10013_v52  ;;  %v9881_v52 = vld [vmem:[%s18069_s0 + $0xaf0] sm:$0xff] }
 0x2c8   :  { %v3897_v13 = vpop.f32.mrf.mxu1  ;;  %12201 = vmatmul.mubr.msk.f32.gmra.mxu1 %vm80_vm1, %v9934_v26  ;;  %v11781_v49 = vpop.f32.mrf.mxu0  ;;  %v9935_v26 = vld [vmem:[%s18069_s0 + $0xbd0] sm:$0xff]  ;;  %12366 = vmatprep.subr.mxu1 %v18098_v58 }
 0x2c9   :  { %18273 = vst [vmem:[#allocation3_spill] sm:$0xff] %v16031_v60  ;;  %v16044_v36 = vmax.f32 %v18274_v42, %v4004_v11  ;;  %v3898_v31 = vadd.f32 %v15423_v0, %v3897_v13  ;;  %12203 = vmatprep.mubr.msk.f32.mxu1 %vm12684_vm2, %v18098_v58  ;;  %v3660_v10 = vmax.f32 %v3537_v8, 0.0  ;;  %12367 = vmatpush3.msra.mxu1 %v10012_v62  ;;  %v10011_v13 = vld [vmem:[%s18071_s3 + $0x40] sm:$0xff]  ;;  %v18276_v11 = vld [vmem:[#allocation12_spill] sm:$0xff]  ;;  %v18278_v8 = vld [vmem:[#allocation13_spill] sm:$0xff] }
 0x2ca   :  { %v11876_v27 = vpop.f32.mrf.mxu1  ;;  %v3541_v18 = vpop.f32.mrf.mxu0  ;;  %12018 = vmatmul.mubr.msk.f32.gmra.mxu0 %vm80_vm1, %v9803_v59  ;;  %v16073_v62 = vld [vmem:[%s18070_s2] ss:$0 sm:$0xff]  ;;  %12368 = vmatprep.subr.mxu1 %v18098_v58 }
 0x2cb   :  { %18275 = vst [vmem:[#allocation7_spill] sm:$0xff] %v16044_v36  ;;  %v4005_v60 = vmax.f32 %v3898_v31, 0.0  ;;  %v16058_v42 = vmax.f32 %v18276_v11, %v3660_v10  ;;  %v3542_v49 = vadd.f32 %v15423_v0, %v3541_v18  ;;  %12111 = vmatprep.mubr.msk.f32.mxu0 %vm12684_vm2, %v18098_v58  ;;  %v9936_v31 = vld [vmem:[%s18069_s0 + $0xbd8] sm:$0xff]  ;;  %12369 = vmatpush3.msra.mxu1 %v10011_v13 }
 0x2cc   :  { %v3902_v36 = vpop.f32.mrf.mxu1  ;;  %12204 = vmatmul.mubr.msk.f32.gmra.mxu1 %vm80_vm1, %v9935_v26  ;;  %v11784_v18 = vpop.f32.mrf.mxu0  ;;  %12370 = vmatprep.subr.mxu1 %v18098_v58  ;;  %v9882_v13 = vld [vmem:[%s18069_s0 + $0xaf8] sm:$0xff] }
 0x2cd   :  { %18277 = vst [vmem:[#allocation4_spill] sm:$0xff] %v16058_v42  ;;  %v16068_v59 = vmax.f32 %v18278_v8, %v4005_v60  ;;  %v3903_v0 = vadd.f32 %v16073_v62, %v3902_v36  ;;  %12206 = vmatprep.mubr.msk.f32.mxu1 %vm12684_vm2, %v18098_v58  ;;  %v5422_v60 = vld [vmem:[%s18071_s3 + $0x30] sm:$0x3]  ;;  %v3661_v26 = vmax.f32 %v3542_v49, 0.0  ;;  %v10010_v36 = vld [vmem:[%s18071_s3 + $0x38] sm:$0xff]  ;;  %v18280_v8 = vld [vmem:[#allocation14_spill] sm:$0xff] }
 0x2ce   :  { %v11879_v10 = vpop.f32.mrf.mxu1  ;;  %v3546_v11 = vpop.f32.mrf.mxu0  ;;  %12112 = vmatmul.mubr.msk.f32.vlgmr.msra.gmra.mxu0 %vm80_vm1, %v9881_v52  ;;  %v18282_v49 = vld [vmem:[#allocation15_spill] sm:$0xff]  ;;  %12371 = vmatpush3.msra.mxu1 %v10010_v36  ;;  %v9883_v36 = vld [vmem:[%s18069_s0 + $0xb00] sm:$0xff] }
 0x2cf   :  { %18279 = vst [vmem:[#allocation8_spill] sm:$0xff] %v16068_v59  ;;  %v4006_v27 = vmax.f32 %v3903_v0, 0.0  ;;  %v16091_v18 = vmax.f32 %v18280_v8, %v3661_v26  ;;  %v3547_v59 = vadd.f32 %v16073_v62, %v3546_v11  ;;  %12270 = vmatpush3.msk.msra.mxu0 %vm5499_vm3, %v5422_v60  ;;  %12114 = vmatprep.mubr.msk.f32.mxu0 %vm12684_vm2, %v18098_v58  ;;  %v18284_v8 = vld [vmem:[#allocation16_spill] sm:$0xff] }
 0x2d0   :  { %v3907_v42 = vpop.f32.mrf.mxu1  ;;  %12207 = vmatmul.mubr.msk.f32.gmra.mxu1 %vm80_vm1, %v9936_v31  ;;  %v11787_v10 = vpop.f32.mrf.mxu0  ;;  %v9937_v31 = vld [vmem:[%s18069_s0 + $0xbe0] sm:$0xff]  ;;  %12271 = vmatprep.subr.mxu0 %v18098_v58 }
 0x2d1   :  { %18281 = vst [vmem:[#allocation6_spill] sm:$0xff] %v16091_v18  ;;  %v16100_v52 = vmax.f32 %v18282_v49, %v4006_v27  ;;  %v3908_v0 = vadd.f32 %v16073_v62, %v3907_v42  ;;  %12209 = vmatprep.mubr.msk.f32.mxu1 %vm12684_vm2, %v18098_v58  ;;  %v3662_v60 = vmax.f32 %v3547_v59, 0.0  ;;  %v5421_v27 = vld [vmem:[%s18071_s3 + $0x28] sm:$0xff]  ;;  %12536 = vmatprep.subr.mxu1 %v18098_v58 }
 0x2d2   :  { %v11882_v26 = vpop.f32.mrf.mxu1  ;;  %v3551_v11 = vpop.f32.mrf.mxu0  ;;  %12115 = vmatmul.mubr.msk.f32.gmra.mxu0 %vm80_vm1, %v9882_v13 }
 0x2d3   :  { %18283 = vst [vmem:[#allocation9_spill] sm:$0xff] %v16100_v52  ;;  %v4007_v42 = vmax.f32 %v3908_v0, 0.0  ;;  %v16117_v49 = vmax.f32 %v18284_v8, %v3662_v60  ;;  %v3552_v10 = vadd.f32 %v16073_v62, %v3551_v11  ;;  %12117 = vmatprep.mubr.msk.f32.mxu0 %vm12684_vm2, %v18098_v58  ;;  %v18286_v0 = vld [vmem:[#allocation17_spill] sm:$0xff]  ;;  %12272 = vmatpush3.msra.mxu0 %v5421_v27  ;;  %v9884_v27 = vld [vmem:[%s18069_s0 + $0xb08] sm:$0xff] }
 0x2d4   :  { %v3912_v59 = vpop.f32.mrf.mxu1  ;;  %12210 = vmatmul.mubr.msk.f32.gmra.mxu1 %vm80_vm1, %v9937_v31  ;;  %v11790_v52 = vpop.f32.mrf.mxu0  ;;  %v9938_v31 = vld [vmem:[%s18069_s0 + $0xbe8] sm:$0xff]  ;;  %12273 = vmatprep.subr.mxu0 %v18098_v58 }
 0x2d5   :  { %18285 = vst [vmem:[#allocation10_spill] sm:$0xff] %v16117_v49  ;;  %v16127_v26 = vmax.f32 %v18286_v0, %v4007_v42  ;;  %v3913_v13 = vadd.f32 %v16073_v62, %v3912_v59  ;;  %12212 = vmatprep.mubr.msk.f32.mxu1 %vm12684_vm2, %v18098_v58  ;;  %v3663_v60 = vmax.f32 %v3552_v10, 0.0  ;;  %v5420_v42 = vld [vmem:[%s18071_s3 + $0x20] sm:$0xff]  ;;  %v18290_v10 = vld [vmem:[#allocation19_spill] sm:$0xff] }
 0x2d6   :  { %v11885_v11 = vpop.f32.mrf.mxu1  ;;  %v3556_v0 = vpop.f32.mrf.mxu0  ;;  %12118 = vmatmul.mubr.msk.f32.gmra.mxu0 %vm80_vm1, %v9883_v36  ;;  %v18288_v52 = vld [vmem:[#allocation18_spill] sm:$0xff] }
 0x2d7   :  { %18287 = vst [vmem:[#allocation11_spill] sm:$0xff] %v16127_v26  ;;  %v4008_v8 = vmax.f32 %v3913_v13, 0.0  ;;  %v16141_v59 = vmax.f32 %v18288_v52, %v3663_v60  ;;  %v3557_v26 = vadd.f32 %v16073_v62, %v3556_v0  ;;  %12120 = vmatprep.mubr.msk.f32.mxu0 %vm12684_vm2, %v18098_v58  ;;  %12274 = vmatpush3.msra.mxu0 %v5420_v42  ;;  %v18294_v42 = vld [vmem:[#allocation21_spill] sm:$0xff] }
 0x2d8   :  { %v3917_v49 = vpop.f32.mrf.mxu1  ;;  %12213 = vmatmul.mubr.msk.f32.gmra.mxu1 %vm80_vm1, %v9938_v31  ;;  %v11793_v11 = vpop.f32.mrf.mxu0  ;;  %v9939_v31 = vld [vmem:[%s18069_s0 + $0xbf0] sm:$0xff]  ;;  %12275 = vmatprep.subr.mxu0 %v18098_v58 }
 0x2d9   :  { %18289 = vst [vmem:[#allocation12_spill] sm:$0xff] %v16141_v59  ;;  %v16151_v13 = vmax.f32 %v18290_v10, %v4008_v8  ;;  %v3918_v36 = vadd.f32 %v16073_v62, %v3917_v49  ;;  %12215 = vmatprep.mubr.msk.f32.mxu1 %vm12684_vm2, %v18098_v58  ;;  %v3664_v60 = vmax.f32 %v3557_v26, 0.0  ;;  %v5419_v8 = vld [vmem:[%s18071_s3 + $0x18] sm:$0xff]  ;;  %v18292_v49 = vld [vmem:[#allocation20_spill] sm:$0xff] }
 0x2da   :  { %v11888_v0 = vpop.f32.mrf.mxu1  ;;  %v3561_v10 = vpop.f32.mrf.mxu0  ;;  %12121 = vmatmul.mubr.msk.f32.gmra.mxu0 %vm80_vm1, %v9884_v27  ;;  %v9885_v26 = vld [vmem:[%s18069_s0 + $0xb10] sm:$0xff] }
 0x2db   :  { %18291 = vst [vmem:[#allocation13_spill] sm:$0xff] %v16151_v13  ;;  %v4009_v52 = vmax.f32 %v3918_v36, 0.0  ;;  %v16165_v11 = vmax.f32 %v18292_v49, %v3664_v60  ;;  %v3562_v13 = vadd.f32 %v16073_v62, %v3561_v10  ;;  %12123 = vmatprep.mubr.msk.f32.mxu0 %vm12684_vm2, %v18098_v58  ;;  %12276 = vmatpush3.msra.mxu0 %v5419_v8  ;;  %v18298_v8 = vld [vmem:[#allocation23_spill] sm:$0xff] }
 0x2dc   :  { %v3922_v59 = vpop.f32.mrf.mxu1  ;;  %12216 = vmatmul.mubr.msk.f32.gmra.mxu1 %vm80_vm1, %v9939_v31  ;;  %v11796_v0 = vpop.f32.mrf.mxu0  ;;  %v9940_v31 = vld [vmem:[%s18069_s0 + $0xbf8] sm:$0xff]  ;;  %12277 = vmatprep.subr.mxu0 %v18098_v58 }
 0x2dd   :  { %18293 = vst [vmem:[#allocation14_spill] sm:$0xff] %v16165_v11  ;;  %v16175_v36 = vmax.f32 %v18294_v42, %v4009_v52  ;;  %v3923_v27 = vadd.f32 %v16073_v62, %v3922_v59  ;;  %12218 = vmatprep.mubr.msk.f32.mxu1 %vm12684_vm2, %v18098_v58  ;;  %v3665_v60 = vmax.f32 %v3562_v13, 0.0  ;;  %v5418_v52 = vld [vmem:[%s18071_s3 + $0x10] sm:$0xff]  ;;  %v18296_v59 = vld [vmem:[#allocation22_spill] sm:$0xff]  ;;  %v9886_v13 = vld [vmem:[%s18069_s0 + $0xb18] sm:$0xff] }
 0x2de   :  { %v11891_v10 = vpop.f32.mrf.mxu1  ;;  %v3566_v42 = vpop.f32.mrf.mxu0  ;;  %12124 = vmatmul.mubr.msk.f32.gmra.mxu0 %vm80_vm1, %v9885_v26 }
 0x2df   :  { %18295 = vst [vmem:[#allocation15_spill] sm:$0xff] %v16175_v36  ;;  %v4010_v49 = vmax.f32 %v3923_v27, 0.0  ;;  %v16189_v0 = vmax.f32 %v18296_v59, %v3665_v60  ;;  %v3567_v36 = vadd.f32 %v16073_v62, %v3566_v42  ;;  %12126 = vmatprep.mubr.msk.f32.mxu0 %vm12684_vm2, %v18098_v58  ;;  %12278 = vmatpush3.msra.mxu0 %v5418_v52  ;;  %v18302_v52 = vld [vmem:[#allocation25_spill] sm:$0xff] }
 0x2e0   :  { %v3927_v11 = vpop.f32.mrf.mxu1  ;;  %12219 = vmatmul.mubr.msk.f32.gmra.mxu1 %vm80_vm1, %v9940_v31  ;;  %v11799_v10 = vpop.f32.mrf.mxu0  ;;  %v9941_v31 = vld [vmem:[%s18069_s0 + $0xc00] sm:$0xff]  ;;  %12279 = vmatprep.subr.mxu0 %v18098_v58 }
 0x2e1   :  { %18297 = vst [vmem:[#allocation16_spill] sm:$0xff] %v16189_v0  ;;  %v16199_v27 = vmax.f32 %v18298_v8, %v4010_v49  ;;  %v3928_v26 = vadd.f32 %v16073_v62, %v3927_v11  ;;  %12221 = vmatprep.mubr.msk.f32.mxu1 %vm12684_vm2, %v18098_v58  ;;  %v3666_v60 = vmax.f32 %v3567_v36, 0.0  ;;  %v5417_v49 = vld [vmem:[%s18071_s3 + $0x8] sm:$0xff]  ;;  %v18300_v11 = vld [vmem:[#allocation24_spill] sm:$0xff]  ;;  %v9887_v36 = vld [vmem:[%s18069_s0 + $0xb20] sm:$0xff] }
 0x2e2   :  { %v11894_v42 = vpop.f32.mrf.mxu1  ;;  %v3571_v8 = vpop.f32.mrf.mxu0  ;;  %12127 = vmatmul.mubr.msk.f32.gmra.mxu0 %vm80_vm1, %v9886_v13 }
 0x2e3   :  { %18299 = vst [vmem:[#allocation17_spill] sm:$0xff] %v16199_v27  ;;  %v4011_v59 = vmax.f32 %v3928_v26, 0.0  ;;  %v16213_v10 = vmax.f32 %v18300_v11, %v3666_v60  ;;  %v3572_v27 = vadd.f32 %v16073_v62, %v3571_v8  ;;  %12129 = vmatprep.mubr.msk.f32.mxu0 %vm12684_vm2, %v18098_v58  ;;  %12280 = vmatpush3.msra.mxu0 %v5417_v49  ;;  %v18306_v49 = vld [vmem:[#allocation27_spill] sm:$0xff] }
 0x2e4   :  { %v3932_v0 = vpop.f32.mrf.mxu1  ;;  %12222 = vmatmul.mubr.msk.f32.gmra.mxu1 %vm80_vm1, %v9941_v31  ;;  %v11802_v42 = vpop.f32.mrf.mxu0  ;;  %v9942_v31 = vld [vmem:[%s18069_s0 + $0xc08] sm:$0xff]  ;;  %12281 = vmatprep.subr.mxu0 %v18098_v58 }
 0x2e5   :  { %18301 = vst [vmem:[#allocation18_spill] sm:$0xff] %v16213_v10  ;;  %v16223_v26 = vmax.f32 %v18302_v52, %v4011_v59  ;;  %v3933_v13 = vadd.f32 %v16073_v62, %v3932_v0  ;;  %12224 = vmatprep.mubr.msk.f32.mxu1 %vm12684_vm2, %v18098_v58  ;;  %v3667_v60 = vmax.f32 %v3572_v27, 0.0  ;;  %v5416_v59 = vld [vmem:[%s18071_s3] sm:$0xff]  ;;  %v9888_v27 = vld [vmem:[%s18069_s0 + $0xb28] sm:$0xff] }
 0x2e6   :  { %v11897_v8 = vpop.f32.mrf.mxu1  ;;  %v3576_v52 = vpop.f32.mrf.mxu0  ;;  %12130 = vmatmul.mubr.msk.f32.gmra.mxu0 %vm80_vm1, %v9887_v36  ;;  %v18304_v0 = vld [vmem:[#allocation26_spill] sm:$0xff] }
 0x2e7   :  { %18303 = vst [vmem:[#allocation19_spill] sm:$0xff] %v16223_v26  ;;  %v4012_v11 = vmax.f32 %v3933_v13, 0.0  ;;  %v16237_v42 = vmax.f32 %v18304_v0, %v3667_v60  ;;  %v3577_v26 = vadd.f32 %v16073_v62, %v3576_v52  ;;  %12132 = vmatprep.mubr.msk.f32.mxu0 %vm12684_vm2, %v18098_v58  ;;  %12282 = vmatpush3.msra.mxu0 %v5416_v59  ;;  %v18310_v59 = vld [vmem:[#allocation29_spill] sm:$0xff] }
 0x2e8   :  { %v3937_v10 = vpop.f32.mrf.mxu1  ;;  %12225 = vmatmul.mubr.msk.f32.gmra.mxu1 %vm80_vm1, %v9942_v31  ;;  %v11805_v8 = vpop.f32.mrf.mxu0  ;;  %v9943_v31 = vld [vmem:[%s18069_s0 + $0xc10] sm:$0xff]  ;;  %12447 = vmatprep.subr.mxu0 %v18098_v58 }
 0x2e9   :  { %18305 = vst [vmem:[#allocation20_spill] sm:$0xff] %v16237_v42  ;;  %v16247_v13 = vmax.f32 %v18306_v49, %v4012_v11  ;;  %v3938_v36 = vadd.f32 %v16073_v62, %v3937_v10  ;;  %12227 = vmatprep.mubr.msk.f32.mxu1 %vm12684_vm2, %v18098_v58  ;;  %v3668_v60 = vmax.f32 %v3577_v26, 0.0  ;;  %v18308_v11 = vld [vmem:[#allocation28_spill] sm:$0xff] }
 0x2ea   :  { %v11900_v52 = vpop.f32.mrf.mxu1  ;;  %v3581_v42 = vpop.f32.mrf.mxu0  ;;  %12133 = vmatmul.mubr.msk.f32.gmra.mxu0 %vm80_vm1, %v9888_v27  ;;  %v9889_v26 = vld [vmem:[%s18069_s0 + $0xb30] sm:$0xff] }
 0x2eb   :  { %18307 = vst [vmem:[#allocation21_spill] sm:$0xff] %v16247_v13  ;;  %v4013_v0 = vmax.f32 %v3938_v36, 0.0  ;;  %v16258_v49 = vmax.f32 %v18308_v11, %v3668_v60  ;;  %v3582_v10 = vadd.f32 %v16073_v62, %v3581_v42  ;;  %12135 = vmatprep.mubr.msk.f32.mxu0 %vm12684_vm2, %v18098_v58  ;;  %v9944_v42 = vld [vmem:[%s18069_s0 + $0xc18] sm:$0xff]  ;;  %v18312_v13 = vld [vmem:[#allocation30_spill] sm:$0xff] }
 0x2ec   :  { %v3942_v8 = vpop.f32.mrf.mxu1  ;;  %12228 = vmatmul.mubr.msk.f32.gmra.mxu1 %vm80_vm1, %v9943_v31  ;;  %v11808_v52 = vpop.f32.mrf.mxu0 }
 0x2ed   :  { %18309 = vst [vmem:[#allocation22_spill] sm:$0xff] %v16258_v49  ;;  %v16268_v36 = vmax.f32 %v18310_v59, %v4013_v0  ;;  %v3943_v27 = vadd.f32 %v16073_v62, %v3942_v8  ;;  %12230 = vmatprep.mubr.msk.f32.mxu1 %vm12684_vm2, %v18098_v58  ;;  %v3669_v31 = vmax.f32 %v3582_v10, 0.0  ;;  %v9890_v10 = vld [vmem:[%s18069_s0 + $0xb38] sm:$0xff]  ;;  %v18314_v59 = vld [vmem:[#allocation31_spill] sm:$0xff] }
 0x2ee   :  { %v11903_v60 = vpop.f32.mrf.mxu1  ;;  %v3586_v49 = vpop.f32.mrf.mxu0  ;;  %12136 = vmatmul.mubr.msk.f32.gmra.mxu0 %vm80_vm1, %v9889_v26 }
 0x2ef   :  { %18311 = vst [vmem:[#allocation23_spill] sm:$0xff] %v16268_v36  ;;  %v4014_v11 = vmax.f32 %v3943_v27, 0.0  ;;  %v16278_v18 = vmax.f32 %v18312_v13, %v3669_v31  ;;  %v3587_v0 = vadd.f32 %v16073_v62, %v3586_v49  ;;  %12138 = vmatprep.mubr.msk.f32.mxu0 %vm12684_vm2, %v18098_v58  ;;  %v9945_v13 = vld [vmem:[%s18069_s0 + $0xc20] sm:$0xff] }
 0x2f0   :  { %v3947_v8 = vpop.f32.mrf.mxu1  ;;  %12231 = vmatmul.mubr.msk.f32.gmra.mxu1 %vm80_vm1, %v9944_v42  ;;  %v11811_v52 = vpop.f32.mrf.mxu0 }
 0x2f1   :  { %18313 = vst [vmem:[#allocation24_spill] sm:$0xff] %v16278_v18  ;;  %v16288_v27 = vmax.f32 %v18314_v59, %v4014_v11  ;;  %v3948_v26 = vadd.f32 %v16073_v62, %v3947_v8  ;;  %12233 = vmatprep.mubr.msk.f32.mxu1 %vm12684_vm2, %v18098_v58  ;;  %v3670_v49 = vmax.f32 %v3587_v0, 0.0  ;;  %v18316_v18 = vld [vmem:[#allocation32_spill] sm:$0xff]  ;;  %v9891_v0 = vld [vmem:[%s18069_s0 + $0xb40] sm:$0xff]  ;;  %v18318_v59 = vld [vmem:[#allocation33_spill] sm:$0xff] }
 0x2f2   :  { %v11906_v42 = vpop.f32.mrf.mxu1  ;;  %v3591_v60 = vpop.f32.mrf.mxu0  ;;  %12139 = vmatmul.mubr.msk.f32.gmra.mxu0 %vm80_vm1, %v9890_v10 }
 0x2f3   :  { %18315 = vst [vmem:[#allocation25_spill] sm:$0xff] %v16288_v27  ;;  %v4015_v31 = vmax.f32 %v3948_v26, 0.0  ;;  %v16298_v36 = vmax.f32 %v18316_v18, %v3670_v49  ;;  %v3592_v11 = vadd.f32 %v16073_v62, %v3591_v60  ;;  %12141 = vmatprep.mubr.msk.f32.mxu0 %vm12684_vm2, %v18098_v58  ;;  %v9946_v18 = vld [vmem:[%s18069_s0 + $0xc28] sm:$0xff] }
 0x2f4   :  { %v3952_v8 = vpop.f32.mrf.mxu1  ;;  %12234 = vmatmul.mubr.msk.f32.gmra.mxu1 %vm80_vm1, %v9945_v13  ;;  %v11814_v52 = vpop.f32.mrf.mxu0 }
 0x2f5   :  { %18317 = vst [vmem:[#allocation26_spill] sm:$0xff] %v16298_v36  ;;  %v16308_v26 = vmax.f32 %v18318_v59, %v4015_v31  ;;  %v3953_v10 = vadd.f32 %v16073_v62, %v3952_v8  ;;  %12236 = vmatprep.mubr.msk.f32.mxu1 %vm12684_vm2, %v18098_v58  ;;  %v3671_v13 = vmax.f32 %v3592_v11, 0.0  ;;  %v18320_v36 = vld [vmem:[#allocation34_spill] sm:$0xff]  ;;  %v9892_v11 = vld [vmem:[%s18069_s0 + $0xb48] sm:$0xff] }
 0x2f6   :  { %v11909_v49 = vpop.f32.mrf.mxu1  ;;  %v3596_v60 = vpop.f32.mrf.mxu0  ;;  %12142 = vmatmul.mubr.msk.f32.gmra.mxu0 %vm80_vm1, %v9891_v0  ;;  %v18322_v59 = vld [vmem:[#allocation35_spill] sm:$0xff] }
 0x2f7   :  { %18319 = vst [vmem:[#allocation27_spill] sm:$0xff] %v16308_v26  ;;  %v4016_v42 = vmax.f32 %v3953_v10, 0.0  ;;  %v16318_v27 = vmax.f32 %v18320_v36, %v3671_v13  ;;  %v3597_v31 = vadd.f32 %v16073_v62, %v3596_v60  ;;  %12144 = vmatprep.mubr.msk.f32.mxu0 %vm12684_vm2, %v18098_v58  ;;  %v9947_v36 = vld [vmem:[%s18069_s0 + $0xc30] sm:$0xff] }
 0x2f8   :  { %v3957_v8 = vpop.f32.mrf.mxu1  ;;  %12237 = vmatmul.mubr.msk.f32.gmra.mxu1 %vm80_vm1, %v9946_v18  ;;  %v11817_v52 = vpop.f32.mrf.mxu0 }
 0x2f9   :  { %18321 = vst [vmem:[#allocation28_spill] sm:$0xff] %v16318_v27  ;;  %v16328_v10 = vmax.f32 %v18322_v59, %v4016_v42  ;;  %v3958_v0 = vadd.f32 %v16073_v62, %v3957_v8  ;;  %12239 = vmatprep.mubr.msk.f32.mxu1 %vm12684_vm2, %v18098_v58  ;;  %v3672_v18 = vmax.f32 %v3597_v31, 0.0  ;;  %v18324_v27 = vld [vmem:[#allocation36_spill] sm:$0xff]  ;;  %v18326_v59 = vld [vmem:[#allocation37_spill] sm:$0xff] }
 0x2fa   :  { %v11912_v13 = vpop.f32.mrf.mxu1  ;;  %v3601_v60 = vpop.f32.mrf.mxu0  ;;  %12145 = vmatmul.mubr.msk.f32.gmra.mxu0 %vm80_vm1, %v9892_v11  ;;  %v9893_v31 = vld [vmem:[%s18069_s0 + $0xb50] sm:$0xff] }
 0x2fb   :  { %18323 = vst [vmem:[#allocation29_spill] sm:$0xff] %v16328_v10  ;;  %v4017_v49 = vmax.f32 %v3958_v0, 0.0  ;;  %v16338_v26 = vmax.f32 %v18324_v27, %v3672_v18  ;;  %v3602_v42 = vadd.f32 %v16073_v62, %v3601_v60  ;;  %12147 = vmatprep.mubr.msk.f32.mxu0 %vm12684_vm2, %v18098_v58  ;;  %v9948_v27 = vld [vmem:[%s18069_s0 + $0xc38] sm:$0xff] }
 0x2fc   :  { %v3962_v8 = vpop.f32.mrf.mxu1  ;;  %12240 = vmatmul.mubr.msk.f32.gmra.mxu1 %vm80_vm1, %v9947_v36  ;;  %v11820_v52 = vpop.f32.mrf.mxu0 }
 0x2fd   :  { %18325 = vst [vmem:[#allocation30_spill] sm:$0xff] %v16338_v26  ;;  %v16348_v0 = vmax.f32 %v18326_v59, %v4017_v49  ;;  %v3963_v11 = vadd.f32 %v16073_v62, %v3962_v8  ;;  %12242 = vmatprep.mubr.msk.f32.mxu1 %vm12684_vm2, %v18098_v58  ;;  %v3673_v36 = vmax.f32 %v3602_v42, 0.0  ;;  %v18328_v26 = vld [vmem:[#allocation38_spill] sm:$0xff]  ;;  %v9894_v42 = vld [vmem:[%s18069_s0 + $0xb58] sm:$0xff]  ;;  %v18330_v59 = vld [vmem:[#allocation39_spill] sm:$0xff] }
 0x2fe   :  { %v11915_v18 = vpop.f32.mrf.mxu1  ;;  %v3606_v60 = vpop.f32.mrf.mxu0  ;;  %12148 = vmatmul.mubr.msk.f32.gmra.mxu0 %vm80_vm1, %v9893_v31 }
 0x2ff   :  { %18327 = vst [vmem:[#allocation31_spill] sm:$0xff] %v16348_v0  ;;  %v4018_v13 = vmax.f32 %v3963_v11, 0.0  ;;  %v16358_v10 = vmax.f32 %v18328_v26, %v3673_v36  ;;  %v3607_v49 = vadd.f32 %v16073_v62, %v3606_v60  ;;  %12150 = vmatprep.mubr.msk.f32.mxu0 %vm12684_vm2, %v18098_v58  ;;  %v9949_v26 = vld [vmem:[%s18069_s0 + $0xc40] sm:$0xff] }
 0x300   :  { %v3967_v8 = vpop.f32.mrf.mxu1  ;;  %12243 = vmatmul.mubr.msk.f32.gmra.mxu1 %vm80_vm1, %v9948_v27  ;;  %v11823_v52 = vpop.f32.mrf.mxu0 }
 0x301   :  { %18329 = vst [vmem:[#allocation32_spill] sm:$0xff] %v16358_v10  ;;  %v16368_v11 = vmax.f32 %v18330_v59, %v4018_v13  ;;  %v3968_v31 = vadd.f32 %v16073_v62, %v3967_v8  ;;  %12245 = vmatprep.mubr.msk.f32.mxu1 %vm12684_vm2, %v18098_v58  ;;  %v3674_v27 = vmax.f32 %v3607_v49, 0.0  ;;  %v18332_v10 = vld [vmem:[#allocation40_spill] sm:$0xff]  ;;  %v9895_v49 = vld [vmem:[%s18069_s0 + $0xb60] sm:$0xff]  ;;  %v18334_v59 = vld [vmem:[#allocation41_spill] sm:$0xff] }
 0x302   :  { %v11918_v36 = vpop.f32.mrf.mxu1  ;;  %v3611_v60 = vpop.f32.mrf.mxu0  ;;  %12151 = vmatmul.mubr.msk.f32.gmra.mxu0 %vm80_vm1, %v9894_v42 }
 0x303   :  { %18331 = vst [vmem:[#allocation33_spill] sm:$0xff] %v16368_v11  ;;  %v4019_v18 = vmax.f32 %v3968_v31, 0.0  ;;  %v16378_v0 = vmax.f32 %v18332_v10, %v3674_v27  ;;  %v3612_v13 = vadd.f32 %v16073_v62, %v3611_v60  ;;  %12153 = vmatprep.mubr.msk.f32.mxu0 %vm12684_vm2, %v18098_v58  ;;  %v9950_v10 = vld [vmem:[%s18069_s0 + $0xc48] sm:$0xff] }
 0x304   :  { %v3972_v8 = vpop.f32.mrf.mxu1  ;;  %12246 = vmatmul.mubr.msk.f32.gmra.mxu1 %vm80_vm1, %v9949_v26  ;;  %v11826_v52 = vpop.f32.mrf.mxu0 }
 0x305   :  { %18333 = vst [vmem:[#allocation34_spill] sm:$0xff] %v16378_v0  ;;  %v16388_v31 = vmax.f32 %v18334_v59, %v4019_v18  ;;  %v3973_v42 = vadd.f32 %v16073_v62, %v3972_v8  ;;  %12248 = vmatprep.mubr.msk.f32.mxu1 %vm12684_vm2, %v18098_v58  ;;  %v3675_v26 = vmax.f32 %v3612_v13, 0.0  ;;  %v18336_v0 = vld [vmem:[#allocation42_spill] sm:$0xff]  ;;  %v9896_v13 = vld [vmem:[%s18069_s0 + $0xb68] sm:$0xff] }
 0x306   :  { %v11921_v27 = vpop.f32.mrf.mxu1  ;;  %v3616_v60 = vpop.f32.mrf.mxu0  ;;  %12154 = vmatmul.mubr.msk.f32.gmra.mxu0 %vm80_vm1, %v9895_v49  ;;  %v18338_v59 = vld [vmem:[#allocation43_spill] sm:$0xff] }
 0x307   :  { %18335 = vst [vmem:[#allocation35_spill] sm:$0xff] %v16388_v31  ;;  %v4020_v36 = vmax.f32 %v3973_v42, 0.0  ;;  %v16398_v11 = vmax.f32 %v18336_v0, %v3675_v26  ;;  %v3617_v18 = vadd.f32 %v16073_v62, %v3616_v60  ;;  %12156 = vmatprep.mubr.msk.f32.mxu0 %vm12684_vm2, %v18098_v58  ;;  %v9951_v0 = vld [vmem:[%s18069_s0 + $0xc50] sm:$0xff] }
 0x308   :  { %v3977_v8 = vpop.f32.mrf.mxu1  ;;  %12249 = vmatmul.mubr.msk.f32.gmra.mxu1 %vm80_vm1, %v9950_v10  ;;  %v11829_v52 = vpop.f32.mrf.mxu0 }
 0x309   :  { %18337 = vst [vmem:[#allocation36_spill] sm:$0xff] %v16398_v11  ;;  %v16408_v42 = vmax.f32 %v18338_v59, %v4020_v36  ;;  %v3978_v49 = vadd.f32 %v16073_v62, %v3977_v8  ;;  %12251 = vmatprep.mubr.msk.f32.mxu1 %vm12684_vm2, %v18098_v58  ;;  %v3676_v10 = vmax.f32 %v3617_v18, 0.0  ;;  %v18340_v11 = vld [vmem:[#allocation44_spill] sm:$0xff]  ;;  %v18342_v59 = vld [vmem:[#allocation45_spill] sm:$0xff] }
 0x30a   :  { %v11924_v26 = vpop.f32.mrf.mxu1  ;;  %v3621_v60 = vpop.f32.mrf.mxu0  ;;  %12157 = vmatmul.mubr.msk.f32.gmra.mxu0 %vm80_vm1, %v9896_v13  ;;  %v9897_v18 = vld [vmem:[%s18069_s0 + $0xb70] sm:$0xff] }
 0x30b   :  { %18339 = vst [vmem:[#allocation37_spill] sm:$0xff] %v16408_v42  ;;  %v4021_v27 = vmax.f32 %v3978_v49, 0.0  ;;  %v16418_v31 = vmax.f32 %v18340_v11, %v3676_v10  ;;  %v3622_v36 = vadd.f32 %v16073_v62, %v3621_v60  ;;  %12159 = vmatprep.mubr.msk.f32.mxu0 %vm12684_vm2, %v18098_v58  ;;  %v9952_v11 = vld [vmem:[%s18069_s0 + $0xc58] sm:$0xff] }
 0x30c   :  { %v3982_v8 = vpop.f32.mrf.mxu1  ;;  %12252 = vmatmul.mubr.msk.f32.gmra.mxu1 %vm80_vm1, %v9951_v0  ;;  %v11832_v52 = vpop.f32.mrf.mxu0 }
 0x30d   :  { %18341 = vst [vmem:[#allocation38_spill] sm:$0xff] %v16418_v31  ;;  %v16428_v49 = vmax.f32 %v18342_v59, %v4021_v27  ;;  %v3983_v13 = vadd.f32 %v16073_v62, %v3982_v8  ;;  %12254 = vmatprep.mubr.msk.f32.mxu1 %vm12684_vm2, %v18098_v58  ;;  %v3677_v0 = vmax.f32 %v3622_v36, 0.0  ;;  %v18344_v31 = vld [vmem:[#allocation46_spill] sm:$0xff]  ;;  %v9898_v36 = vld [vmem:[%s18069_s0 + $0xb78] sm:$0xff]  ;;  %v18346_v59 = vld [vmem:[#allocation47_spill] sm:$0xff] }
 0x30e   :  { %v11927_v10 = vpop.f32.mrf.mxu1  ;;  %v3626_v60 = vpop.f32.mrf.mxu0  ;;  %12160 = vmatmul.mubr.msk.f32.gmra.mxu0 %vm80_vm1, %v9897_v18 }
 0x30f   :  { %18343 = vst [vmem:[#allocation39_spill] sm:$0xff] %v16428_v49  ;;  %v4022_v26 = vmax.f32 %v3983_v13, 0.0  ;;  %v16438_v42 = vmax.f32 %v18344_v31, %v3677_v0  ;;  %v3627_v27 = vadd.f32 %v16073_v62, %v3626_v60  ;;  %12162 = vmatprep.mubr.msk.f32.mxu0 %vm12684_vm2, %v18098_v58  ;;  %v9953_v31 = vld [vmem:[%s18069_s0 + $0xc60] sm:$0xff] }
 0x310   :  { %v3987_v8 = vpop.f32.mrf.mxu1  ;;  %12255 = vmatmul.mubr.msk.f32.gmra.mxu1 %vm80_vm1, %v9952_v11  ;;  %v11835_v52 = vpop.f32.mrf.mxu0 }
 0x311   :  { %18345 = vst [vmem:[#allocation40_spill] sm:$0xff] %v16438_v42  ;;  %v16448_v13 = vmax.f32 %v18346_v59, %v4022_v26  ;;  %v3988_v18 = vadd.f32 %v16073_v62, %v3987_v8  ;;  %12257 = vmatprep.mubr.msk.f32.mxu1 %vm12684_vm2, %v18098_v58  ;;  %v3678_v11 = vmax.f32 %v3627_v27, 0.0  ;;  %v18347_v42 = vld [vmem:[#allocation48_spill] sm:$0xff]  ;;  %v9899_v27 = vld [vmem:[%s18069_s0 + $0xb80] sm:$0xff]  ;;  %v18349_v59 = vld [vmem:[#allocation49_spill] sm:$0xff] }
 0x312   :  { %v11930_v0 = vpop.f32.mrf.mxu1  ;;  %v3631_v60 = vpop.f32.mrf.mxu0  ;;  %12163 = vmatmul.mubr.msk.f32.gmra.mxu0 %vm80_vm1, %v9898_v36 }
 0x313   :  { %v4023_v10 = vmax.f32 %v3988_v18, 0.0  ;;  %v16458_v49 = vmax.f32 %v18347_v42, %v3678_v11  ;;  %v3632_v26 = vadd.f32 %v16073_v62, %v3631_v60  ;;  %12165 = vmatprep.mubr.msk.f32.mxu0 %vm12684_vm2, %v18098_v58  ;;  %v9954_v42 = vld [vmem:[%s18069_s0 + $0xc68] sm:$0xff] }
 0x314   :  { %v3992_v8 = vpop.f32.mrf.mxu1  ;;  %12258 = vmatmul.mubr.msk.f32.gmra.mxu1 %vm80_vm1, %v9953_v31  ;;  %v11838_v52 = vpop.f32.mrf.mxu0 }
 0x315   :  { %18348 = vst [vmem:[#allocation41_spill] sm:$0xff] %v16458_v49  ;;  %v16468_v18 = vmax.f32 %v18349_v59, %v4023_v10  ;;  %v3993_v36 = vadd.f32 %v16073_v62, %v3992_v8  ;;  %12260 = vmatprep.mubr.msk.f32.mxu1 %vm12684_vm2, %v18098_v58  ;;  %v3679_v31 = vmax.f32 %v3632_v26, 0.0  ;;  %v9900_v26 = vld [vmem:[%s18069_s0 + $0xb88] sm:$0xff] }
 0x316   :  { %v11933_v11 = vpop.f32.mrf.mxu1  ;;  %v3636_v60 = vpop.f32.mrf.mxu0  ;;  %12166 = vmatmul.mubr.msk.f32.gmra.mxu0 %vm80_vm1, %v9899_v27 }
 0x317   :  { %v4024_v0 = vmax.f32 %v3993_v36, 0.0  ;;  %v16478_v49 = vmax.f32 %v15383_v57, %v3679_v31  ;;  %v3637_v10 = vadd.f32 %v16073_v62, %v3636_v60  ;;  %12168 = vmatprep.mubr.msk.f32.mxu0 %vm12684_vm2, %v18098_v58  ;;  %v9955_v57 = vld [vmem:[%s18069_s0 + $0xc70] sm:$0xff] }
 0x318   :  { %v3997_v8 = vpop.f32.mrf.mxu1  ;;  %12261 = vmatmul.mubr.msk.f32.gmra.mxu1 %vm80_vm1, %v9954_v42  ;;  %v11841_v36 = vpop.f32.mrf.mxu0 }
 0x319   :  { %v16488_v59 = vmax.f32 %v15392_v54, %v4024_v0  ;;  %v3998_v27 = vadd.f32 %v16073_v62, %v3997_v8  ;;  %12263 = vmatprep.mubr.msk.f32.mxu1 %vm12684_vm2, %v18098_v58  ;;  %v3680_v52 = vmax.f32 %v3637_v10, 0.0  ;;  %v9901_v10 = vld [vmem:[%s18069_s0 + $0xb90] sm:$0xff] }
 0x31a   :  { %v11936_v42 = vpop.f32.mrf.mxu1  ;;  %v3641_v11 = vpop.f32.mrf.mxu0  ;;  %12169 = vmatmul.mubr.msk.f32.gmra.mxu0 %vm80_vm1, %v9900_v26 }
 0x31b   :  { %v4025_v31 = vmax.f32 %v3998_v27, 0.0  ;;  %v16498_v60 = vmax.f32 %v15403_v7, %v3680_v52  ;;  %v3642_v54 = vadd.f32 %v16073_v62, %v3641_v11  ;;  %12171 = vmatprep.mubr.msk.f32.mxu0 %vm12684_vm2, %v18098_v58  ;;  %v9956_v7 = vld [vmem:[%s18069_s0 + $0xc78] sm:$0xff]  ;;  %v18351_v11 = vld [vmem:[#allocation50_spill] sm:$0xff] }
 0x31c   :  { %v4559_v0 = vpop.f32.mrf.mxu1  ;;  %12264 = vmatmul.mubr.msk.f32.gmra.mxu1 %vm80_vm1, %v9955_v57  ;;  %v11844_v27 = vpop.f32.mrf.mxu0 }
 0x31d   :  { %18350 = vst [vmem:[#allocation42_spill] sm:$0xff] %v16498_v60  ;;  %v16508_v8 = vmax.f32 %v15412_v33, %v4025_v31  ;;  %v4560_v26 = vadd.f32 %v16073_v62, %v4559_v0  ;;  %12266 = vmatprep.mubr.msk.f32.mxu1 %vm12684_vm2, %v18098_v58  ;;  %v3681_v36 = vmax.f32 %v3642_v54, 0.0  ;;  %v9902_v54 = vld [vmem:[%s18069_s0 + $0xb98] sm:$0xff] }
 0x31e   :  { %v12030_v57 = vpop.f32.mrf.mxu1  ;;  %v3646_v42 = vpop.f32.mrf.mxu0  ;;  %12172 = vmatmul.mubr.msk.f32.gmra.mxu0 %vm80_vm1, %v9901_v10 }
 0x31f   :  { %v4683_v52 = vmax.f32 %v4560_v26, 0.0  ;;  %v16518_v60 = vmax.f32 %v18351_v11, %v3681_v36  ;;  %v3647_v33 = vadd.f32 %v16073_v62, %v3646_v42  ;;  %12174 = vmatprep.mubr.msk.f32.mxu0 %vm12684_vm2, %v18098_v58 }
 0x320   :  { %v4564_v31 = vpop.f32.mrf.mxu1  ;;  %12267 = vmatmul.mubr.msk.f32.gmra.mxu1 %vm80_vm1, %v9956_v7  ;;  %v11847_v10 = vpop.f32.mrf.mxu0  ;;  %v10082_v7 = vld [vmem:[%s18071_s3 + $0xd8] sm:$0x3] }
 0x321   :  { %v4708_v0 = vmax.f32 %v15438_v12, %v4683_v52  ;;  %v4565_v26 = vadd.f32 %v16073_v62, %v4564_v31  ;;  %12372 = vmatprep.mubr.msk.f32.mxu1 %vm12684_vm2, %v18098_v58  ;;  %v3682_v27 = vmax.f32 %v3647_v33, 0.0  ;;  %v9903_v33 = vld [vmem:[%s18069_s0 + $0xba0] sm:$0xff]  ;;  %v10081_v31 = vld [vmem:[%s18071_s3 + $0xd0] sm:$0xff] }
 0x322   :  { %v12033_v36 = vpop.f32.mrf.mxu1  ;;  %v3651_v42 = vpop.f32.mrf.mxu0  ;;  %12175 = vmatmul.mubr.msk.f32.gmra.mxu0 %vm80_vm1, %v9902_v54  ;;  %v18352_v54 = vld [vmem:[#allocation51_spill] sm:$0xff] }
 0x323   :  { %v4684_v57 = vmax.f32 %v4565_v26, 0.0  ;;  %v16536_v11 = vmax.f32 %v15449_v39, %v3682_v27  ;;  %v3652_v12 = vadd.f32 %v16073_v62, %v3651_v42  ;;  %12177 = vmatprep.mubr.msk.f32.mxu0 %vm12684_vm2, %v18098_v58 }
 0x324   :  { %v4569_v52 = vpop.f32.mrf.mxu1  ;;  %12373 = vmatmul.mubr.msk.f32.vlgmr.msra.gmra.mxu1 %vm5423_vm4, %v4708_v0  ;;  %v11850_v10 = vpop.f32.mrf.mxu0 }
 0x325   :  { %v4709_v26 = vmax.f32 %v18352_v54, %v4684_v57  ;;  %v4570_v39 = vadd.f32 %v16073_v62, %v4569_v52  ;;  %12375 = vmatprep.mubr.msk.f32.mxu1 %vm12684_vm2, %v18098_v58  ;;  %12537 = vmatpush3.msk.msra.mxu1 %vm5499_vm3, %v10082_v7  ;;  %v3683_v0 = vmax.f32 %v3652_v12, 0.0  ;;  %v10080_v57 = vld [vmem:[%s18071_s3 + $0xc8] sm:$0xff] }
 0x326   :  { %v12036_v27 = vpop.f32.mrf.mxu1  ;;  %12538 = vmatprep.subr.mxu1 %v18098_v58  ;;  %v3656_v42 = vpop.f32.mrf.mxu0  ;;  %12178 = vmatmul.mubr.msk.f32.gmra.mxu0 %vm80_vm1, %v9903_v33  ;;  %v9904_v7 = vld [vmem:[%s18069_s0 + $0xba8] sm:$0xff] }
 0x327   :  { %v4685_v36 = vmax.f32 %v4570_v39, 0.0  ;;  %12539 = vmatpush3.msra.mxu1 %v10081_v31  ;;  %v16559_v52 = vmax.f32 %v15474_v53, %v3683_v0  ;;  %v3657_v54 = vadd.f32 %v16073_v62, %v3656_v42  ;;  %12180 = vmatprep.mubr.msk.f32.mxu0 %vm12684_vm2, %v18098_v58 }
 0x328   :  { %v4574_v10 = vpop.f32.mrf.mxu1  ;;  %12376 = vmatmul.mubr.msk.f32.gmra.mxu1 %vm5423_vm4, %v4709_v26  ;;  %v11853_v31 = vpop.f32.mrf.mxu0  ;;  %12540 = vmatprep.subr.mxu1 %v18098_v58  ;;  %v10079_v26 = vld [vmem:[%s18071_s3 + $0xc0] sm:$0xff] }
 0x329   :  { %v4710_v12 = vmax.f32 %v15484_v45, %v4685_v36  ;;  %v4575_v33 = vadd.f32 %v16073_v62, %v4574_v10  ;;  %12378 = vmatprep.mubr.msk.f32.mxu1 %vm12684_vm2, %v18098_v58  ;;  %v3684_v53 = vmax.f32 %v3657_v54, 0.0  ;;  %12541 = vmatpush3.msra.mxu1 %v10080_v57  ;;  %v9905_v57 = vld [vmem:[%s18069_s0 + $0xbb0] sm:$0xff]  ;;  %v10078_v54 = vld [vmem:[%s18071_s3 + $0xb8] sm:$0xff] }
 0x32a   :  { %v12039_v39 = vpop.f32.mrf.mxu1  ;;  %v4218_v27 = vpop.f32.mrf.mxu0  ;;  %12181 = vmatmul.mubr.msk.f32.gmra.mxu0 %vm80_vm1, %v9904_v7  ;;  %12542 = vmatprep.subr.mxu1 %v18098_v58 }
 0x32b   :  { %v4686_v0 = vmax.f32 %v4575_v33, 0.0  ;;  %v16579_v45 = vmax.f32 %v15496_v3, %v3684_v53  ;;  %v4219_v36 = vadd.f32 %v16073_v62, %v4218_v27  ;;  %12183 = vmatprep.mubr.msk.f32.mxu0 %vm12684_vm2, %v18098_v58  ;;  %12543 = vmatpush3.msra.mxu1 %v10079_v26 }
 0x32c   :  { %v4579_v42 = vpop.f32.mrf.mxu1  ;;  %12379 = vmatmul.mubr.msk.f32.gmra.mxu1 %vm5423_vm4, %v4710_v12  ;;  %v11947_v7 = vpop.f32.mrf.mxu0  ;;  %12544 = vmatprep.subr.mxu1 %v18098_v58 }
 0x32d   :  { %v4711_v10 = vmax.f32 %v15506_v56, %v4686_v0  ;;  %v4580_v3 = vadd.f32 %v16073_v62, %v4579_v42  ;;  %12381 = vmatprep.mubr.msk.f32.mxu1 %vm12684_vm2, %v18098_v58  ;;  %v4342_v12 = vmax.f32 %v4219_v36, 0.0  ;;  %12545 = vmatpush3.msra.mxu1 %v10078_v54  ;;  %v10077_v56 = vld [vmem:[%s18071_s3 + $0xb0] sm:$0xff] }
 0x32e   :  { %v12042_v33 = vpop.f32.mrf.mxu1  ;;  %v4223_v53 = vpop.f32.mrf.mxu0  ;;  %12184 = vmatmul.mubr.msk.f32.gmra.mxu0 %vm80_vm1, %v9905_v57  ;;  %12546 = vmatprep.subr.mxu1 %v18098_v58 }
 0x32f   :  { %v4687_v31 = vmax.f32 %v4580_v3, 0.0  ;;  %v4367_v39 = vmax.f32 %v15518_v40, %v4342_v12  ;;  %v4224_v0 = vadd.f32 %v16073_v62, %v4223_v53  ;;  %12283 = vmatprep.mubr.msk.f32.mxu0 %vm12684_vm2, %v18098_v58  ;;  %v10049_v40 = vld [vmem:[%s18071_s3 + $0xa0] sm:$0x3]  ;;  %12547 = vmatpush3.msra.mxu1 %v10077_v56 }
 0x330   :  { %v4584_v27 = vpop.f32.mrf.mxu1  ;;  %12382 = vmatmul.mubr.msk.f32.gmra.mxu1 %vm5423_vm4, %v4711_v10  ;;  %v11950_v42 = vpop.f32.mrf.mxu0  ;;  %12548 = vmatprep.subr.mxu1 %v18098_v58 }
 0x331   :  { %v4712_v26 = vmax.f32 %v15528_v2, %v4687_v31  ;;  %v4585_v36 = vadd.f32 %v16073_v62, %v4584_v27  ;;  %12384 = vmatprep.mubr.msk.f32.mxu1 %vm12684_vm2, %v18098_v58  ;;  %v4343_v57 = vmax.f32 %v4224_v0, 0.0  ;;  %v10076_v2 = vld [vmem:[%s18071_s3 + $0xa8] sm:$0xff]  ;;  %v10048_v0 = vld [vmem:[%s18071_s3 + $0x98] sm:$0xff] }
 0x332   :  { %v12045_v54 = vpop.f32.mrf.mxu1  ;;  %v4228_v3 = vpop.f32.mrf.mxu0  ;;  %12284 = vmatmul.mubr.msk.f32.vlgmr.msra.gmra.mxu0 %vm5423_vm4, %v4367_v39  ;;  %12549 = vmatpush3.msra.mxu1 %v10076_v2 }
 0x333   :  { %v4688_v10 = vmax.f32 %v4585_v36, 0.0  ;;  %v4368_v7 = vmax.f32 %v15538_v17, %v4343_v57  ;;  %v4229_v12 = vadd.f32 %v16073_v62, %v4228_v3  ;;  %12448 = vmatpush3.msk.msra.mxu0 %vm5499_vm3, %v10049_v40  ;;  %12286 = vmatprep.mubr.msk.f32.mxu0 %vm12684_vm2, %v18098_v58 }
 0x334   :  { %v4589_v33 = vpop.f32.mrf.mxu1  ;;  %12385 = vmatmul.mubr.msk.f32.gmra.mxu1 %vm5423_vm4, %v4712_v26  ;;  %v11953_v56 = vpop.f32.mrf.mxu0  ;;  %12449 = vmatprep.subr.mxu0 %v18098_v58 }
 0x335   :  { %v4713_v31 = vmax.f32 %v15550_v22, %v4688_v10  ;;  %v4590_v53 = vadd.f32 %v16073_v62, %v4589_v33  ;;  %12387 = vmatprep.mubr.msk.f32.mxu1 %vm12684_vm2, %v18098_v58  ;;  %v4344_v39 = vmax.f32 %v4229_v12, 0.0  ;;  %12450 = vmatpush3.msra.mxu0 %v10048_v0 }
 0x336   :  { %v12048_v17 = vpop.f32.mrf.mxu1  ;;  %v4233_v22 = vpop.f32.mrf.mxu0  ;;  %12287 = vmatmul.mubr.msk.f32.gmra.mxu0 %vm5423_vm4, %v4368_v7  ;;  %12451 = vmatprep.subr.mxu0 %v18098_v58 }
 0x337   :  { %v4689_v27 = vmax.f32 %v4590_v53, 0.0  ;;  %v4369_v26 = vmax.f32 %v15563_v48, %v4344_v39  ;;  %v4234_v36 = vadd.f32 %v16073_v62, %v4233_v22  ;;  %12289 = vmatprep.mubr.msk.f32.mxu0 %vm12684_vm2, %v18098_v58  ;;  %v10047_v48 = vld [vmem:[%s18071_s3 + $0x90] sm:$0xff] }
 0x338   :  { %v4594_v42 = vpop.f32.mrf.mxu1  ;;  %12388 = vmatmul.mubr.msk.f32.gmra.mxu1 %vm5423_vm4, %v4713_v31  ;;  %v11956_v54 = vpop.f32.mrf.mxu0  ;;  %12452 = vmatpush3.msra.mxu0 %v10047_v48 }
 0x339   :  { %v4714_v40 = vmax.f32 %v15573_v23, %v4689_v27  ;;  %v4595_v57 = vadd.f32 %v16073_v62, %v4594_v42  ;;  %12390 = vmatprep.mubr.msk.f32.mxu1 %vm12684_vm2, %v18098_v58  ;;  %v4345_v10 = vmax.f32 %v4234_v36, 0.0  ;;  %12453 = vmatprep.subr.mxu0 %v18098_v58 }
 0x33a   :  { %v12051_v3 = vpop.f32.mrf.mxu1  ;;  %v4238_v7 = vpop.f32.mrf.mxu0  ;;  %12290 = vmatmul.mubr.msk.f32.gmra.mxu0 %vm5423_vm4, %v4369_v26 }
 0x33b   :  { %v4690_v2 = vmax.f32 %v4595_v57, 0.0  ;;  %v4370_v23 = vmax.f32 %v15587_v47, %v4345_v10  ;;  %v4239_v12 = vadd.f32 %v16073_v62, %v4238_v7  ;;  %12292 = vmatprep.mubr.msk.f32.mxu0 %vm12684_vm2, %v18098_v58  ;;  %v10046_v47 = vld [vmem:[%s18071_s3 + $0x88] sm:$0xff] }
 0x33c   :  { %v4599_v33 = vpop.f32.mrf.mxu1  ;;  %12391 = vmatmul.mubr.msk.f32.gmra.mxu1 %vm5423_vm4, %v4714_v40  ;;  %v11959_v56 = vpop.f32.mrf.mxu0  ;;  %12454 = vmatpush3.msra.mxu0 %v10046_v47 }
 0x33d   :  { %v4715_v31 = vmax.f32 %v15597_v6, %v4690_v2  ;;  %v4600_v53 = vadd.f32 %v16073_v62, %v4599_v33  ;;  %12393 = vmatprep.mubr.msk.f32.mxu1 %vm12684_vm2, %v18098_v58  ;;  %v4346_v39 = vmax.f32 %v4239_v12, 0.0  ;;  %12455 = vmatprep.subr.mxu0 %v18098_v58 }
 0x33e   :  { %v12054_v17 = vpop.f32.mrf.mxu1  ;;  %v4243_v27 = vpop.f32.mrf.mxu0  ;;  %12293 = vmatmul.mubr.msk.f32.gmra.mxu0 %vm5423_vm4, %v4370_v23 }
 0x33f   :  { %v4691_v0 = vmax.f32 %v4600_v53, 0.0  ;;  %v4371_v6 = vmax.f32 %v15611_v34, %v4346_v39  ;;  %v4244_v22 = vadd.f32 %v16073_v62, %v4243_v27  ;;  %12295 = vmatprep.mubr.msk.f32.mxu0 %vm12684_vm2, %v18098_v58  ;;  %v10045_v34 = vld [vmem:[%s18071_s3 + $0x80] sm:$0xff] }
 0x340   :  { %v4604_v26 = vpop.f32.mrf.mxu1  ;;  %12394 = vmatmul.mubr.msk.f32.gmra.mxu1 %vm5423_vm4, %v4715_v31  ;;  %v11962_v40 = vpop.f32.mrf.mxu0  ;;  %12456 = vmatpush3.msra.mxu0 %v10045_v34  ;;  %v10044_v31 = vld [vmem:[%s18071_s3 + $0x78] sm:$0xff] }
 0x341   :  { %v4716_v36 = vmax.f32 %v15621_v28, %v4691_v0  ;;  %v4605_v42 = vadd.f32 %v16073_v62, %v4604_v26  ;;  %12396 = vmatprep.mubr.msk.f32.mxu1 %vm12684_vm2, %v18098_v58  ;;  %v4347_v57 = vmax.f32 %v4244_v22, 0.0  ;;  %v16679_v62 = vld [vmem:[%s18070_s2] ss:$0 sm:$0xff]  ;;  %12457 = vmatprep.subr.mxu0 %v18098_v58 }
 0x342   :  { %v12057_v54 = vpop.f32.mrf.mxu1  ;;  %v4248_v3 = vpop.f32.mrf.mxu0  ;;  %12296 = vmatmul.mubr.msk.f32.gmra.mxu0 %vm5423_vm4, %v4371_v6 }
 0x343   :  { %v4692_v10 = vmax.f32 %v4605_v42, 0.0  ;;  %v4372_v28 = vmax.f32 %v15635_v29, %v4347_v57  ;;  %v4249_v48 = vadd.f32 %v16679_v62, %v4248_v3  ;;  %12298 = vmatprep.mubr.msk.f32.mxu0 %vm12684_vm2, %v18098_v58  ;;  %12458 = vmatpush3.msra.mxu0 %v10044_v31 }
 0x344   :  { %v4609_v2 = vpop.f32.mrf.mxu1  ;;  %12397 = vmatmul.mubr.msk.f32.gmra.mxu1 %vm5423_vm4, %v4716_v36  ;;  %v11965_v12 = vpop.f32.mrf.mxu0  ;;  %12459 = vmatprep.subr.mxu0 %v18098_v58 }
 0x345   :  { %v4717_v7 = vmax.f32 %v15645_v55, %v4692_v10  ;;  %v4610_v23 = vadd.f32 %v16679_v62, %v4609_v2  ;;  %12399 = vmatprep.mubr.msk.f32.mxu1 %vm12684_vm2, %v18098_v58  ;;  %v4348_v29 = vmax.f32 %v4249_v48, 0.0 }
 0x346   :  { %v12060_v33 = vpop.f32.mrf.mxu1  ;;  %v4253_v56 = vpop.f32.mrf.mxu0  ;;  %12299 = vmatmul.mubr.msk.f32.gmra.mxu0 %vm5423_vm4, %v4372_v28 }
 0x347   :  { %v4693_v53 = vmax.f32 %v4610_v23, 0.0  ;;  %v4373_v55 = vmax.f32 %v15655_v1, %v4348_v29  ;;  %v4254_v39 = vadd.f32 %v16679_v62, %v4253_v56  ;;  %12301 = vmatprep.mubr.msk.f32.mxu0 %vm12684_vm2, %v18098_v58  ;;  %v10043_v1 = vld [vmem:[%s18071_s3 + $0x70] sm:$0xff] }
 0x348   :  { %v4614_v17 = vpop.f32.mrf.mxu1  ;;  %12400 = vmatmul.mubr.msk.f32.gmra.mxu1 %vm5423_vm4, %v4717_v7  ;;  %v11968_v27 = vpop.f32.mrf.mxu0  ;;  %12460 = vmatpush3.msra.mxu0 %v10043_v1 }
 0x349   :  { %v4718_v47 = vmax.f32 %v15665_v44, %v4693_v53  ;;  %v4615_v0 = vadd.f32 %v16679_v62, %v4614_v17  ;;  %12402 = vmatprep.mubr.msk.f32.mxu1 %vm12684_vm2, %v18098_v58  ;;  %v4349_v6 = vmax.f32 %v4254_v39, 0.0 }
 0x34a   :  { %v12063_v22 = vpop.f32.mrf.mxu1  ;;  %v4258_v36 = vpop.f32.mrf.mxu0  ;;  %12302 = vmatmul.mubr.msk.f32.gmra.mxu0 %vm5423_vm4, %v4373_v55 }
 0x34b   :  { %v4694_v26 = vmax.f32 %v4615_v0, 0.0  ;;  %v4374_v44 = vmax.f32 %v15675_v14, %v4349_v6  ;;  %v4259_v42 = vadd.f32 %v16679_v62, %v4258_v36  ;;  %12304 = vmatprep.mubr.msk.f32.mxu0 %vm12684_vm2, %v18098_v58 }
 0x34c   :  { %v4619_v40 = vpop.f32.mrf.mxu1  ;;  %12403 = vmatmul.mubr.msk.f32.gmra.mxu1 %vm5423_vm4, %v4718_v47  ;;  %v11971_v34 = vpop.f32.mrf.mxu0 }
 0x34d   :  { %v4719_v57 = vmax.f32 %v15685_v19, %v4694_v26  ;;  %v4620_v54 = vadd.f32 %v16679_v62, %v4619_v40  ;;  %12405 = vmatprep.mubr.msk.f32.mxu1 %vm12684_vm2, %v18098_v58  ;;  %v4350_v10 = vmax.f32 %v4259_v42, 0.0 }
 0x34e   :  { %v12066_v3 = vpop.f32.mrf.mxu1  ;;  %v4263_v28 = vpop.f32.mrf.mxu0  ;;  %12305 = vmatmul.mubr.msk.f32.gmra.mxu0 %vm5423_vm4, %v4374_v44 }
 0x34f   :  { %v4695_v14 = vmax.f32 %v4620_v54, 0.0  ;;  %v4375_v48 = vmax.f32 %v15695_v32, %v4350_v10  ;;  %v4264_v2 = vadd.f32 %v16679_v62, %v4263_v28  ;;  %12307 = vmatprep.mubr.msk.f32.mxu0 %vm12684_vm2, %v18098_v58 }
 0x350   :  { %v4624_v7 = vpop.f32.mrf.mxu1  ;;  %12406 = vmatmul.mubr.msk.f32.gmra.mxu1 %vm5423_vm4, %v4719_v57  ;;  %v11974_v12 = vpop.f32.mrf.mxu0 }
 0x351   :  { %v4720_v19 = vmax.f32 %v15705_v50, %v4695_v14  ;;  %v4625_v23 = vadd.f32 %v16679_v62, %v4624_v7  ;;  %12408 = vmatprep.mubr.msk.f32.mxu1 %vm12684_vm2, %v18098_v58  ;;  %v4351_v29 = vmax.f32 %v4264_v2, 0.0 }
 0x352   :  { %v12069_v33 = vpop.f32.mrf.mxu1  ;;  %v4268_v32 = vpop.f32.mrf.mxu0  ;;  %12308 = vmatmul.mubr.msk.f32.gmra.mxu0 %vm5423_vm4, %v4375_v48 }
 0x353   :  { %v4696_v31 = vmax.f32 %v4625_v23, 0.0  ;;  %v4376_v53 = vmax.f32 %v15715_v5, %v4351_v29  ;;  %v4269_v56 = vadd.f32 %v16679_v62, %v4268_v32  ;;  %12310 = vmatprep.mubr.msk.f32.mxu0 %vm12684_vm2, %v18098_v58 }
 0x354   :  { %v4629_v55 = vpop.f32.mrf.mxu1  ;;  %12409 = vmatmul.mubr.msk.f32.gmra.mxu1 %vm5423_vm4, %v4720_v19  ;;  %v11977_v17 = vpop.f32.mrf.mxu0 }
 0x355   :  { %v4721_v50 = vmax.f32 %v15725_v61, %v4696_v31  ;;  %v4630_v39 = vadd.f32 %v16679_v62, %v4629_v55  ;;  %12411 = vmatprep.mubr.msk.f32.mxu1 %vm12684_vm2, %v18098_v58  ;;  %v4352_v47 = vmax.f32 %v4269_v56, 0.0 }
 0x356   :  { %v12072_v0 = vpop.f32.mrf.mxu1  ;;  %v4273_v5 = vpop.f32.mrf.mxu0  ;;  %12311 = vmatmul.mubr.msk.f32.gmra.mxu0 %vm5423_vm4, %v4376_v53 }
 0x357   :  { %v4697_v27 = vmax.f32 %v4630_v39, 0.0  ;;  %v4377_v6 = vmax.f32 %v15735_v37, %v4352_v47  ;;  %v4274_v22 = vadd.f32 %v16679_v62, %v4273_v5  ;;  %12313 = vmatprep.mubr.msk.f32.mxu0 %vm12684_vm2, %v18098_v58 }
 0x358   :  { %v4634_v1 = vpop.f32.mrf.mxu1  ;;  %12412 = vmatmul.mubr.msk.f32.gmra.mxu1 %vm5423_vm4, %v4721_v50  ;;  %v11980_v36 = vpop.f32.mrf.mxu0 }
 0x359   :  { %v4722_v61 = vmax.f32 %v15745_v16, %v4697_v27  ;;  %v4635_v26 = vadd.f32 %v16679_v62, %v4634_v1  ;;  %12414 = vmatprep.mubr.msk.f32.mxu1 %vm12684_vm2, %v18098_v58  ;;  %v4353_v44 = vmax.f32 %v4274_v22, 0.0 }
 0x35a   :  { %v12075_v42 = vpop.f32.mrf.mxu1  ;;  %v4278_v37 = vpop.f32.mrf.mxu0  ;;  %12314 = vmatmul.mubr.msk.f32.gmra.mxu0 %vm5423_vm4, %v4377_v6 }
 0x35b   :  { %v4698_v40 = vmax.f32 %v4635_v26, 0.0  ;;  %v4378_v57 = vmax.f32 %v15755_v46, %v4353_v44  ;;  %v4279_v54 = vadd.f32 %v16679_v62, %v4278_v37  ;;  %12316 = vmatprep.mubr.msk.f32.mxu0 %vm12684_vm2, %v18098_v58 }
 0x35c   :  { %v4639_v34 = vpop.f32.mrf.mxu1  ;;  %12415 = vmatmul.mubr.msk.f32.gmra.mxu1 %vm5423_vm4, %v4722_v61  ;;  %v11983_v3 = vpop.f32.mrf.mxu0 }
 0x35d   :  { %v4723_v16 = vmax.f32 %v15765_v21, %v4698_v40  ;;  %v4640_v10 = vadd.f32 %v16679_v62, %v4639_v34  ;;  %12417 = vmatprep.mubr.msk.f32.mxu1 %vm12684_vm2, %v18098_v58  ;;  %v4354_v14 = vmax.f32 %v4279_v54, 0.0 }
 0x35e   :  { %v12078_v28 = vpop.f32.mrf.mxu1  ;;  %v4283_v46 = vpop.f32.mrf.mxu0  ;;  %12317 = vmatmul.mubr.msk.f32.gmra.mxu0 %vm5423_vm4, %v4378_v57 }
 0x35f   :  { %v4699_v48 = vmax.f32 %v4640_v10, 0.0  ;;  %v4379_v2 = vmax.f32 %v15775_v38, %v4354_v14  ;;  %v4284_v7 = vadd.f32 %v16679_v62, %v4283_v46  ;;  %12319 = vmatprep.mubr.msk.f32.mxu0 %vm12684_vm2, %v18098_v58 }
 0x360   :  { %v4644_v19 = vpop.f32.mrf.mxu1  ;;  %12418 = vmatmul.mubr.msk.f32.gmra.mxu1 %vm5423_vm4, %v4723_v16  ;;  %v11986_v12 = vpop.f32.mrf.mxu0 }
 0x361   :  { %v4724_v21 = vmax.f32 %v15785_v15, %v4699_v48  ;;  %v4645_v23 = vadd.f32 %v16679_v62, %v4644_v19  ;;  %12420 = vmatprep.mubr.msk.f32.mxu1 %vm12684_vm2, %v18098_v58  ;;  %v4355_v29 = vmax.f32 %v4284_v7, 0.0 }
 0x362   :  { %v12081_v33 = vpop.f32.mrf.mxu1  ;;  %v4288_v38 = vpop.f32.mrf.mxu0  ;;  %12320 = vmatmul.mubr.msk.f32.gmra.mxu0 %vm5423_vm4, %v4379_v2 }
 0x363   :  { %v4700_v31 = vmax.f32 %v4645_v23, 0.0  ;;  %v4380_v32 = vmax.f32 %v15795_v24, %v4355_v29  ;;  %v4289_v53 = vadd.f32 %v16679_v62, %v4288_v38  ;;  %12322 = vmatprep.mubr.msk.f32.mxu0 %vm12684_vm2, %v18098_v58 }
 0x364   :  { %v4649_v56 = vpop.f32.mrf.mxu1  ;;  %12421 = vmatmul.mubr.msk.f32.gmra.mxu1 %vm5423_vm4, %v4724_v21  ;;  %v11989_v50 = vpop.f32.mrf.mxu0 }
 0x365   :  { %v4725_v15 = vmax.f32 %v15805_v20, %v4700_v31  ;;  %v4650_v55 = vadd.f32 %v16679_v62, %v4649_v56  ;;  %12423 = vmatprep.mubr.msk.f32.mxu1 %vm12684_vm2, %v18098_v58  ;;  %v4356_v39 = vmax.f32 %v4289_v53, 0.0 }
 0x366   :  { %v12084_v17 = vpop.f32.mrf.mxu1  ;;  %v4293_v24 = vpop.f32.mrf.mxu0  ;;  %12323 = vmatmul.mubr.msk.f32.gmra.mxu0 %vm5423_vm4, %v4380_v32 }
 0x367   :  { %v4701_v47 = vmax.f32 %v4650_v55, 0.0  ;;  %v4381_v0 = vmax.f32 %v15815_v4, %v4356_v39  ;;  %v4294_v27 = vadd.f32 %v16679_v62, %v4293_v24  ;;  %12325 = vmatprep.mubr.msk.f32.mxu0 %vm12684_vm2, %v18098_v58 }
 0x368   :  { %v4654_v5 = vpop.f32.mrf.mxu1  ;;  %12424 = vmatmul.mubr.msk.f32.gmra.mxu1 %vm5423_vm4, %v4725_v15  ;;  %v11992_v22 = vpop.f32.mrf.mxu0 }
 0x369   :  { %v4726_v20 = vmax.f32 %v15825_v25, %v4701_v47  ;;  %v4655_v6 = vadd.f32 %v16679_v62, %v4654_v5  ;;  %12426 = vmatprep.mubr.msk.f32.mxu1 %vm12684_vm2, %v18098_v58  ;;  %v4357_v1 = vmax.f32 %v4294_v27, 0.0  ;;  %v18354_v47 = vld [vmem:[#allocation53_spill] sm:$0xff]  ;;  %v18355_v5 = vld [vmem:[#allocation54_spill] sm:$0xff] }
 0x36a   :  { %v12087_v61 = vpop.f32.mrf.mxu1  ;;  %v4298_v4 = vpop.f32.mrf.mxu0  ;;  %12326 = vmatmul.mubr.msk.f32.gmra.mxu0 %vm5423_vm4, %v4381_v0 }
 0x36b   :  { %v4702_v26 = vmax.f32 %v4655_v6, 0.0  ;;  %v4382_v36 = vmax.f32 %v15835_v63, %v4357_v1  ;;  %v4299_v44 = vadd.f32 %v16679_v62, %v4298_v4  ;;  %12328 = vmatprep.mubr.msk.f32.mxu0 %vm12684_vm2, %v18098_v58 }
 0x36c   :  { %v4659_v42 = vpop.f32.mrf.mxu1  ;;  %12427 = vmatmul.mubr.msk.f32.gmra.mxu1 %vm5423_vm4, %v4726_v20  ;;  %v11995_v37 = vpop.f32.mrf.mxu0 }
 0x36d   :  { %v4727_v25 = vmax.f32 %v15845_v30, %v4702_v26  ;;  %v4660_v40 = vadd.f32 %v16679_v62, %v4659_v42  ;;  %12429 = vmatprep.mubr.msk.f32.mxu1 %vm12684_vm2, %v18098_v58  ;;  %v4358_v57 = vmax.f32 %v4299_v44, 0.0 }
 0x36e   :  { %v12090_v54 = vpop.f32.mrf.mxu1  ;;  %v4303_v63 = vpop.f32.mrf.mxu0  ;;  %12329 = vmatmul.mubr.msk.f32.gmra.mxu0 %vm5423_vm4, %v4382_v36  ;;  %v18356_v36 = vld [vmem:[#allocation55_spill] sm:$0xff] }
 0x36f   :  { %v4703_v34 = vmax.f32 %v4660_v40, 0.0  ;;  %v4383_v16 = vmax.f32 %v15855_v43, %v4358_v57  ;;  %v4304_v10 = vadd.f32 %v16679_v62, %v4303_v63  ;;  %12331 = vmatprep.mubr.msk.f32.mxu0 %vm12684_vm2, %v18098_v58  ;;  %v18357_v40 = vld [vmem:[#allocation56_spill] sm:$0xff] }
 0x370   :  { %v4664_v3 = vpop.f32.mrf.mxu1  ;;  %12430 = vmatmul.mubr.msk.f32.gmra.mxu1 %vm5423_vm4, %v4727_v25  ;;  %v11998_v28 = vpop.f32.mrf.mxu0 }
 0x371   :  { %v4728_v30 = vmax.f32 %v15865_v35, %v4703_v34  ;;  %v4665_v14 = vadd.f32 %v16679_v62, %v4664_v3  ;;  %12432 = vmatprep.mubr.msk.f32.mxu1 %vm12684_vm2, %v18098_v58  ;;  %v4359_v48 = vmax.f32 %v4304_v10, 0.0  ;;  %v18358_v3 = vld [vmem:[#allocation57_spill] sm:$0xff] }
 0x372   :  { %v12093_v46 = vpop.f32.mrf.mxu1  ;;  %v4308_v43 = vpop.f32.mrf.mxu0  ;;  %12332 = vmatmul.mubr.msk.f32.gmra.mxu0 %vm5423_vm4, %v4383_v16 }
 0x373   :  { %v4704_v2 = vmax.f32 %v4665_v14, 0.0  ;;  %v4384_v7 = vmax.f32 %v15875_v51, %v4359_v48  ;;  %v4309_v19 = vadd.f32 %v16679_v62, %v4308_v43  ;;  %12334 = vmatprep.mubr.msk.f32.mxu0 %vm12684_vm2, %v18098_v58  ;;  %v18359_v48 = vld [vmem:[#allocation58_spill] sm:$0xff] }
 0x374   :  { %v4669_v21 = vpop.f32.mrf.mxu1  ;;  %12433 = vmatmul.mubr.msk.f32.gmra.mxu1 %vm5423_vm4, %v4728_v30  ;;  %v12001_v12 = vpop.f32.mrf.mxu0 }
 0x375   :  { %v4729_v35 = vmax.f32 %v15885_v41, %v4704_v2  ;;  %v4670_v23 = vadd.f32 %v16679_v62, %v4669_v21  ;;  %12435 = vmatprep.mubr.msk.f32.mxu1 %vm12684_vm2, %v18098_v58  ;;  %v4360_v29 = vmax.f32 %v4309_v19, 0.0  ;;  %v18353_v41 = vld [vmem:[#allocation52_spill] sm:$0xff] }
 0x376   :  { %v12096_v33 = vpop.f32.mrf.mxu1  ;;  %v4313_v51 = vpop.f32.mrf.mxu0  ;;  %12335 = vmatmul.mubr.msk.f32.gmra.mxu0 %vm5423_vm4, %v4384_v7 }
 0x377   :  { %v4705_v31 = vmax.f32 %v4670_v23, 0.0  ;;  %v4385_v38 = vmax.f32 %v15895_v9, %v4360_v29  ;;  %v4314_v32 = vadd.f32 %v16679_v62, %v4313_v51  ;;  %12337 = vmatprep.mubr.msk.f32.mxu0 %vm12684_vm2, %v18098_v58  ;;  %v18360_v23 = vld [vmem:[#allocation59_spill] sm:$0xff] }
 0x378   :  { %v4674_v53 = vpop.f32.mrf.mxu1  ;;  %12436 = vmatmul.mubr.msk.f32.gmra.mxu1 %vm5423_vm4, %v4729_v35  ;;  %v12004_v55 = vpop.f32.mrf.mxu0 }
 0x379   :  { %v4730_v56 = vmax.f32 %v18353_v41, %v4705_v31  ;;  %v4675_v15 = vadd.f32 %v16679_v62, %v4674_v53  ;;  %12438 = vmatprep.mubr.msk.f32.mxu1 %vm12684_vm2, %v18098_v58  ;;  %v4361_v50 = vmax.f32 %v4314_v32, 0.0  ;;  %v18361_v31 = vld [vmem:[#allocation60_spill] sm:$0xff]  ;;  %v18362_v55 = vld [vmem:[#allocation2_spill] sm:$0xff] }
 0x37a   :  { %v12099_v39 = vpop.f32.mrf.mxu1  ;;  %v4318_v9 = vpop.f32.mrf.mxu0  ;;  %12338 = vmatmul.mubr.msk.f32.gmra.mxu0 %vm5423_vm4, %v4385_v38 }
 0x37b   :  { %v4706_v17 = vmax.f32 %v4675_v15, 0.0  ;;  %v4386_v24 = vmax.f32 %v18354_v47, %v4361_v50  ;;  %v4319_v0 = vadd.f32 %v16679_v62, %v4318_v9  ;;  %12340 = vmatprep.mubr.msk.f32.mxu0 %vm12684_vm2, %v18098_v58  ;;  %v18363_v9 = vld [vmem:[#allocation5_spill] sm:$0xff] }
 0x37c   :  { %v4679_v27 = vpop.f32.mrf.mxu1  ;;  %12439 = vmatmul.mubr.msk.f32.gmra.mxu1 %vm5423_vm4, %v4730_v56  ;;  %v12007_v22 = vpop.f32.mrf.mxu0 }
 0x37d   :  { %v4731_v20 = vmax.f32 %v18355_v5, %v4706_v17  ;;  %v4680_v6 = vadd.f32 %v16679_v62, %v4679_v27  ;;  %12441 = vmatprep.mubr.msk.f32.mxu1 %vm12684_vm2, %v18098_v58  ;;  %v4362_v1 = vmax.f32 %v4319_v0, 0.0  ;;  %v18364_v22 = vld [vmem:[#allocation3_spill] sm:$0xff] }
 0x37e   :  { %v12102_v61 = vpop.f32.mrf.mxu1  ;;  %v4323_v4 = vpop.f32.mrf.mxu0  ;;  %12341 = vmatmul.mubr.msk.f32.gmra.mxu0 %vm5423_vm4, %v4386_v24 }
 0x37f   :  { %v4707_v26 = vmax.f32 %v4680_v6, 0.0  ;;  %v4387_v44 = vmax.f32 %v18356_v36, %v4362_v1  ;;  %v4324_v42 = vadd.f32 %v16679_v62, %v4323_v4  ;;  %12343 = vmatprep.mubr.msk.f32.mxu0 %vm12684_vm2, %v18098_v58  ;;  %v18365_v4 = vld [vmem:[#allocation7_spill] sm:$0xff] }
 0x380   :  { %v5241_v25 = vpop.f32.mrf.mxu1  ;;  %12442 = vmatmul.mubr.msk.f32.gmra.mxu1 %vm5423_vm4, %v4731_v20  ;;  %v12010_v54 = vpop.f32.mrf.mxu0 }
 0x381   :  { %v4732_v37 = vmax.f32 %v18357_v40, %v4707_v26  ;;  %v5242_v57 = vadd.f32 %v16679_v62, %v5241_v25  ;;  %12444 = vmatprep.mubr.msk.f32.mxu1 %vm12684_vm2, %v18098_v58  ;;  %v4363_v34 = vmax.f32 %v4324_v42, 0.0  ;;  %v18366_v54 = vld [vmem:[#allocation4_spill] sm:$0xff] }
 0x382   :  { %v12196_v63 = vpop.f32.mrf.mxu1  ;;  %v4328_v10 = vpop.f32.mrf.mxu0  ;;  %12344 = vmatmul.mubr.msk.f32.gmra.mxu0 %vm5423_vm4, %v4387_v44 }
 0x383   :  { %v5365_v16 = vmax.f32 %v5242_v57, 0.0  ;;  %v4388_v30 = vmax.f32 %v18358_v3, %v4363_v34  ;;  %v4329_v14 = vadd.f32 %v16679_v62, %v4328_v10  ;;  %12346 = vmatprep.mubr.msk.f32.mxu0 %vm12684_vm2, %v18098_v58  ;;  %v18367_v10 = vld [vmem:[#allocation8_spill] sm:$0xff] }
 0x384   :  { %v5246_v28 = vpop.f32.mrf.mxu1  ;;  %12445 = vmatmul.mubr.msk.f32.gmra.mxu1 %vm5423_vm4, %v4732_v37  ;;  %v12013_v43 = vpop.f32.mrf.mxu0 }
 0x385   :  { %v5390_v46 = vmax.f32 %v18359_v48, %v5365_v16  ;;  %v5247_v2 = vadd.f32 %v16679_v62, %v5246_v28  ;;  %12550 = vmatprep.mubr.msk.f32.mxu1 %vm12684_vm2, %v18098_v58  ;;  %v4364_v7 = vmax.f32 %v4329_v14, 0.0  ;;  %v18368_v43 = vld [vmem:[#allocation6_spill] sm:$0xff] }
 0x386   :  { %v12199_v19 = vpop.f32.mrf.mxu1  ;;  %v4333_v35 = vpop.f32.mrf.mxu0  ;;  %12347 = vmatmul.mubr.msk.f32.gmra.mxu0 %vm5423_vm4, %v4388_v30 }
 0x387   :  { %v5366_v21 = vmax.f32 %v5247_v2, 0.0  ;;  %v4389_v12 = vmax.f32 %v18360_v23, %v4364_v7  ;;  %v4334_v29 = vadd.f32 %v16679_v62, %v4333_v35  ;;  %12349 = vmatprep.mubr.msk.f32.mxu0 %vm12684_vm2, %v18098_v58  ;;  %v18369_v35 = vld [vmem:[#allocation9_spill] sm:$0xff] }
 0x388   :  { %v5251_v33 = vpop.f32.mrf.mxu1  ;;  %12551 = vmatmul.mubr.msk.f32.vlgmr.msra.gmra.mxu1 %vm5423_vm4, %v5390_v46  ;;  %v12016_v32 = vpop.f32.mrf.mxu0 }
 0x389   :  { %v5391_v51 = vmax.f32 %v18361_v31, %v5366_v21  ;;  %v5252_v38 = vadd.f32 %v16679_v62, %v5251_v33  ;;  %12553 = vmatprep.mubr.msk.f32.mxu1 %vm12684_vm2, %v18098_v58  ;;  %v4365_v53 = vmax.f32 %v4334_v29, 0.0  ;;  %v6747_v32 = vld [vmem:[%s18072_s7 + $0x28] sm:$0xf] }
 0x38a   :  { %v12202_v41 = vpop.f32.mrf.mxu1  ;;  %v4338_v15 = vpop.f32.mrf.mxu0  ;;  %12350 = vmatmul.mubr.msk.f32.gmra.mxu0 %vm5423_vm4, %v4389_v12  ;;  %10111 = vmatprep.subr.msk.mxu0 %vm6752_vm5, %v6747_v32 }
 0x38b   :  { %v5367_v56 = vmax.f32 %v5252_v38, 0.0  ;;  %v4390_v50 = vmax.f32 %v18362_v55, %v4365_v53  ;;  %v4339_v39 = vadd.f32 %v16679_v62, %v4338_v15  ;;  %12352 = vmatprep.mubr.msk.f32.mxu0 %vm12684_vm2, %v18098_v58  ;;  %v6746_v53 = vld [vmem:[%s18072_s7 + $0x20] sm:$0xf] }
 0x38c   :  { %v5256_v17 = vpop.f32.mrf.mxu1  ;;  %12554 = vmatmul.mubr.msk.f32.gmra.mxu1 %vm5423_vm4, %v5391_v51  ;;  %v12019_v0 = vpop.f32.mrf.mxu0  ;;  %v18370_v41 = vld [vmem:[#allocation10_spill] sm:$0xff] }
 0x38d   :  { %v5392_v47 = vmax.f32 %v18363_v9, %v5367_v56  ;;  %v5257_v24 = vadd.f32 %v16679_v62, %v5256_v17  ;;  %12556 = vmatprep.mubr.msk.f32.mxu1 %vm12684_vm2, %v18098_v58  ;;  %v4366_v27 = vmax.f32 %v4339_v39, 0.0  ;;  %v10119_v0 = vld [vmem:[%s18072_s7 + $0x58] sm:$0xf] }
 0x38e   :  { %v12205_v5 = vpop.f32.mrf.mxu1  ;;  %v4900_v6 = vpop.f32.mrf.mxu0  ;;  %12353 = vmatmul.mubr.msk.f32.gmra.mxu0 %vm5423_vm4, %v4390_v50  ;;  %v18371_v50 = vld [vmem:[#allocation11_spill] sm:$0xff]  ;;  %10120 = vmatprep.subr.msk.mxu1 %vm6752_vm5, %v10119_v0 }
 0x38f   :  { %v5368_v20 = vmax.f32 %v5257_v24, 0.0  ;;  %v4391_v1 = vmax.f32 %v18364_v22, %v4366_v27  ;;  %v4901_v61 = vadd.f32 %v16679_v62, %v4900_v6  ;;  %12355 = vmatprep.mubr.msk.f32.mxu0 %vm12684_vm2, %v18098_v58  ;;  %v10118_v27 = vld [vmem:[%s18072_s7 + $0x50] sm:$0xf] }
 0x390   :  { %v5261_v26 = vpop.f32.mrf.mxu1  ;;  %12557 = vmatmul.mubr.msk.f32.gmra.mxu1 %vm5423_vm4, %v5392_v47  ;;  %v12113_v42 = vpop.f32.mrf.mxu0  ;;  %v18372_v6 = vld [vmem:[#allocation12_spill] sm:$0xff] }
 0x391   :  { %v5393_v36 = vmax.f32 %v18365_v4, %v5368_v20  ;;  %v5262_v44 = vadd.f32 %v16679_v62, %v5261_v26  ;;  %12559 = vmatprep.mubr.msk.f32.mxu1 %vm12684_vm2, %v18098_v58  ;;  %v5024_v25 = vmax.f32 %v4901_v61, 0.0  ;;  %v18373_v26 = vld [vmem:[#allocation13_spill] sm:$0xff]  ;;  %10121 = vmatpush1.msk.msra.mxu1 %vm6752_vm5, %v10118_v27 }
 0x392   :  { %v12208_v40 = vpop.f32.mrf.mxu1  ;;  %v4905_v57 = vpop.f32.mrf.mxu0  ;;  %12356 = vmatmul.mubr.msk.f32.gmra.mxu0 %vm5423_vm4, %v4391_v1 }
 0x393   :  { %v5369_v37 = vmax.f32 %v5262_v44, 0.0  ;;  %v5049_v34 = vmax.f32 %v18366_v54, %v5024_v25  ;;  %v4906_v63 = vadd.f32 %v16679_v62, %v4905_v57  ;;  %12461 = vmatprep.mubr.msk.f32.mxu0 %vm12684_vm2, %v18098_v58  ;;  %v18374_v57 = vld [vmem:[#allocation14_spill] sm:$0xff] }
 0x394   :  { %v5266_v16 = vpop.f32.mrf.mxu1  ;;  %12560 = vmatmul.mubr.msk.f32.gmra.mxu1 %vm5423_vm4, %v5393_v36  ;;  %v12116_v14 = vpop.f32.mrf.mxu0 }
 0x395   :  { %v5394_v3 = vmax.f32 %v18367_v10, %v5369_v37  ;;  %v5267_v30 = vadd.f32 %v16679_v62, %v5266_v16  ;;  %12562 = vmatprep.mubr.msk.f32.mxu1 %vm12684_vm2, %v18098_v58  ;;  %v5025_v28 = vmax.f32 %v4906_v63, 0.0  ;;  %v18375_v16 = vld [vmem:[#allocation15_spill] sm:$0xff] }
 0x396   :  { %v12211_v48 = vpop.f32.mrf.mxu1  ;;  %v4910_v2 = vpop.f32.mrf.mxu0  ;;  %12462 = vmatmul.mubr.msk.f32.vlgmr.msra.gmra.mxu0 %vm5423_vm4, %v5049_v34 }
 0x397   :  { %v5370_v46 = vmax.f32 %v5267_v30, 0.0  ;;  %v5050_v7 = vmax.f32 %v18368_v43, %v5025_v28  ;;  %v4911_v19 = vadd.f32 %v16679_v62, %v4910_v2  ;;  %12464 = vmatprep.mubr.msk.f32.mxu0 %vm12684_vm2, %v18098_v58  ;;  %10112 = vmatpush1.msk.msra.mxu0 %vm6752_vm5, %v6746_v53  ;;  %v18376_v2 = vld [vmem:[#allocation16_spill] sm:$0xff] }
 0x398   :  { %v5271_v21 = vpop.f32.mrf.mxu1  ;;  %12563 = vmatmul.mubr.msk.f32.gmra.mxu1 %vm5423_vm4, %v5394_v3  ;;  %v12119_v29 = vpop.f32.mrf.mxu0 }
 0x399   :  { %v5395_v23 = vmax.f32 %v18369_v35, %v5370_v46  ;;  %v5272_v12 = vadd.f32 %v16679_v62, %v5271_v21  ;;  %12565 = vmatprep.mubr.msk.f32.mxu1 %vm12684_vm2, %v18098_v58  ;;  %v5026_v33 = vmax.f32 %v4911_v19, 0.0  ;;  %v18377_v21 = vld [vmem:[#allocation17_spill] sm:$0xff] }
 0x39a   :  { %v12214_v31 = vpop.f32.mrf.mxu1  ;;  %v4915_v38 = vpop.f32.mrf.mxu0  ;;  %12465 = vmatmul.mubr.msk.f32.gmra.mxu0 %vm5423_vm4, %v5050_v7 }
 0x39b   :  { %v5371_v51 = vmax.f32 %v5272_v12, 0.0  ;;  %v5051_v56 = vmax.f32 %v18370_v41, %v5026_v33  ;;  %v4916_v15 = vadd.f32 %v16679_v62, %v4915_v38  ;;  %12467 = vmatprep.mubr.msk.f32.mxu0 %vm12684_vm2, %v18098_v58  ;;  %v18378_v38 = vld [vmem:[#allocation18_spill] sm:$0xff] }
 0x39c   :  { %v5276_v55 = vpop.f32.mrf.mxu1  ;;  %12566 = vmatmul.mubr.msk.f32.gmra.mxu1 %vm5423_vm4, %v5395_v23  ;;  %v12122_v9 = vpop.f32.mrf.mxu0 }
 0x39d   :  { %v5396_v39 = vmax.f32 %v18371_v50, %v5371_v51  ;;  %v5277_v17 = vadd.f32 %v16679_v62, %v5276_v55  ;;  %12568 = vmatprep.mubr.msk.f32.mxu1 %vm12684_vm2, %v18098_v58  ;;  %v5027_v47 = vmax.f32 %v4916_v15, 0.0 }
 0x39e   :  { %v12217_v24 = vpop.f32.mrf.mxu1  ;;  %v4920_v20 = vpop.f32.mrf.mxu0  ;;  %12468 = vmatmul.mubr.msk.f32.gmra.mxu0 %vm5423_vm4, %v5051_v56  ;;  %v18379_v56 = vld [vmem:[#allocation19_spill] sm:$0xff] }
 0x39f   :  { %v5372_v5 = vmax.f32 %v5277_v17, 0.0  ;;  %v5052_v22 = vmax.f32 %v18372_v6, %v5027_v47  ;;  %v4921_v1 = vadd.f32 %v16679_v62, %v4920_v20  ;;  %12470 = vmatprep.mubr.msk.f32.mxu0 %vm12684_vm2, %v18098_v58  ;;  %v18380_v24 = vld [vmem:[#allocation20_spill] sm:$0xff]  ;;  %v18381_v20 = vld [vmem:[#allocation21_spill] sm:$0xff] }
 0x3a0   :  { %v5281_v61 = vpop.f32.mrf.mxu1  ;;  %12569 = vmatmul.mubr.msk.f32.gmra.mxu1 %vm5423_vm4, %v5396_v39  ;;  %v12125_v44 = vpop.f32.mrf.mxu0 }
 0x3a1   :  { %v5397_v4 = vmax.f32 %v18373_v26, %v5372_v5  ;;  %v5282_v36 = vadd.f32 %v16679_v62, %v5281_v61  ;;  %12571 = vmatprep.mubr.msk.f32.mxu1 %vm12684_vm2, %v18098_v58  ;;  %v5028_v42 = vmax.f32 %v4921_v1, 0.0  ;;  %v18382_v44 = vld [vmem:[#allocation22_spill] sm:$0xff] }
 0x3a2   :  { %v12220_v25 = vpop.f32.mrf.mxu1  ;;  %v4925_v37 = vpop.f32.mrf.mxu0  ;;  %12471 = vmatmul.mubr.msk.f32.gmra.mxu0 %vm5423_vm4, %v5052_v22 }
 0x3a3   :  { %v5373_v40 = vmax.f32 %v5282_v36, 0.0  ;;  %v5053_v54 = vmax.f32 %v18374_v57, %v5028_v42  ;;  %v4926_v34 = vadd.f32 %v16679_v62, %v4925_v37  ;;  %12473 = vmatprep.mubr.msk.f32.mxu0 %vm12684_vm2, %v18098_v58  ;;  %v18383_v37 = vld [vmem:[#allocation23_spill] sm:$0xff] }
 0x3a4   :  { %v5286_v63 = vpop.f32.mrf.mxu1  ;;  %12572 = vmatmul.mubr.msk.f32.gmra.mxu1 %vm5423_vm4, %v5397_v4  ;;  %v12128_v30 = vpop.f32.mrf.mxu0 }
 0x3a5   :  { %v5398_v10 = vmax.f32 %v18375_v16, %v5373_v40  ;;  %v5287_v3 = vadd.f32 %v16679_v62, %v5286_v63  ;;  %12574 = vmatprep.mubr.msk.f32.mxu1 %vm12684_vm2, %v18098_v58  ;;  %v5029_v14 = vmax.f32 %v4926_v34, 0.0  ;;  %v18384_v30 = vld [vmem:[#allocation24_spill] sm:$0xff] }
 0x3a6   :  { %v12223_v28 = vpop.f32.mrf.mxu1  ;;  %v4930_v46 = vpop.f32.mrf.mxu0  ;;  %12474 = vmatmul.mubr.msk.f32.gmra.mxu0 %vm5423_vm4, %v5053_v54 }
 0x3a7   :  { %v5374_v48 = vmax.f32 %v5287_v3, 0.0  ;;  %v5054_v43 = vmax.f32 %v18376_v2, %v5029_v14  ;;  %v4931_v7 = vadd.f32 %v16679_v62, %v4930_v46  ;;  %12476 = vmatprep.mubr.msk.f32.mxu0 %vm12684_vm2, %v18098_v58  ;;  %v18385_v46 = vld [vmem:[#allocation25_spill] sm:$0xff] }
 0x3a8   :  { %v5291_v19 = vpop.f32.mrf.mxu1  ;;  %12575 = vmatmul.mubr.msk.f32.gmra.mxu1 %vm5423_vm4, %v5398_v10  ;;  %v12131_v12 = vpop.f32.mrf.mxu0 }
 0x3a9   :  { %v5399_v35 = vmax.f32 %v18377_v21, %v5374_v48  ;;  %v5292_v23 = vadd.f32 %v16679_v62, %v5291_v19  ;;  %12577 = vmatprep.mubr.msk.f32.mxu1 %vm12684_vm2, %v18098_v58  ;;  %v5030_v29 = vmax.f32 %v4931_v7, 0.0  ;;  %v18386_v12 = vld [vmem:[#allocation26_spill] sm:$0xff] }
 0x3aa   :  { %v12226_v33 = vpop.f32.mrf.mxu1  ;;  %v4935_v51 = vpop.f32.mrf.mxu0  ;;  %12477 = vmatmul.mubr.msk.f32.gmra.mxu0 %vm5423_vm4, %v5054_v43 }
 0x3ab   :  { %v5375_v31 = vmax.f32 %v5292_v23, 0.0  ;;  %v5055_v32 = vmax.f32 %v18378_v38, %v5030_v29  ;;  %v4936_v53 = vadd.f32 %v16679_v62, %v4935_v51  ;;  %12479 = vmatprep.mubr.msk.f32.mxu0 %vm12684_vm2, %v18098_v58  ;;  %v6745_v51 = vld [vmem:[%s18072_s7 + $0x18] sm:$0xff]  ;;  %v6744_v38 = vld [vmem:[%s18072_s7 + $0x10] sm:$0xff] }
 0x3ac   :  { %v5296_v41 = vpop.f32.mrf.mxu1  ;;  %12578 = vmatmul.mubr.msk.f32.gmra.mxu1 %vm5423_vm4, %v5399_v35  ;;  %v12134_v50 = vpop.f32.mrf.mxu0  ;;  %6787 = vmatprep.subr.mxu0 %v6745_v51 }
 0x3ad   :  { %v5400_v15 = vmax.f32 %v18379_v56, %v5375_v31  ;;  %v5297_v55 = vadd.f32 %v16679_v62, %v5296_v41  ;;  %12580 = vmatprep.mubr.msk.f32.mxu1 %vm12684_vm2, %v18098_v58  ;;  %v5031_v39 = vmax.f32 %v4936_v53, 0.0  ;;  %6788 = vmatpush1.msra.mxu0 %v6744_v38 }
 0x3ae   :  { %v12229_v17 = vpop.f32.mrf.mxu1  ;;  %v4940_v47 = vpop.f32.mrf.mxu0  ;;  %12480 = vmatmul.mubr.msk.f32.gmra.mxu0 %vm5423_vm4, %v5055_v32  ;;  %v18387_v32 = vld [vmem:[#allocation27_spill] sm:$0xff] }
 0x3af   :  { %v5376_v9 = vmax.f32 %v5297_v55, 0.0  ;;  %v5056_v0 = vmax.f32 %v18380_v24, %v5031_v39  ;;  %v4941_v27 = vadd.f32 %v16679_v62, %v4940_v47  ;;  %12482 = vmatprep.mubr.msk.f32.mxu0 %vm12684_vm2, %v18098_v58  ;;  %v18388_v17 = vld [vmem:[#allocation28_spill] sm:$0xff] }
 0x3b0   :  { %v5301_v5 = vpop.f32.mrf.mxu1  ;;  %12581 = vmatmul.mubr.msk.f32.gmra.mxu1 %vm5423_vm4, %v5400_v15  ;;  %v12137_v1 = vpop.f32.mrf.mxu0 }
 0x3b1   :  { %v5401_v6 = vmax.f32 %v18381_v20, %v5376_v9  ;;  %v5302_v22 = vadd.f32 %v16679_v62, %v5301_v5  ;;  %12583 = vmatprep.mubr.msk.f32.mxu1 %vm12684_vm2, %v18098_v58  ;;  %v5032_v61 = vmax.f32 %v4941_v27, 0.0  ;;  %v10116_v27 = vld [vmem:[%s18072_s7 + $0x40] sm:$0xff]  ;;  %v18389_v5 = vld [vmem:[#allocation29_spill] sm:$0xff] }
 0x3b2   :  { %v12232_v26 = vpop.f32.mrf.mxu1  ;;  %v4945_v36 = vpop.f32.mrf.mxu0  ;;  %12483 = vmatmul.mubr.msk.f32.gmra.mxu0 %vm5423_vm4, %v5056_v0  ;;  %v10117_v0 = vld [vmem:[%s18072_s7 + $0x48] sm:$0xff] }
 0x3b3   :  { %v5377_v4 = vmax.f32 %v5302_v22, 0.0  ;;  %v5057_v42 = vmax.f32 %v18382_v44, %v5032_v61  ;;  %v4946_v25 = vadd.f32 %v16679_v62, %v4945_v36  ;;  %12485 = vmatprep.mubr.msk.f32.mxu0 %vm12684_vm2, %v18098_v58  ;;  %6887 = vmatprep.subr.mxu1 %v10117_v0  ;;  %v18390_v36 = vld [vmem:[#allocation30_spill] sm:$0xff] }
 0x3b4   :  { %v5306_v40 = vpop.f32.mrf.mxu1  ;;  %12584 = vmatmul.mubr.msk.f32.gmra.mxu1 %vm5423_vm4, %v5401_v6  ;;  %v12140_v34 = vpop.f32.mrf.mxu0 }
 0x3b5   :  { %v5402_v57 = vmax.f32 %v18383_v37, %v5377_v4  ;;  %v5307_v54 = vadd.f32 %v16679_v62, %v5306_v40  ;;  %12586 = vmatprep.mubr.msk.f32.mxu1 %vm12684_vm2, %v18098_v58  ;;  %v5033_v63 = vmax.f32 %v4946_v25, 0.0  ;;  %6888 = vmatpush1.msra.mxu1 %v10116_v27  ;;  %v18391_v40 = vld [vmem:[#allocation31_spill] sm:$0xff] }
 0x3b6   :  { %v12235_v16 = vpop.f32.mrf.mxu1  ;;  %v4950_v3 = vpop.f32.mrf.mxu0  ;;  %12486 = vmatmul.mubr.msk.f32.gmra.mxu0 %vm5423_vm4, %v5057_v42 }
 0x3b7   :  { %v5378_v10 = vmax.f32 %v5307_v54, 0.0  ;;  %v5058_v14 = vmax.f32 %v18384_v30, %v5033_v63  ;;  %v4951_v28 = vadd.f32 %v16679_v62, %v4950_v3  ;;  %12488 = vmatprep.mubr.msk.f32.mxu0 %vm12684_vm2, %v18098_v58  ;;  %v18392_v3 = vld [vmem:[#allocation32_spill] sm:$0xff] }
 0x3b8   :  { %v5311_v48 = vpop.f32.mrf.mxu1  ;;  %12587 = vmatmul.mubr.msk.f32.gmra.mxu1 %vm5423_vm4, %v5402_v57  ;;  %v12143_v7 = vpop.f32.mrf.mxu0 }
 0x3b9   :  { %v5403_v2 = vmax.f32 %v18385_v46, %v5378_v10  ;;  %v5312_v43 = vadd.f32 %v16679_v62, %v5311_v48  ;;  %12589 = vmatprep.mubr.msk.f32.mxu1 %vm12684_vm2, %v18098_v58  ;;  %v5034_v19 = vmax.f32 %v4951_v28, 0.0  ;;  %v18393_v48 = vld [vmem:[#allocation33_spill] sm:$0xff] }
 0x3ba   :  { %v12238_v21 = vpop.f32.mrf.mxu1  ;;  %v4955_v23 = vpop.f32.mrf.mxu0  ;;  %12489 = vmatmul.mubr.msk.f32.gmra.mxu0 %vm5423_vm4, %v5058_v14 }
 0x3bb   :  { %v5379_v35 = vmax.f32 %v5312_v43, 0.0  ;;  %v5059_v29 = vmax.f32 %v18386_v12, %v5034_v19  ;;  %v4956_v33 = vadd.f32 %v16679_v62, %v4955_v23  ;;  %12491 = vmatprep.mubr.msk.f32.mxu0 %vm12684_vm2, %v18098_v58  ;;  %v18394_v23 = vld [vmem:[#allocation34_spill] sm:$0xff] }
 0x3bc   :  { %v5316_v31 = vpop.f32.mrf.mxu1  ;;  %12590 = vmatmul.mubr.msk.f32.gmra.mxu1 %vm5423_vm4, %v5403_v2  ;;  %v12146_v56 = vpop.f32.mrf.mxu0 }
 0x3bd   :  { %v5404_v53 = vmax.f32 %v18387_v32, %v5379_v35  ;;  %v5317_v41 = vadd.f32 %v16679_v62, %v5316_v31  ;;  %12592 = vmatprep.mubr.msk.f32.mxu1 %vm12684_vm2, %v18098_v58  ;;  %v5035_v15 = vmax.f32 %v4956_v33, 0.0  ;;  %v18395_v31 = vld [vmem:[#allocation35_spill] sm:$0xff] }
 0x3be   :  { %v12241_v55 = vpop.f32.mrf.mxu1  ;;  %v4960_v39 = vpop.f32.mrf.mxu0  ;;  %12492 = vmatmul.mubr.msk.f32.gmra.mxu0 %vm5423_vm4, %v5059_v29 }
 0x3bf   :  { %v5380_v50 = vmax.f32 %v5317_v41, 0.0  ;;  %v5060_v9 = vmax.f32 %v18388_v17, %v5035_v15  ;;  %v4961_v47 = vadd.f32 %v16679_v62, %v4960_v39  ;;  %12494 = vmatprep.mubr.msk.f32.mxu0 %vm12684_vm2, %v18098_v58  ;;  %v18396_v55 = vld [vmem:[#allocation36_spill] sm:$0xff]  ;;  %v17070_v39 = vld [vmem:[%s18070_s2] ss:$0 sm:$0xff] }
 0x3c0   :  { %v5321_v24 = vpop.f32.mrf.mxu1  ;;  %12593 = vmatmul.mubr.msk.f32.gmra.mxu1 %vm5423_vm4, %v5404_v53  ;;  %v12149_v22 = vpop.f32.mrf.mxu0 }
 0x3c1   :  { %v5405_v20 = vmax.f32 %v18389_v5, %v5380_v50  ;;  %v5322_v6 = vadd.f32 %v16679_v62, %v5321_v24  ;;  %12595 = vmatprep.mubr.msk.f32.mxu1 %vm12684_vm2, %v18098_v58  ;;  %v5036_v1 = vmax.f32 %v4961_v47, 0.0  ;;  %v18398_v22 = vld [vmem:[#allocation38_spill] sm:$0xff] }
 0x3c2   :  { %v12244_v61 = vpop.f32.mrf.mxu1  ;;  %v4965_v4 = vpop.f32.mrf.mxu0  ;;  %12495 = vmatmul.mubr.msk.f32.gmra.mxu0 %vm5423_vm4, %v5060_v9  ;;  %v18397_v9 = vld [vmem:[#allocation37_spill] sm:$0xff] }
 0x3c3   :  { %v5381_v26 = vmax.f32 %v5322_v6, 0.0  ;;  %v5061_v44 = vmax.f32 %v18390_v36, %v5036_v1  ;;  %v4966_v42 = vadd.f32 %v16679_v62, %v4965_v4  ;;  %12497 = vmatprep.mubr.msk.f32.mxu0 %vm12684_vm2, %v18098_v58  ;;  %v18399_v4 = vld [vmem:[#allocation39_spill] sm:$0xff] }
 0x3c4   :  { %v5326_v25 = vpop.f32.mrf.mxu1  ;;  %12596 = vmatmul.mubr.msk.f32.gmra.mxu1 %vm5423_vm4, %v5405_v20  ;;  %v12152_v54 = vpop.f32.mrf.mxu0 }
 0x3c5   :  { %v5406_v37 = vmax.f32 %v18391_v40, %v5381_v26  ;;  %v5327_v57 = vadd.f32 %v16679_v62, %v5326_v25  ;;  %12598 = vmatprep.mubr.msk.f32.mxu1 %vm12684_vm2, %v18098_v58  ;;  %v5037_v34 = vmax.f32 %v4966_v42, 0.0  ;;  %v18400_v54 = vld [vmem:[#allocation40_spill] sm:$0xff] }
 0x3c6   :  { %v12247_v63 = vpop.f32.mrf.mxu1  ;;  %v4970_v10 = vpop.f32.mrf.mxu0  ;;  %12498 = vmatmul.mubr.msk.f32.gmra.mxu0 %vm5423_vm4, %v5061_v44 }
 0x3c7   :  { %v5382_v16 = vmax.f32 %v5327_v57, 0.0  ;;  %v5062_v30 = vmax.f32 %v18392_v3, %v5037_v34  ;;  %v4971_v14 = vadd.f32 %v16679_v62, %v4970_v10  ;;  %12500 = vmatprep.mubr.msk.f32.mxu0 %vm12684_vm2, %v18098_v58 }
 0x3c8   :  { %v5331_v28 = vpop.f32.mrf.mxu1  ;;  %12599 = vmatmul.mubr.msk.f32.gmra.mxu1 %vm5423_vm4, %v5406_v37  ;;  %v12155_v43 = vpop.f32.mrf.mxu0 }
 0x3c9   :  { %v5407_v46 = vmax.f32 %v18393_v48, %v5382_v16  ;;  %v5332_v2 = vadd.f32 %v16679_v62, %v5331_v28  ;;  %12601 = vmatprep.mubr.msk.f32.mxu1 %vm12684_vm2, %v18098_v58  ;;  %v5038_v7 = vmax.f32 %v4971_v14, 0.0 }
 0x3ca   :  { %v12250_v19 = vpop.f32.mrf.mxu1  ;;  %v4975_v35 = vpop.f32.mrf.mxu0  ;;  %12501 = vmatmul.mubr.msk.f32.gmra.mxu0 %vm5423_vm4, %v5062_v30 }
 0x3cb   :  { %v5383_v21 = vmax.f32 %v5332_v2, 0.0  ;;  %v5063_v12 = vmax.f32 %v18394_v23, %v5038_v7  ;;  %v4976_v29 = vadd.f32 %v16679_v62, %v4975_v35  ;;  %12503 = vmatprep.mubr.msk.f32.mxu0 %vm12684_vm2, %v18098_v58  ;;  %v18401_v2 = vld [vmem:[#allocation41_spill] sm:$0xff] }
 0x3cc   :  { %v5336_v33 = vpop.f32.mrf.mxu1  ;;  %12602 = vmatmul.mubr.msk.f32.gmra.mxu1 %vm5423_vm4, %v5407_v46  ;;  %v12158_v32 = vpop.f32.mrf.mxu0 }
 0x3cd   :  { %v5408_v51 = vmax.f32 %v18395_v31, %v5383_v21  ;;  %v5337_v38 = vadd.f32 %v16679_v62, %v5336_v33  ;;  %12604 = vmatprep.mubr.msk.f32.mxu1 %vm12684_vm2, %v18098_v58  ;;  %v5039_v53 = vmax.f32 %v4976_v29, 0.0 }
 0x3ce   :  { %v12253_v41 = vpop.f32.mrf.mxu1  ;;  %v4980_v15 = vpop.f32.mrf.mxu0  ;;  %12504 = vmatmul.mubr.msk.f32.gmra.mxu0 %vm5423_vm4, %v5063_v12 }
 0x3cf   :  { %v5384_v56 = vmax.f32 %v5337_v38, 0.0  ;;  %v5064_v50 = vmax.f32 %v18396_v55, %v5039_v53  ;;  %v4981_v17 = vadd.f32 %v17070_v39, %v4980_v15  ;;  %12506 = vmatprep.mubr.msk.f32.mxu0 %vm12684_vm2, %v18098_v58 }
 0x3d0   :  { %v5341_v62 = vpop.f32.mrf.mxu1  ;;  %12605 = vmatmul.mubr.msk.f32.gmra.mxu1 %vm5423_vm4, %v5408_v51  ;;  %v12161_v0 = vpop.f32.mrf.mxu0 }
 0x3d1   :  { %v5409_v47 = vmax.f32 %v18397_v9, %v5384_v56  ;;  %v5342_v24 = vadd.f32 %v17070_v39, %v5341_v62  ;;  %12607 = vmatprep.mubr.msk.f32.mxu1 %vm12684_vm2, %v18098_v58  ;;  %v5040_v27 = vmax.f32 %v4981_v17, 0.0 }
 0x3d2   :  { %v12256_v5 = vpop.f32.mrf.mxu1  ;;  %v4985_v6 = vpop.f32.mrf.mxu0  ;;  %12507 = vmatmul.mubr.msk.f32.gmra.mxu0 %vm5423_vm4, %v5064_v50  ;;  %v18402_v50 = vld [vmem:[#allocation42_spill] sm:$0xff] }
 0x3d3   :  { %v5385_v20 = vmax.f32 %v5342_v24, 0.0  ;;  %v5065_v1 = vmax.f32 %v18398_v22, %v5040_v27  ;;  %v4986_v61 = vadd.f32 %v17070_v39, %v4985_v6  ;;  %12509 = vmatprep.mubr.msk.f32.mxu0 %vm12684_vm2, %v18098_v58  ;;  %v10115_v5 = vld [vmem:[%s18072_s7 + $0x38] sm:$0xff] }
 0x3d4   :  { %v5346_v26 = vpop.f32.mrf.mxu1  ;;  %12608 = vmatmul.mubr.msk.f32.gmra.mxu1 %vm5423_vm4, %v5409_v47  ;;  %v12164_v42 = vpop.f32.mrf.mxu0  ;;  %6889 = vmatprep.subr.mxu1 %v10115_v5 }
 0x3d5   :  { %v5410_v36 = vmax.f32 %v18399_v4, %v5385_v20  ;;  %v5347_v44 = vadd.f32 %v17070_v39, %v5346_v26  ;;  %12610 = vmatprep.mubr.msk.f32.mxu1 %vm12684_vm2, %v18098_v58  ;;  %v5041_v25 = vmax.f32 %v4986_v61, 0.0  ;;  %v10128_v20 = vld [vmem:[%s18072_s7 + $0x88] sm:$0xf] }
 0x3d6   :  { %v12259_v40 = vpop.f32.mrf.mxu1  ;;  %v4990_v57 = vpop.f32.mrf.mxu0  ;;  %12510 = vmatmul.mubr.msk.f32.gmra.mxu0 %vm5423_vm4, %v5065_v1 }
 0x3d7   :  { %v5386_v37 = vmax.f32 %v5347_v44, 0.0  ;;  %v5066_v34 = vmax.f32 %v18400_v54, %v5041_v25  ;;  %v4991_v63 = vadd.f32 %v17070_v39, %v4990_v57  ;;  %12512 = vmatprep.mubr.msk.f32.mxu0 %vm12684_vm2, %v18098_v58 }
 0x3d8   :  { %v5351_v16 = vpop.f32.mrf.mxu1  ;;  %12611 = vmatmul.mubr.msk.f32.gmra.mxu1 %vm5423_vm4, %v5410_v36  ;;  %v12167_v30 = vpop.f32.mrf.mxu0 }
 0x3d9   :  { %v5411_v10 = vmax.f32 %v16448_v13, %v5386_v37  ;;  %v5352_v3 = vadd.f32 %v17070_v39, %v5351_v16  ;;  %12613 = vmatprep.mubr.msk.f32.mxu1 %vm12684_vm2, %v18098_v58  ;;  %v5042_v14 = vmax.f32 %v4991_v63, 0.0 }
 0x3da   :  { %v12262_v28 = vpop.f32.mrf.mxu1  ;;  %v4995_v46 = vpop.f32.mrf.mxu0  ;;  %12513 = vmatmul.mubr.msk.f32.gmra.mxu0 %vm5423_vm4, %v5066_v34 }
 0x3db   :  { %v5387_v48 = vmax.f32 %v5352_v3, 0.0  ;;  %v5067_v43 = vmax.f32 %v18401_v2, %v5042_v14  ;;  %v4996_v7 = vadd.f32 %v17070_v39, %v4995_v46  ;;  %12515 = vmatprep.mubr.msk.f32.mxu0 %vm12684_vm2, %v18098_v58  ;;  %v17169_v3 = vld [vmem:[%s18073_s4] ss:$0 sm:$0xff] }
 0x3dc   :  { %v5356_v19 = vpop.f32.mrf.mxu1  ;;  %12614 = vmatmul.mubr.msk.f32.gmra.mxu1 %vm5423_vm4, %v5411_v10  ;;  %v12170_v35 = vpop.f32.mrf.mxu0 }
 0x3dd   :  { %v5412_v13 = vmax.f32 %v16468_v18, %v5387_v48  ;;  %v5357_v21 = vadd.f32 %v17070_v39, %v5356_v19  ;;  %12616 = vmatprep.mubr.msk.f32.mxu1 %vm12684_vm2, %v18098_v58  ;;  %v5043_v23 = vmax.f32 %v4996_v7, 0.0 }
 0x3de   :  { %v12265_v12 = vpop.f32.mrf.mxu1  ;;  %v5000_v33 = vpop.f32.mrf.mxu0  ;;  %12516 = vmatmul.mubr.msk.f32.gmra.mxu0 %vm5423_vm4, %v5067_v43 }
 0x3df   :  { %v5388_v29 = vmax.f32 %v5357_v21, 0.0  ;;  %v5068_v31 = vmax.f32 %v16478_v49, %v5043_v23  ;;  %v5001_v51 = vadd.f32 %v17070_v39, %v5000_v33  ;;  %12518 = vmatprep.mubr.msk.f32.mxu0 %vm12684_vm2, %v18098_v58  ;;  %v6743_v49 = vld [vmem:[%s18072_s7 + $0x8] sm:$0xff] }
 0x3e0   :  { %v5361_v38 = vpop.f32.mrf.mxu1  ;;  %12617 = vmatmul.mubr.msk.f32.gmra.mxu1 %vm5423_vm4, %v5412_v13  ;;  %v12173_v53 = vpop.f32.mrf.mxu0  ;;  %6789 = vmatprep.subr.mxu0 %v6743_v49 }
 0x3e1   :  { %v5413_v18 = vmax.f32 %v16488_v59, %v5388_v29  ;;  %v5362_v32 = vadd.f32 %v17070_v39, %v5361_v38  ;;  %12619 = vmatprep.mubr.msk.f32.mxu1 %vm12684_vm2, %v18098_v58  ;;  %v5044_v41 = vmax.f32 %v5001_v51, 0.0  ;;  %v6742_v59 = vld [vmem:[%s18072_s7] sm:$0xff] }
 0x3e2   :  { %v12268_v56 = vpop.f32.mrf.mxu1  ;;  %v5005_v55 = vpop.f32.mrf.mxu0  ;;  %12519 = vmatmul.mubr.msk.f32.gmra.mxu0 %vm5423_vm4, %v5068_v31 }
 0x3e3   :  { %v5389_v15 = vmax.f32 %v5362_v32, 0.0  ;;  %v5069_v17 = vmax.f32 %v18402_v50, %v5044_v41  ;;  %v5006_v62 = vadd.f32 %v17070_v39, %v5005_v55  ;;  %12521 = vmatprep.mubr.msk.f32.mxu0 %vm12684_vm2, %v18098_v58  ;;  %6790 = vmatpush1.msra.mxu0 %v6742_v59 }
 0x3e4   :  { %v5876_v9 = vpop.f32.mrf.mxu1  ;;  %12620 = vmatmul.mubr.msk.f32.gmra.mxu1 %vm5423_vm4, %v5413_v18  ;;  %v12176_v24 = vpop.f32.mrf.mxu0  ;;  %10129 = vmatprep.subr.msk.mxu0 %vm6752_vm5, %v10128_v20 }
 0x3e5   :  { %v5414_v47 = vmax.f32 %v16508_v8, %v5389_v15  ;;  %12622 = vmatprep.mubr.msk.f32.mxu1 %vm12684_vm2, %v18098_v58  ;;  %v5045_v0 = vmax.f32 %v5006_v62, 0.0  ;;  %v10114_v8 = vld [vmem:[%s18072_s7 + $0x30] sm:$0xff] }
 0x3e6   :  { %v12374_v27 = vpop.f32.mrf.mxu1  ;;  %v5010_v6 = vpop.f32.mrf.mxu0  ;;  %12522 = vmatmul.mubr.msk.f32.gmra.mxu0 %vm5423_vm4, %v5069_v17  ;;  %6890 = vmatpush1.msra.mxu1 %v10114_v8 }
 0x3e7   :  { %v5070_v22 = vmax.f32 %v16518_v60, %v5045_v0  ;;  %v5011_v1 = vadd.f32 %v17070_v39, %v5010_v6  ;;  %12524 = vmatprep.mubr.msk.f32.mxu0 %vm12684_vm2, %v18098_v58  ;;  %v10137_v60 = vld [vmem:[%s18072_s7 + $0xb8] sm:$0xf] }
 0x3e8   :  { %v5881_v61 = vpop.f32.mrf.mxu1  ;;  %12623 = vmatmul.mubr.msk.f32.gmra.mxu1 %vm5423_vm4, %v5414_v47  ;;  %v12179_v26 = vpop.f32.mrf.mxu0  ;;  %10138 = vmatprep.subr.msk.mxu1 %vm6752_vm5, %v10137_v60 }
 0x3e9   :  { %v5046_v4 = vmax.f32 %v5011_v1, 0.0  ;;  %6923 = vmatprep.mubr.f32.mxu1 %v18098_v58 }
 0x3ea   :  { %v12377_v36 = vpop.f32.mrf.mxu1  ;;  %v5015_v44 = vpop.f32.mrf.mxu0  ;;  %12525 = vmatmul.mubr.msk.f32.gmra.mxu0 %vm5423_vm4, %v5070_v22 }
 0x3eb   :  { %v5071_v42 = vmax.f32 %v16536_v11, %v5046_v4  ;;  %v5016_v25 = vadd.f32 %v17070_v39, %v5015_v44  ;;  %12527 = vmatprep.mubr.msk.f32.mxu0 %vm12684_vm2, %v18098_v58 }
 0x3ec   :  { %v5886_v40 = vpop.f32.mrf.mxu1  ;;  %v12182_v37 = vpop.f32.mrf.mxu0 }
 0x3ed   :  { %v5047_v57 = vmax.f32 %v5016_v25, 0.0 }
 0x3ee   :  { %v12380_v54 = vpop.f32.mrf.mxu1  ;;  %v5020_v34 = vpop.f32.mrf.mxu0  ;;  %12528 = vmatmul.mubr.msk.f32.gmra.mxu0 %vm5423_vm4, %v5071_v42 }
 0x3ef   :  { %v5072_v63 = vmax.f32 %v16559_v52, %v5047_v57  ;;  %v5021_v16 = vadd.f32 %v17070_v39, %v5020_v34  ;;  %12530 = vmatprep.mubr.msk.f32.mxu0 %vm12684_vm2, %v18098_v58 }
 0x3f0   :  { %v5891_v10 = vpop.f32.mrf.mxu1  ;;  %v12185_v11 = vpop.f32.mrf.mxu0 }
 0x3f1   :  { %v5048_v30 = vmax.f32 %v5021_v16, 0.0 }
 0x3f2   :  { %v12383_v14 = vpop.f32.mrf.mxu1  ;;  %v5569_v28 = vpop.f32.mrf.mxu0  ;;  %12531 = vmatmul.mubr.msk.f32.gmra.mxu0 %vm5423_vm4, %v5072_v63 }
 0x3f3   :  { %v5073_v48 = vmax.f32 %v16579_v45, %v5048_v30  ;;  %v5699_v52 = vadd.f32 %v17169_v3, %v5569_v28  ;;  %12533 = vmatprep.mubr.msk.f32.mxu0 %vm12684_vm2, %v18098_v58 }
 0x3f4   :  { %v5896_v39 = vpop.f32.mrf.mxu1  ;;  %v12285_v46 = vpop.f32.mrf.mxu0 }
 0x3f5   :  { %v17176_v43 = vadd.f32 %v5876_v9, %v5699_v52 }
 0x3f6   :  { %v12386_v2 = vpop.f32.mrf.mxu1  ;;  %v5574_v7 = vpop.f32.mrf.mxu0  ;;  %12534 = vmatmul.mubr.msk.f32.gmra.mxu0 %vm5423_vm4, %v5073_v48 }
 0x3f7   :  { %v5700_v19 = vadd.f32 %v17169_v3, %v5574_v7  ;;  %6823 = vmatprep.mubr.f32.mxu0 %v18098_v58 }
 0x3f8   :  { %v5901_v13 = vpop.f32.mrf.mxu1  ;;  %v12288_v21 = vpop.f32.mrf.mxu0 }
 0x3f9   :  { %v17181_v35 = vadd.f32 %v5881_v61, %v5700_v19 }
 0x3fa   :  { %v12389_v45 = vpop.f32.mrf.mxu1  ;;  %v5579_v23 = vpop.f32.mrf.mxu0 }
 0x3fb   :  { %v5701_v12 = vadd.f32 %v17169_v3, %v5579_v23 }
 0x3fc   :  { %v5906_v29 = vpop.f32.mrf.mxu1  ;;  %v12291_v33 = vpop.f32.mrf.mxu0 }
 0x3fd   :  { %v17184_v51 = vadd.f32 %v5886_v40, %v5701_v12 }
 0x3fe   :  { %v12392_v31 = vpop.f32.mrf.mxu1  ;;  %v5584_v38 = vpop.f32.mrf.mxu0 }
 0x3ff   :  { %v5702_v18 = vadd.f32 %v17169_v3, %v5584_v38 }
 0x400   :  { %v5911_v32 = vpop.f32.mrf.mxu1  ;;  %v12294_v53 = vpop.f32.mrf.mxu0 }
 0x401   :  { %v17187_v56 = vadd.f32 %v5891_v10, %v5702_v18 }
 0x402   :  { %v12395_v41 = vpop.f32.mrf.mxu1  ;;  %v5589_v49 = vpop.f32.mrf.mxu0 }
 0x403   :  { %v5703_v15 = vadd.f32 %v17169_v3, %v5589_v49 }
 0x404   :  { %v5916_v55 = vpop.f32.mrf.mxu1  ;;  %v12297_v59 = vpop.f32.mrf.mxu0 }
 0x405   :  { %v17190_v17 = vadd.f32 %v5896_v39, %v5703_v15 }
 0x406   :  { %v12398_v50 = vpop.f32.mrf.mxu1  ;;  %v5594_v62 = vpop.f32.mrf.mxu0 }
 0x407   :  { %v5704_v9 = vadd.f32 %v17169_v3, %v5594_v62 }
 0x408   :  { %v5921_v47 = vpop.f32.mrf.mxu1  ;;  %v12300_v24 = vpop.f32.mrf.mxu0 }
 0x409   :  { %v17193_v27 = vadd.f32 %v5901_v13, %v5704_v9 }
 0x40a   :  { %v12401_v0 = vpop.f32.mrf.mxu1  ;;  %v5599_v5 = vpop.f32.mrf.mxu0 }
 0x40b   :  { %v5705_v20 = vadd.f32 %v17169_v3, %v5599_v5 }
 0x40c   :  { %v5926_v6 = vpop.f32.mrf.mxu1  ;;  %v12303_v8 = vpop.f32.mrf.mxu0 }
 0x40d   :  { %v17196_v1 = vadd.f32 %v5906_v29, %v5705_v20 }
 0x40e   :  { %v12404_v22 = vpop.f32.mrf.mxu1  ;;  %v5604_v61 = vpop.f32.mrf.mxu0 }
 0x40f   :  { %v5706_v26 = vadd.f32 %v17169_v3, %v5604_v61 }
 0x410   :  { %v5931_v4 = vpop.f32.mrf.mxu1  ;;  %v12306_v36 = vpop.f32.mrf.mxu0 }
 0x411   :  { %v17199_v44 = vadd.f32 %v5911_v32, %v5706_v26 }
 0x412   :  { %v12407_v60 = vpop.f32.mrf.mxu1  ;;  %v5609_v42 = vpop.f32.mrf.mxu0 }
 0x413   :  { %v5707_v25 = vadd.f32 %v17169_v3, %v5609_v42 }
 0x414   :  { %v5936_v40 = vpop.f32.mrf.mxu1  ;;  %v12309_v37 = vpop.f32.mrf.mxu0 }
 0x415   :  { %v17202_v54 = vadd.f32 %v5916_v55, %v5707_v25 }
 0x416   :  { %v12410_v57 = vpop.f32.mrf.mxu1  ;;  %v5614_v34 = vpop.f32.mrf.mxu0 }
 0x417   :  { %v5708_v63 = vadd.f32 %v17169_v3, %v5614_v34 }
 0x418   :  { %v5941_v16 = vpop.f32.mrf.mxu1  ;;  %v12312_v10 = vpop.f32.mrf.mxu0 }
 0x419   :  { %v17205_v30 = vadd.f32 %v5921_v47, %v5708_v63 }
 0x41a   :  { %v12413_v11 = vpop.f32.mrf.mxu1  ;;  %v5619_v14 = vpop.f32.mrf.mxu0 }
 0x41b   :  { %v5709_v28 = vadd.f32 %v17169_v3, %v5619_v14 }
 0x41c   :  { %v5946_v48 = vpop.f32.mrf.mxu1  ;;  %v12315_v52 = vpop.f32.mrf.mxu0 }
 0x41d   :  { %v17208_v46 = vadd.f32 %v5926_v6, %v5709_v28 }
 0x41e   :  { %v12416_v39 = vpop.f32.mrf.mxu1  ;;  %v5624_v2 = vpop.f32.mrf.mxu0 }
 0x41f   :  { %v5710_v7 = vadd.f32 %v17169_v3, %v5624_v2 }
 0x420   :  { %v5951_v19 = vpop.f32.mrf.mxu1  ;;  %v12318_v13 = vpop.f32.mrf.mxu0 }
 0x421   :  { %v17211_v45 = vadd.f32 %v5931_v4, %v5710_v7 }
 0x422   :  { %v12419_v21 = vpop.f32.mrf.mxu1  ;;  %v5629_v23 = vpop.f32.mrf.mxu0 }
 0x423   :  { %v5711_v12 = vadd.f32 %v17169_v3, %v5629_v23 }
 0x424   :  { %v5956_v29 = vpop.f32.mrf.mxu1  ;;  %v12321_v33 = vpop.f32.mrf.mxu0 }
 0x425   :  { %v17214_v38 = vadd.f32 %v5936_v40, %v5711_v12 }
 0x426   :  { %v12422_v31 = vpop.f32.mrf.mxu1  ;;  %v5634_v18 = vpop.f32.mrf.mxu0 }
 0x427   :  { %v5712_v32 = vadd.f32 %v17169_v3, %v5634_v18 }
 0x428   :  { %v5961_v53 = vpop.f32.mrf.mxu1  ;;  %v12324_v41 = vpop.f32.mrf.mxu0 }
 0x429   :  { %v17217_v15 = vadd.f32 %v5941_v16, %v5712_v32 }
 0x42a   :  { %v12425_v49 = vpop.f32.mrf.mxu1  ;;  %v5639_v55 = vpop.f32.mrf.mxu0 }
 0x42b   :  { %v5713_v59 = vadd.f32 %v17169_v3, %v5639_v55 }
 0x42c   :  { %v5966_v50 = vpop.f32.mrf.mxu1  ;;  %v12327_v62 = vpop.f32.mrf.mxu0 }
 0x42d   :  { %v17220_v47 = vadd.f32 %v5946_v48, %v5713_v59 }
 0x42e   :  { %v12428_v9 = vpop.f32.mrf.mxu1  ;;  %v5644_v24 = vpop.f32.mrf.mxu0 }
 0x42f   :  { %v5714_v0 = vadd.f32 %v17169_v3, %v5644_v24 }
 0x430   :  { %v5971_v5 = vpop.f32.mrf.mxu1  ;;  %v12330_v20 = vpop.f32.mrf.mxu0 }
 0x431   :  { %v17223_v8 = vadd.f32 %v5951_v19, %v5714_v0 }
 0x432   :  { %v12431_v6 = vpop.f32.mrf.mxu1  ;;  %v5649_v22 = vpop.f32.mrf.mxu0 }
 0x433   :  { %v5715_v61 = vadd.f32 %v17169_v3, %v5649_v22 }
 0x434   :  { %v5976_v26 = vpop.f32.mrf.mxu1  ;;  %v12333_v4 = vpop.f32.mrf.mxu0 }
 0x435   :  { %v17226_v60 = vadd.f32 %v5956_v29, %v5715_v61 }
 0x436   :  { %v12434_v36 = vpop.f32.mrf.mxu1  ;;  %v5654_v42 = vpop.f32.mrf.mxu0 }
 0x437   :  { %v5716_v25 = vadd.f32 %v17169_v3, %v5654_v42 }
 0x438   :  { %v5981_v40 = vpop.f32.mrf.mxu1  ;;  %v12336_v37 = vpop.f32.mrf.mxu0 }
 0x439   :  { %v17229_v34 = vadd.f32 %v5961_v53, %v5716_v25 }
 0x43a   :  { %v12437_v57 = vpop.f32.mrf.mxu1  ;;  %v5659_v63 = vpop.f32.mrf.mxu0 }
 0x43b   :  { %v5717_v16 = vadd.f32 %v17169_v3, %v5659_v63 }
 0x43c   :  { %v5986_v10 = vpop.f32.mrf.mxu1  ;;  %v12339_v11 = vpop.f32.mrf.mxu0 }
 0x43d   :  { %v17232_v28 = vadd.f32 %v5966_v50, %v5717_v16 }
 0x43e   :  { %v12440_v14 = vpop.f32.mrf.mxu1  ;;  %v5664_v48 = vpop.f32.mrf.mxu0 }
 0x43f   :  { %v5718_v52 = vadd.f32 %v17169_v3, %v5664_v48  ;;  %v17258_v14 = vld [vmem:[%s18074_s5] ss:$0 sm:$0xff] }
 0x440   :  { %v5991_v39 = vpop.f32.mrf.mxu1  ;;  %v12342_v2 = vpop.f32.mrf.mxu0 }
 0x441   :  { %v17235_v19 = vadd.f32 %v5971_v5, %v5718_v52 }
 0x442   :  { %v12443_v7 = vpop.f32.mrf.mxu1  ;;  %v5669_v13 = vpop.f32.mrf.mxu0 }
 0x443   :  { %v5719_v21 = vadd.f32 %v17169_v3, %v5669_v13 }
 0x444   :  { %v5996_v23 = vpop.f32.mrf.mxu1  ;;  %v12345_v12 = vpop.f32.mrf.mxu0 }
 0x445   :  { %v17238_v33 = vadd.f32 %v5976_v26, %v5719_v21 }
 0x446   :  { %v12446_v29 = vpop.f32.mrf.mxu1  ;;  %v5674_v31 = vpop.f32.mrf.mxu0 }
 0x447   :  { %v5720_v18 = vadd.f32 %v17169_v3, %v5674_v31 }
 0x448   :  { %v6478_v32 = vpop.f32.mrf.mxu1  ;;  %v12348_v53 = vpop.f32.mrf.mxu0 }
 0x449   :  { %v17241_v49 = vadd.f32 %v5981_v40, %v5720_v18 }
 0x44a   :  { %v12552_v41 = vpop.f32.mrf.mxu1  ;;  %v5679_v55 = vpop.f32.mrf.mxu0 }
 0x44b   :  { %v5721_v59 = vadd.f32 %v17169_v3, %v5679_v55 }
 0x44c   :  { %v6483_v50 = vpop.f32.mrf.mxu1  ;;  %v12351_v62 = vpop.f32.mrf.mxu0 }
 0x44d   :  { %v17244_v24 = vadd.f32 %v5986_v10, %v5721_v59  ;;  %v10127_v59 = vld [vmem:[%s18072_s7 + $0x80] sm:$0xf]  ;;  %v10126_v62 = vld [vmem:[%s18072_s7 + $0x78] sm:$0xff] }
 0x44e   :  { %v12555_v9 = vpop.f32.mrf.mxu1  ;;  %v5684_v0 = vpop.f32.mrf.mxu0 }
 0x44f   :  { %v5722_v5 = vadd.f32 %v17169_v3, %v5684_v0 }
 0x450   :  { %v6488_v20 = vpop.f32.mrf.mxu1  ;;  %v12354_v6 = vpop.f32.mrf.mxu0 }
 0x451   :  { %v17247_v61 = vadd.f32 %v5991_v39, %v5722_v5 }
 0x452   :  { %v12558_v22 = vpop.f32.mrf.mxu1  ;;  %v5689_v26 = vpop.f32.mrf.mxu0 }
 0x453   :  { %v5723_v4 = vadd.f32 %v17169_v3, %v5689_v26  ;;  %v10124_v22 = vld [vmem:[%s18072_s7 + $0x68] sm:$0xff] }
 0x454   :  { %v6493_v36 = vpop.f32.mrf.mxu1  ;;  %v12357_v42 = vpop.f32.mrf.mxu0 }
 0x455   :  { %v17250_v40 = vadd.f32 %v5996_v23, %v5723_v4 }
 0x456   :  { %v12561_v25 = vpop.f32.mrf.mxu1  ;;  %v6177_v37 = vpop.f32.mrf.mxu0 }
 0x457   :  { %v6301_v57 = vadd.f32 %v6177_v37, %v17176_v43  ;;  %v17266_v43 = vld [vmem:[%s18075_s6] ss:$0 sm:$0xff]  ;;  %v10136_v37 = vld [vmem:[%s18072_s7 + $0xb0] sm:$0xf] }
 0x458   :  { %v17253_v63 = vpop.f32.mrf.mxu1  ;;  %v12463_v16 = vpop.f32.mrf.mxu0  ;;  %v10123_v25 = vld [vmem:[%s18072_s7 + $0x60] sm:$0xff] }
 0x459   :  { %v6602_v10 = vadd.f32 %v6478_v32, %v6301_v57  ;;  %v10135_v16 = vld [vmem:[%s18072_s7 + $0xa8] sm:$0xff] }
 0x45a   :  { %v12564_v11 = vpop.f32.mrf.mxu1  ;;  %v6182_v48 = vpop.f32.mrf.mxu0 }
 0x45b   :  { %v6627_v3 = vmax.f32 %v6602_v10, 0.0  ;;  %v6302_v52 = vadd.f32 %v6182_v48, %v17181_v35 }
 0x45c   :  { %v17261_v39 = vpop.f32.mrf.mxu1  ;;  %v12466_v2 = vpop.f32.mrf.mxu0 }
 0x45d   :  { %v6659_v7 = vmul.f32 %v17258_v14, %v6627_v3  ;;  %v6603_v13 = vadd.f32 %v6483_v50, %v6302_v52  ;;  %v10134_v52 = vld [vmem:[%s18072_s7 + $0xa0] sm:$0xff] }
 0x45e   :  { %v12567_v21 = vpop.f32.mrf.mxu1  ;;  %v6187_v23 = vpop.f32.mrf.mxu0 }
 0x45f   :  { %v6691_v12 = vadd.f32 %v17266_v43, %v6659_v7  ;;  %v6628_v29 = vmax.f32 %v6603_v13, 0.0  ;;  %v6303_v31 = vadd.f32 %v6187_v23, %v17184_v51  ;;  %v10133_v7 = vld [vmem:[%s18072_s7 + $0x98] sm:$0xff] }
 0x460   :  { %v17271_v18 = vpop.f32.mrf.mxu1  ;;  %v12469_v35 = vpop.f32.mrf.mxu0 }
 0x461   :  { %v6716_v32 = vmax.f32 %v6691_v12, 0.0  ;;  %v6660_v53 = vmul.f32 %v17258_v14, %v6628_v29  ;;  %v6604_v41 = vadd.f32 %v6488_v20, %v6303_v31  ;;  %v10125_v20 = vld [vmem:[%s18072_s7 + $0x70] sm:$0xff]  ;;  %v10145_v29 = vld [vmem:[%s18072_s7 + $0xe0] sm:$0xf]  ;;  %v10155_v35 = vld [vmem:[%s18072_s7 + $0x118] sm:$0xf] }
 0x462   :  { %v12570_v55 = vpop.f32.mrf.mxu1  ;;  %v6192_v50 = vpop.f32.mrf.mxu0  ;;  %v10132_v12 = vld [vmem:[%s18072_s7 + $0x90] sm:$0xff] }
 0x463   :  { %v6692_v51 = vadd.f32 %v17266_v43, %v6660_v53  ;;  %v6629_v9 = vmax.f32 %v6604_v41, 0.0  ;;  %v6304_v0 = vadd.f32 %v6192_v50, %v17187_v56  ;;  %10113 = vmatmul.mubr.msk.f32.vlgmr.msra.gmra.mxu0 %vm6748_vm6, %v6716_v32 }
 0x464   :  { %v17282_v5 = vpop.f32.mrf.mxu1  ;;  %v12472_v6 = vpop.f32.mrf.mxu0  ;;  %10130 = vmatpush1.msk.msra.mxu0 %vm6752_vm5, %v10127_v59  ;;  %7012 = vmatprep.mubr.f32.mxu0 %v18098_v58  ;;  %v10143_v59 = vld [vmem:[%s18072_s7 + $0xd0] sm:$0xff] }
 0x465   :  { %v6717_v26 = vmax.f32 %v6692_v51, 0.0  ;;  %v6661_v56 = vmul.f32 %v17258_v14, %v6629_v9  ;;  %v6605_v4 = vadd.f32 %v6493_v36, %v6304_v0  ;;  %6976 = vmatprep.subr.mxu0 %v10126_v62  ;;  %v10146_v36 = vld [vmem:[%s18072_s7 + $0xe8] sm:$0xf]  ;;  %v10154_v6 = vld [vmem:[%s18072_s7 + $0x110] sm:$0xf] }
 0x466   :  { %v12573_v42 = vpop.f32.mrf.mxu1  ;;  %v6197_v57 = vpop.f32.mrf.mxu0  ;;  %6977 = vmatpush1.msra.mxu0 %v10125_v20  ;;  %v10142_v62 = vld [vmem:[%s18072_s7 + $0xc8] sm:$0xff]  ;;  %v10141_v20 = vld [vmem:[%s18072_s7 + $0xc0] sm:$0xff] }
 0x467   :  { %v6693_v10 = vadd.f32 %v17266_v43, %v6661_v56  ;;  %v6630_v11 = vmax.f32 %v6605_v4, 0.0  ;;  %v6305_v48 = vadd.f32 %v6197_v57, %v17190_v17  ;;  %10122 = vmatmul.mubr.msk.f32.vlgmr.msra.gmra.mxu1 %vm6748_vm6, %v6717_v26  ;;  %6978 = vmatprep.subr.mxu0 %v10124_v22  ;;  %v10164_v26 = vld [vmem:[%s18072_s7 + $0x148] sm:$0xf] }
 0x468   :  { %v17308_v3 = vpop.f32.mrf.mxu1  ;;  %v12475_v2 = vpop.f32.mrf.mxu0  ;;  %6979 = vmatpush1.msra.mxu0 %v10123_v25  ;;  %10139 = vmatpush1.msk.msra.mxu1 %vm6752_vm5, %v10136_v37  ;;  %v10152_v37 = vld [vmem:[%s18072_s7 + $0x100] sm:$0xff] }
 0x469   :  { %v6718_v13 = vmax.f32 %v6693_v10, 0.0  ;;  %v6662_v17 = vmul.f32 %v17258_v14, %v6630_v11  ;;  %v6606_v21 = vadd.f32 %v17253_v63, %v6305_v48  ;;  %7065 = vmatprep.subr.mxu1 %v10135_v16  ;;  %10147 = vmatprep.subr.msk.mxu0 %vm6752_vm5, %v10146_v36  ;;  %v10144_v63 = vld [vmem:[%s18072_s7 + $0xd8] sm:$0xff]  ;;  %v10150_v48 = vld [vmem:[%s18072_s7 + $0xf0] sm:$0xff] }
 0x46a   :  { %v12576_v23 = vpop.f32.mrf.mxu1  ;;  %v6202_v31 = vpop.f32.mrf.mxu0  ;;  %7066 = vmatpush1.msra.mxu1 %v10134_v52  ;;  %7101 = vmatprep.mubr.f32.mxu1 %v18098_v58  ;;  %v10151_v16 = vld [vmem:[%s18072_s7 + $0xf8] sm:$0xff]  ;;  %v10163_v52 = vld [vmem:[%s18072_s7 + $0x140] sm:$0xf] }
 0x46b   :  { %v6694_v32 = vadd.f32 %v17266_v43, %v6662_v17  ;;  %v6631_v53 = vmax.f32 %v6606_v21, 0.0  ;;  %v6306_v41 = vadd.f32 %v6202_v31, %v17193_v27  ;;  %10131 = vmatmul.mubr.msk.f32.vlgmr.msra.gmra.mxu0 %vm6748_vm6, %v6718_v13  ;;  %7067 = vmatprep.subr.mxu1 %v10133_v7  ;;  %v10173_v7 = vld [vmem:[%s18072_s7 + $0x178] sm:$0xf]  ;;  %v10160_v31 = vld [vmem:[%s18072_s7 + $0x128] sm:$0xff] }
 0x46c   :  { %v17336_v55 = vpop.f32.mrf.mxu1  ;;  %v12478_v50 = vpop.f32.mrf.mxu0  ;;  %7068 = vmatpush1.msra.mxu1 %v10132_v12  ;;  %10148 = vmatpush1.msk.msra.mxu0 %vm6752_vm5, %v10145_v29  ;;  %v10161_v12 = vld [vmem:[%s18072_s7 + $0x130] sm:$0xff] }
 0x46d   :  { %v6719_v51 = vmax.f32 %v6694_v32, 0.0  ;;  %v6663_v27 = vmul.f32 %v17258_v14, %v6631_v53  ;;  %v6607_v9 = vadd.f32 %v17261_v39, %v6306_v41  ;;  %7154 = vmatprep.subr.mxu0 %v10144_v63  ;;  %10156 = vmatprep.subr.msk.mxu1 %vm6752_vm5, %v10155_v35  ;;  %v10153_v39 = vld [vmem:[%s18072_s7 + $0x108] sm:$0xff]  ;;  %v10159_v53 = vld [vmem:[%s18072_s7 + $0x120] sm:$0xff]  ;;  %v10172_v41 = vld [vmem:[%s18072_s7 + $0x170] sm:$0xf] }
 0x46e   :  { %v12579_v0 = vpop.f32.mrf.mxu1  ;;  %v6207_v22 = vpop.f32.mrf.mxu0  ;;  %7155 = vmatpush1.msra.mxu0 %v10143_v59  ;;  %7190 = vmatprep.mubr.f32.mxu0 %v18098_v58  ;;  %v10182_v50 = vld [vmem:[%s18072_s7 + $0x1a8] sm:$0xf] }
 0x46f   :  { %v6695_v56 = vadd.f32 %v17266_v43, %v6663_v27  ;;  %v6632_v4 = vmax.f32 %v6607_v9, 0.0  ;;  %v6307_v42 = vadd.f32 %v6207_v22, %v17196_v1  ;;  %10140 = vmatmul.mubr.msk.f32.vlgmr.msra.gmra.mxu1 %vm6748_vm6, %v6719_v51  ;;  %7156 = vmatprep.subr.mxu0 %v10142_v62  ;;  %v10170_v0 = vld [vmem:[%s18072_s7 + $0x160] sm:$0xff] }
 0x470   :  { %v17364_v25 = vpop.f32.mrf.mxu1  ;;  %v12481_v57 = vpop.f32.mrf.mxu0  ;;  %7157 = vmatpush1.msra.mxu0 %v10141_v20  ;;  %10157 = vmatpush1.msk.msra.mxu1 %vm6752_vm5, %v10154_v6  ;;  %v10169_v6 = vld [vmem:[%s18072_s7 + $0x158] sm:$0xff] }
 0x471   :  { %v6720_v36 = vmax.f32 %v6695_v56, 0.0  ;;  %v6664_v1 = vmul.f32 %v17258_v14, %v6632_v4  ;;  %v6608_v10 = vadd.f32 %v17271_v18, %v6307_v42  ;;  %7243 = vmatprep.subr.mxu1 %v10153_v39  ;;  %10165 = vmatprep.subr.msk.mxu0 %vm6752_vm5, %v10164_v26  ;;  %v10162_v18 = vld [vmem:[%s18072_s7 + $0x138] sm:$0xff]  ;;  %v10168_v56 = vld [vmem:[%s18072_s7 + $0x150] sm:$0xff]  ;;  %v10181_v4 = vld [vmem:[%s18072_s7 + $0x1a0] sm:$0xf] }
 0x472   :  { %v12582_v11 = vpop.f32.mrf.mxu1  ;;  %v6212_v2 = vpop.f32.mrf.mxu0  ;;  %7244 = vmatpush1.msra.mxu1 %v10152_v37  ;;  %7279 = vmatprep.mubr.f32.mxu1 %v18098_v58  ;;  %v10191_v37 = vld [vmem:[%s18072_s7 + $0x1d8] sm:$0xf] }
 0x473   :  { %v6696_v13 = vadd.f32 %v17266_v43, %v6664_v1  ;;  %v6633_v17 = vmax.f32 %v6608_v10, 0.0  ;;  %v6308_v21 = vadd.f32 %v6212_v2, %v17199_v44  ;;  %10149 = vmatmul.mubr.msk.f32.vlgmr.msra.gmra.mxu0 %vm6748_vm6, %v6720_v36  ;;  %7245 = vmatprep.subr.mxu1 %v10151_v16  ;;  %v10179_v10 = vld [vmem:[%s18072_s7 + $0x190] sm:$0xff] }
 0x474   :  { %v17392_v23 = vpop.f32.mrf.mxu1  ;;  %v12484_v29 = vpop.f32.mrf.mxu0  ;;  %7246 = vmatpush1.msra.mxu1 %v10150_v48  ;;  %10166 = vmatpush1.msk.msra.mxu0 %vm6752_vm5, %v10163_v52  ;;  %v10178_v48 = vld [vmem:[%s18072_s7 + $0x188] sm:$0xff] }
 0x475   :  { %v6721_v63 = vmax.f32 %v6696_v13, 0.0  ;;  %v6665_v44 = vmul.f32 %v17258_v14, %v6633_v17  ;;  %v6609_v35 = vadd.f32 %v17282_v5, %v6308_v21  ;;  %7332 = vmatprep.subr.mxu0 %v10162_v18  ;;  %10174 = vmatprep.subr.msk.mxu1 %vm6752_vm5, %v10173_v7  ;;  %v10171_v5 = vld [vmem:[%s18072_s7 + $0x168] sm:$0xff]  ;;  %v10177_v7 = vld [vmem:[%s18072_s7 + $0x180] sm:$0xff]  ;;  %v10190_v13 = vld [vmem:[%s18072_s7 + $0x1d0] sm:$0xf] }
 0x476   :  { %v12585_v32 = vpop.f32.mrf.mxu1  ;;  %v6217_v59 = vpop.f32.mrf.mxu0  ;;  %7333 = vmatpush1.msra.mxu0 %v10161_v12  ;;  %7368 = vmatprep.mubr.f32.mxu0 %v18098_v58  ;;  %v10200_v21 = vld [vmem:[%s18072_s7 + $0x208] sm:$0xf] }
 0x477   :  { %v6697_v62 = vadd.f32 %v17266_v43, %v6665_v44  ;;  %v6634_v51 = vmax.f32 %v6609_v35, 0.0  ;;  %v6309_v27 = vadd.f32 %v6217_v59, %v17202_v54  ;;  %10158 = vmatmul.mubr.msk.f32.vlgmr.msra.gmra.mxu1 %vm6748_vm6, %v6721_v63  ;;  %7334 = vmatprep.subr.mxu0 %v10160_v31  ;;  %v10188_v44 = vld [vmem:[%s18072_s7 + $0x1c0] sm:$0xff]  ;;  %v10187_v32 = vld [vmem:[%s18072_s7 + $0x1b8] sm:$0xff] }
 0x478   :  { %v17420_v9 = vpop.f32.mrf.mxu1  ;;  %v12487_v20 = vpop.f32.mrf.mxu0  ;;  %7335 = vmatpush1.msra.mxu0 %v10159_v53  ;;  %10175 = vmatpush1.msk.msra.mxu1 %vm6752_vm5, %v10172_v41 }
 0x479   :  { %v6722_v22 = vmax.f32 %v6697_v62, 0.0  ;;  %v6666_v54 = vmul.f32 %v17258_v14, %v6634_v51  ;;  %v6610_v39 = vadd.f32 %v17308_v3, %v6309_v27  ;;  %7421 = vmatprep.subr.mxu1 %v10171_v5  ;;  %10183 = vmatprep.subr.msk.mxu0 %vm6752_vm5, %v10182_v50  ;;  %v10180_v3 = vld [vmem:[%s18072_s7 + $0x198] sm:$0xff]  ;;  %v10186_v5 = vld [vmem:[%s18072_s7 + $0x1b0] sm:$0xff]  ;;  %v10199_v50 = vld [vmem:[%s18072_s7 + $0x200] sm:$0xf] }
 0x47a   :  { %v12588_v26 = vpop.f32.mrf.mxu1  ;;  %v6222_v42 = vpop.f32.mrf.mxu0  ;;  %7422 = vmatpush1.msra.mxu1 %v10170_v0  ;;  %7457 = vmatprep.mubr.f32.mxu1 %v18098_v58  ;;  %v10209_v51 = vld [vmem:[%s18072_s7 + $0x238] sm:$0xf] }
 0x47b   :  { %v6698_v57 = vadd.f32 %v17266_v43, %v6666_v54  ;;  %v6635_v16 = vmax.f32 %v6610_v39, 0.0  ;;  %v6310_v36 = vadd.f32 %v6222_v42, %v17205_v30  ;;  %10167 = vmatmul.mubr.msk.f32.vlgmr.msra.gmra.mxu0 %vm6748_vm6, %v6722_v22  ;;  %7423 = vmatprep.subr.mxu1 %v10169_v6  ;;  %v10197_v22 = vld [vmem:[%s18072_s7 + $0x1f0] sm:$0xff]  ;;  %v10196_v39 = vld [vmem:[%s18072_s7 + $0x1e8] sm:$0xff]  ;;  %v10195_v42 = vld [vmem:[%s18072_s7 + $0x1e0] sm:$0xff] }
 0x47c   :  { %v17448_v1 = vpop.f32.mrf.mxu1  ;;  %v12490_v11 = vpop.f32.mrf.mxu0  ;;  %7424 = vmatpush1.msra.mxu1 %v10168_v56  ;;  %10184 = vmatpush1.msk.msra.mxu0 %vm6752_vm5, %v10181_v4 }
 0x47d   :  { %v6723_v52 = vmax.f32 %v6698_v57, 0.0  ;;  %v6667_v30 = vmul.f32 %v17258_v14, %v6635_v16  ;;  %v6611_v2 = vadd.f32 %v17336_v55, %v6310_v36  ;;  %7510 = vmatprep.subr.mxu0 %v10180_v3  ;;  %10192 = vmatprep.subr.msk.mxu1 %vm6752_vm5, %v10191_v37  ;;  %v10189_v55 = vld [vmem:[%s18072_s7 + $0x1c8] sm:$0xff]  ;;  %v10208_v3 = vld [vmem:[%s18072_s7 + $0x230] sm:$0xf] }
 0x47e   :  { %v12591_v18 = vpop.f32.mrf.mxu1  ;;  %v6227_v17 = vpop.f32.mrf.mxu0  ;;  %7511 = vmatpush1.msra.mxu0 %v10179_v10  ;;  %7546 = vmatprep.mubr.f32.mxu0 %v18098_v58  ;;  %v10218_v57 = vld [vmem:[%s18072_s7 + $0x268] sm:$0xf] }
 0x47f   :  { %v6699_v12 = vadd.f32 %v17266_v43, %v6667_v30  ;;  %v6636_v29 = vmax.f32 %v6611_v2, 0.0  ;;  %v6311_v31 = vadd.f32 %v6227_v17, %v17208_v46  ;;  %10176 = vmatmul.mubr.msk.f32.vlgmr.msra.gmra.mxu1 %vm6748_vm6, %v6723_v52  ;;  %7512 = vmatprep.subr.mxu0 %v10178_v48  ;;  %v10206_v48 = vld [vmem:[%s18072_s7 + $0x220] sm:$0xff]  ;;  %v10205_v30 = vld [vmem:[%s18072_s7 + $0x218] sm:$0xff] }
 0x480   :  { %v17476_v63 = vpop.f32.mrf.mxu1  ;;  %v12493_v35 = vpop.f32.mrf.mxu0  ;;  %7513 = vmatpush1.msra.mxu0 %v10177_v7  ;;  %10193 = vmatpush1.msk.msra.mxu1 %vm6752_vm5, %v10190_v13  ;;  %v10204_v13 = vld [vmem:[%s18072_s7 + $0x210] sm:$0xff]  ;;  %v10217_v17 = vld [vmem:[%s18072_s7 + $0x260] sm:$0xf] }
 0x481   :  { %v6724_v53 = vmax.f32 %v6699_v12, 0.0  ;;  %v6668_v46 = vmul.f32 %v17258_v14, %v6636_v29  ;;  %v6612_v41 = vadd.f32 %v17364_v25, %v6311_v31  ;;  %7599 = vmatprep.subr.mxu1 %v10189_v55  ;;  %10201 = vmatprep.subr.msk.mxu0 %vm6752_vm5, %v10200_v21  ;;  %v10198_v25 = vld [vmem:[%s18072_s7 + $0x1f8] sm:$0xff]  ;;  %v10215_v35 = vld [vmem:[%s18072_s7 + $0x250] sm:$0xff] }
 0x482   :  { %v12594_v59 = vpop.f32.mrf.mxu1  ;;  %v6232_v62 = vpop.f32.mrf.mxu0  ;;  %7600 = vmatpush1.msra.mxu1 %v10188_v44  ;;  %7635 = vmatprep.mubr.f32.mxu1 %v18098_v58  ;;  %v10227_v21 = vld [vmem:[%s18072_s7 + $0x298] sm:$0xf] }
 0x483   :  { %v6700_v27 = vadd.f32 %v17266_v43, %v6668_v46  ;;  %v6637_v0 = vmax.f32 %v6612_v41, 0.0  ;;  %v6312_v20 = vadd.f32 %v6232_v62, %v17211_v45  ;;  %10185 = vmatmul.mubr.msk.f32.vlgmr.msra.gmra.mxu0 %vm6748_vm6, %v6724_v53  ;;  %7601 = vmatprep.subr.mxu1 %v10187_v32  ;;  %v10214_v53 = vld [vmem:[%s18072_s7 + $0x248] sm:$0xff] }
 0x484   :  { %v17504_v6 = vpop.f32.mrf.mxu1  ;;  %v12496_v54 = vpop.f32.mrf.mxu0  ;;  %7602 = vmatpush1.msra.mxu1 %v10186_v5  ;;  %10202 = vmatpush1.msk.msra.mxu0 %vm6752_vm5, %v10199_v50  ;;  %v10213_v5 = vld [vmem:[%s18072_s7 + $0x240] sm:$0xff]  ;;  %v10226_v50 = vld [vmem:[%s18072_s7 + $0x290] sm:$0xf] }
 0x485   :  { %v6725_v26 = vmax.f32 %v6700_v27, 0.0  ;;  %v6669_v45 = vmul.f32 %v17258_v14, %v6637_v0  ;;  %v6613_v56 = vadd.f32 %v17392_v23, %v6312_v20  ;;  %7688 = vmatprep.subr.mxu0 %v10198_v25  ;;  %10210 = vmatprep.subr.msk.mxu1 %vm6752_vm5, %v10209_v51  ;;  %v10207_v23 = vld [vmem:[%s18072_s7 + $0x228] sm:$0xff] }
 0x486   :  { %v12597_v4 = vpop.f32.mrf.mxu1  ;;  %v6237_v37 = vpop.f32.mrf.mxu0  ;;  %7689 = vmatpush1.msra.mxu0 %v10197_v22  ;;  %7724 = vmatprep.mubr.f32.mxu0 %v18098_v58  ;;  %v10236_v25 = vld [vmem:[%s18072_s7 + $0x2c8] sm:$0xf]  ;;  %v10224_v22 = vld [vmem:[%s18072_s7 + $0x280] sm:$0xff] }
 0x487   :  { %v6701_v16 = vadd.f32 %v17266_v43, %v6669_v45  ;;  %v6638_v36 = vmax.f32 %v6613_v56, 0.0  ;;  %v6313_v10 = vadd.f32 %v6237_v37, %v17214_v38  ;;  %10194 = vmatmul.mubr.msk.f32.vlgmr.msra.gmra.mxu1 %vm6748_vm6, %v6725_v26  ;;  %7690 = vmatprep.subr.mxu0 %v10196_v39  ;;  %v10223_v39 = vld [vmem:[%s18072_s7 + $0x278] sm:$0xff]  ;;  %v10222_v4 = vld [vmem:[%s18072_s7 + $0x270] sm:$0xff] }
 0x488   :  { %v17532_v11 = vpop.f32.mrf.mxu1  ;;  %v12499_v52 = vpop.f32.mrf.mxu0  ;;  %7691 = vmatpush1.msra.mxu0 %v10195_v42  ;;  %10211 = vmatpush1.msk.msra.mxu1 %vm6752_vm5, %v10208_v3  ;;  %v10235_v42 = vld [vmem:[%s18072_s7 + $0x2c0] sm:$0xf]  ;;  %v10245_v37 = vld [vmem:[%s18072_s7 + $0x2f8] sm:$0xf] }
 0x489   :  { %v6726_v2 = vmax.f32 %v6701_v16, 0.0  ;;  %v6670_v38 = vmul.f32 %v17258_v14, %v6638_v36  ;;  %v6614_v18 = vadd.f32 %v17420_v9, %v6313_v10  ;;  %7777 = vmatprep.subr.mxu1 %v10207_v23  ;;  %10219 = vmatprep.subr.msk.mxu0 %vm6752_vm5, %v10218_v57  ;;  %v10216_v9 = vld [vmem:[%s18072_s7 + $0x258] sm:$0xff]  ;;  %v10233_v10 = vld [vmem:[%s18072_s7 + $0x2b0] sm:$0xff]  ;;  %v10232_v52 = vld [vmem:[%s18072_s7 + $0x2a8] sm:$0xff] }
 0x48a   :  { %v12600_v7 = vpop.f32.mrf.mxu1  ;;  %v6242_v55 = vpop.f32.mrf.mxu0  ;;  %7778 = vmatpush1.msra.mxu1 %v10206_v48  ;;  %7813 = vmatprep.mubr.f32.mxu1 %v18098_v58 }
 0x48b   :  { %v6702_v12 = vadd.f32 %v17266_v43, %v6670_v38  ;;  %v6639_v29 = vmax.f32 %v6614_v18, 0.0  ;;  %v6314_v31 = vadd.f32 %v6242_v55, %v17217_v15  ;;  %10203 = vmatmul.mubr.msk.f32.vlgmr.msra.gmra.mxu0 %vm6748_vm6, %v6726_v2  ;;  %7779 = vmatprep.subr.mxu1 %v10205_v30  ;;  %v10231_v18 = vld [vmem:[%s18072_s7 + $0x2a0] sm:$0xff]  ;;  %v10244_v7 = vld [vmem:[%s18072_s7 + $0x2f0] sm:$0xf] }
 0x48c   :  { %v17560_v44 = vpop.f32.mrf.mxu1  ;;  %v12502_v32 = vpop.f32.mrf.mxu0  ;;  %7780 = vmatpush1.msra.mxu1 %v10204_v13  ;;  %10220 = vmatpush1.msk.msra.mxu0 %vm6752_vm5, %v10217_v17  ;;  %v10254_v17 = vld [vmem:[%s18072_s7 + $0x328] sm:$0xf] }
 0x48d   :  { %v6727_v46 = vmax.f32 %v6702_v12, 0.0  ;;  %v6671_v15 = vmul.f32 %v17258_v14, %v6639_v29  ;;  %v6615_v41 = vadd.f32 %v17448_v1, %v6314_v31  ;;  %7866 = vmatprep.subr.mxu0 %v10216_v9  ;;  %10228 = vmatprep.subr.msk.mxu1 %vm6752_vm5, %v10227_v21  ;;  %v10225_v1 = vld [vmem:[%s18072_s7 + $0x288] sm:$0xff]  ;;  %v10242_v29 = vld [vmem:[%s18072_s7 + $0x2e0] sm:$0xff] }
 0x48e   :  { %v12603_v59 = vpop.f32.mrf.mxu1  ;;  %v6247_v62 = vpop.f32.mrf.mxu0  ;;  %7867 = vmatpush1.msra.mxu0 %v10215_v35  ;;  %7902 = vmatprep.mubr.f32.mxu0 %v18098_v58  ;;  %v10241_v35 = vld [vmem:[%s18072_s7 + $0x2d8] sm:$0xff] }
 0x48f   :  { %v6703_v51 = vadd.f32 %v17266_v43, %v6671_v15  ;;  %v6640_v27 = vmax.f32 %v6615_v41, 0.0  ;;  %v6315_v0 = vadd.f32 %v6247_v62, %v17220_v47  ;;  %10212 = vmatmul.mubr.msk.f32.vlgmr.msra.gmra.mxu1 %vm6748_vm6, %v6727_v46  ;;  %7868 = vmatprep.subr.mxu0 %v10214_v53  ;;  %v10240_v15 = vld [vmem:[%s18072_s7 + $0x2d0] sm:$0xff]  ;;  %v10253_v41 = vld [vmem:[%s18072_s7 + $0x320] sm:$0xf] }
 0x490   :  { %v17588_v20 = vpop.f32.mrf.mxu1  ;;  %v12505_v54 = vpop.f32.mrf.mxu0  ;;  %7869 = vmatpush1.msra.mxu0 %v10213_v5  ;;  %10229 = vmatpush1.msk.msra.mxu1 %vm6752_vm5, %v10226_v50  ;;  %v10263_v5 = vld [vmem:[%s18072_s7 + $0x358] sm:$0xf] }
 0x491   :  { %v6728_v26 = vmax.f32 %v6703_v51, 0.0  ;;  %v6672_v47 = vmul.f32 %v17258_v14, %v6640_v27  ;;  %v6616_v45 = vadd.f32 %v17476_v63, %v6315_v0  ;;  %7955 = vmatprep.subr.mxu1 %v10225_v1  ;;  %10237 = vmatprep.subr.msk.mxu0 %vm6752_vm5, %v10236_v25  ;;  %v10234_v63 = vld [vmem:[%s18072_s7 + $0x2b8] sm:$0xff]  ;;  %v10251_v51 = vld [vmem:[%s18072_s7 + $0x310] sm:$0xff]  ;;  %v10250_v0 = vld [vmem:[%s18072_s7 + $0x308] sm:$0xff] }
 0x492   :  { %v12606_v56 = vpop.f32.mrf.mxu1  ;;  %v6252_v3 = vpop.f32.mrf.mxu0  ;;  %7956 = vmatpush1.msra.mxu1 %v10224_v22  ;;  %7991 = vmatprep.mubr.f32.mxu1 %v18098_v58 }
 0x493   :  { %v6704_v23 = vadd.f32 %v17266_v43, %v6672_v47  ;;  %v6641_v57 = vmax.f32 %v6616_v45, 0.0  ;;  %v6316_v16 = vadd.f32 %v6252_v3, %v17223_v8  ;;  %10221 = vmatmul.mubr.msk.f32.vlgmr.msra.gmra.mxu0 %vm6748_vm6, %v6728_v26  ;;  %7957 = vmatprep.subr.mxu1 %v10223_v39  ;;  %v10249_v26 = vld [vmem:[%s18072_s7 + $0x300] sm:$0xff]  ;;  %v10262_v47 = vld [vmem:[%s18072_s7 + $0x350] sm:$0xf]  ;;  %v10272_v56 = vld [vmem:[%s18072_s7 + $0x388] sm:$0xf] }
 0x494   :  { %v17616_v36 = vpop.f32.mrf.mxu1  ;;  %v12508_v48 = vpop.f32.mrf.mxu0  ;;  %7958 = vmatpush1.msra.mxu1 %v10222_v4  ;;  %10238 = vmatpush1.msk.msra.mxu0 %vm6752_vm5, %v10235_v42 }
 0x495   :  { %v6729_v30 = vmax.f32 %v6704_v23, 0.0  ;;  %v6673_v8 = vmul.f32 %v17258_v14, %v6641_v57  ;;  %v6617_v2 = vadd.f32 %v17504_v6, %v6316_v16  ;;  %8044 = vmatprep.subr.mxu0 %v10234_v63  ;;  %10246 = vmatprep.subr.msk.mxu1 %vm6752_vm5, %v10245_v37  ;;  %v10243_v6 = vld [vmem:[%s18072_s7 + $0x2e8] sm:$0xff]  ;;  %v10260_v37 = vld [vmem:[%s18072_s7 + $0x340] sm:$0xff]  ;;  %v10259_v57 = vld [vmem:[%s18072_s7 + $0x338] sm:$0xff] }
 0x496   :  { %v12609_v38 = vpop.f32.mrf.mxu1  ;;  %v6257_v13 = vpop.f32.mrf.mxu0  ;;  %8045 = vmatpush1.msra.mxu0 %v10233_v10  ;;  %8080 = vmatprep.mubr.f32.mxu0 %v18098_v58 }
 0x497   :  { %v6705_v55 = vadd.f32 %v17266_v43, %v6673_v8  ;;  %v6642_v9 = vmax.f32 %v6617_v2, 0.0  ;;  %v6317_v21 = vadd.f32 %v6257_v13, %v17226_v60  ;;  %10230 = vmatmul.mubr.msk.f32.vlgmr.msra.gmra.mxu1 %vm6748_vm6, %v6729_v30  ;;  %8046 = vmatprep.subr.mxu0 %v10232_v52  ;;  %v10258_v52 = vld [vmem:[%s18072_s7 + $0x330] sm:$0xff]  ;;  %v10271_v30 = vld [vmem:[%s18072_s7 + $0x380] sm:$0xf]  ;;  %v10281_v2 = vld [vmem:[%s18072_s7 + $0x3b8] sm:$0xf] }
 0x498   :  { %v17644_v12 = vpop.f32.mrf.mxu1  ;;  %v12511_v31 = vpop.f32.mrf.mxu0  ;;  %8047 = vmatpush1.msra.mxu0 %v10231_v18  ;;  %10247 = vmatpush1.msk.msra.mxu1 %vm6752_vm5, %v10244_v7 }
 0x499   :  { %v6730_v32 = vmax.f32 %v6705_v55, 0.0  ;;  %v6674_v60 = vmul.f32 %v17258_v14, %v6642_v9  ;;  %v6618_v53 = vadd.f32 %v17532_v11, %v6317_v21  ;;  %8133 = vmatprep.subr.mxu1 %v10243_v6  ;;  %10255 = vmatprep.subr.msk.mxu0 %vm6752_vm5, %v10254_v17  ;;  %v10252_v11 = vld [vmem:[%s18072_s7 + $0x318] sm:$0xff]  ;;  %v10269_v6 = vld [vmem:[%s18072_s7 + $0x370] sm:$0xff]  ;;  %v10268_v55 = vld [vmem:[%s18072_s7 + $0x368] sm:$0xff] }
 0x49a   :  { %v12612_v46 = vpop.f32.mrf.mxu1  ;;  %v6262_v59 = vpop.f32.mrf.mxu0  ;;  %8134 = vmatpush1.msra.mxu1 %v10242_v29  ;;  %8169 = vmatprep.mubr.f32.mxu1 %v18098_v58  ;;  %v10267_v31 = vld [vmem:[%s18072_s7 + $0x360] sm:$0xff] }
 0x49b   :  { %v6706_v50 = vadd.f32 %v17266_v43, %v6674_v60  ;;  %v6643_v62 = vmax.f32 %v6618_v53, 0.0  ;;  %v6318_v1 = vadd.f32 %v6262_v59, %v17229_v34  ;;  %10239 = vmatmul.mubr.msk.f32.vlgmr.msra.gmra.mxu0 %vm6748_vm6, %v6730_v32  ;;  %8135 = vmatprep.subr.mxu1 %v10241_v35  ;;  %v10280_v35 = vld [vmem:[%s18072_s7 + $0x3b0] sm:$0xf]  ;;  %v10290_v60 = vld [vmem:[%s18072_s7 + $0x3e8] sm:$0xf]  ;;  %v10278_v59 = vld [vmem:[%s18072_s7 + $0x3a0] sm:$0xff] }
 0x49c   :  { %v17672_v25 = vpop.f32.mrf.mxu1  ;;  %v12514_v27 = vpop.f32.mrf.mxu0  ;;  %8136 = vmatpush1.msra.mxu1 %v10240_v15  ;;  %10256 = vmatpush1.msk.msra.mxu0 %vm6752_vm5, %v10253_v41 }
 0x49d   :  { %v6731_v22 = vmax.f32 %v6706_v50, 0.0  ;;  %v6675_v34 = vmul.f32 %v17258_v14, %v6643_v62  ;;  %v6619_v54 = vadd.f32 %v17560_v44, %v6318_v1  ;;  %8222 = vmatprep.subr.mxu0 %v10252_v11  ;;  %10264 = vmatprep.subr.msk.mxu1 %vm6752_vm5, %v10263_v5  ;;  %v10261_v44 = vld [vmem:[%s18072_s7 + $0x348] sm:$0xff]  ;;  %v10277_v5 = vld [vmem:[%s18072_s7 + $0x398] sm:$0xff]  ;;  %v10289_v27 = vld [vmem:[%s18072_s7 + $0x3e0] sm:$0xf] }
 0x49e   :  { %v12615_v39 = vpop.f32.mrf.mxu1  ;;  %v6267_v45 = vpop.f32.mrf.mxu0  ;;  %8223 = vmatpush1.msra.mxu0 %v10251_v51  ;;  %8258 = vmatprep.mubr.f32.mxu0 %v18098_v58  ;;  %v10276_v51 = vld [vmem:[%s18072_s7 + $0x390] sm:$0xff] }
 0x49f   :  { %v6707_v4 = vadd.f32 %v17266_v43, %v6675_v34  ;;  %v6644_v42 = vmax.f32 %v6619_v54, 0.0  ;;  %v6319_v3 = vadd.f32 %v6267_v45, %v17232_v28  ;;  %10248 = vmatmul.mubr.msk.f32.vlgmr.msra.gmra.mxu1 %vm6748_vm6, %v6731_v22  ;;  %8224 = vmatprep.subr.mxu0 %v10250_v0  ;;  %v10299_v22 = vld [vmem:[%s18072_s7 + $0x418] sm:$0xf]  ;;  %v10286_v45 = vld [vmem:[%s18072_s7 + $0x3c8] sm:$0xff] }
 0x4a0   :  { %v17700_v63 = vpop.f32.mrf.mxu1  ;;  %v12517_v23 = vpop.f32.mrf.mxu0  ;;  %8225 = vmatpush1.msra.mxu0 %v10249_v26  ;;  %10265 = vmatpush1.msk.msra.mxu1 %vm6752_vm5, %v10262_v47  ;;  %v10287_v26 = vld [vmem:[%s18072_s7 + $0x3d0] sm:$0xff] }
 0x4a1   :  { %v6732_v16 = vmax.f32 %v6707_v4, 0.0  ;;  %v6676_v28 = vmul.f32 %v17258_v14, %v6644_v42  ;;  %v6620_v10 = vadd.f32 %v17588_v20, %v6319_v3  ;;  %8311 = vmatprep.subr.mxu1 %v10261_v44  ;;  %10273 = vmatprep.subr.msk.mxu0 %vm6752_vm5, %v10272_v56  ;;  %v10270_v20 = vld [vmem:[%s18072_s7 + $0x378] sm:$0xff]  ;;  %v10285_v4 = vld [vmem:[%s18072_s7 + $0x3c0] sm:$0xff]  ;;  %v10298_v42 = vld [vmem:[%s18072_s7 + $0x410] sm:$0xf] }
 0x4a2   :  { %v12618_v48 = vpop.f32.mrf.mxu1  ;;  %v6272_v8 = vpop.f32.mrf.mxu0  ;;  %8312 = vmatpush1.msra.mxu1 %v10260_v37  ;;  %8347 = vmatprep.mubr.f32.mxu1 %v18098_v58  ;;  %v10297_v37 = vld [vmem:[%s18072_s7 + $0x408] sm:$0xff] }
 0x4a3   :  { %v6708_v38 = vadd.f32 %v17266_v43, %v6676_v28  ;;  %v6645_v18 = vmax.f32 %v6620_v10, 0.0  ;;  %v6320_v7 = vadd.f32 %v6272_v8, %v17235_v19  ;;  %10257 = vmatmul.mubr.msk.f32.vlgmr.msra.gmra.mxu0 %vm6748_vm6, %v6732_v16  ;;  %8313 = vmatprep.subr.mxu1 %v10259_v57  ;;  %v10296_v28 = vld [vmem:[%s18072_s7 + $0x400] sm:$0xff]  ;;  %v10295_v48 = vld [vmem:[%s18072_s7 + $0x3f8] sm:$0xff]  ;;  %v10294_v8 = vld [vmem:[%s18072_s7 + $0x3f0] sm:$0xff] }
 0x4a4   :  { %v17728_v13 = vpop.f32.mrf.mxu1  ;;  %v12520_v17 = vpop.f32.mrf.mxu0  ;;  %8314 = vmatpush1.msra.mxu1 %v10258_v52  ;;  %10274 = vmatpush1.msk.msra.mxu0 %vm6752_vm5, %v10271_v30 }
 0x4a5   :  { %v6733_v9 = vmax.f32 %v6708_v38, 0.0  ;;  %v6677_v19 = vmul.f32 %v17258_v14, %v6645_v18  ;;  %v6621_v21 = vadd.f32 %v17616_v36, %v6320_v7  ;;  %8400 = vmatprep.subr.mxu0 %v10270_v20  ;;  %10282 = vmatprep.subr.msk.mxu1 %vm6752_vm5, %v10281_v2  ;;  %v10279_v36 = vld [vmem:[%s18072_s7 + $0x3a8] sm:$0xff]  ;;  %v10307_v20 = vld [vmem:[%s18072_s7 + $0x440] sm:$0xf]  ;;  %v10306_v38 = vld [vmem:[%s18072_s7 + $0x438] sm:$0xff] }
 0x4a6   :  { %v12621_v29 = vpop.f32.mrf.mxu1  ;;  %v6277_v32 = vpop.f32.mrf.mxu0  ;;  %8401 = vmatpush1.msra.mxu0 %v10269_v6  ;;  %8436 = vmatprep.mubr.f32.mxu0 %v18098_v58  ;;  %v10305_v17 = vld [vmem:[%s18072_s7 + $0x430] sm:$0xff] }
 0x4a7   :  { %v6709_v53 = vadd.f32 %v17266_v43, %v6677_v19  ;;  %v6646_v46 = vmax.f32 %v6621_v21, 0.0  ;;  %v6321_v15 = vadd.f32 %v6277_v32, %v17238_v33  ;;  %10266 = vmatmul.mubr.msk.f32.vlgmr.msra.gmra.mxu1 %vm6748_vm6, %v6733_v9  ;;  %8402 = vmatprep.subr.mxu0 %v10268_v55  ;;  %v10304_v9 = vld [vmem:[%s18072_s7 + $0x428] sm:$0xff]  ;;  %v10303_v21 = vld [vmem:[%s18072_s7 + $0x420] sm:$0xff]  ;;  %v10316_v29 = vld [vmem:[%s18072_s7 + $0x470] sm:$0xf] }
 0x4a8   :  { %v17756_v41 = vpop.f32.mrf.mxu1  ;;  %v12523_v11 = vpop.f32.mrf.mxu0  ;;  %8403 = vmatpush1.msra.mxu0 %v10267_v31  ;;  %10283 = vmatpush1.msk.msra.mxu1 %vm6752_vm5, %v10280_v35  ;;  %v12681_v35 = vld [vmem:[%s18075_s6] ss:$0 sm:$0xff] }
 0x4a9   :  { %v6734_v50 = vmax.f32 %v6709_v53, 0.0  ;;  %v6678_v33 = vmul.f32 %v17258_v14, %v6646_v46  ;;  %v6622_v62 = vadd.f32 %v17644_v12, %v6321_v15  ;;  %8489 = vmatprep.subr.mxu1 %v10279_v36  ;;  %10291 = vmatprep.subr.msk.mxu0 %vm6752_vm5, %v10290_v60  ;;  %v10288_v12 = vld [vmem:[%s18072_s7 + $0x3d8] sm:$0xff]  ;;  %v10314_v53 = vld [vmem:[%s18072_s7 + $0x460] sm:$0xff] }
 0x4aa   :  { %v12624_v1 = vpop.f32.mrf.mxu1  ;;  %v6282_v0 = vpop.f32.mrf.mxu0  ;;  %8490 = vmatpush1.msra.mxu1 %v10278_v59  ;;  %8525 = vmatprep.mubr.f32.mxu1 %v18098_v58  ;;  %v10313_v15 = vld [vmem:[%s18072_s7 + $0x458] sm:$0xff] }
 0x4ab   :  { %v6710_v34 = vadd.f32 %v17266_v43, %v6678_v33  ;;  %v6647_v54 = vmax.f32 %v6622_v62, 0.0  ;;  %v6322_v39 = vadd.f32 %v6282_v0, %v17241_v49  ;;  %10275 = vmatmul.mubr.msk.f32.vlgmr.msra.gmra.mxu0 %vm6748_vm6, %v6734_v50  ;;  %8491 = vmatprep.subr.mxu1 %v10277_v5  ;;  %v10312_v50 = vld [vmem:[%s18072_s7 + $0x450] sm:$0xff]  ;;  %v10325_v33 = vld [vmem:[%s18072_s7 + $0x4a0] sm:$0xf]  ;;  %v10324_v62 = vld [vmem:[%s18072_s7 + $0x498] sm:$0xff] }
 0x4ac   :  { %v12526_v47 = vpop.f32.mrf.mxu0  ;;  %8492 = vmatpush1.msra.mxu1 %v10276_v51  ;;  %10292 = vmatpush1.msk.msra.mxu0 %vm6752_vm5, %v10289_v27  ;;  %v10323_v51 = vld [vmem:[%s18072_s7 + $0x490] sm:$0xff]  ;;  %v10322_v27 = vld [vmem:[%s18072_s7 + $0x488] sm:$0xff] }
 0x4ad   :  { %v6735_v44 = vmax.f32 %v6710_v34, 0.0  ;;  %v6679_v56 = vmul.f32 %v17258_v14, %v6647_v54  ;;  %v6623_v49 = vadd.f32 %v17672_v25, %v6322_v39  ;;  %8578 = vmatprep.subr.mxu0 %v10288_v12  ;;  %10300 = vmatprep.subr.msk.mxu1 %vm6752_vm5, %v10299_v22  ;;  %v10308_v25 = vld [vmem:[%s18072_s7 + $0x448] sm:$0xf]  ;;  %v10321_v22 = vld [vmem:[%s18072_s7 + $0x480] sm:$0xff]  ;;  %v8996_v39 = vld [vmem:[%s18076_s9 + $0x78] sm:$0xff] }
 0x4ae   :  { %v6287_v3 = vpop.f32.mrf.mxu0  ;;  %8579 = vmatpush1.msra.mxu0 %v10287_v26  ;;  %8614 = vmatprep.mubr.f32.mxu0 %v18098_v58  ;;  %v8995_v26 = vld [vmem:[%s18076_s9 + $0x70] sm:$0xff]  ;;  %v8994_v47 = vld [vmem:[%s18076_s9 + $0x68] sm:$0xff] }
 0x4af   :  { %v6711_v23 = vadd.f32 %v17266_v43, %v6679_v56  ;;  %v6648_v57 = vmax.f32 %v6623_v49, 0.0  ;;  %v6323_v16 = vadd.f32 %v6287_v3, %v17244_v24  ;;  %10284 = vmatmul.mubr.msk.f32.vlgmr.msra.gmra.mxu1 %vm6748_vm6, %v6735_v44  ;;  %8580 = vmatprep.subr.mxu0 %v10286_v45  ;;  %v8993_v45 = vld [vmem:[%s18076_s9 + $0x60] sm:$0xff]  ;;  %v8992_v44 = vld [vmem:[%s18076_s9 + $0x58] sm:$0xff]  ;;  %v8991_v56 = vld [vmem:[%s18076_s9 + $0x50] sm:$0xff] }
 0x4b0   :  { %v12529_v10 = vpop.f32.mrf.mxu0  ;;  %8581 = vmatpush1.msra.mxu0 %v10285_v4  ;;  %10301 = vmatpush1.msk.msra.mxu1 %vm6752_vm5, %v10298_v42  ;;  %v8990_v49 = vld [vmem:[%s18076_s9 + $0x48] sm:$0xff]  ;;  %v8989_v4 = vld [vmem:[%s18076_s9 + $0x40] sm:$0xff]  ;;  %v8988_v42 = vld [vmem:[%s18076_s9 + $0x38] sm:$0xff] }
 0x4b1   :  { %v6736_v52 = vmax.f32 %v6711_v23, 0.0  ;;  %v6680_v30 = vmul.f32 %v17258_v14, %v6648_v57  ;;  %v6624_v24 = vadd.f32 %v17700_v63, %v6323_v16  ;;  %8667 = vmatprep.subr.mxu1 %v10297_v37  ;;  %10309 = vmatprep.subr.msk.mxu0 %vm6752_vm5, %v10308_v25  ;;  %v10317_v63 = vld [vmem:[%s18072_s7 + $0x478] sm:$0xf]  ;;  %v8987_v3 = vld [vmem:[%s18076_s9 + $0x30] sm:$0xff]  ;;  %v8986_v37 = vld [vmem:[%s18076_s9 + $0x28] sm:$0xff] }
 0x4b2   :  { %v6292_v2 = vpop.f32.mrf.mxu0  ;;  %8668 = vmatpush1.msra.mxu1 %v10296_v28  ;;  %8703 = vmatprep.mubr.f32.mxu1 %v18098_v58  ;;  %v8985_v25 = vld [vmem:[%s18076_s9 + $0x20] sm:$0xff]  ;;  %v8984_v23 = vld [vmem:[%s18076_s9 + $0x18] sm:$0xff]  ;;  %v8983_v57 = vld [vmem:[%s18076_s9 + $0x10] sm:$0xff] }
 0x4b3   :  { %v6712_v18 = vadd.f32 %v17266_v43, %v6680_v30  ;;  %v6649_v7 = vmax.f32 %v6624_v24, 0.0  ;;  %v6324_v6 = vadd.f32 %v6292_v2, %v17247_v61  ;;  %10293 = vmatmul.mubr.msk.f32.vlgmr.msra.gmra.mxu0 %vm6748_vm6, %v6736_v52  ;;  %8669 = vmatprep.subr.mxu1 %v10295_v48  ;;  %v8982_v16 = vld [vmem:[%s18076_s9 + $0x8] sm:$0xff]  ;;  %v8981_v28 = vld [vmem:[%s18076_s9] sm:$0xff]  ;;  %v9004_v48 = vld [vmem:[%s18076_s9 + $0xb8] sm:$0xff] }
 0x4b4   :  { %v12532_v55 = vpop.f32.mrf.mxu0  ;;  %8670 = vmatpush1.msra.mxu1 %v10294_v8  ;;  %10310 = vmatpush1.msk.msra.mxu0 %vm6752_vm5, %v10307_v20  ;;  %v9005_v10 = vld [vmem:[%s18076_s9 + $0xc0] sm:$0xff]  ;;  %v9003_v52 = vld [vmem:[%s18076_s9 + $0xb0] sm:$0xff]  ;;  %v9002_v30 = vld [vmem:[%s18076_s9 + $0xa8] sm:$0xff] }
 0x4b5   :  { %v6737_v19 = vmax.f32 %v6712_v18, 0.0  ;;  %v6681_v43 = vmul.f32 %v17258_v14, %v6649_v7  ;;  %v6625_v61 = vadd.f32 %v17728_v13, %v6324_v6  ;;  %8756 = vmatprep.subr.mxu0 %v10306_v38  ;;  %10318 = vmatprep.subr.msk.mxu1 %vm6752_vm5, %v10317_v63  ;;  %v10315_v14 = vld [vmem:[%s18072_s7 + $0x468] sm:$0xff]  ;;  %v9001_v24 = vld [vmem:[%s18076_s9 + $0xa0] sm:$0xff]  ;;  %v9000_v8 = vld [vmem:[%s18076_s9 + $0x98] sm:$0xff] }
 0x4b6   :  { %v6297_v31 = vpop.f32.mrf.mxu0  ;;  %8757 = vmatpush1.msra.mxu0 %v10305_v17  ;;  %8792 = vmatprep.mubr.f32.mxu0 %v18098_v58  ;;  %v10326_v13 = vld [vmem:[%s18072_s7 + $0x4a8] sm:$0xf]  ;;  %v8999_v20 = vld [vmem:[%s18076_s9 + $0x90] sm:$0xff]  ;;  %v8997_v38 = vld [vmem:[%s18076_s9 + $0x80] sm:$0xff] }
 0x4b7   :  { %v6713_v32 = vadd.f32 %v12681_v35, %v6681_v43  ;;  %v6650_v36 = vmax.f32 %v6625_v61, 0.0  ;;  %v6325_v60 = vadd.f32 %v6297_v31, %v17250_v40  ;;  %10302 = vmatmul.mubr.msk.f32.vlgmr.msra.gmra.mxu1 %vm6748_vm6, %v6737_v19  ;;  %8758 = vmatprep.subr.mxu0 %v10304_v9  ;;  %v12682_v40 = vld [vmem:[%s18074_s5] ss:$0 sm:$0xff]  ;;  %v8998_v2 = vld [vmem:[%s18076_s9 + $0x88] sm:$0xff]  ;;  %v9099_v18 = vld [vmem:[%s18077_s11 + $0x58] sm:$0xff] }
 0x4b8   :  { %v12535_v46 = vpop.f32.mrf.mxu0  ;;  %8759 = vmatpush1.msra.mxu0 %v10303_v21  ;;  %10319 = vmatpush1.msk.msra.mxu1 %vm6752_vm5, %v10316_v29  ;;  %v9100_v63 = vld [vmem:[%s18077_s11 + $0x60] sm:$0xf]  ;;  %v9098_v7 = vld [vmem:[%s18077_s11 + $0x50] sm:$0xff]  ;;  %v9097_v6 = vld [vmem:[%s18077_s11 + $0x48] sm:$0xff] }
 0x4b9   :  { %v6738_v59 = vmax.f32 %v6713_v32, 0.0  ;;  %v6682_v11 = vmul.f32 %v12682_v40, %v6650_v36  ;;  %v6626_v5 = vadd.f32 %v17756_v41, %v6325_v60  ;;  %8845 = vmatprep.subr.mxu1 %v10315_v14  ;;  %10327 = vmatprep.subr.msk.mxu0 %vm6752_vm5, %v10326_v13  ;;  %v9096_v17 = vld [vmem:[%s18077_s11 + $0x40] sm:$0xff]  ;;  %v9095_v55 = vld [vmem:[%s18077_s11 + $0x38] sm:$0xff]  ;;  %v9094_v9 = vld [vmem:[%s18077_s11 + $0x30] sm:$0xff]  ;;  %v6831_v36 = vlaneseq }
 0x4ba   :  { %8846 = vmatpush1.msra.mxu1 %v10314_v53  ;;  %8881 = vmatprep.mubr.f32.mxu1 %v18098_v58  ;;  %v9093_v19 = vld [vmem:[%s18077_s11 + $0x28] sm:$0xff]  ;;  %v9092_v43 = vld [vmem:[%s18077_s11 + $0x20] sm:$0xff]  ;;  %v9091_v61 = vld [vmem:[%s18077_s11 + $0x18] sm:$0xff] }
 0x4bb   :  { %v6714_v1 = vadd.f32 %v12681_v35, %v6682_v11  ;;  %v6651_v41 = vmax.f32 %v6626_v5, 0.0  ;;  %10311 = vmatmul.mubr.msk.f32.vlgmr.msra.gmra.mxu0 %vm6748_vm6, %v6738_v59  ;;  %8847 = vmatprep.subr.mxu1 %v10313_v15  ;;  %v6832_v46 = vshrl.u32 %v6831_v36, 7 }
 0x4bc   :  { %8848 = vmatpush1.msra.mxu1 %v10312_v50  ;;  %10328 = vmatpush1.msk.msra.mxu0 %vm6752_vm5, %v10325_v33  ;;  %v6741_v50 = vld [vmem:[%s18078_s8] sm:$0x3] }
 0x4bd   :  { %v6739_v0 = vmax.f32 %v6714_v1, 0.0  ;;  %v6683_v12 = vmul.f32 %v12682_v40, %v6651_v41  ;;  %8934 = vmatprep.subr.mxu0 %v10324_v62  ;;  %8970 = vmatprep.mubr.f32.mxu0 %v18098_v58  ;;  %v6833_v11 = vsub.s32 0, %v6832_v46  ;;  %v6837_v33 = vsub.s32 1, %v6832_v46 }
 0x4be   :  { %8935 = vmatpush1.msra.mxu0 %v10323_v51  ;;  %9017 = vmatprep.subr.mxu1 %v18098_v58 }
 0x4bf   :  { %v6715_v34 = vadd.f32 %v12681_v35, %v6683_v12  ;;  %10320 = vmatmul.mubr.msk.f32.vlgmr.msra.gmra.mxu1 %vm6748_vm6, %v6739_v0  ;;  %8936 = vmatprep.subr.mxu0 %v10322_v27  ;;  %v6834_v41 = vrot.slane %v6741_v50, %v6833_v11  ;;  %v6838_v27 = vrot.slane %v6741_v50, %v6837_v33 }
 0x4c0   :  { %8937 = vmatpush1.msra.mxu0 %v10321_v22  ;;  %9018 = vmatpush1.msra.mxu1 %v8996_v39 }
 0x4c1   :  { %v6740_v54 = vmax.f32 %v6715_v34, 0.0  ;;  %12625 = vmatprep.subr.mxu0 %v18098_v58  ;;  %9019 = vmatprep.subr.mxu1 %v18098_v58 }
 0x4c2   :  { %9020 = vmatpush1.msra.mxu1 %v8995_v26 }
 0x4c3   :  { %10329 = vmatmul.mubr.msk.f32.vlgmr.msra.gmra.mxu0 %vm6748_vm6, %v6740_v54  ;;  %9021 = vmatprep.subr.mxu1 %v18098_v58 }
 0x4c4   :  { %12651 = vmatprep.mubr.msk.f32.mxu0 %vm12684_vm2, %v18098_v58  ;;  %9022 = vmatpush1.msra.mxu1 %v8994_v47 }
 0x4c5   :  { %9023 = vmatprep.subr.mxu1 %v18098_v58  ;;  %12626 = vmatpush3.msk.msra.mxu0 %vm6752_vm5, %v9100_v63 }
 0x4c6   :  { %9024 = vmatpush1.msra.mxu1 %v8993_v45  ;;  %12627 = vmatprep.subr.mxu0 %v18098_v58 }
 0x4c7   :  { %9025 = vmatprep.subr.mxu1 %v18098_v58  ;;  %12628 = vmatpush3.msra.mxu0 %v9099_v18 }
 0x4c8   :  { %9026 = vmatpush1.msra.mxu1 %v8992_v44  ;;  %12629 = vmatprep.subr.mxu0 %v18098_v58 }
 0x4c9   :  { %9027 = vmatprep.subr.mxu1 %v18098_v58  ;;  %12630 = vmatpush3.msra.mxu0 %v9098_v7 }
 0x4ca   :  { %9028 = vmatpush1.msra.mxu1 %v8991_v56  ;;  %12631 = vmatprep.subr.mxu0 %v18098_v58 }
 0x4cb   :  { %9029 = vmatprep.subr.mxu1 %v18098_v58  ;;  %12632 = vmatpush3.msra.mxu0 %v9097_v6 }
 0x4cc   :  { %9030 = vmatpush1.msra.mxu1 %v8990_v49  ;;  %12633 = vmatprep.subr.mxu0 %v18098_v58 }
 0x4cd   :  { %9031 = vmatprep.subr.mxu1 %v18098_v58  ;;  %12634 = vmatpush3.msra.mxu0 %v9096_v17 }
 0x4ce   :  { %9032 = vmatpush1.msra.mxu1 %v8989_v4  ;;  %12635 = vmatprep.subr.mxu0 %v18098_v58 }
 0x4cf   :  { %9033 = vmatprep.subr.mxu1 %v18098_v58  ;;  %12636 = vmatpush3.msra.mxu0 %v9095_v55 }
 0x4d0   :  { %9034 = vmatpush1.msra.mxu1 %v8988_v42  ;;  %12637 = vmatprep.subr.mxu0 %v18098_v58 }
 0x4d1   :  { %9035 = vmatprep.subr.mxu1 %v18098_v58  ;;  %12638 = vmatpush3.msra.mxu0 %v9094_v9 }
 0x4d2   :  { %9036 = vmatpush1.msra.mxu1 %v8987_v3  ;;  %12639 = vmatprep.subr.mxu0 %v18098_v58 }
 0x4d3   :  { %9037 = vmatprep.subr.mxu1 %v18098_v58  ;;  %12640 = vmatpush3.msra.mxu0 %v9093_v19 }
 0x4d4   :  { %9038 = vmatpush1.msra.mxu1 %v8986_v37  ;;  %12641 = vmatprep.subr.mxu0 %v18098_v58 }
 0x4d5   :  { %9039 = vmatprep.subr.mxu1 %v18098_v58  ;;  %12642 = vmatpush3.msra.mxu0 %v9092_v43 }
 0x4d6   :  { %9040 = vmatpush1.msra.mxu1 %v8985_v25  ;;  %12643 = vmatprep.subr.mxu0 %v18098_v58 }
 0x4d7   :  { %9041 = vmatprep.subr.mxu1 %v18098_v58  ;;  %12644 = vmatpush3.msra.mxu0 %v9091_v61 }
 0x4d8   :  { %9042 = vmatpush1.msra.mxu1 %v8984_v23  ;;  %12645 = vmatprep.subr.mxu0 %v18098_v58 }
 0x4d9   :  { %9043 = vmatprep.subr.mxu1 %v18098_v58 }
 0x4da   :  { %9044 = vmatpush1.msra.mxu1 %v8983_v57 }
 0x4db   :  { %9045 = vmatprep.subr.mxu1 %v18098_v58 }
 0x4dc   :  { %9046 = vmatpush1.msra.mxu1 %v8982_v16 }
 0x4dd   :  { %9047 = vmatprep.subr.mxu1 %v18098_v58 }
 0x4de   :  { %9048 = vmatpush1.msra.mxu1 %v8981_v28 }
 0x4df   :  { %9063 = vmatprep.subr.mxu1 %v18098_v58 }
 0x4e0   :  { %9064 = vmatpush2.msra.mxu1 %v9005_v10 }
 0x4e1   :  { %9065 = vmatprep.subr.mxu1 %v18098_v58 }
 0x4e2   :  { %9066 = vmatpush2.msra.mxu1 %v9004_v48 }
 0x4e3   :  { %9067 = vmatprep.subr.mxu1 %v18098_v58 }
 0x4e4   :  { %9068 = vmatpush2.msra.mxu1 %v9003_v52 }
 0x4e5   :  { %9069 = vmatprep.subr.mxu1 %v18098_v58 }
 0x4e6   :  { %9070 = vmatpush2.msra.mxu1 %v9002_v30 }
 0x4e7   :  { %9071 = vmatprep.subr.mxu1 %v18098_v58 }
 0x4e8   :  { %9072 = vmatpush2.msra.mxu1 %v9001_v24 }
 0x4e9   :  { %9073 = vmatprep.subr.mxu1 %v18098_v58 }
 0x4ea   :  { %9074 = vmatpush2.msra.mxu1 %v9000_v8 }
 0x4eb   :  { %9075 = vmatprep.subr.mxu1 %v18098_v58 }
 0x4ec   :  { %9076 = vmatpush2.msra.mxu1 %v8999_v20 }
 0x4ed   :  { %9077 = vmatprep.subr.mxu1 %v18098_v58 }
 0x4ee   :  { %9078 = vmatpush2.msra.mxu1 %v8998_v2 }
 0x4ef   :  { %9079 = vmatprep.subr.mxu1 %v18098_v58 }
 0x4f0   :  { %9080 = vmatpush2.msra.mxu1 %v8997_v38 }
 0x523   :  { %v6825_v21 = vpop.f32.mrf.mxu0 }
 0x524   :  { %v6841_v12 = vadd.f32 %v6834_v41, %v6825_v21 }
 0x525   :  { %v6827_v29 = vpop.f32.mrf.mxu0 }
 0x526   :  { %v6842_v54 = vadd.f32 %v6838_v27, %v6827_v29 }
 0x527   :  { %v6925_v31 = vpop.f32.mrf.mxu1 }
 0x528   :  { %v6930_v39 = vadd.f32 %v6925_v31, %v6841_v12 }
 0x529   :  { %v6927_v13 = vpop.f32.mrf.mxu1 }
 0x52a   :  { %v6931_v47 = vadd.f32 %v6927_v13, %v6842_v54 }
 0x52b   :  { %v7014_v14 = vpop.f32.mrf.mxu0 }
 0x52c   :  { %v7019_v45 = vadd.f32 %v7014_v14, %v6930_v39 }
 0x52d   :  { %v7016_v35 = vpop.f32.mrf.mxu0 }
 0x52e   :  { %v7020_v56 = vadd.f32 %v7016_v35, %v6931_v47 }
 0x52f   :  { %v7103_v32 = vpop.f32.mrf.mxu1 }
 0x530   :  { %v7108_v49 = vadd.f32 %v7103_v32, %v7019_v45 }
 0x531   :  { %v7105_v53 = vpop.f32.mrf.mxu1 }
 0x532   :  { %v7109_v3 = vadd.f32 %v7105_v53, %v7020_v56 }
 0x533   :  { %v7192_v60 = vpop.f32.mrf.mxu0 }
 0x534   :  { %v7197_v37 = vadd.f32 %v7192_v60, %v7108_v49 }
 0x535   :  { %v7194_v15 = vpop.f32.mrf.mxu0 }
 0x536   :  { %v7198_v23 = vadd.f32 %v7194_v15, %v7109_v3 }
 0x537   :  { %v7281_v59 = vpop.f32.mrf.mxu1 }
 0x538   :  { %v7286_v57 = vadd.f32 %v7281_v59, %v7197_v37 }
 0x539   :  { %v7283_v5 = vpop.f32.mrf.mxu1 }
 0x53a   :  { %v7287_v28 = vadd.f32 %v7283_v5, %v7198_v23 }
 0x53b   :  { %v7370_v40 = vpop.f32.mrf.mxu0 }
 0x53c   :  { %v7375_v10 = vadd.f32 %v7370_v40, %v7286_v57 }
 0x53d   :  { %v7372_v62 = vpop.f32.mrf.mxu0 }
 0x53e   :  { %v7376_v30 = vadd.f32 %v7372_v62, %v7287_v28 }
 0x53f   :  { %v7459_v1 = vpop.f32.mrf.mxu1 }
 0x540   :  { %v7464_v24 = vadd.f32 %v7459_v1, %v7375_v10 }
 0x541   :  { %v7461_v0 = vpop.f32.mrf.mxu1 }
 0x542   :  { %v7465_v20 = vadd.f32 %v7461_v0, %v7376_v30  ;;  %v9089_v30 = vld [vmem:[%s18077_s11 + $0x8] sm:$0xff] }
 0x543   :  { %v7548_v51 = vpop.f32.mrf.mxu0 }
 0x544   :  { %v7553_v2 = vadd.f32 %v7548_v51, %v7464_v24  ;;  %v9088_v24 = vld [vmem:[%s18077_s11] sm:$0xff] }
 0x545   :  { %v7550_v22 = vpop.f32.mrf.mxu0 }
 0x546   :  { %v7554_v63 = vadd.f32 %v7550_v22, %v7465_v20 }
 0x547   :  { %v7637_v34 = vpop.f32.mrf.mxu1 }
 0x548   :  { %v7642_v18 = vadd.f32 %v7637_v34, %v7553_v2 }
 0x549   :  { %v7639_v44 = vpop.f32.mrf.mxu1 }
 0x54a   :  { %v7643_v17 = vadd.f32 %v7639_v44, %v7554_v63 }
 0x54b   :  { %v7726_v26 = vpop.f32.mrf.mxu0 }
 0x54c   :  { %v7731_v55 = vadd.f32 %v7726_v26, %v7642_v18  ;;  %v10332_v18 = vld [vmem:[%s18080_s12] ss:$0 sm:$0xff] }
 0x54d   :  { %v7728_v4 = vpop.f32.mrf.mxu0 }
 0x54e   :  { %v7732_v19 = vadd.f32 %v7728_v4, %v7643_v17 }
 0x54f   :  { %v7815_v42 = vpop.f32.mrf.mxu1 }
 0x550   :  { %v7820_v43 = vadd.f32 %v7815_v42, %v7731_v55 }
 0x551   :  { %v7817_v16 = vpop.f32.mrf.mxu1 }
 0x552   :  { %v7821_v21 = vadd.f32 %v7817_v16, %v7732_v19 }
 0x553   :  { %v7904_v25 = vpop.f32.mrf.mxu0 }
 0x554   :  { %v7909_v29 = vadd.f32 %v7904_v25, %v7820_v43 }
 0x555   :  { %v7906_v48 = vpop.f32.mrf.mxu0 }
 0x556   :  { %v7910_v13 = vadd.f32 %v7906_v48, %v7821_v21 }
 0x557   :  { %v7993_v52 = vpop.f32.mrf.mxu1 }
 0x558   :  { %v7998_v35 = vadd.f32 %v7993_v52, %v7909_v29  ;;  %v9090_v52 = vld [vmem:[%s18077_s11 + $0x10] sm:$0xff] }
 0x559   :  { %v7995_v38 = vpop.f32.mrf.mxu1  ;;  %12646 = vmatpush3.msra.mxu0 %v9090_v52 }
 0x55a   :  { %v7999_v36 = vadd.f32 %v7995_v38, %v7910_v13  ;;  %12647 = vmatprep.subr.mxu0 %v18098_v58 }
 0x55b   :  { %v8082_v8 = vpop.f32.mrf.mxu0  ;;  %12648 = vmatpush3.msra.mxu0 %v9089_v30 }
 0x55c   :  { %v8087_v60 = vadd.f32 %v8082_v8, %v7998_v35  ;;  %12649 = vmatprep.subr.mxu0 %v18098_v58  ;;  %v10330_v8 = vld [vmem:[%s18079_s10] ss:$0 sm:$0xff] }
 0x55d   :  { %v8084_v7 = vpop.f32.mrf.mxu0  ;;  %12650 = vmatpush3.msra.mxu0 %v9088_v24 }
 0x55e   :  { %v8088_v46 = vadd.f32 %v8084_v7, %v7999_v36 }
 0x55f   :  { %v8171_v6 = vpop.f32.mrf.mxu1 }
 0x560   :  { %v8176_v15 = vadd.f32 %v8171_v6, %v8087_v60 }
 0x561   :  { %v8173_v61 = vpop.f32.mrf.mxu1 }
 0x562   :  { %v8177_v11 = vadd.f32 %v8173_v61, %v8088_v46 }
 0x563   :  { %v8260_v9 = vpop.f32.mrf.mxu0 }
 0x564   :  { %v8265_v5 = vadd.f32 %v8260_v9, %v8176_v15 }
 0x565   :  { %v8262_v31 = vpop.f32.mrf.mxu0 }
 0x566   :  { %v8266_v33 = vadd.f32 %v8262_v31, %v8177_v11 }
 0x567   :  { %v8349_v14 = vpop.f32.mrf.mxu1 }
 0x568   :  { %v8354_v62 = vadd.f32 %v8349_v14, %v8265_v5 }
 0x569   :  { %v8351_v53 = vpop.f32.mrf.mxu1 }
 0x56a   :  { %v8355_v41 = vadd.f32 %v8351_v53, %v8266_v33 }
 0x56b   :  { %v8438_v32 = vpop.f32.mrf.mxu0 }
 0x56c   :  { %v8443_v51 = vadd.f32 %v8438_v32, %v8354_v62 }
 0x56d   :  { %v8440_v59 = vpop.f32.mrf.mxu0 }
 0x56e   :  { %v8444_v12 = vadd.f32 %v8440_v59, %v8355_v41 }
 0x56f   :  { %v8527_v40 = vpop.f32.mrf.mxu1 }
 0x570   :  { %v8532_v22 = vadd.f32 %v8527_v40, %v8443_v51 }
 0x571   :  { %v8529_v1 = vpop.f32.mrf.mxu1 }
 0x572   :  { %v8533_v54 = vadd.f32 %v8529_v1, %v8444_v12 }
 0x573   :  { %v8616_v50 = vpop.f32.mrf.mxu0 }
 0x574   :  { %v8621_v39 = vadd.f32 %v8616_v50, %v8532_v22 }
 0x575   :  { %v8618_v27 = vpop.f32.mrf.mxu0 }
 0x576   :  { %v8622_v47 = vadd.f32 %v8618_v27, %v8533_v54 }
 0x577   :  { %v8705_v0 = vpop.f32.mrf.mxu1 }
 0x578   :  { %v8710_v45 = vadd.f32 %v8705_v0, %v8621_v39 }
 0x579   :  { %v8707_v26 = vpop.f32.mrf.mxu1 }
 0x57a   :  { %v8711_v49 = vadd.f32 %v8707_v26, %v8622_v47 }
 0x57b   :  { %v8794_v34 = vpop.f32.mrf.mxu0 }
 0x57c   :  { %v8799_v4 = vadd.f32 %v8794_v34, %v8710_v45 }
 0x57d   :  { %v8796_v44 = vpop.f32.mrf.mxu0 }
 0x57e   :  { %v8800_v3 = vadd.f32 %v8796_v44, %v8711_v49 }
 0x57f   :  { %v8883_v56 = vpop.f32.mrf.mxu1 }
 0x580   :  { %v8888_v37 = vadd.f32 %v8883_v56, %v8799_v4 }
 0x581   :  { %v8885_v42 = vpop.f32.mrf.mxu1 }
 0x582   :  { %v8889_v23 = vadd.f32 %v8885_v42, %v8800_v3 }
 0x583   :  { %v8972_v25 = vpop.f32.mrf.mxu0 }
 0x584   :  { %v8977_v57 = vadd.f32 %v8972_v25, %v8888_v37 }
 0x585   :  { %v8974_v16 = vpop.f32.mrf.mxu0 }
 0x586   :  { %v8978_v28 = vadd.f32 %v8974_v16, %v8889_v23  ;;  %v8979_v48 = vmax.f32 %v8977_v57, 0.0 }
 0x588   :  { %v8980_v10 = vmax.f32 %v8978_v28, 0.0 }
 0x58a   :  { %10331 = vmatprep.mubr.msk.f32.mxu1 %vm9013_vm7, %v8980_v10 }
 0x58b   :  { %9082 = vmatmul.mubr.f32.vlgmr.msra.gmra.mxu1 %v8979_v48 }
 0x64b   :  { %v9083_v20 = vpop.f32.mrf.mxu1 }
 0x64c   :  { %v9084_v2 = vadd.f32 %v10330_v8, %v9083_v20 }
 0x64d   :  { %v9085_v38 = vpop.f32.mrf.mxu1 }
 0x64e   :  { %v9087_v63 = vmax.f32 %v9084_v2, 0.0 }
 0x650   :  { %12652 = vmatmul.mubr.msk.f32.vlgmr.msra.gmra.mxu0 %vm9108_vm8, %v9087_v63 }
 0x710   :  { %v9181_v7 = vpop.f32.mrf.mxu0 }
 0x711   :  { %v9182_v6 = vadd.f32 %v10332_v18, %v9181_v7 }
 0x712   :  { %v12653_v17 = vpop.f32.mrf.mxu0 }
 0x713   :  { %9186 = vst.msk [vmem:[%s18081_s13] sm:$0xff] %vm9185_vm9, %v9182_v6 }

</bundles_post_ra>
